<compile_context>
chip_gen: v7x
topology: tpu7x:2x2x1
jax: 0.10.0
libtpu: 0.0.40
codegen_flags: <defaults>
</compile_context>

<pallas_src>
import functools

import jax
import jax.numpy as jnp
from jax.experimental import pallas as pl
from jax.experimental.pallas import tpu as pltpu

N_LAYERS = 4  # aggregator = TransformerDropout(width=vis_dim, layers=4, heads=vis_dim // 64)


def _layer_norm(x, g, b, eps=1e-5):
    # x: (M, D) f32; g, b: (D,) f32 -- VPU math in f32
    mu = jnp.mean(x, axis=-1, keepdims=True)
    xc = x - mu
    var = jnp.mean(xc * xc, axis=-1, keepdims=True)
    return xc * jax.lax.rsqrt(var + eps) * g[None, :] + b[None, :]


def _mxu(a_f32, w_bf16):
    # (M, K) f32 activations x (K, N) bf16 weights -> f32 accumulation on the MXU.
    return jnp.dot(a_f32.astype(jnp.bfloat16), w_bf16,
                   preferred_element_type=jnp.float32)


def aggregator_kernel(
    x_ref,
    ln1g_ref, ln1b_ref, wqkv_ref, bqkv_ref, wo_ref, bo_ref,
    ln2g_ref, ln2b_ref, wfc_ref, bfc_ref, wpj_ref, bpj_ref,
    o_ref, *, n_heads, n_ctx,
):
    Bb, L, D = x_ref.shape
    hd = D // n_heads

    x = x_ref[...].astype(jnp.float32)                               # (Bb, L, D)

    for l in range(N_LAYERS):                                        # static unroll: 4 residual blocks
        last = l == N_LAYERS - 1
        Lq = n_ctx if last else L                                     # last layer: only n_ctx query rows matter

        # ---------------- multi-head self-attention ----------------
        h = _layer_norm(x.reshape(Bb * L, D), ln1g_ref[l], ln1b_ref[l])
        qkv = _mxu(h, wqkv_ref[l]) + bqkv_ref[l][None, :]             # (Bb*L, 3D), f32 accum
        qkv = qkv.reshape(Bb, L, 3 * D)
        # 128-lane-aligned q/k/v slabs; the 1/sqrt(hd) scale is pre-folded into Wq/bq.
        q = qkv[:, :Lq, 0 * D:1 * D]                                  # (Bb, Lq, D)
        k = qkv[:, :, 1 * D:2 * D]                                    # (Bb, L, D)
        v = qkv[:, :, 2 * D:3 * D]

        head_outs = []
        for hh in range(n_heads):                                     # static unroll over heads
            sl = slice(hh * hd, (hh + 1) * hd)
            qh = q[:, :, sl].astype(jnp.bfloat16)                     # (Bb, Lq, hd)
            kh = k[:, :, sl].astype(jnp.bfloat16)                     # (Bb, L, hd)
            vh = v[:, :, sl].astype(jnp.bfloat16)
            s = jnp.einsum('bqd,bkd->bqk', qh, kh,
                           preferred_element_type=jnp.float32)        # (Bb, Lq, L)
            s = s - jnp.max(s, axis=-1, keepdims=True)
            p = jnp.exp(s)
            p = p * pl.reciprocal(jnp.sum(p, axis=-1, keepdims=True), approx=True)
            head_outs.append(
                jnp.einsum('bqk,bkd->bqd', p.astype(jnp.bfloat16), vh,
                           preferred_element_type=jnp.float32))       # (Bb, Lq, hd)
        att_in = head_outs[0] if n_heads == 1 else jnp.concatenate(head_outs, axis=-1)
        # single output projection: (Bb*Lq, D) x (D, D), full K=128 MXU contraction
        att = _mxu(att_in.reshape(Bb * Lq, D), wo_ref[l]) + bo_ref[l][None, :]
        # TODO(synk): dropout(p=0.1) of TransformerDropout omitted (eval-mode identity).
        xq = x[:, :Lq, :] + att.reshape(Bb, Lq, D)                    # residual

        # ---------------- MLP: c_fc -> QuickGELU -> c_proj ----------------
        h2 = _layer_norm(xq.reshape(Bb * Lq, D), ln2g_ref[l], ln2b_ref[l])
        m = _mxu(h2, wfc_ref[l]) + bfc_ref[l][None, :]                # (Bb*Lq, 4D)
        m = m * jax.nn.sigmoid(1.702 * m)                             # QuickGELU, f32 on VPU/EUP
        m = _mxu(m, wpj_ref[l]) + bpj_ref[l][None, :]                 # (Bb*Lq, D)
        xq = xq + m.reshape(Bb, Lq, D)

        if last:
            # lane-dense store: (Bb, 1, n_ctx*D) -> n_ctx*D (>=512) unmasked lanes
            o_ref[...] = xq.reshape(Bb, 1, n_ctx * D).astype(o_ref.dtype)
        else:
            x = xq


def _tpu_generation():
    """Best-effort TPU generation (4/5/6/7); defaults to 6 if unknown."""
    try:
        kind = jax.devices()[0].device_kind.lower()
    except Exception:
        return 6
    for gen in (7, 6, 5, 4):
        if f"v{gen}" in kind:
            return gen
    return 6


def _choose_block_b(batch, seq_len, dim):
    """How many classes to fold into the M dimension of each grid step (generation-aware)."""
    gen = _tpu_generation()
    target_rows = 512 if gen >= 6 else 256          # 2x256^2 MXU (v6e/v7x) vs 4x128^2 (v5e)
    block_b = max(1, min(batch, max(1, target_rows // seq_len)))
    # VMEM guard: keep the f32 activation working set (~16 copies of (block_b*L, D..4D))
    # comfortably inside ~8 MiB so the default scoped VMEM never limits the pipeline.
    bytes_per_class = seq_len * dim * 4 * 16
    block_b = min(block_b, max(1, (8 << 20) // max(1, bytes_per_class)))
    if gen >= 7 and batch >= 2:
        # v7x has 2 TensorCores: keep >=2 grid steps so the "parallel" axis feeds both.
        block_b = min(block_b, max(1, batch // 2))
    return max(1, block_b)


def run_aggregator(x, params, n_heads, n_ctx):
    """x: (B, L, D) f32.  Returns (B, n_ctx, D) f32 == agg output rows consumed downstream."""
    B, L, D = x.shape
    block_b = _choose_block_b(B, L, D)
    n_steps = -(-B // block_b)
    B_pad = n_steps * block_b
    if B_pad != B:
        x = jnp.pad(x, ((0, B_pad - B), (0, 0), (0, 0)))

    kernel = functools.partial(aggregator_kernel, n_heads=n_heads, n_ctx=n_ctx)

    def _weight_spec(arr, single_buffer):
        # Loop-invariant, fully-resident weight block (bf16 weights ~1.6 MiB at D=128).
        nd = arr.ndim
        kwargs = {"pipeline_mode": pl.Buffered(1)} if single_buffer else {}
        return pl.BlockSpec(arr.shape, lambda b, _nd=nd: (0,) * _nd, **kwargs)

    def _call(single_buffer_weights):
        weight_specs = [_weight_spec(p, single_buffer_weights) for p in params]
        return pl.pallas_call(
            kernel,
            out_shape=jax.ShapeDtypeStruct((B_pad, 1, n_ctx * D), jnp.float32),
            grid=(n_steps,),
            in_specs=[pl.BlockSpec((block_b, L, D), lambda b: (b, 0, 0))] + weight_specs,
            out_specs=pl.BlockSpec((block_b, 1, n_ctx * D), lambda b: (b, 0, 0)),
            compiler_params=pltpu.CompilerParams(dimension_semantics=("parallel",)),
        )(x, *params)

    try:
        # Weights never change across grid steps -> single-buffer them (halves weight VMEM).
        out = jax.block_until_ready(_call(True))
    except Exception:
        # Fallback for jax builds where BlockSpec.pipeline_mode / Buffered(1) is unsupported.
        out = _call(False)
    return out.reshape(B_pad, n_ctx, D)[:B]


class PromptLearnerPallas:
    """JAX/Pallas re-implementation of PromptLearner.forward.

    CLIP tokenization / text-encoder (zero_shot_classifier) from __init__ is not part of
    forward; prompt token embeddings are synthesized deterministically instead.
    """

    def __init__(self, key, n_cls, n_ctx, vis_dim, tok_len):
        self.n_cls = n_cls
        self.n_ctx = n_ctx
        self.vis_dim = vis_dim
        self.n_heads = vis_dim // 64
        ks = jax.random.split(key, 8)

        # ---- aggregator params (same init stds as the torch module) ----
        proj_std = vis_dim ** (-0.5) * (2 * N_LAYERS) ** (-0.5)
        attn_std = vis_dim ** (-0.5)
        fc_std = (2 * vis_dim) ** (-0.5)
        Ly, D = N_LAYERS, vis_dim
        hd = D // self.n_heads
        scale = hd ** (-0.5)
        ln1g = jnp.ones((Ly, D), jnp.float32)
        ln1b = jnp.zeros((Ly, D), jnp.float32)
        ln2g = jnp.ones((Ly, D), jnp.float32)
        ln2b = jnp.zeros((Ly, D), jnp.float32)
        # Weights stored pre-transposed as (layer, K, N) in bf16 (MXU-native operands).
        # The 1/sqrt(hd) attention scale is folded into the Q columns of wqkv / bqkv.
        wqkv = jax.random.normal(ks[0], (Ly, D, 3 * D), jnp.float32) * attn_std
        wqkv = wqkv.at[:, :, :D].multiply(scale).astype(jnp.bfloat16)
        wo = (jax.random.normal(ks[1], (Ly, D, D), jnp.float32) * proj_std).astype(jnp.bfloat16)
        wfc = (jax.random.normal(ks[2], (Ly, D, 4 * D), jnp.float32) * fc_std).astype(jnp.bfloat16)
        wpj = (jax.random.normal(ks[3], (Ly, 4 * D, D), jnp.float32) * proj_std).astype(jnp.bfloat16)
        # TODO(synk): torch Linear default bias init (uniform) replaced with zeros.
        bqkv = jnp.zeros((Ly, 3 * D), jnp.float32).at[:, :D].multiply(scale)
        bo = jnp.zeros((Ly, D), jnp.float32)
        bfc = jnp.zeros((Ly, 4 * D), jnp.float32)
        bpj = jnp.zeros((Ly, D), jnp.float32)
        self.agg_params = (ln1g, ln1b, wqkv, bqkv, wo, bo,
                           ln2g, ln2b, wfc, bfc, wpj, bpj)

        # ---- cls_token = F.normalize(randn(n_ctx, vis_dim), dim=-1) (f32 parameter) ----
        ct = jax.random.normal(ks[4], (n_ctx, D), jnp.float32)
        self.cls_token = ct / jnp.linalg.norm(ct, axis=-1, keepdims=True)

        # ---- synthetic CLIP token embeddings (the torch module stores them in fp16) ----
        self.prompt_tokens = (
            jax.random.normal(ks[5], (n_cls, tok_len, D), jnp.float32) * 0.02
        ).astype(jnp.float16)
        self.visual_prompt_temp = (
            jax.random.normal(ks[6], (1, tok_len, D), jnp.float32) * 0.02
        ).astype(jnp.float16)

    def update_prompts(self, prompt_tokens, ins_tokens):
        return jnp.concatenate(
            [prompt_tokens[:, :2],
             ins_tokens.astype(prompt_tokens.dtype),
             prompt_tokens[:, 2:-self.n_ctx]],
            axis=1,
        )

    def forward(self, exemplar_img_feats, label, ori_text_len):
        num_class, num_ins, dim = exemplar_img_feats.shape
        prompts = self.prompt_tokens[label]                       # (num_class, T, D) fp16
        mm_lens = ori_text_len + self.n_ctx
        v_lens = jnp.ones_like(ori_text_len, dtype=jnp.int32) + self.n_ctx

        # cls_token.unsqueeze(1).repeat(1, num_class, 1) + cat along seq; batch-first here
        cls_tok = jnp.broadcast_to(
            self.cls_token[None, :, :], (num_class, self.n_ctx, dim)
        )
        agg_in = jnp.concatenate(
            [cls_tok, exemplar_img_feats.astype(jnp.float32)], axis=1
        )                                                         # (B, n_ctx+num_ins, D)
        # Kernel already returns only the first n_ctx rows per class
        # (== torch aggregator(...)[0:n_ctx].permute(1, 0, 2)).
        agg_img_token_ = run_aggregator(agg_in, self.agg_params, self.n_heads, self.n_ctx)

        new_mm_prompts = self.update_prompts(prompts, agg_img_token_)
        new_v_prompts = self.update_prompts(
            jnp.tile(self.visual_prompt_temp, (num_class, 1, 1)), agg_img_token_
        )
        return ([new_mm_prompts], mm_lens, [new_v_prompts], v_lens, agg_img_token_)


if __name__ == "__main__":
    n_cls = 2        # number of classes (= batch of the aggregator)
    n_ctx = 4        # cfg.TRAINER.COCOOP.N_CTX
    vis_dim = 128    # clip_model.visual.output_dim  -> heads = 2
    tok_len = 16     # shortened CLIP context length (77 in real CLIP)
    num_ins = 4      # exemplars per class

    key = jax.random.PRNGKey(0)
    k_model, k_feat = jax.random.split(key)

    learner = PromptLearnerPallas(k_model, n_cls, n_ctx, vis_dim, tok_len)

    exemplar_img_feats = jax.random.normal(
        k_feat, (n_cls, num_ins, vis_dim), jnp.float32
    )
    label = jnp.arange(n_cls, dtype=jnp.int32)
    ori_text_len = jnp.array([3, 5], dtype=jnp.int32)

    out = learner.forward(exemplar_img_feats, label, ori_text_len)
    jax.block_until_ready(out)

    mm_prompts_list, mm_lens, v_prompts_list, v_lens, agg_img_token_ = out
    assert mm_prompts_list[0].shape == (n_cls, tok_len, vis_dim)
    assert mm_prompts_list[0].dtype == jnp.float16
    assert v_prompts_list[0].shape == (n_cls, tok_len, vis_dim)
    assert agg_img_token_.shape == (n_cls, n_ctx, vis_dim)
    assert bool(jnp.all(jnp.isfinite(agg_img_token_)))
    print("KERNEL_OK")
</pallas_src>

<mosaic_0001>
module attributes {stable_mosaic.version = 11 : i64} {
  func.func @aggregator_kernel(%arg0: i32, %arg1: memref<2x8x128xf32, #tpu.memory_space<vmem>>, %arg2: memref<4x128xf32, #tpu.memory_space<vmem>>, %arg3: memref<4x128xf32, #tpu.memory_space<vmem>>, %arg4: memref<4x128x384xbf16, #tpu.memory_space<vmem>>, %arg5: memref<4x384xf32, #tpu.memory_space<vmem>>, %arg6: memref<4x128x128xbf16, #tpu.memory_space<vmem>>, %arg7: memref<4x128xf32, #tpu.memory_space<vmem>>, %arg8: memref<4x128xf32, #tpu.memory_space<vmem>>, %arg9: memref<4x128xf32, #tpu.memory_space<vmem>>, %arg10: memref<4x128x512xbf16, #tpu.memory_space<vmem>>, %arg11: memref<4x512xf32, #tpu.memory_space<vmem>>, %arg12: memref<4x512x128xbf16, #tpu.memory_space<vmem>>, %arg13: memref<4x128xf32, #tpu.memory_space<vmem>>, %arg14: memref<2x1x512xf32, #tpu.memory_space<vmem>>) attributes {dimension_semantics = [#tpu.dimension_semantics<parallel>], iteration_bounds = array<i64: 1>, scalar_prefetch = 0 : i64, scratch_operands = 0 : i64, tpu.core_type = #tpu.core_type<tc>, window_params = [{transform_indices = @transform_0, window_bounds = array<i64: 2, 8, 128>}, {pipeline_mode = #tpu.pipeline_mode<synchronous>, transform_indices = @transform_1, window_bounds = array<i64: 4, 128>}, {pipeline_mode = #tpu.pipeline_mode<synchronous>, transform_indices = @transform_2, window_bounds = array<i64: 4, 128>}, {pipeline_mode = #tpu.pipeline_mode<synchronous>, transform_indices = @transform_3, window_bounds = array<i64: 4, 128, 384>}, {pipeline_mode = #tpu.pipeline_mode<synchronous>, transform_indices = @transform_4, window_bounds = array<i64: 4, 384>}, {pipeline_mode = #tpu.pipeline_mode<synchronous>, transform_indices = @transform_5, window_bounds = array<i64: 4, 128, 128>}, {pipeline_mode = #tpu.pipeline_mode<synchronous>, transform_indices = @transform_6, window_bounds = array<i64: 4, 128>}, {pipeline_mode = #tpu.pipeline_mode<synchronous>, transform_indices = @transform_7, window_bounds = array<i64: 4, 128>}, {pipeline_mode = #tpu.pipeline_mode<synchronous>, transform_indices = @transform_8, window_bounds = array<i64: 4, 128>}, {pipeline_mode = #tpu.pipeline_mode<synchronous>, transform_indices = @transform_9, window_bounds = array<i64: 4, 128, 512>}, {pipeline_mode = #tpu.pipeline_mode<synchronous>, transform_indices = @transform_10, window_bounds = array<i64: 4, 512>}, {pipeline_mode = #tpu.pipeline_mode<synchronous>, transform_indices = @transform_11, window_bounds = array<i64: 4, 512, 128>}, {pipeline_mode = #tpu.pipeline_mode<synchronous>, transform_indices = @transform_12, window_bounds = array<i64: 4, 128>}, {transform_indices = @transform_13, window_bounds = array<i64: 2, 1, 512>}]} {
    %c0 = arith.constant 0 : index
    %c0_0 = arith.constant 0 : index
    %c0_1 = arith.constant 0 : index
    %0 = vector.load %arg1[%c0, %c0_0, %c0_1] : memref<2x8x128xf32, #tpu.memory_space<vmem>>, vector<2x8x128xf32>
    %1 = vector.shape_cast %0 : vector<2x8x128xf32> to vector<16x128xf32>
    %c0_2 = arith.constant 0 : index
    %c0_3 = arith.constant 0 : index
    %2 = vector.load %arg2[%c0_2, %c0_3] : memref<4x128xf32, #tpu.memory_space<vmem>>, vector<1x128xf32>
    %3 = vector.shape_cast %2 : vector<1x128xf32> to vector<128xf32>
    %c0_4 = arith.constant 0 : index
    %c0_5 = arith.constant 0 : index
    %4 = vector.load %arg3[%c0_4, %c0_5] : memref<4x128xf32, #tpu.memory_space<vmem>>, vector<1x128xf32>
    %5 = vector.shape_cast %4 : vector<1x128xf32> to vector<128xf32>
    %cst = arith.constant dense<0.000000e+00> : vector<16xf32>
    %6 = vector.multi_reduction <add>, %1, %cst [1] : vector<16x128xf32> to vector<16xf32>
    %7 = vector.shape_cast %6 : vector<16xf32> to vector<16x1xf32>
    %cst_6 = arith.constant 1.280000e+02 : f32
    %8 = vector.broadcast %cst_6 : f32 to vector<16x1xf32>
    %9 = arith.divf %7, %8 : vector<16x1xf32>
    %10 = vector.broadcast %9 : vector<16x1xf32> to vector<16x128xf32>
    %11 = arith.subf %1, %10 : vector<16x128xf32>
    %12 = arith.mulf %11, %11 : vector<16x128xf32>
    %cst_7 = arith.constant dense<0.000000e+00> : vector<16xf32>
    %13 = vector.multi_reduction <add>, %12, %cst_7 [1] : vector<16x128xf32> to vector<16xf32>
    %14 = vector.shape_cast %13 : vector<16xf32> to vector<16x1xf32>
    %cst_8 = arith.constant 1.280000e+02 : f32
    %15 = vector.broadcast %cst_8 : f32 to vector<16x1xf32>
    %16 = arith.divf %14, %15 : vector<16x1xf32>
    %cst_9 = arith.constant 9.99999974E-6 : f32
    %17 = vector.broadcast %cst_9 : f32 to vector<16x1xf32>
    %18 = arith.addf %16, %17 : vector<16x1xf32>
    %19 = math.rsqrt %18 : vector<16x1xf32>
    %20 = vector.broadcast %19 : vector<16x1xf32> to vector<16x128xf32>
    %21 = arith.mulf %11, %20 : vector<16x128xf32>
    %22 = vector.shape_cast %3 : vector<128xf32> to vector<1x128xf32>
    %23 = vector.broadcast %22 : vector<1x128xf32> to vector<16x128xf32>
    %24 = arith.mulf %21, %23 : vector<16x128xf32>
    %25 = vector.shape_cast %5 : vector<128xf32> to vector<1x128xf32>
    %26 = vector.broadcast %25 : vector<1x128xf32> to vector<16x128xf32>
    %27 = arith.addf %24, %26 : vector<16x128xf32>
    %c0_10 = arith.constant 0 : index
    %c0_11 = arith.constant 0 : index
    %c0_12 = arith.constant 0 : index
    %28 = vector.load %arg4[%c0_10, %c0_11, %c0_12] : memref<4x128x384xbf16, #tpu.memory_space<vmem>>, vector<1x128x384xbf16>
    %29 = vector.shape_cast %28 : vector<1x128x384xbf16> to vector<128x384xbf16>
    %30 = arith.truncf %27 : vector<16x128xf32> to vector<16x128xbf16>
    %cst_13 = arith.constant dense<0.000000e+00> : vector<16x384xf32>
    %31 = tpu.matmul %30, %29, %cst_13 {dimension_numbers = #tpu.dot_dimension_numbers<[1], [0], [0], [1], [0, 0, 1, 1], [], []>} : vector<16x128xbf16>, vector<128x384xbf16>, vector<16x384xf32> -> vector<16x384xf32>
    %c0_14 = arith.constant 0 : index
    %c0_15 = arith.constant 0 : index
    %32 = vector.load %arg5[%c0_14, %c0_15] : memref<4x384xf32, #tpu.memory_space<vmem>>, vector<1x384xf32>
    %33 = vector.shape_cast %32 : vector<1x384xf32> to vector<384xf32>
    %34 = vector.shape_cast %33 : vector<384xf32> to vector<1x384xf32>
    %35 = vector.broadcast %34 : vector<1x384xf32> to vector<16x384xf32>
    %36 = arith.addf %31, %35 : vector<16x384xf32>
    %37 = vector.shape_cast %36 : vector<16x384xf32> to vector<2x8x384xf32>
    %38 = vector.extract_strided_slice %37 {offsets = [0, 0, 0], sizes = [2, 8, 128], strides = [1, 1, 1]} : vector<2x8x384xf32> to vector<2x8x128xf32>
    %39 = vector.extract_strided_slice %37 {offsets = [0, 0, 128], sizes = [2, 8, 128], strides = [1, 1, 1]} : vector<2x8x384xf32> to vector<2x8x128xf32>
    %40 = vector.extract_strided_slice %37 {offsets = [0, 0, 256], sizes = [2, 8, 128], strides = [1, 1, 1]} : vector<2x8x384xf32> to vector<2x8x128xf32>
    %41 = vector.extract_strided_slice %38 {offsets = [0, 0, 0], sizes = [2, 8, 64], strides = [1, 1, 1]} : vector<2x8x128xf32> to vector<2x8x64xf32>
    %42 = arith.truncf %41 : vector<2x8x64xf32> to vector<2x8x64xbf16>
    %43 = vector.extract_strided_slice %39 {offsets = [0, 0, 0], sizes = [2, 8, 64], strides = [1, 1, 1]} : vector<2x8x128xf32> to vector<2x8x64xf32>
    %44 = arith.truncf %43 : vector<2x8x64xf32> to vector<2x8x64xbf16>
    %45 = vector.extract_strided_slice %40 {offsets = [0, 0, 0], sizes = [2, 8, 64], strides = [1, 1, 1]} : vector<2x8x128xf32> to vector<2x8x64xf32>
    %46 = arith.truncf %45 : vector<2x8x64xf32> to vector<2x8x64xbf16>
    "tpu.trace_start"() <{level = 10 : i32, message = "bqd,bkd->bqk"}> : () -> ()
    %cst_16 = arith.constant dense<0.000000e+00> : vector<2x8x8xf32>
    %47 = tpu.matmul %42, %44, %cst_16 {dimension_numbers = #tpu.dot_dimension_numbers<[2], [2], [1], [1], [0, 0, 0, 1, 1, 1], [0], [0]>} : vector<2x8x64xbf16>, vector<2x8x64xbf16>, vector<2x8x8xf32> -> vector<2x8x8xf32>
    "tpu.trace_stop"() : () -> ()
    %cst_17 = arith.constant dense<0xFF800000> : vector<2x8xf32>
    %48 = vector.multi_reduction <maximumf>, %47, %cst_17 [2] : vector<2x8x8xf32> to vector<2x8xf32>
    %49 = vector.shape_cast %48 : vector<2x8xf32> to vector<2x8x1xf32>
    %50 = vector.broadcast %49 : vector<2x8x1xf32> to vector<2x8x8xf32>
    %51 = arith.subf %47, %50 : vector<2x8x8xf32>
    %52 = math.exp %51 : vector<2x8x8xf32>
    %cst_18 = arith.constant dense<0.000000e+00> : vector<2x8xf32>
    %53 = vector.multi_reduction <add>, %52, %cst_18 [2] : vector<2x8x8xf32> to vector<2x8xf32>
    %54 = vector.shape_cast %53 : vector<2x8xf32> to vector<2x8x1xf32>
    %55 = tpu.reciprocal %54 {approx = true} : vector<2x8x1xf32> -> vector<2x8x1xf32>
    %56 = vector.broadcast %55 : vector<2x8x1xf32> to vector<2x8x8xf32>
    %57 = arith.mulf %52, %56 : vector<2x8x8xf32>
    %58 = arith.truncf %57 : vector<2x8x8xf32> to vector<2x8x8xbf16>
    "tpu.trace_start"() <{level = 10 : i32, message = "bqk,bkd->bqd"}> : () -> ()
    %cst_19 = arith.constant dense<0.000000e+00> : vector<2x8x64xf32>
    %59 = tpu.matmul %58, %46, %cst_19 {dimension_numbers = #tpu.dot_dimension_numbers<[2], [1], [1], [2], [0, 0, 0, 1, 1, 2], [0], [0]>} : vector<2x8x8xbf16>, vector<2x8x64xbf16>, vector<2x8x64xf32> -> vector<2x8x64xf32>
    "tpu.trace_stop"() : () -> ()
    %60 = vector.extract_strided_slice %38 {offsets = [0, 0, 64], sizes = [2, 8, 64], strides = [1, 1, 1]} : vector<2x8x128xf32> to vector<2x8x64xf32>
    %61 = arith.truncf %60 : vector<2x8x64xf32> to vector<2x8x64xbf16>
    %62 = vector.extract_strided_slice %39 {offsets = [0, 0, 64], sizes = [2, 8, 64], strides = [1, 1, 1]} : vector<2x8x128xf32> to vector<2x8x64xf32>
    %63 = arith.truncf %62 : vector<2x8x64xf32> to vector<2x8x64xbf16>
    %64 = vector.extract_strided_slice %40 {offsets = [0, 0, 64], sizes = [2, 8, 64], strides = [1, 1, 1]} : vector<2x8x128xf32> to vector<2x8x64xf32>
    %65 = arith.truncf %64 : vector<2x8x64xf32> to vector<2x8x64xbf16>
    "tpu.trace_start"() <{level = 10 : i32, message = "bqd,bkd->bqk"}> : () -> ()
    %cst_20 = arith.constant dense<0.000000e+00> : vector<2x8x8xf32>
    %66 = tpu.matmul %61, %63, %cst_20 {dimension_numbers = #tpu.dot_dimension_numbers<[2], [2], [1], [1], [0, 0, 0, 1, 1, 1], [0], [0]>} : vector<2x8x64xbf16>, vector<2x8x64xbf16>, vector<2x8x8xf32> -> vector<2x8x8xf32>
    "tpu.trace_stop"() : () -> ()
    %cst_21 = arith.constant dense<0xFF800000> : vector<2x8xf32>
    %67 = vector.multi_reduction <maximumf>, %66, %cst_21 [2] : vector<2x8x8xf32> to vector<2x8xf32>
    %68 = vector.shape_cast %67 : vector<2x8xf32> to vector<2x8x1xf32>
    %69 = vector.broadcast %68 : vector<2x8x1xf32> to vector<2x8x8xf32>
    %70 = arith.subf %66, %69 : vector<2x8x8xf32>
    %71 = math.exp %70 : vector<2x8x8xf32>
    %cst_22 = arith.constant dense<0.000000e+00> : vector<2x8xf32>
    %72 = vector.multi_reduction <add>, %71, %cst_22 [2] : vector<2x8x8xf32> to vector<2x8xf32>
    %73 = vector.shape_cast %72 : vector<2x8xf32> to vector<2x8x1xf32>
    %74 = tpu.reciprocal %73 {approx = true} : vector<2x8x1xf32> -> vector<2x8x1xf32>
    %75 = vector.broadcast %74 : vector<2x8x1xf32> to vector<2x8x8xf32>
    %76 = arith.mulf %71, %75 : vector<2x8x8xf32>
    %77 = arith.truncf %76 : vector<2x8x8xf32> to vector<2x8x8xbf16>
    "tpu.trace_start"() <{level = 10 : i32, message = "bqk,bkd->bqd"}> : () -> ()
    %cst_23 = arith.constant dense<0.000000e+00> : vector<2x8x64xf32>
    %78 = tpu.matmul %77, %65, %cst_23 {dimension_numbers = #tpu.dot_dimension_numbers<[2], [1], [1], [2], [0, 0, 0, 1, 1, 2], [0], [0]>} : vector<2x8x8xbf16>, vector<2x8x64xbf16>, vector<2x8x64xf32> -> vector<2x8x64xf32>
    "tpu.trace_stop"() : () -> ()
    %79 = tpu.concatenate %59, %78 in 2 : vector<2x8x64xf32>, vector<2x8x64xf32> -> vector<2x8x128xf32>
    %80 = vector.shape_cast %79 : vector<2x8x128xf32> to vector<16x128xf32>
    %c0_24 = arith.constant 0 : index
    %c0_25 = arith.constant 0 : index
    %c0_26 = arith.constant 0 : index
    %81 = vector.load %arg6[%c0_24, %c0_25, %c0_26] : memref<4x128x128xbf16, #tpu.memory_space<vmem>>, vector<1x128x128xbf16>
    %82 = vector.shape_cast %81 : vector<1x128x128xbf16> to vector<128x128xbf16>
    %83 = arith.truncf %80 : vector<16x128xf32> to vector<16x128xbf16>
    %cst_27 = arith.constant dense<0.000000e+00> : vector<16x128xf32>
    %84 = tpu.matmul %83, %82, %cst_27 {dimension_numbers = #tpu.dot_dimension_numbers<[1], [0], [0], [1], [0, 0, 1, 1], [], []>} : vector<16x128xbf16>, vector<128x128xbf16>, vector<16x128xf32> -> vector<16x128xf32>
    %c0_28 = arith.constant 0 : index
    %c0_29 = arith.constant 0 : index
    %85 = vector.load %arg7[%c0_28, %c0_29] : memref<4x128xf32, #tpu.memory_space<vmem>>, vector<1x128xf32>
    %86 = vector.shape_cast %85 : vector<1x128xf32> to vector<128xf32>
    %87 = vector.shape_cast %86 : vector<128xf32> to vector<1x128xf32>
    %88 = vector.broadcast %87 : vector<1x128xf32> to vector<16x128xf32>
    %89 = arith.addf %84, %88 : vector<16x128xf32>
    %90 = vector.shape_cast %89 : vector<16x128xf32> to vector<2x8x128xf32>
    %91 = arith.addf %0, %90 : vector<2x8x128xf32>
    %92 = vector.shape_cast %91 : vector<2x8x128xf32> to vector<16x128xf32>
    %c0_30 = arith.constant 0 : index
    %c0_31 = arith.constant 0 : index
    %93 = vector.load %arg8[%c0_30, %c0_31] : memref<4x128xf32, #tpu.memory_space<vmem>>, vector<1x128xf32>
    %94 = vector.shape_cast %93 : vector<1x128xf32> to vector<128xf32>
    %c0_32 = arith.constant 0 : index
    %c0_33 = arith.constant 0 : index
    %95 = vector.load %arg9[%c0_32, %c0_33] : memref<4x128xf32, #tpu.memory_space<vmem>>, vector<1x128xf32>
    %96 = vector.shape_cast %95 : vector<1x128xf32> to vector<128xf32>
    %cst_34 = arith.constant dense<0.000000e+00> : vector<16xf32>
    %97 = vector.multi_reduction <add>, %92, %cst_34 [1] : vector<16x128xf32> to vector<16xf32>
    %98 = vector.shape_cast %97 : vector<16xf32> to vector<16x1xf32>
    %cst_35 = arith.constant 1.280000e+02 : f32
    %99 = vector.broadcast %cst_35 : f32 to vector<16x1xf32>
    %100 = arith.divf %98, %99 : vector<16x1xf32>
    %101 = vector.broadcast %100 : vector<16x1xf32> to vector<16x128xf32>
    %102 = arith.subf %92, %101 : vector<16x128xf32>
    %103 = arith.mulf %102, %102 : vector<16x128xf32>
    %cst_36 = arith.constant dense<0.000000e+00> : vector<16xf32>
    %104 = vector.multi_reduction <add>, %103, %cst_36 [1] : vector<16x128xf32> to vector<16xf32>
    %105 = vector.shape_cast %104 : vector<16xf32> to vector<16x1xf32>
    %cst_37 = arith.constant 1.280000e+02 : f32
    %106 = vector.broadcast %cst_37 : f32 to vector<16x1xf32>
    %107 = arith.divf %105, %106 : vector<16x1xf32>
    %cst_38 = arith.constant 9.99999974E-6 : f32
    %108 = vector.broadcast %cst_38 : f32 to vector<16x1xf32>
    %109 = arith.addf %107, %108 : vector<16x1xf32>
    %110 = math.rsqrt %109 : vector<16x1xf32>
    %111 = vector.broadcast %110 : vector<16x1xf32> to vector<16x128xf32>
    %112 = arith.mulf %102, %111 : vector<16x128xf32>
    %113 = vector.shape_cast %94 : vector<128xf32> to vector<1x128xf32>
    %114 = vector.broadcast %113 : vector<1x128xf32> to vector<16x128xf32>
    %115 = arith.mulf %112, %114 : vector<16x128xf32>
    %116 = vector.shape_cast %96 : vector<128xf32> to vector<1x128xf32>
    %117 = vector.broadcast %116 : vector<1x128xf32> to vector<16x128xf32>
    %118 = arith.addf %115, %117 : vector<16x128xf32>
    %c0_39 = arith.constant 0 : index
    %c0_40 = arith.constant 0 : index
    %c0_41 = arith.constant 0 : index
    %119 = vector.load %arg10[%c0_39, %c0_40, %c0_41] : memref<4x128x512xbf16, #tpu.memory_space<vmem>>, vector<1x128x512xbf16>
    %120 = vector.shape_cast %119 : vector<1x128x512xbf16> to vector<128x512xbf16>
    %121 = arith.truncf %118 : vector<16x128xf32> to vector<16x128xbf16>
    %cst_42 = arith.constant dense<0.000000e+00> : vector<16x512xf32>
    %122 = tpu.matmul %121, %120, %cst_42 {dimension_numbers = #tpu.dot_dimension_numbers<[1], [0], [0], [1], [0, 0, 1, 1], [], []>} : vector<16x128xbf16>, vector<128x512xbf16>, vector<16x512xf32> -> vector<16x512xf32>
    %c0_43 = arith.constant 0 : index
    %c0_44 = arith.constant 0 : index
    %123 = vector.load %arg11[%c0_43, %c0_44] : memref<4x512xf32, #tpu.memory_space<vmem>>, vector<1x512xf32>
    %124 = vector.shape_cast %123 : vector<1x512xf32> to vector<512xf32>
    %125 = vector.shape_cast %124 : vector<512xf32> to vector<1x512xf32>
    %126 = vector.broadcast %125 : vector<1x512xf32> to vector<16x512xf32>
    %127 = arith.addf %122, %126 : vector<16x512xf32>
    %cst_45 = arith.constant 1.702000e+00 : f32
    %128 = vector.broadcast %cst_45 : f32 to vector<16x512xf32>
    %129 = arith.mulf %128, %127 : vector<16x512xf32>
    %130 = arith.negf %129 : vector<16x512xf32>
    %131 = math.exp %130 : vector<16x512xf32>
    %cst_46 = arith.constant 1.000000e+00 : f32
    %132 = vector.broadcast %cst_46 : f32 to vector<16x512xf32>
    %133 = arith.addf %132, %131 : vector<16x512xf32>
    %134 = arith.divf %132, %133 : vector<16x512xf32>
    %135 = arith.mulf %127, %134 : vector<16x512xf32>
    %c0_47 = arith.constant 0 : index
    %c0_48 = arith.constant 0 : index
    %c0_49 = arith.constant 0 : index
    %136 = vector.load %arg12[%c0_47, %c0_48, %c0_49] : memref<4x512x128xbf16, #tpu.memory_space<vmem>>, vector<1x512x128xbf16>
    %137 = vector.shape_cast %136 : vector<1x512x128xbf16> to vector<512x128xbf16>
    %138 = arith.truncf %135 : vector<16x512xf32> to vector<16x512xbf16>
    %cst_50 = arith.constant dense<0.000000e+00> : vector<16x128xf32>
    %139 = tpu.matmul %138, %137, %cst_50 {dimension_numbers = #tpu.dot_dimension_numbers<[1], [0], [0], [1], [0, 0, 1, 1], [], []>} : vector<16x512xbf16>, vector<512x128xbf16>, vector<16x128xf32> -> vector<16x128xf32>
    %c0_51 = arith.constant 0 : index
    %c0_52 = arith.constant 0 : index
    %140 = vector.load %arg13[%c0_51, %c0_52] : memref<4x128xf32, #tpu.memory_space<vmem>>, vector<1x128xf32>
    %141 = vector.shape_cast %140 : vector<1x128xf32> to vector<128xf32>
    %142 = vector.shape_cast %141 : vector<128xf32> to vector<1x128xf32>
    %143 = vector.broadcast %142 : vector<1x128xf32> to vector<16x128xf32>
    %144 = arith.addf %139, %143 : vector<16x128xf32>
    %145 = vector.shape_cast %144 : vector<16x128xf32> to vector<2x8x128xf32>
    %146 = arith.addf %91, %145 : vector<2x8x128xf32>
    %147 = vector.shape_cast %146 : vector<2x8x128xf32> to vector<16x128xf32>
    %c1 = arith.constant 1 : index
    %c0_53 = arith.constant 0 : index
    %148 = vector.load %arg2[%c1, %c0_53] : memref<4x128xf32, #tpu.memory_space<vmem>>, vector<1x128xf32>
    %149 = vector.shape_cast %148 : vector<1x128xf32> to vector<128xf32>
    %c1_54 = arith.constant 1 : index
    %c0_55 = arith.constant 0 : index
    %150 = vector.load %arg3[%c1_54, %c0_55] : memref<4x128xf32, #tpu.memory_space<vmem>>, vector<1x128xf32>
    %151 = vector.shape_cast %150 : vector<1x128xf32> to vector<128xf32>
    %cst_56 = arith.constant dense<0.000000e+00> : vector<16xf32>
    %152 = vector.multi_reduction <add>, %147, %cst_56 [1] : vector<16x128xf32> to vector<16xf32>
    %153 = vector.shape_cast %152 : vector<16xf32> to vector<16x1xf32>
    %cst_57 = arith.constant 1.280000e+02 : f32
    %154 = vector.broadcast %cst_57 : f32 to vector<16x1xf32>
    %155 = arith.divf %153, %154 : vector<16x1xf32>
    %156 = vector.broadcast %155 : vector<16x1xf32> to vector<16x128xf32>
    %157 = arith.subf %147, %156 : vector<16x128xf32>
    %158 = arith.mulf %157, %157 : vector<16x128xf32>
    %cst_58 = arith.constant dense<0.000000e+00> : vector<16xf32>
    %159 = vector.multi_reduction <add>, %158, %cst_58 [1] : vector<16x128xf32> to vector<16xf32>
    %160 = vector.shape_cast %159 : vector<16xf32> to vector<16x1xf32>
    %cst_59 = arith.constant 1.280000e+02 : f32
    %161 = vector.broadcast %cst_59 : f32 to vector<16x1xf32>
    %162 = arith.divf %160, %161 : vector<16x1xf32>
    %cst_60 = arith.constant 9.99999974E-6 : f32
    %163 = vector.broadcast %cst_60 : f32 to vector<16x1xf32>
    %164 = arith.addf %162, %163 : vector<16x1xf32>
    %165 = math.rsqrt %164 : vector<16x1xf32>
    %166 = vector.broadcast %165 : vector<16x1xf32> to vector<16x128xf32>
    %167 = arith.mulf %157, %166 : vector<16x128xf32>
    %168 = vector.shape_cast %149 : vector<128xf32> to vector<1x128xf32>
    %169 = vector.broadcast %168 : vector<1x128xf32> to vector<16x128xf32>
    %170 = arith.mulf %167, %169 : vector<16x128xf32>
    %171 = vector.shape_cast %151 : vector<128xf32> to vector<1x128xf32>
    %172 = vector.broadcast %171 : vector<1x128xf32> to vector<16x128xf32>
    %173 = arith.addf %170, %172 : vector<16x128xf32>
    %c1_61 = arith.constant 1 : index
    %c0_62 = arith.constant 0 : index
    %c0_63 = arith.constant 0 : index
    %174 = vector.load %arg4[%c1_61, %c0_62, %c0_63] : memref<4x128x384xbf16, #tpu.memory_space<vmem>>, vector<1x128x384xbf16>
    %175 = vector.shape_cast %174 : vector<1x128x384xbf16> to vector<128x384xbf16>
    %176 = arith.truncf %173 : vector<16x128xf32> to vector<16x128xbf16>
    %cst_64 = arith.constant dense<0.000000e+00> : vector<16x384xf32>
    %177 = tpu.matmul %176, %175, %cst_64 {dimension_numbers = #tpu.dot_dimension_numbers<[1], [0], [0], [1], [0, 0, 1, 1], [], []>} : vector<16x128xbf16>, vector<128x384xbf16>, vector<16x384xf32> -> vector<16x384xf32>
    %c1_65 = arith.constant 1 : index
    %c0_66 = arith.constant 0 : index
    %178 = vector.load %arg5[%c1_65, %c0_66] : memref<4x384xf32, #tpu.memory_space<vmem>>, vector<1x384xf32>
    %179 = vector.shape_cast %178 : vector<1x384xf32> to vector<384xf32>
    %180 = vector.shape_cast %179 : vector<384xf32> to vector<1x384xf32>
    %181 = vector.broadcast %180 : vector<1x384xf32> to vector<16x384xf32>
    %182 = arith.addf %177, %181 : vector<16x384xf32>
    %183 = vector.shape_cast %182 : vector<16x384xf32> to vector<2x8x384xf32>
    %184 = vector.extract_strided_slice %183 {offsets = [0, 0, 0], sizes = [2, 8, 128], strides = [1, 1, 1]} : vector<2x8x384xf32> to vector<2x8x128xf32>
    %185 = vector.extract_strided_slice %183 {offsets = [0, 0, 128], sizes = [2, 8, 128], strides = [1, 1, 1]} : vector<2x8x384xf32> to vector<2x8x128xf32>
    %186 = vector.extract_strided_slice %183 {offsets = [0, 0, 256], sizes = [2, 8, 128], strides = [1, 1, 1]} : vector<2x8x384xf32> to vector<2x8x128xf32>
    %187 = vector.extract_strided_slice %184 {offsets = [0, 0, 0], sizes = [2, 8, 64], strides = [1, 1, 1]} : vector<2x8x128xf32> to vector<2x8x64xf32>
    %188 = arith.truncf %187 : vector<2x8x64xf32> to vector<2x8x64xbf16>
    %189 = vector.extract_strided_slice %185 {offsets = [0, 0, 0], sizes = [2, 8, 64], strides = [1, 1, 1]} : vector<2x8x128xf32> to vector<2x8x64xf32>
    %190 = arith.truncf %189 : vector<2x8x64xf32> to vector<2x8x64xbf16>
    %191 = vector.extract_strided_slice %186 {offsets = [0, 0, 0], sizes = [2, 8, 64], strides = [1, 1, 1]} : vector<2x8x128xf32> to vector<2x8x64xf32>
    %192 = arith.truncf %191 : vector<2x8x64xf32> to vector<2x8x64xbf16>
    "tpu.trace_start"() <{level = 10 : i32, message = "bqd,bkd->bqk"}> : () -> ()
    %cst_67 = arith.constant dense<0.000000e+00> : vector<2x8x8xf32>
    %193 = tpu.matmul %188, %190, %cst_67 {dimension_numbers = #tpu.dot_dimension_numbers<[2], [2], [1], [1], [0, 0, 0, 1, 1, 1], [0], [0]>} : vector<2x8x64xbf16>, vector<2x8x64xbf16>, vector<2x8x8xf32> -> vector<2x8x8xf32>
    "tpu.trace_stop"() : () -> ()
    %cst_68 = arith.constant dense<0xFF800000> : vector<2x8xf32>
    %194 = vector.multi_reduction <maximumf>, %193, %cst_68 [2] : vector<2x8x8xf32> to vector<2x8xf32>
    %195 = vector.shape_cast %194 : vector<2x8xf32> to vector<2x8x1xf32>
    %196 = vector.broadcast %195 : vector<2x8x1xf32> to vector<2x8x8xf32>
    %197 = arith.subf %193, %196 : vector<2x8x8xf32>
    %198 = math.exp %197 : vector<2x8x8xf32>
    %cst_69 = arith.constant dense<0.000000e+00> : vector<2x8xf32>
    %199 = vector.multi_reduction <add>, %198, %cst_69 [2] : vector<2x8x8xf32> to vector<2x8xf32>
    %200 = vector.shape_cast %199 : vector<2x8xf32> to vector<2x8x1xf32>
    %201 = tpu.reciprocal %200 {approx = true} : vector<2x8x1xf32> -> vector<2x8x1xf32>
    %202 = vector.broadcast %201 : vector<2x8x1xf32> to vector<2x8x8xf32>
    %203 = arith.mulf %198, %202 : vector<2x8x8xf32>
    %204 = arith.truncf %203 : vector<2x8x8xf32> to vector<2x8x8xbf16>
    "tpu.trace_start"() <{level = 10 : i32, message = "bqk,bkd->bqd"}> : () -> ()
    %cst_70 = arith.constant dense<0.000000e+00> : vector<2x8x64xf32>
    %205 = tpu.matmul %204, %192, %cst_70 {dimension_numbers = #tpu.dot_dimension_numbers<[2], [1], [1], [2], [0, 0, 0, 1, 1, 2], [0], [0]>} : vector<2x8x8xbf16>, vector<2x8x64xbf16>, vector<2x8x64xf32> -> vector<2x8x64xf32>
    "tpu.trace_stop"() : () -> ()
    %206 = vector.extract_strided_slice %184 {offsets = [0, 0, 64], sizes = [2, 8, 64], strides = [1, 1, 1]} : vector<2x8x128xf32> to vector<2x8x64xf32>
    %207 = arith.truncf %206 : vector<2x8x64xf32> to vector<2x8x64xbf16>
    %208 = vector.extract_strided_slice %185 {offsets = [0, 0, 64], sizes = [2, 8, 64], strides = [1, 1, 1]} : vector<2x8x128xf32> to vector<2x8x64xf32>
    %209 = arith.truncf %208 : vector<2x8x64xf32> to vector<2x8x64xbf16>
    %210 = vector.extract_strided_slice %186 {offsets = [0, 0, 64], sizes = [2, 8, 64], strides = [1, 1, 1]} : vector<2x8x128xf32> to vector<2x8x64xf32>
    %211 = arith.truncf %210 : vector<2x8x64xf32> to vector<2x8x64xbf16>
    "tpu.trace_start"() <{level = 10 : i32, message = "bqd,bkd->bqk"}> : () -> ()
    %cst_71 = arith.constant dense<0.000000e+00> : vector<2x8x8xf32>
    %212 = tpu.matmul %207, %209, %cst_71 {dimension_numbers = #tpu.dot_dimension_numbers<[2], [2], [1], [1], [0, 0, 0, 1, 1, 1], [0], [0]>} : vector<2x8x64xbf16>, vector<2x8x64xbf16>, vector<2x8x8xf32> -> vector<2x8x8xf32>
    "tpu.trace_stop"() : () -> ()
    %cst_72 = arith.constant dense<0xFF800000> : vector<2x8xf32>
    %213 = vector.multi_reduction <maximumf>, %212, %cst_72 [2] : vector<2x8x8xf32> to vector<2x8xf32>
    %214 = vector.shape_cast %213 : vector<2x8xf32> to vector<2x8x1xf32>
    %215 = vector.broadcast %214 : vector<2x8x1xf32> to vector<2x8x8xf32>
    %216 = arith.subf %212, %215 : vector<2x8x8xf32>
    %217 = math.exp %216 : vector<2x8x8xf32>
    %cst_73 = arith.constant dense<0.000000e+00> : vector<2x8xf32>
    %218 = vector.multi_reduction <add>, %217, %cst_73 [2] : vector<2x8x8xf32> to vector<2x8xf32>
    %219 = vector.shape_cast %218 : vector<2x8xf32> to vector<2x8x1xf32>
    %220 = tpu.reciprocal %219 {approx = true} : vector<2x8x1xf32> -> vector<2x8x1xf32>
    %221 = vector.broadcast %220 : vector<2x8x1xf32> to vector<2x8x8xf32>
    %222 = arith.mulf %217, %221 : vector<2x8x8xf32>
    %223 = arith.truncf %222 : vector<2x8x8xf32> to vector<2x8x8xbf16>
    "tpu.trace_start"() <{level = 10 : i32, message = "bqk,bkd->bqd"}> : () -> ()
    %cst_74 = arith.constant dense<0.000000e+00> : vector<2x8x64xf32>
    %224 = tpu.matmul %223, %211, %cst_74 {dimension_numbers = #tpu.dot_dimension_numbers<[2], [1], [1], [2], [0, 0, 0, 1, 1, 2], [0], [0]>} : vector<2x8x8xbf16>, vector<2x8x64xbf16>, vector<2x8x64xf32> -> vector<2x8x64xf32>
    "tpu.trace_stop"() : () -> ()
    %225 = tpu.concatenate %205, %224 in 2 : vector<2x8x64xf32>, vector<2x8x64xf32> -> vector<2x8x128xf32>
    %226 = vector.shape_cast %225 : vector<2x8x128xf32> to vector<16x128xf32>
    %c1_75 = arith.constant 1 : index
    %c0_76 = arith.constant 0 : index
    %c0_77 = arith.constant 0 : index
    %227 = vector.load %arg6[%c1_75, %c0_76, %c0_77] : memref<4x128x128xbf16, #tpu.memory_space<vmem>>, vector<1x128x128xbf16>
    %228 = vector.shape_cast %227 : vector<1x128x128xbf16> to vector<128x128xbf16>
    %229 = arith.truncf %226 : vector<16x128xf32> to vector<16x128xbf16>
    %cst_78 = arith.constant dense<0.000000e+00> : vector<16x128xf32>
    %230 = tpu.matmul %229, %228, %cst_78 {dimension_numbers = #tpu.dot_dimension_numbers<[1], [0], [0], [1], [0, 0, 1, 1], [], []>} : vector<16x128xbf16>, vector<128x128xbf16>, vector<16x128xf32> -> vector<16x128xf32>
    %c1_79 = arith.constant 1 : index
    %c0_80 = arith.constant 0 : index
    %231 = vector.load %arg7[%c1_79, %c0_80] : memref<4x128xf32, #tpu.memory_space<vmem>>, vector<1x128xf32>
    %232 = vector.shape_cast %231 : vector<1x128xf32> to vector<128xf32>
    %233 = vector.shape_cast %232 : vector<128xf32> to vector<1x128xf32>
    %234 = vector.broadcast %233 : vector<1x128xf32> to vector<16x128xf32>
    %235 = arith.addf %230, %234 : vector<16x128xf32>
    %236 = vector.shape_cast %235 : vector<16x128xf32> to vector<2x8x128xf32>
    %237 = arith.addf %146, %236 : vector<2x8x128xf32>
    %238 = vector.shape_cast %237 : vector<2x8x128xf32> to vector<16x128xf32>
    %c1_81 = arith.constant 1 : index
    %c0_82 = arith.constant 0 : index
    %239 = vector.load %arg8[%c1_81, %c0_82] : memref<4x128xf32, #tpu.memory_space<vmem>>, vector<1x128xf32>
    %240 = vector.shape_cast %239 : vector<1x128xf32> to vector<128xf32>
    %c1_83 = arith.constant 1 : index
    %c0_84 = arith.constant 0 : index
    %241 = vector.load %arg9[%c1_83, %c0_84] : memref<4x128xf32, #tpu.memory_space<vmem>>, vector<1x128xf32>
    %242 = vector.shape_cast %241 : vector<1x128xf32> to vector<128xf32>
    %cst_85 = arith.constant dense<0.000000e+00> : vector<16xf32>
    %243 = vector.multi_reduction <add>, %238, %cst_85 [1] : vector<16x128xf32> to vector<16xf32>
    %244 = vector.shape_cast %243 : vector<16xf32> to vector<16x1xf32>
    %cst_86 = arith.constant 1.280000e+02 : f32
    %245 = vector.broadcast %cst_86 : f32 to vector<16x1xf32>
    %246 = arith.divf %244, %245 : vector<16x1xf32>
    %247 = vector.broadcast %246 : vector<16x1xf32> to vector<16x128xf32>
    %248 = arith.subf %238, %247 : vector<16x128xf32>
    %249 = arith.mulf %248, %248 : vector<16x128xf32>
    %cst_87 = arith.constant dense<0.000000e+00> : vector<16xf32>
    %250 = vector.multi_reduction <add>, %249, %cst_87 [1] : vector<16x128xf32> to vector<16xf32>
    %251 = vector.shape_cast %250 : vector<16xf32> to vector<16x1xf32>
    %cst_88 = arith.constant 1.280000e+02 : f32
    %252 = vector.broadcast %cst_88 : f32 to vector<16x1xf32>
    %253 = arith.divf %251, %252 : vector<16x1xf32>
    %cst_89 = arith.constant 9.99999974E-6 : f32
    %254 = vector.broadcast %cst_89 : f32 to vector<16x1xf32>
    %255 = arith.addf %253, %254 : vector<16x1xf32>
    %256 = math.rsqrt %255 : vector<16x1xf32>
    %257 = vector.broadcast %256 : vector<16x1xf32> to vector<16x128xf32>
    %258 = arith.mulf %248, %257 : vector<16x128xf32>
    %259 = vector.shape_cast %240 : vector<128xf32> to vector<1x128xf32>
    %260 = vector.broadcast %259 : vector<1x128xf32> to vector<16x128xf32>
    %261 = arith.mulf %258, %260 : vector<16x128xf32>
    %262 = vector.shape_cast %242 : vector<128xf32> to vector<1x128xf32>
    %263 = vector.broadcast %262 : vector<1x128xf32> to vector<16x128xf32>
    %264 = arith.addf %261, %263 : vector<16x128xf32>
    %c1_90 = arith.constant 1 : index
    %c0_91 = arith.constant 0 : index
    %c0_92 = arith.constant 0 : index
    %265 = vector.load %arg10[%c1_90, %c0_91, %c0_92] : memref<4x128x512xbf16, #tpu.memory_space<vmem>>, vector<1x128x512xbf16>
    %266 = vector.shape_cast %265 : vector<1x128x512xbf16> to vector<128x512xbf16>
    %267 = arith.truncf %264 : vector<16x128xf32> to vector<16x128xbf16>
    %cst_93 = arith.constant dense<0.000000e+00> : vector<16x512xf32>
    %268 = tpu.matmul %267, %266, %cst_93 {dimension_numbers = #tpu.dot_dimension_numbers<[1], [0], [0], [1], [0, 0, 1, 1], [], []>} : vector<16x128xbf16>, vector<128x512xbf16>, vector<16x512xf32> -> vector<16x512xf32>
    %c1_94 = arith.constant 1 : index
    %c0_95 = arith.constant 0 : index
    %269 = vector.load %arg11[%c1_94, %c0_95] : memref<4x512xf32, #tpu.memory_space<vmem>>, vector<1x512xf32>
    %270 = vector.shape_cast %269 : vector<1x512xf32> to vector<512xf32>
    %271 = vector.shape_cast %270 : vector<512xf32> to vector<1x512xf32>
    %272 = vector.broadcast %271 : vector<1x512xf32> to vector<16x512xf32>
    %273 = arith.addf %268, %272 : vector<16x512xf32>
    %cst_96 = arith.constant 1.702000e+00 : f32
    %274 = vector.broadcast %cst_96 : f32 to vector<16x512xf32>
    %275 = arith.mulf %274, %273 : vector<16x512xf32>
    %276 = arith.negf %275 : vector<16x512xf32>
    %277 = math.exp %276 : vector<16x512xf32>
    %cst_97 = arith.constant 1.000000e+00 : f32
    %278 = vector.broadcast %cst_97 : f32 to vector<16x512xf32>
    %279 = arith.addf %278, %277 : vector<16x512xf32>
    %280 = arith.divf %278, %279 : vector<16x512xf32>
    %281 = arith.mulf %273, %280 : vector<16x512xf32>
    %c1_98 = arith.constant 1 : index
    %c0_99 = arith.constant 0 : index
    %c0_100 = arith.constant 0 : index
    %282 = vector.load %arg12[%c1_98, %c0_99, %c0_100] : memref<4x512x128xbf16, #tpu.memory_space<vmem>>, vector<1x512x128xbf16>
    %283 = vector.shape_cast %282 : vector<1x512x128xbf16> to vector<512x128xbf16>
    %284 = arith.truncf %281 : vector<16x512xf32> to vector<16x512xbf16>
    %cst_101 = arith.constant dense<0.000000e+00> : vector<16x128xf32>
    %285 = tpu.matmul %284, %283, %cst_101 {dimension_numbers = #tpu.dot_dimension_numbers<[1], [0], [0], [1], [0, 0, 1, 1], [], []>} : vector<16x512xbf16>, vector<512x128xbf16>, vector<16x128xf32> -> vector<16x128xf32>
    %c1_102 = arith.constant 1 : index
    %c0_103 = arith.constant 0 : index
    %286 = vector.load %arg13[%c1_102, %c0_103] : memref<4x128xf32, #tpu.memory_space<vmem>>, vector<1x128xf32>
    %287 = vector.shape_cast %286 : vector<1x128xf32> to vector<128xf32>
    %288 = vector.shape_cast %287 : vector<128xf32> to vector<1x128xf32>
    %289 = vector.broadcast %288 : vector<1x128xf32> to vector<16x128xf32>
    %290 = arith.addf %285, %289 : vector<16x128xf32>
    %291 = vector.shape_cast %290 : vector<16x128xf32> to vector<2x8x128xf32>
    %292 = arith.addf %237, %291 : vector<2x8x128xf32>
    %293 = vector.shape_cast %292 : vector<2x8x128xf32> to vector<16x128xf32>
    %c2 = arith.constant 2 : index
    %c0_104 = arith.constant 0 : index
    %294 = vector.load %arg2[%c2, %c0_104] : memref<4x128xf32, #tpu.memory_space<vmem>>, vector<1x128xf32>
    %295 = vector.shape_cast %294 : vector<1x128xf32> to vector<128xf32>
    %c2_105 = arith.constant 2 : index
    %c0_106 = arith.constant 0 : index
    %296 = vector.load %arg3[%c2_105, %c0_106] : memref<4x128xf32, #tpu.memory_space<vmem>>, vector<1x128xf32>
    %297 = vector.shape_cast %296 : vector<1x128xf32> to vector<128xf32>
    %cst_107 = arith.constant dense<0.000000e+00> : vector<16xf32>
    %298 = vector.multi_reduction <add>, %293, %cst_107 [1] : vector<16x128xf32> to vector<16xf32>
    %299 = vector.shape_cast %298 : vector<16xf32> to vector<16x1xf32>
    %cst_108 = arith.constant 1.280000e+02 : f32
    %300 = vector.broadcast %cst_108 : f32 to vector<16x1xf32>
    %301 = arith.divf %299, %300 : vector<16x1xf32>
    %302 = vector.broadcast %301 : vector<16x1xf32> to vector<16x128xf32>
    %303 = arith.subf %293, %302 : vector<16x128xf32>
    %304 = arith.mulf %303, %303 : vector<16x128xf32>
    %cst_109 = arith.constant dense<0.000000e+00> : vector<16xf32>
    %305 = vector.multi_reduction <add>, %304, %cst_109 [1] : vector<16x128xf32> to vector<16xf32>
    %306 = vector.shape_cast %305 : vector<16xf32> to vector<16x1xf32>
    %cst_110 = arith.constant 1.280000e+02 : f32
    %307 = vector.broadcast %cst_110 : f32 to vector<16x1xf32>
    %308 = arith.divf %306, %307 : vector<16x1xf32>
    %cst_111 = arith.constant 9.99999974E-6 : f32
    %309 = vector.broadcast %cst_111 : f32 to vector<16x1xf32>
    %310 = arith.addf %308, %309 : vector<16x1xf32>
    %311 = math.rsqrt %310 : vector<16x1xf32>
    %312 = vector.broadcast %311 : vector<16x1xf32> to vector<16x128xf32>
    %313 = arith.mulf %303, %312 : vector<16x128xf32>
    %314 = vector.shape_cast %295 : vector<128xf32> to vector<1x128xf32>
    %315 = vector.broadcast %314 : vector<1x128xf32> to vector<16x128xf32>
    %316 = arith.mulf %313, %315 : vector<16x128xf32>
    %317 = vector.shape_cast %297 : vector<128xf32> to vector<1x128xf32>
    %318 = vector.broadcast %317 : vector<1x128xf32> to vector<16x128xf32>
    %319 = arith.addf %316, %318 : vector<16x128xf32>
    %c2_112 = arith.constant 2 : index
    %c0_113 = arith.constant 0 : index
    %c0_114 = arith.constant 0 : index
    %320 = vector.load %arg4[%c2_112, %c0_113, %c0_114] : memref<4x128x384xbf16, #tpu.memory_space<vmem>>, vector<1x128x384xbf16>
    %321 = vector.shape_cast %320 : vector<1x128x384xbf16> to vector<128x384xbf16>
    %322 = arith.truncf %319 : vector<16x128xf32> to vector<16x128xbf16>
    %cst_115 = arith.constant dense<0.000000e+00> : vector<16x384xf32>
    %323 = tpu.matmul %322, %321, %cst_115 {dimension_numbers = #tpu.dot_dimension_numbers<[1], [0], [0], [1], [0, 0, 1, 1], [], []>} : vector<16x128xbf16>, vector<128x384xbf16>, vector<16x384xf32> -> vector<16x384xf32>
    %c2_116 = arith.constant 2 : index
    %c0_117 = arith.constant 0 : index
    %324 = vector.load %arg5[%c2_116, %c0_117] : memref<4x384xf32, #tpu.memory_space<vmem>>, vector<1x384xf32>
    %325 = vector.shape_cast %324 : vector<1x384xf32> to vector<384xf32>
    %326 = vector.shape_cast %325 : vector<384xf32> to vector<1x384xf32>
    %327 = vector.broadcast %326 : vector<1x384xf32> to vector<16x384xf32>
    %328 = arith.addf %323, %327 : vector<16x384xf32>
    %329 = vector.shape_cast %328 : vector<16x384xf32> to vector<2x8x384xf32>
    %330 = vector.extract_strided_slice %329 {offsets = [0, 0, 0], sizes = [2, 8, 128], strides = [1, 1, 1]} : vector<2x8x384xf32> to vector<2x8x128xf32>
    %331 = vector.extract_strided_slice %329 {offsets = [0, 0, 128], sizes = [2, 8, 128], strides = [1, 1, 1]} : vector<2x8x384xf32> to vector<2x8x128xf32>
    %332 = vector.extract_strided_slice %329 {offsets = [0, 0, 256], sizes = [2, 8, 128], strides = [1, 1, 1]} : vector<2x8x384xf32> to vector<2x8x128xf32>
    %333 = vector.extract_strided_slice %330 {offsets = [0, 0, 0], sizes = [2, 8, 64], strides = [1, 1, 1]} : vector<2x8x128xf32> to vector<2x8x64xf32>
    %334 = arith.truncf %333 : vector<2x8x64xf32> to vector<2x8x64xbf16>
    %335 = vector.extract_strided_slice %331 {offsets = [0, 0, 0], sizes = [2, 8, 64], strides = [1, 1, 1]} : vector<2x8x128xf32> to vector<2x8x64xf32>
    %336 = arith.truncf %335 : vector<2x8x64xf32> to vector<2x8x64xbf16>
    %337 = vector.extract_strided_slice %332 {offsets = [0, 0, 0], sizes = [2, 8, 64], strides = [1, 1, 1]} : vector<2x8x128xf32> to vector<2x8x64xf32>
    %338 = arith.truncf %337 : vector<2x8x64xf32> to vector<2x8x64xbf16>
    "tpu.trace_start"() <{level = 10 : i32, message = "bqd,bkd->bqk"}> : () -> ()
    %cst_118 = arith.constant dense<0.000000e+00> : vector<2x8x8xf32>
    %339 = tpu.matmul %334, %336, %cst_118 {dimension_numbers = #tpu.dot_dimension_numbers<[2], [2], [1], [1], [0, 0, 0, 1, 1, 1], [0], [0]>} : vector<2x8x64xbf16>, vector<2x8x64xbf16>, vector<2x8x8xf32> -> vector<2x8x8xf32>
    "tpu.trace_stop"() : () -> ()
    %cst_119 = arith.constant dense<0xFF800000> : vector<2x8xf32>
    %340 = vector.multi_reduction <maximumf>, %339, %cst_119 [2] : vector<2x8x8xf32> to vector<2x8xf32>
    %341 = vector.shape_cast %340 : vector<2x8xf32> to vector<2x8x1xf32>
    %342 = vector.broadcast %341 : vector<2x8x1xf32> to vector<2x8x8xf32>
    %343 = arith.subf %339, %342 : vector<2x8x8xf32>
    %344 = math.exp %343 : vector<2x8x8xf32>
    %cst_120 = arith.constant dense<0.000000e+00> : vector<2x8xf32>
    %345 = vector.multi_reduction <add>, %344, %cst_120 [2] : vector<2x8x8xf32> to vector<2x8xf32>
    %346 = vector.shape_cast %345 : vector<2x8xf32> to vector<2x8x1xf32>
    %347 = tpu.reciprocal %346 {approx = true} : vector<2x8x1xf32> -> vector<2x8x1xf32>
    %348 = vector.broadcast %347 : vector<2x8x1xf32> to vector<2x8x8xf32>
    %349 = arith.mulf %344, %348 : vector<2x8x8xf32>
    %350 = arith.truncf %349 : vector<2x8x8xf32> to vector<2x8x8xbf16>
    "tpu.trace_start"() <{level = 10 : i32, message = "bqk,bkd->bqd"}> : () -> ()
    %cst_121 = arith.constant dense<0.000000e+00> : vector<2x8x64xf32>
    %351 = tpu.matmul %350, %338, %cst_121 {dimension_numbers = #tpu.dot_dimension_numbers<[2], [1], [1], [2], [0, 0, 0, 1, 1, 2], [0], [0]>} : vector<2x8x8xbf16>, vector<2x8x64xbf16>, vector<2x8x64xf32> -> vector<2x8x64xf32>
    "tpu.trace_stop"() : () -> ()
    %352 = vector.extract_strided_slice %330 {offsets = [0, 0, 64], sizes = [2, 8, 64], strides = [1, 1, 1]} : vector<2x8x128xf32> to vector<2x8x64xf32>
    %353 = arith.truncf %352 : vector<2x8x64xf32> to vector<2x8x64xbf16>
    %354 = vector.extract_strided_slice %331 {offsets = [0, 0, 64], sizes = [2, 8, 64], strides = [1, 1, 1]} : vector<2x8x128xf32> to vector<2x8x64xf32>
    %355 = arith.truncf %354 : vector<2x8x64xf32> to vector<2x8x64xbf16>
    %356 = vector.extract_strided_slice %332 {offsets = [0, 0, 64], sizes = [2, 8, 64], strides = [1, 1, 1]} : vector<2x8x128xf32> to vector<2x8x64xf32>
    %357 = arith.truncf %356 : vector<2x8x64xf32> to vector<2x8x64xbf16>
    "tpu.trace_start"() <{level = 10 : i32, message = "bqd,bkd->bqk"}> : () -> ()
    %cst_122 = arith.constant dense<0.000000e+00> : vector<2x8x8xf32>
    %358 = tpu.matmul %353, %355, %cst_122 {dimension_numbers = #tpu.dot_dimension_numbers<[2], [2], [1], [1], [0, 0, 0, 1, 1, 1], [0], [0]>} : vector<2x8x64xbf16>, vector<2x8x64xbf16>, vector<2x8x8xf32> -> vector<2x8x8xf32>
    "tpu.trace_stop"() : () -> ()
    %cst_123 = arith.constant dense<0xFF800000> : vector<2x8xf32>
    %359 = vector.multi_reduction <maximumf>, %358, %cst_123 [2] : vector<2x8x8xf32> to vector<2x8xf32>
    %360 = vector.shape_cast %359 : vector<2x8xf32> to vector<2x8x1xf32>
    %361 = vector.broadcast %360 : vector<2x8x1xf32> to vector<2x8x8xf32>
    %362 = arith.subf %358, %361 : vector<2x8x8xf32>
    %363 = math.exp %362 : vector<2x8x8xf32>
    %cst_124 = arith.constant dense<0.000000e+00> : vector<2x8xf32>
    %364 = vector.multi_reduction <add>, %363, %cst_124 [2] : vector<2x8x8xf32> to vector<2x8xf32>
    %365 = vector.shape_cast %364 : vector<2x8xf32> to vector<2x8x1xf32>
    %366 = tpu.reciprocal %365 {approx = true} : vector<2x8x1xf32> -> vector<2x8x1xf32>
    %367 = vector.broadcast %366 : vector<2x8x1xf32> to vector<2x8x8xf32>
    %368 = arith.mulf %363, %367 : vector<2x8x8xf32>
    %369 = arith.truncf %368 : vector<2x8x8xf32> to vector<2x8x8xbf16>
    "tpu.trace_start"() <{level = 10 : i32, message = "bqk,bkd->bqd"}> : () -> ()
    %cst_125 = arith.constant dense<0.000000e+00> : vector<2x8x64xf32>
    %370 = tpu.matmul %369, %357, %cst_125 {dimension_numbers = #tpu.dot_dimension_numbers<[2], [1], [1], [2], [0, 0, 0, 1, 1, 2], [0], [0]>} : vector<2x8x8xbf16>, vector<2x8x64xbf16>, vector<2x8x64xf32> -> vector<2x8x64xf32>
    "tpu.trace_stop"() : () -> ()
    %371 = tpu.concatenate %351, %370 in 2 : vector<2x8x64xf32>, vector<2x8x64xf32> -> vector<2x8x128xf32>
    %372 = vector.shape_cast %371 : vector<2x8x128xf32> to vector<16x128xf32>
    %c2_126 = arith.constant 2 : index
    %c0_127 = arith.constant 0 : index
    %c0_128 = arith.constant 0 : index
    %373 = vector.load %arg6[%c2_126, %c0_127, %c0_128] : memref<4x128x128xbf16, #tpu.memory_space<vmem>>, vector<1x128x128xbf16>
    %374 = vector.shape_cast %373 : vector<1x128x128xbf16> to vector<128x128xbf16>
    %375 = arith.truncf %372 : vector<16x128xf32> to vector<16x128xbf16>
    %cst_129 = arith.constant dense<0.000000e+00> : vector<16x128xf32>
    %376 = tpu.matmul %375, %374, %cst_129 {dimension_numbers = #tpu.dot_dimension_numbers<[1], [0], [0], [1], [0, 0, 1, 1], [], []>} : vector<16x128xbf16>, vector<128x128xbf16>, vector<16x128xf32> -> vector<16x128xf32>
    %c2_130 = arith.constant 2 : index
    %c0_131 = arith.constant 0 : index
    %377 = vector.load %arg7[%c2_130, %c0_131] : memref<4x128xf32, #tpu.memory_space<vmem>>, vector<1x128xf32>
    %378 = vector.shape_cast %377 : vector<1x128xf32> to vector<128xf32>
    %379 = vector.shape_cast %378 : vector<128xf32> to vector<1x128xf32>
    %380 = vector.broadcast %379 : vector<1x128xf32> to vector<16x128xf32>
    %381 = arith.addf %376, %380 : vector<16x128xf32>
    %382 = vector.shape_cast %381 : vector<16x128xf32> to vector<2x8x128xf32>
    %383 = arith.addf %292, %382 : vector<2x8x128xf32>
    %384 = vector.shape_cast %383 : vector<2x8x128xf32> to vector<16x128xf32>
    %c2_132 = arith.constant 2 : index
    %c0_133 = arith.constant 0 : index
    %385 = vector.load %arg8[%c2_132, %c0_133] : memref<4x128xf32, #tpu.memory_space<vmem>>, vector<1x128xf32>
    %386 = vector.shape_cast %385 : vector<1x128xf32> to vector<128xf32>
    %c2_134 = arith.constant 2 : index
    %c0_135 = arith.constant 0 : index
    %387 = vector.load %arg9[%c2_134, %c0_135] : memref<4x128xf32, #tpu.memory_space<vmem>>, vector<1x128xf32>
    %388 = vector.shape_cast %387 : vector<1x128xf32> to vector<128xf32>
    %cst_136 = arith.constant dense<0.000000e+00> : vector<16xf32>
    %389 = vector.multi_reduction <add>, %384, %cst_136 [1] : vector<16x128xf32> to vector<16xf32>
    %390 = vector.shape_cast %389 : vector<16xf32> to vector<16x1xf32>
    %cst_137 = arith.constant 1.280000e+02 : f32
    %391 = vector.broadcast %cst_137 : f32 to vector<16x1xf32>
    %392 = arith.divf %390, %391 : vector<16x1xf32>
    %393 = vector.broadcast %392 : vector<16x1xf32> to vector<16x128xf32>
    %394 = arith.subf %384, %393 : vector<16x128xf32>
    %395 = arith.mulf %394, %394 : vector<16x128xf32>
    %cst_138 = arith.constant dense<0.000000e+00> : vector<16xf32>
    %396 = vector.multi_reduction <add>, %395, %cst_138 [1] : vector<16x128xf32> to vector<16xf32>
    %397 = vector.shape_cast %396 : vector<16xf32> to vector<16x1xf32>
    %cst_139 = arith.constant 1.280000e+02 : f32
    %398 = vector.broadcast %cst_139 : f32 to vector<16x1xf32>
    %399 = arith.divf %397, %398 : vector<16x1xf32>
    %cst_140 = arith.constant 9.99999974E-6 : f32
    %400 = vector.broadcast %cst_140 : f32 to vector<16x1xf32>
    %401 = arith.addf %399, %400 : vector<16x1xf32>
    %402 = math.rsqrt %401 : vector<16x1xf32>
    %403 = vector.broadcast %402 : vector<16x1xf32> to vector<16x128xf32>
    %404 = arith.mulf %394, %403 : vector<16x128xf32>
    %405 = vector.shape_cast %386 : vector<128xf32> to vector<1x128xf32>
    %406 = vector.broadcast %405 : vector<1x128xf32> to vector<16x128xf32>
    %407 = arith.mulf %404, %406 : vector<16x128xf32>
    %408 = vector.shape_cast %388 : vector<128xf32> to vector<1x128xf32>
    %409 = vector.broadcast %408 : vector<1x128xf32> to vector<16x128xf32>
    %410 = arith.addf %407, %409 : vector<16x128xf32>
    %c2_141 = arith.constant 2 : index
    %c0_142 = arith.constant 0 : index
    %c0_143 = arith.constant 0 : index
    %411 = vector.load %arg10[%c2_141, %c0_142, %c0_143] : memref<4x128x512xbf16, #tpu.memory_space<vmem>>, vector<1x128x512xbf16>
    %412 = vector.shape_cast %411 : vector<1x128x512xbf16> to vector<128x512xbf16>
    %413 = arith.truncf %410 : vector<16x128xf32> to vector<16x128xbf16>
    %cst_144 = arith.constant dense<0.000000e+00> : vector<16x512xf32>
    %414 = tpu.matmul %413, %412, %cst_144 {dimension_numbers = #tpu.dot_dimension_numbers<[1], [0], [0], [1], [0, 0, 1, 1], [], []>} : vector<16x128xbf16>, vector<128x512xbf16>, vector<16x512xf32> -> vector<16x512xf32>
    %c2_145 = arith.constant 2 : index
    %c0_146 = arith.constant 0 : index
    %415 = vector.load %arg11[%c2_145, %c0_146] : memref<4x512xf32, #tpu.memory_space<vmem>>, vector<1x512xf32>
    %416 = vector.shape_cast %415 : vector<1x512xf32> to vector<512xf32>
    %417 = vector.shape_cast %416 : vector<512xf32> to vector<1x512xf32>
    %418 = vector.broadcast %417 : vector<1x512xf32> to vector<16x512xf32>
    %419 = arith.addf %414, %418 : vector<16x512xf32>
    %cst_147 = arith.constant 1.702000e+00 : f32
    %420 = vector.broadcast %cst_147 : f32 to vector<16x512xf32>
    %421 = arith.mulf %420, %419 : vector<16x512xf32>
    %422 = arith.negf %421 : vector<16x512xf32>
    %423 = math.exp %422 : vector<16x512xf32>
    %cst_148 = arith.constant 1.000000e+00 : f32
    %424 = vector.broadcast %cst_148 : f32 to vector<16x512xf32>
    %425 = arith.addf %424, %423 : vector<16x512xf32>
    %426 = arith.divf %424, %425 : vector<16x512xf32>
    %427 = arith.mulf %419, %426 : vector<16x512xf32>
    %c2_149 = arith.constant 2 : index
    %c0_150 = arith.constant 0 : index
    %c0_151 = arith.constant 0 : index
    %428 = vector.load %arg12[%c2_149, %c0_150, %c0_151] : memref<4x512x128xbf16, #tpu.memory_space<vmem>>, vector<1x512x128xbf16>
    %429 = vector.shape_cast %428 : vector<1x512x128xbf16> to vector<512x128xbf16>
    %430 = arith.truncf %427 : vector<16x512xf32> to vector<16x512xbf16>
    %cst_152 = arith.constant dense<0.000000e+00> : vector<16x128xf32>
    %431 = tpu.matmul %430, %429, %cst_152 {dimension_numbers = #tpu.dot_dimension_numbers<[1], [0], [0], [1], [0, 0, 1, 1], [], []>} : vector<16x512xbf16>, vector<512x128xbf16>, vector<16x128xf32> -> vector<16x128xf32>
    %c2_153 = arith.constant 2 : index
    %c0_154 = arith.constant 0 : index
    %432 = vector.load %arg13[%c2_153, %c0_154] : memref<4x128xf32, #tpu.memory_space<vmem>>, vector<1x128xf32>
    %433 = vector.shape_cast %432 : vector<1x128xf32> to vector<128xf32>
    %434 = vector.shape_cast %433 : vector<128xf32> to vector<1x128xf32>
    %435 = vector.broadcast %434 : vector<1x128xf32> to vector<16x128xf32>
    %436 = arith.addf %431, %435 : vector<16x128xf32>
    %437 = vector.shape_cast %436 : vector<16x128xf32> to vector<2x8x128xf32>
    %438 = arith.addf %383, %437 : vector<2x8x128xf32>
    %439 = vector.shape_cast %438 : vector<2x8x128xf32> to vector<16x128xf32>
    %c3 = arith.constant 3 : index
    %c0_155 = arith.constant 0 : index
    %440 = vector.load %arg2[%c3, %c0_155] : memref<4x128xf32, #tpu.memory_space<vmem>>, vector<1x128xf32>
    %441 = vector.shape_cast %440 : vector<1x128xf32> to vector<128xf32>
    %c3_156 = arith.constant 3 : index
    %c0_157 = arith.constant 0 : index
    %442 = vector.load %arg3[%c3_156, %c0_157] : memref<4x128xf32, #tpu.memory_space<vmem>>, vector<1x128xf32>
    %443 = vector.shape_cast %442 : vector<1x128xf32> to vector<128xf32>
    %cst_158 = arith.constant dense<0.000000e+00> : vector<16xf32>
    %444 = vector.multi_reduction <add>, %439, %cst_158 [1] : vector<16x128xf32> to vector<16xf32>
    %445 = vector.shape_cast %444 : vector<16xf32> to vector<16x1xf32>
    %cst_159 = arith.constant 1.280000e+02 : f32
    %446 = vector.broadcast %cst_159 : f32 to vector<16x1xf32>
    %447 = arith.divf %445, %446 : vector<16x1xf32>
    %448 = vector.broadcast %447 : vector<16x1xf32> to vector<16x128xf32>
    %449 = arith.subf %439, %448 : vector<16x128xf32>
    %450 = arith.mulf %449, %449 : vector<16x128xf32>
    %cst_160 = arith.constant dense<0.000000e+00> : vector<16xf32>
    %451 = vector.multi_reduction <add>, %450, %cst_160 [1] : vector<16x128xf32> to vector<16xf32>
    %452 = vector.shape_cast %451 : vector<16xf32> to vector<16x1xf32>
    %cst_161 = arith.constant 1.280000e+02 : f32
    %453 = vector.broadcast %cst_161 : f32 to vector<16x1xf32>
    %454 = arith.divf %452, %453 : vector<16x1xf32>
    %cst_162 = arith.constant 9.99999974E-6 : f32
    %455 = vector.broadcast %cst_162 : f32 to vector<16x1xf32>
    %456 = arith.addf %454, %455 : vector<16x1xf32>
    %457 = math.rsqrt %456 : vector<16x1xf32>
    %458 = vector.broadcast %457 : vector<16x1xf32> to vector<16x128xf32>
    %459 = arith.mulf %449, %458 : vector<16x128xf32>
    %460 = vector.shape_cast %441 : vector<128xf32> to vector<1x128xf32>
    %461 = vector.broadcast %460 : vector<1x128xf32> to vector<16x128xf32>
    %462 = arith.mulf %459, %461 : vector<16x128xf32>
    %463 = vector.shape_cast %443 : vector<128xf32> to vector<1x128xf32>
    %464 = vector.broadcast %463 : vector<1x128xf32> to vector<16x128xf32>
    %465 = arith.addf %462, %464 : vector<16x128xf32>
    %c3_163 = arith.constant 3 : index
    %c0_164 = arith.constant 0 : index
    %c0_165 = arith.constant 0 : index
    %466 = vector.load %arg4[%c3_163, %c0_164, %c0_165] : memref<4x128x384xbf16, #tpu.memory_space<vmem>>, vector<1x128x384xbf16>
    %467 = vector.shape_cast %466 : vector<1x128x384xbf16> to vector<128x384xbf16>
    %468 = arith.truncf %465 : vector<16x128xf32> to vector<16x128xbf16>
    %cst_166 = arith.constant dense<0.000000e+00> : vector<16x384xf32>
    %469 = tpu.matmul %468, %467, %cst_166 {dimension_numbers = #tpu.dot_dimension_numbers<[1], [0], [0], [1], [0, 0, 1, 1], [], []>} : vector<16x128xbf16>, vector<128x384xbf16>, vector<16x384xf32> -> vector<16x384xf32>
    %c3_167 = arith.constant 3 : index
    %c0_168 = arith.constant 0 : index
    %470 = vector.load %arg5[%c3_167, %c0_168] : memref<4x384xf32, #tpu.memory_space<vmem>>, vector<1x384xf32>
    %471 = vector.shape_cast %470 : vector<1x384xf32> to vector<384xf32>
    %472 = vector.shape_cast %471 : vector<384xf32> to vector<1x384xf32>
    %473 = vector.broadcast %472 : vector<1x384xf32> to vector<16x384xf32>
    %474 = arith.addf %469, %473 : vector<16x384xf32>
    %475 = vector.shape_cast %474 : vector<16x384xf32> to vector<2x8x384xf32>
    %476 = vector.extract_strided_slice %475 {offsets = [0, 0, 0], sizes = [2, 4, 128], strides = [1, 1, 1]} : vector<2x8x384xf32> to vector<2x4x128xf32>
    %477 = vector.extract_strided_slice %475 {offsets = [0, 0, 128], sizes = [2, 8, 128], strides = [1, 1, 1]} : vector<2x8x384xf32> to vector<2x8x128xf32>
    %478 = vector.extract_strided_slice %475 {offsets = [0, 0, 256], sizes = [2, 8, 128], strides = [1, 1, 1]} : vector<2x8x384xf32> to vector<2x8x128xf32>
    %479 = vector.extract_strided_slice %476 {offsets = [0, 0, 0], sizes = [2, 4, 64], strides = [1, 1, 1]} : vector<2x4x128xf32> to vector<2x4x64xf32>
    %480 = arith.truncf %479 : vector<2x4x64xf32> to vector<2x4x64xbf16>
    %481 = vector.extract_strided_slice %477 {offsets = [0, 0, 0], sizes = [2, 8, 64], strides = [1, 1, 1]} : vector<2x8x128xf32> to vector<2x8x64xf32>
    %482 = arith.truncf %481 : vector<2x8x64xf32> to vector<2x8x64xbf16>
    %483 = vector.extract_strided_slice %478 {offsets = [0, 0, 0], sizes = [2, 8, 64], strides = [1, 1, 1]} : vector<2x8x128xf32> to vector<2x8x64xf32>
    %484 = arith.truncf %483 : vector<2x8x64xf32> to vector<2x8x64xbf16>
    "tpu.trace_start"() <{level = 10 : i32, message = "bqd,bkd->bqk"}> : () -> ()
    %cst_169 = arith.constant dense<0.000000e+00> : vector<2x4x8xf32>
    %485 = tpu.matmul %480, %482, %cst_169 {dimension_numbers = #tpu.dot_dimension_numbers<[2], [2], [1], [1], [0, 0, 0, 1, 1, 1], [0], [0]>} : vector<2x4x64xbf16>, vector<2x8x64xbf16>, vector<2x4x8xf32> -> vector<2x4x8xf32>
    "tpu.trace_stop"() : () -> ()
    %cst_170 = arith.constant dense<0xFF800000> : vector<2x4xf32>
    %486 = vector.multi_reduction <maximumf>, %485, %cst_170 [2] : vector<2x4x8xf32> to vector<2x4xf32>
    %487 = vector.shape_cast %486 : vector<2x4xf32> to vector<2x4x1xf32>
    %488 = vector.broadcast %487 : vector<2x4x1xf32> to vector<2x4x8xf32>
    %489 = arith.subf %485, %488 : vector<2x4x8xf32>
    %490 = math.exp %489 : vector<2x4x8xf32>
    %cst_171 = arith.constant dense<0.000000e+00> : vector<2x4xf32>
    %491 = vector.multi_reduction <add>, %490, %cst_171 [2] : vector<2x4x8xf32> to vector<2x4xf32>
    %492 = vector.shape_cast %491 : vector<2x4xf32> to vector<2x4x1xf32>
    %493 = tpu.reciprocal %492 {approx = true} : vector<2x4x1xf32> -> vector<2x4x1xf32>
    %494 = vector.broadcast %493 : vector<2x4x1xf32> to vector<2x4x8xf32>
    %495 = arith.mulf %490, %494 : vector<2x4x8xf32>
    %496 = arith.truncf %495 : vector<2x4x8xf32> to vector<2x4x8xbf16>
    "tpu.trace_start"() <{level = 10 : i32, message = "bqk,bkd->bqd"}> : () -> ()
    %cst_172 = arith.constant dense<0.000000e+00> : vector<2x4x64xf32>
    %497 = tpu.matmul %496, %484, %cst_172 {dimension_numbers = #tpu.dot_dimension_numbers<[2], [1], [1], [2], [0, 0, 0, 1, 1, 2], [0], [0]>} : vector<2x4x8xbf16>, vector<2x8x64xbf16>, vector<2x4x64xf32> -> vector<2x4x64xf32>
    "tpu.trace_stop"() : () -> ()
    %498 = vector.extract_strided_slice %476 {offsets = [0, 0, 64], sizes = [2, 4, 64], strides = [1, 1, 1]} : vector<2x4x128xf32> to vector<2x4x64xf32>
    %499 = arith.truncf %498 : vector<2x4x64xf32> to vector<2x4x64xbf16>
    %500 = vector.extract_strided_slice %477 {offsets = [0, 0, 64], sizes = [2, 8, 64], strides = [1, 1, 1]} : vector<2x8x128xf32> to vector<2x8x64xf32>
    %501 = arith.truncf %500 : vector<2x8x64xf32> to vector<2x8x64xbf16>
    %502 = vector.extract_strided_slice %478 {offsets = [0, 0, 64], sizes = [2, 8, 64], strides = [1, 1, 1]} : vector<2x8x128xf32> to vector<2x8x64xf32>
    %503 = arith.truncf %502 : vector<2x8x64xf32> to vector<2x8x64xbf16>
    "tpu.trace_start"() <{level = 10 : i32, message = "bqd,bkd->bqk"}> : () -> ()
    %cst_173 = arith.constant dense<0.000000e+00> : vector<2x4x8xf32>
    %504 = tpu.matmul %499, %501, %cst_173 {dimension_numbers = #tpu.dot_dimension_numbers<[2], [2], [1], [1], [0, 0, 0, 1, 1, 1], [0], [0]>} : vector<2x4x64xbf16>, vector<2x8x64xbf16>, vector<2x4x8xf32> -> vector<2x4x8xf32>
    "tpu.trace_stop"() : () -> ()
    %cst_174 = arith.constant dense<0xFF800000> : vector<2x4xf32>
    %505 = vector.multi_reduction <maximumf>, %504, %cst_174 [2] : vector<2x4x8xf32> to vector<2x4xf32>
    %506 = vector.shape_cast %505 : vector<2x4xf32> to vector<2x4x1xf32>
    %507 = vector.broadcast %506 : vector<2x4x1xf32> to vector<2x4x8xf32>
    %508 = arith.subf %504, %507 : vector<2x4x8xf32>
    %509 = math.exp %508 : vector<2x4x8xf32>
    %cst_175 = arith.constant dense<0.000000e+00> : vector<2x4xf32>
    %510 = vector.multi_reduction <add>, %509, %cst_175 [2] : vector<2x4x8xf32> to vector<2x4xf32>
    %511 = vector.shape_cast %510 : vector<2x4xf32> to vector<2x4x1xf32>
    %512 = tpu.reciprocal %511 {approx = true} : vector<2x4x1xf32> -> vector<2x4x1xf32>
    %513 = vector.broadcast %512 : vector<2x4x1xf32> to vector<2x4x8xf32>
    %514 = arith.mulf %509, %513 : vector<2x4x8xf32>
    %515 = arith.truncf %514 : vector<2x4x8xf32> to vector<2x4x8xbf16>
    "tpu.trace_start"() <{level = 10 : i32, message = "bqk,bkd->bqd"}> : () -> ()
    %cst_176 = arith.constant dense<0.000000e+00> : vector<2x4x64xf32>
    %516 = tpu.matmul %515, %503, %cst_176 {dimension_numbers = #tpu.dot_dimension_numbers<[2], [1], [1], [2], [0, 0, 0, 1, 1, 2], [0], [0]>} : vector<2x4x8xbf16>, vector<2x8x64xbf16>, vector<2x4x64xf32> -> vector<2x4x64xf32>
    "tpu.trace_stop"() : () -> ()
    %517 = tpu.concatenate %497, %516 in 2 : vector<2x4x64xf32>, vector<2x4x64xf32> -> vector<2x4x128xf32>
    %518 = vector.shape_cast %517 : vector<2x4x128xf32> to vector<8x128xf32>
    %c3_177 = arith.constant 3 : index
    %c0_178 = arith.constant 0 : index
    %c0_179 = arith.constant 0 : index
    %519 = vector.load %arg6[%c3_177, %c0_178, %c0_179] : memref<4x128x128xbf16, #tpu.memory_space<vmem>>, vector<1x128x128xbf16>
    %520 = vector.shape_cast %519 : vector<1x128x128xbf16> to vector<128x128xbf16>
    %521 = arith.truncf %518 : vector<8x128xf32> to vector<8x128xbf16>
    %cst_180 = arith.constant dense<0.000000e+00> : vector<8x128xf32>
    %522 = tpu.matmul %521, %520, %cst_180 {dimension_numbers = #tpu.dot_dimension_numbers<[1], [0], [0], [1], [0, 0, 1, 1], [], []>} : vector<8x128xbf16>, vector<128x128xbf16>, vector<8x128xf32> -> vector<8x128xf32>
    %c3_181 = arith.constant 3 : index
    %c0_182 = arith.constant 0 : index
    %523 = vector.load %arg7[%c3_181, %c0_182] : memref<4x128xf32, #tpu.memory_space<vmem>>, vector<1x128xf32>
    %524 = vector.shape_cast %523 : vector<1x128xf32> to vector<128xf32>
    %525 = vector.shape_cast %524 : vector<128xf32> to vector<1x128xf32>
    %526 = vector.broadcast %525 : vector<1x128xf32> to vector<8x128xf32>
    %527 = arith.addf %522, %526 : vector<8x128xf32>
    %528 = vector.extract_strided_slice %438 {offsets = [0, 0, 0], sizes = [2, 4, 128], strides = [1, 1, 1]} : vector<2x8x128xf32> to vector<2x4x128xf32>
    %529 = vector.shape_cast %527 : vector<8x128xf32> to vector<2x4x128xf32>
    %530 = arith.addf %528, %529 : vector<2x4x128xf32>
    %531 = vector.shape_cast %530 : vector<2x4x128xf32> to vector<8x128xf32>
    %c3_183 = arith.constant 3 : index
    %c0_184 = arith.constant 0 : index
    %532 = vector.load %arg8[%c3_183, %c0_184] : memref<4x128xf32, #tpu.memory_space<vmem>>, vector<1x128xf32>
    %533 = vector.shape_cast %532 : vector<1x128xf32> to vector<128xf32>
    %c3_185 = arith.constant 3 : index
    %c0_186 = arith.constant 0 : index
    %534 = vector.load %arg9[%c3_185, %c0_186] : memref<4x128xf32, #tpu.memory_space<vmem>>, vector<1x128xf32>
    %535 = vector.shape_cast %534 : vector<1x128xf32> to vector<128xf32>
    %cst_187 = arith.constant dense<0.000000e+00> : vector<8xf32>
    %536 = vector.multi_reduction <add>, %531, %cst_187 [1] : vector<8x128xf32> to vector<8xf32>
    %537 = vector.shape_cast %536 : vector<8xf32> to vector<8x1xf32>
    %cst_188 = arith.constant 1.280000e+02 : f32
    %538 = vector.broadcast %cst_188 : f32 to vector<8x1xf32>
    %539 = arith.divf %537, %538 : vector<8x1xf32>
    %540 = vector.broadcast %539 : vector<8x1xf32> to vector<8x128xf32>
    %541 = arith.subf %531, %540 : vector<8x128xf32>
    %542 = arith.mulf %541, %541 : vector<8x128xf32>
    %cst_189 = arith.constant dense<0.000000e+00> : vector<8xf32>
    %543 = vector.multi_reduction <add>, %542, %cst_189 [1] : vector<8x128xf32> to vector<8xf32>
    %544 = vector.shape_cast %543 : vector<8xf32> to vector<8x1xf32>
    %cst_190 = arith.constant 1.280000e+02 : f32
    %545 = vector.broadcast %cst_190 : f32 to vector<8x1xf32>
    %546 = arith.divf %544, %545 : vector<8x1xf32>
    %cst_191 = arith.constant 9.99999974E-6 : f32
    %547 = vector.broadcast %cst_191 : f32 to vector<8x1xf32>
    %548 = arith.addf %546, %547 : vector<8x1xf32>
    %549 = math.rsqrt %548 : vector<8x1xf32>
    %550 = vector.broadcast %549 : vector<8x1xf32> to vector<8x128xf32>
    %551 = arith.mulf %541, %550 : vector<8x128xf32>
    %552 = vector.shape_cast %533 : vector<128xf32> to vector<1x128xf32>
    %553 = vector.broadcast %552 : vector<1x128xf32> to vector<8x128xf32>
    %554 = arith.mulf %551, %553 : vector<8x128xf32>
    %555 = vector.shape_cast %535 : vector<128xf32> to vector<1x128xf32>
    %556 = vector.broadcast %555 : vector<1x128xf32> to vector<8x128xf32>
    %557 = arith.addf %554, %556 : vector<8x128xf32>
    %c3_192 = arith.constant 3 : index
    %c0_193 = arith.constant 0 : index
    %c0_194 = arith.constant 0 : index
    %558 = vector.load %arg10[%c3_192, %c0_193, %c0_194] : memref<4x128x512xbf16, #tpu.memory_space<vmem>>, vector<1x128x512xbf16>
    %559 = vector.shape_cast %558 : vector<1x128x512xbf16> to vector<128x512xbf16>
    %560 = arith.truncf %557 : vector<8x128xf32> to vector<8x128xbf16>
    %cst_195 = arith.constant dense<0.000000e+00> : vector<8x512xf32>
    %561 = tpu.matmul %560, %559, %cst_195 {dimension_numbers = #tpu.dot_dimension_numbers<[1], [0], [0], [1], [0, 0, 1, 1], [], []>} : vector<8x128xbf16>, vector<128x512xbf16>, vector<8x512xf32> -> vector<8x512xf32>
    %c3_196 = arith.constant 3 : index
    %c0_197 = arith.constant 0 : index
    %562 = vector.load %arg11[%c3_196, %c0_197] : memref<4x512xf32, #tpu.memory_space<vmem>>, vector<1x512xf32>
    %563 = vector.shape_cast %562 : vector<1x512xf32> to vector<512xf32>
    %564 = vector.shape_cast %563 : vector<512xf32> to vector<1x512xf32>
    %565 = vector.broadcast %564 : vector<1x512xf32> to vector<8x512xf32>
    %566 = arith.addf %561, %565 : vector<8x512xf32>
    %cst_198 = arith.constant 1.702000e+00 : f32
    %567 = vector.broadcast %cst_198 : f32 to vector<8x512xf32>
    %568 = arith.mulf %567, %566 : vector<8x512xf32>
    %569 = arith.negf %568 : vector<8x512xf32>
    %570 = math.exp %569 : vector<8x512xf32>
    %cst_199 = arith.constant 1.000000e+00 : f32
    %571 = vector.broadcast %cst_199 : f32 to vector<8x512xf32>
    %572 = arith.addf %571, %570 : vector<8x512xf32>
    %573 = arith.divf %571, %572 : vector<8x512xf32>
    %574 = arith.mulf %566, %573 : vector<8x512xf32>
    %c3_200 = arith.constant 3 : index
    %c0_201 = arith.constant 0 : index
    %c0_202 = arith.constant 0 : index
    %575 = vector.load %arg12[%c3_200, %c0_201, %c0_202] : memref<4x512x128xbf16, #tpu.memory_space<vmem>>, vector<1x512x128xbf16>
    %576 = vector.shape_cast %575 : vector<1x512x128xbf16> to vector<512x128xbf16>
    %577 = arith.truncf %574 : vector<8x512xf32> to vector<8x512xbf16>
    %cst_203 = arith.constant dense<0.000000e+00> : vector<8x128xf32>
    %578 = tpu.matmul %577, %576, %cst_203 {dimension_numbers = #tpu.dot_dimension_numbers<[1], [0], [0], [1], [0, 0, 1, 1], [], []>} : vector<8x512xbf16>, vector<512x128xbf16>, vector<8x128xf32> -> vector<8x128xf32>
    %c3_204 = arith.constant 3 : index
    %c0_205 = arith.constant 0 : index
    %579 = vector.load %arg13[%c3_204, %c0_205] : memref<4x128xf32, #tpu.memory_space<vmem>>, vector<1x128xf32>
    %580 = vector.shape_cast %579 : vector<1x128xf32> to vector<128xf32>
    %581 = vector.shape_cast %580 : vector<128xf32> to vector<1x128xf32>
    %582 = vector.broadcast %581 : vector<1x128xf32> to vector<8x128xf32>
    %583 = arith.addf %578, %582 : vector<8x128xf32>
    %584 = vector.shape_cast %583 : vector<8x128xf32> to vector<2x4x128xf32>
    %585 = arith.addf %530, %584 : vector<2x4x128xf32>
    %586 = vector.shape_cast %585 : vector<2x4x128xf32> to vector<2x1x512xf32>
    %c0_206 = arith.constant 0 : index
    %c0_207 = arith.constant 0 : index
    %c0_208 = arith.constant 0 : index
    %587 = vector.load %arg14[%c0_206, %c0_207, %c0_208] : memref<2x1x512xf32, #tpu.memory_space<vmem>>, vector<2x1x512xf32>
    tpu.vector_store %arg14[%c0_206, %c0_207, %c0_208], %586 {strides = array<i32>} : memref<2x1x512xf32, #tpu.memory_space<vmem>>, vector<2x1x512xf32>,
    return
  }
  func.func @transform_0(%arg0: i32) -> (i32, i32, i32) {
    %c0_i32 = arith.constant 0 : i32
    %c0_i32_0 = arith.constant 0 : i32
    %c0_i32_1 = arith.constant 0 : i32
    return %arg0, %c0_i32, %c0_i32_0 : i32, i32, i32
  }
  func.func @transform_1(%arg0: i32) -> (i32, i32) {
    %c0_i32 = arith.constant 0 : i32
    %c0_i32_0 = arith.constant 0 : i32
    %c0_i32_1 = arith.constant 0 : i32
    return %c0_i32, %c0_i32_0 : i32, i32
  }
  func.func @transform_2(%arg0: i32) -> (i32, i32) {
    %c0_i32 = arith.constant 0 : i32
    %c0_i32_0 = arith.constant 0 : i32
    %c0_i32_1 = arith.constant 0 : i32
    return %c0_i32, %c0_i32_0 : i32, i32
  }
  func.func @transform_3(%arg0: i32) -> (i32, i32, i32) {
    %c0_i32 = arith.constant 0 : i32
    %c0_i32_0 = arith.constant 0 : i32
    %c0_i32_1 = arith.constant 0 : i32
    %c0_i32_2 = arith.constant 0 : i32
    return %c0_i32, %c0_i32_0, %c0_i32_1 : i32, i32, i32
  }
  func.func @transform_4(%arg0: i32) -> (i32, i32) {
    %c0_i32 = arith.constant 0 : i32
    %c0_i32_0 = arith.constant 0 : i32
    %c0_i32_1 = arith.constant 0 : i32
    return %c0_i32, %c0_i32_0 : i32, i32
  }
  func.func @transform_5(%arg0: i32) -> (i32, i32, i32) {
    %c0_i32 = arith.constant 0 : i32
    %c0_i32_0 = arith.constant 0 : i32
    %c0_i32_1 = arith.constant 0 : i32
    %c0_i32_2 = arith.constant 0 : i32
    return %c0_i32, %c0_i32_0, %c0_i32_1 : i32, i32, i32
  }
  func.func @transform_6(%arg0: i32) -> (i32, i32) {
    %c0_i32 = arith.constant 0 : i32
    %c0_i32_0 = arith.constant 0 : i32
    %c0_i32_1 = arith.constant 0 : i32
    return %c0_i32, %c0_i32_0 : i32, i32
  }
  func.func @transform_7(%arg0: i32) -> (i32, i32) {
    %c0_i32 = arith.constant 0 : i32
    %c0_i32_0 = arith.constant 0 : i32
    %c0_i32_1 = arith.constant 0 : i32
    return %c0_i32, %c0_i32_0 : i32, i32
  }
  func.func @transform_8(%arg0: i32) -> (i32, i32) {
    %c0_i32 = arith.constant 0 : i32
    %c0_i32_0 = arith.constant 0 : i32
    %c0_i32_1 = arith.constant 0 : i32
    return %c0_i32, %c0_i32_0 : i32, i32
  }
  func.func @transform_9(%arg0: i32) -> (i32, i32, i32) {
    %c0_i32 = arith.constant 0 : i32
    %c0_i32_0 = arith.constant 0 : i32
    %c0_i32_1 = arith.constant 0 : i32
    %c0_i32_2 = arith.constant 0 : i32
    return %c0_i32, %c0_i32_0, %c0_i32_1 : i32, i32, i32
  }
  func.func @transform_10(%arg0: i32) -> (i32, i32) {
    %c0_i32 = arith.constant 0 : i32
    %c0_i32_0 = arith.constant 0 : i32
    %c0_i32_1 = arith.constant 0 : i32
    return %c0_i32, %c0_i32_0 : i32, i32
  }
  func.func @transform_11(%arg0: i32) -> (i32, i32, i32) {
    %c0_i32 = arith.constant 0 : i32
    %c0_i32_0 = arith.constant 0 : i32
    %c0_i32_1 = arith.constant 0 : i32
    %c0_i32_2 = arith.constant 0 : i32
    return %c0_i32, %c0_i32_0, %c0_i32_1 : i32, i32, i32
  }
  func.func @transform_12(%arg0: i32) -> (i32, i32) {
    %c0_i32 = arith.constant 0 : i32
    %c0_i32_0 = arith.constant 0 : i32
    %c0_i32_1 = arith.constant 0 : i32
    return %c0_i32, %c0_i32_0 : i32, i32
  }
  func.func @transform_13(%arg0: i32) -> (i32, i32, i32) {
    %c0_i32 = arith.constant 0 : i32
    %c0_i32_0 = arith.constant 0 : i32
    %c0_i32_1 = arith.constant 0 : i32
    return %arg0, %c0_i32, %c0_i32_0 : i32, i32, i32
  }
}

module attributes {stable_mosaic.version = 11 : i64} {
  func.func @aggregator_kernel(%arg0: i32, %arg1: memref<2x8x128xf32, #tpu.memory_space<vmem>>, %arg2: memref<4x128xf32, #tpu.memory_space<vmem>>, %arg3: memref<4x128xf32, #tpu.memory_space<vmem>>, %arg4: memref<4x128x384xbf16, #tpu.memory_space<vmem>>, %arg5: memref<4x384xf32, #tpu.memory_space<vmem>>, %arg6: memref<4x128x128xbf16, #tpu.memory_space<vmem>>, %arg7: memref<4x128xf32, #tpu.memory_space<vmem>>, %arg8: memref<4x128xf32, #tpu.memory_space<vmem>>, %arg9: memref<4x128xf32, #tpu.memory_space<vmem>>, %arg10: memref<4x128x512xbf16, #tpu.memory_space<vmem>>, %arg11: memref<4x512xf32, #tpu.memory_space<vmem>>, %arg12: memref<4x512x128xbf16, #tpu.memory_space<vmem>>, %arg13: memref<4x128xf32, #tpu.memory_space<vmem>>, %arg14: memref<2x1x512xf32, #tpu.memory_space<vmem>>) attributes {dimension_semantics = [#tpu.dimension_semantics<parallel>], iteration_bounds = array<i64: 1>, scalar_prefetch = 0 : i64, scratch_operands = 0 : i64, tpu.core_type = #tpu.core_type<tc>, window_params = [{transform_indices = @transform_0, window_bounds = array<i64: 2, 8, 128>}, {pipeline_mode = #tpu.pipeline_mode<synchronous>, transform_indices = @transform_1, window_bounds = array<i64: 4, 128>}, {pipeline_mode = #tpu.pipeline_mode<synchronous>, transform_indices = @transform_2, window_bounds = array<i64: 4, 128>}, {pipeline_mode = #tpu.pipeline_mode<synchronous>, transform_indices = @transform_3, window_bounds = array<i64: 4, 128, 384>}, {pipeline_mode = #tpu.pipeline_mode<synchronous>, transform_indices = @transform_4, window_bounds = array<i64: 4, 384>}, {pipeline_mode = #tpu.pipeline_mode<synchronous>, transform_indices = @transform_5, window_bounds = array<i64: 4, 128, 128>}, {pipeline_mode = #tpu.pipeline_mode<synchronous>, transform_indices = @transform_6, window_bounds = array<i64: 4, 128>}, {pipeline_mode = #tpu.pipeline_mode<synchronous>, transform_indices = @transform_7, window_bounds = array<i64: 4, 128>}, {pipeline_mode = #tpu.pipeline_mode<synchronous>, transform_indices = @transform_8, window_bounds = array<i64: 4, 128>}, {pipeline_mode = #tpu.pipeline_mode<synchronous>, transform_indices = @transform_9, window_bounds = array<i64: 4, 128, 512>}, {pipeline_mode = #tpu.pipeline_mode<synchronous>, transform_indices = @transform_10, window_bounds = array<i64: 4, 512>}, {pipeline_mode = #tpu.pipeline_mode<synchronous>, transform_indices = @transform_11, window_bounds = array<i64: 4, 512, 128>}, {pipeline_mode = #tpu.pipeline_mode<synchronous>, transform_indices = @transform_12, window_bounds = array<i64: 4, 128>}, {transform_indices = @transform_13, window_bounds = array<i64: 2, 1, 512>}]} {
    %c0 = arith.constant 0 : index
    %c0_0 = arith.constant 0 : index
    %c0_1 = arith.constant 0 : index
    %0 = vector.load %arg1[%c0, %c0_0, %c0_1] : memref<2x8x128xf32, #tpu.memory_space<vmem>>, vector<2x8x128xf32>
    %1 = vector.shape_cast %0 : vector<2x8x128xf32> to vector<16x128xf32>
    %c0_2 = arith.constant 0 : index
    %c0_3 = arith.constant 0 : index
    %2 = vector.load %arg2[%c0_2, %c0_3] : memref<4x128xf32, #tpu.memory_space<vmem>>, vector<1x128xf32>
    %3 = vector.shape_cast %2 : vector<1x128xf32> to vector<128xf32>
    %c0_4 = arith.constant 0 : index
    %c0_5 = arith.constant 0 : index
    %4 = vector.load %arg3[%c0_4, %c0_5] : memref<4x128xf32, #tpu.memory_space<vmem>>, vector<1x128xf32>
    %5 = vector.shape_cast %4 : vector<1x128xf32> to vector<128xf32>
    %cst = arith.constant dense<0.000000e+00> : vector<16xf32>
    %6 = vector.multi_reduction <add>, %1, %cst [1] : vector<16x128xf32> to vector<16xf32>
    %7 = vector.shape_cast %6 : vector<16xf32> to vector<16x1xf32>
    %cst_6 = arith.constant 1.280000e+02 : f32
    %8 = vector.broadcast %cst_6 : f32 to vector<16x1xf32>
    %9 = arith.divf %7, %8 : vector<16x1xf32>
    %10 = vector.broadcast %9 : vector<16x1xf32> to vector<16x128xf32>
    %11 = arith.subf %1, %10 : vector<16x128xf32>
    %12 = arith.mulf %11, %11 : vector<16x128xf32>
    %cst_7 = arith.constant dense<0.000000e+00> : vector<16xf32>
    %13 = vector.multi_reduction <add>, %12, %cst_7 [1] : vector<16x128xf32> to vector<16xf32>
    %14 = vector.shape_cast %13 : vector<16xf32> to vector<16x1xf32>
    %cst_8 = arith.constant 1.280000e+02 : f32
    %15 = vector.broadcast %cst_8 : f32 to vector<16x1xf32>
    %16 = arith.divf %14, %15 : vector<16x1xf32>
    %cst_9 = arith.constant 9.99999974E-6 : f32
    %17 = vector.broadcast %cst_9 : f32 to vector<16x1xf32>
    %18 = arith.addf %16, %17 : vector<16x1xf32>
    %19 = math.rsqrt %18 : vector<16x1xf32>
    %20 = vector.broadcast %19 : vector<16x1xf32> to vector<16x128xf32>
    %21 = arith.mulf %11, %20 : vector<16x128xf32>
    %22 = vector.shape_cast %3 : vector<128xf32> to vector<1x128xf32>
    %23 = vector.broadcast %22 : vector<1x128xf32> to vector<16x128xf32>
    %24 = arith.mulf %21, %23 : vector<16x128xf32>
    %25 = vector.shape_cast %5 : vector<128xf32> to vector<1x128xf32>
    %26 = vector.broadcast %25 : vector<1x128xf32> to vector<16x128xf32>
    %27 = arith.addf %24, %26 : vector<16x128xf32>
    %c0_10 = arith.constant 0 : index
    %c0_11 = arith.constant 0 : index
    %c0_12 = arith.constant 0 : index
    %28 = vector.load %arg4[%c0_10, %c0_11, %c0_12] : memref<4x128x384xbf16, #tpu.memory_space<vmem>>, vector<1x128x384xbf16>
    %29 = vector.shape_cast %28 : vector<1x128x384xbf16> to vector<128x384xbf16>
    %30 = arith.truncf %27 : vector<16x128xf32> to vector<16x128xbf16>
    %cst_13 = arith.constant dense<0.000000e+00> : vector<16x384xf32>
    %31 = tpu.matmul %30, %29, %cst_13 {dimension_numbers = #tpu.dot_dimension_numbers<[1], [0], [0], [1], [0, 0, 1, 1], [], []>} : vector<16x128xbf16>, vector<128x384xbf16>, vector<16x384xf32> -> vector<16x384xf32>
    %c0_14 = arith.constant 0 : index
    %c0_15 = arith.constant 0 : index
    %32 = vector.load %arg5[%c0_14, %c0_15] : memref<4x384xf32, #tpu.memory_space<vmem>>, vector<1x384xf32>
    %33 = vector.shape_cast %32 : vector<1x384xf32> to vector<384xf32>
    %34 = vector.shape_cast %33 : vector<384xf32> to vector<1x384xf32>
    %35 = vector.broadcast %34 : vector<1x384xf32> to vector<16x384xf32>
    %36 = arith.addf %31, %35 : vector<16x384xf32>
    %37 = vector.shape_cast %36 : vector<16x384xf32> to vector<2x8x384xf32>
    %38 = vector.extract_strided_slice %37 {offsets = [0, 0, 0], sizes = [2, 8, 128], strides = [1, 1, 1]} : vector<2x8x384xf32> to vector<2x8x128xf32>
    %39 = vector.extract_strided_slice %37 {offsets = [0, 0, 128], sizes = [2, 8, 128], strides = [1, 1, 1]} : vector<2x8x384xf32> to vector<2x8x128xf32>
    %40 = vector.extract_strided_slice %37 {offsets = [0, 0, 256], sizes = [2, 8, 128], strides = [1, 1, 1]} : vector<2x8x384xf32> to vector<2x8x128xf32>
    %41 = vector.extract_strided_slice %38 {offsets = [0, 0, 0], sizes = [2, 8, 64], strides = [1, 1, 1]} : vector<2x8x128xf32> to vector<2x8x64xf32>
    %42 = arith.truncf %41 : vector<2x8x64xf32> to vector<2x8x64xbf16>
    %43 = vector.extract_strided_slice %39 {offsets = [0, 0, 0], sizes = [2, 8, 64], strides = [1, 1, 1]} : vector<2x8x128xf32> to vector<2x8x64xf32>
    %44 = arith.truncf %43 : vector<2x8x64xf32> to vector<2x8x64xbf16>
    %45 = vector.extract_strided_slice %40 {offsets = [0, 0, 0], sizes = [2, 8, 64], strides = [1, 1, 1]} : vector<2x8x128xf32> to vector<2x8x64xf32>
    %46 = arith.truncf %45 : vector<2x8x64xf32> to vector<2x8x64xbf16>
    "tpu.trace_start"() <{level = 10 : i32, message = "bqd,bkd->bqk"}> : () -> ()
    %cst_16 = arith.constant dense<0.000000e+00> : vector<2x8x8xf32>
    %47 = tpu.matmul %42, %44, %cst_16 {dimension_numbers = #tpu.dot_dimension_numbers<[2], [2], [1], [1], [0, 0, 0, 1, 1, 1], [0], [0]>} : vector<2x8x64xbf16>, vector<2x8x64xbf16>, vector<2x8x8xf32> -> vector<2x8x8xf32>
    "tpu.trace_stop"() : () -> ()
    %cst_17 = arith.constant dense<0xFF800000> : vector<2x8xf32>
    %48 = vector.multi_reduction <maximumf>, %47, %cst_17 [2] : vector<2x8x8xf32> to vector<2x8xf32>
    %49 = vector.shape_cast %48 : vector<2x8xf32> to vector<2x8x1xf32>
    %50 = vector.broadcast %49 : vector<2x8x1xf32> to vector<2x8x8xf32>
    %51 = arith.subf %47, %50 : vector<2x8x8xf32>
    %52 = math.exp %51 : vector<2x8x8xf32>
    %cst_18 = arith.constant dense<0.000000e+00> : vector<2x8xf32>
    %53 = vector.multi_reduction <add>, %52, %cst_18 [2] : vector<2x8x8xf32> to vector<2x8xf32>
    %54 = vector.shape_cast %53 : vector<2x8xf32> to vector<2x8x1xf32>
    %55 = tpu.reciprocal %54 {approx = true} : vector<2x8x1xf32> -> vector<2x8x1xf32>
    %56 = vector.broadcast %55 : vector<2x8x1xf32> to vector<2x8x8xf32>
    %57 = arith.mulf %52, %56 : vector<2x8x8xf32>
    %58 = arith.truncf %57 : vector<2x8x8xf32> to vector<2x8x8xbf16>
    "tpu.trace_start"() <{level = 10 : i32, message = "bqk,bkd->bqd"}> : () -> ()
    %cst_19 = arith.constant dense<0.000000e+00> : vector<2x8x64xf32>
    %59 = tpu.matmul %58, %46, %cst_19 {dimension_numbers = #tpu.dot_dimension_numbers<[2], [1], [1], [2], [0, 0, 0, 1, 1, 2], [0], [0]>} : vector<2x8x8xbf16>, vector<2x8x64xbf16>, vector<2x8x64xf32> -> vector<2x8x64xf32>
    "tpu.trace_stop"() : () -> ()
    %60 = vector.extract_strided_slice %38 {offsets = [0, 0, 64], sizes = [2, 8, 64], strides = [1, 1, 1]} : vector<2x8x128xf32> to vector<2x8x64xf32>
    %61 = arith.truncf %60 : vector<2x8x64xf32> to vector<2x8x64xbf16>
    %62 = vector.extract_strided_slice %39 {offsets = [0, 0, 64], sizes = [2, 8, 64], strides = [1, 1, 1]} : vector<2x8x128xf32> to vector<2x8x64xf32>
    %63 = arith.truncf %62 : vector<2x8x64xf32> to vector<2x8x64xbf16>
    %64 = vector.extract_strided_slice %40 {offsets = [0, 0, 64], sizes = [2, 8, 64], strides = [1, 1, 1]} : vector<2x8x128xf32> to vector<2x8x64xf32>
    %65 = arith.truncf %64 : vector<2x8x64xf32> to vector<2x8x64xbf16>
    "tpu.trace_start"() <{level = 10 : i32, message = "bqd,bkd->bqk"}> : () -> ()
    %cst_20 = arith.constant dense<0.000000e+00> : vector<2x8x8xf32>
    %66 = tpu.matmul %61, %63, %cst_20 {dimension_numbers = #tpu.dot_dimension_numbers<[2], [2], [1], [1], [0, 0, 0, 1, 1, 1], [0], [0]>} : vector<2x8x64xbf16>, vector<2x8x64xbf16>, vector<2x8x8xf32> -> vector<2x8x8xf32>
    "tpu.trace_stop"() : () -> ()
    %cst_21 = arith.constant dense<0xFF800000> : vector<2x8xf32>
    %67 = vector.multi_reduction <maximumf>, %66, %cst_21 [2] : vector<2x8x8xf32> to vector<2x8xf32>
    %68 = vector.shape_cast %67 : vector<2x8xf32> to vector<2x8x1xf32>
    %69 = vector.broadcast %68 : vector<2x8x1xf32> to vector<2x8x8xf32>
    %70 = arith.subf %66, %69 : vector<2x8x8xf32>
    %71 = math.exp %70 : vector<2x8x8xf32>
    %cst_22 = arith.constant dense<0.000000e+00> : vector<2x8xf32>
    %72 = vector.multi_reduction <add>, %71, %cst_22 [2] : vector<2x8x8xf32> to vector<2x8xf32>
    %73 = vector.shape_cast %72 : vector<2x8xf32> to vector<2x8x1xf32>
    %74 = tpu.reciprocal %73 {approx = true} : vector<2x8x1xf32> -> vector<2x8x1xf32>
    %75 = vector.broadcast %74 : vector<2x8x1xf32> to vector<2x8x8xf32>
    %76 = arith.mulf %71, %75 : vector<2x8x8xf32>
    %77 = arith.truncf %76 : vector<2x8x8xf32> to vector<2x8x8xbf16>
    "tpu.trace_start"() <{level = 10 : i32, message = "bqk,bkd->bqd"}> : () -> ()
    %cst_23 = arith.constant dense<0.000000e+00> : vector<2x8x64xf32>
    %78 = tpu.matmul %77, %65, %cst_23 {dimension_numbers = #tpu.dot_dimension_numbers<[2], [1], [1], [2], [0, 0, 0, 1, 1, 2], [0], [0]>} : vector<2x8x8xbf16>, vector<2x8x64xbf16>, vector<2x8x64xf32> -> vector<2x8x64xf32>
    "tpu.trace_stop"() : () -> ()
    %79 = tpu.concatenate %59, %78 in 2 : vector<2x8x64xf32>, vector<2x8x64xf32> -> vector<2x8x128xf32>
    %80 = vector.shape_cast %79 : vector<2x8x128xf32> to vector<16x128xf32>
    %c0_24 = arith.constant 0 : index
    %c0_25 = arith.constant 0 : index
    %c0_26 = arith.constant 0 : index
    %81 = vector.load %arg6[%c0_24, %c0_25, %c0_26] : memref<4x128x128xbf16, #tpu.memory_space<vmem>>, vector<1x128x128xbf16>
    %82 = vector.shape_cast %81 : vector<1x128x128xbf16> to vector<128x128xbf16>
    %83 = arith.truncf %80 : vector<16x128xf32> to vector<16x128xbf16>
    %cst_27 = arith.constant dense<0.000000e+00> : vector<16x128xf32>
    %84 = tpu.matmul %83, %82, %cst_27 {dimension_numbers = #tpu.dot_dimension_numbers<[1], [0], [0], [1], [0, 0, 1, 1], [], []>} : vector<16x128xbf16>, vector<128x128xbf16>, vector<16x128xf32> -> vector<16x128xf32>
    %c0_28 = arith.constant 0 : index
    %c0_29 = arith.constant 0 : index
    %85 = vector.load %arg7[%c0_28, %c0_29] : memref<4x128xf32, #tpu.memory_space<vmem>>, vector<1x128xf32>
    %86 = vector.shape_cast %85 : vector<1x128xf32> to vector<128xf32>
    %87 = vector.shape_cast %86 : vector<128xf32> to vector<1x128xf32>
    %88 = vector.broadcast %87 : vector<1x128xf32> to vector<16x128xf32>
    %89 = arith.addf %84, %88 : vector<16x128xf32>
    %90 = vector.shape_cast %89 : vector<16x128xf32> to vector<2x8x128xf32>
    %91 = arith.addf %0, %90 : vector<2x8x128xf32>
    %92 = vector.shape_cast %91 : vector<2x8x128xf32> to vector<16x128xf32>
    %c0_30 = arith.constant 0 : index
    %c0_31 = arith.constant 0 : index
    %93 = vector.load %arg8[%c0_30, %c0_31] : memref<4x128xf32, #tpu.memory_space<vmem>>, vector<1x128xf32>
    %94 = vector.shape_cast %93 : vector<1x128xf32> to vector<128xf32>
    %c0_32 = arith.constant 0 : index
    %c0_33 = arith.constant 0 : index
    %95 = vector.load %arg9[%c0_32, %c0_33] : memref<4x128xf32, #tpu.memory_space<vmem>>, vector<1x128xf32>
    %96 = vector.shape_cast %95 : vector<1x128xf32> to vector<128xf32>
    %cst_34 = arith.constant dense<0.000000e+00> : vector<16xf32>
    %97 = vector.multi_reduction <add>, %92, %cst_34 [1] : vector<16x128xf32> to vector<16xf32>
    %98 = vector.shape_cast %97 : vector<16xf32> to vector<16x1xf32>
    %cst_35 = arith.constant 1.280000e+02 : f32
    %99 = vector.broadcast %cst_35 : f32 to vector<16x1xf32>
    %100 = arith.divf %98, %99 : vector<16x1xf32>
    %101 = vector.broadcast %100 : vector<16x1xf32> to vector<16x128xf32>
    %102 = arith.subf %92, %101 : vector<16x128xf32>
    %103 = arith.mulf %102, %102 : vector<16x128xf32>
    %cst_36 = arith.constant dense<0.000000e+00> : vector<16xf32>
    %104 = vector.multi_reduction <add>, %103, %cst_36 [1] : vector<16x128xf32> to vector<16xf32>
    %105 = vector.shape_cast %104 : vector<16xf32> to vector<16x1xf32>
    %cst_37 = arith.constant 1.280000e+02 : f32
    %106 = vector.broadcast %cst_37 : f32 to vector<16x1xf32>
    %107 = arith.divf %105, %106 : vector<16x1xf32>
    %cst_38 = arith.constant 9.99999974E-6 : f32
    %108 = vector.broadcast %cst_38 : f32 to vector<16x1xf32>
    %109 = arith.addf %107, %108 : vector<16x1xf32>
    %110 = math.rsqrt %109 : vector<16x1xf32>
    %111 = vector.broadcast %110 : vector<16x1xf32> to vector<16x128xf32>
    %112 = arith.mulf %102, %111 : vector<16x128xf32>
    %113 = vector.shape_cast %94 : vector<128xf32> to vector<1x128xf32>
    %114 = vector.broadcast %113 : vector<1x128xf32> to vector<16x128xf32>
    %115 = arith.mulf %112, %114 : vector<16x128xf32>
    %116 = vector.shape_cast %96 : vector<128xf32> to vector<1x128xf32>
    %117 = vector.broadcast %116 : vector<1x128xf32> to vector<16x128xf32>
    %118 = arith.addf %115, %117 : vector<16x128xf32>
    %c0_39 = arith.constant 0 : index
    %c0_40 = arith.constant 0 : index
    %c0_41 = arith.constant 0 : index
    %119 = vector.load %arg10[%c0_39, %c0_40, %c0_41] : memref<4x128x512xbf16, #tpu.memory_space<vmem>>, vector<1x128x512xbf16>
    %120 = vector.shape_cast %119 : vector<1x128x512xbf16> to vector<128x512xbf16>
    %121 = arith.truncf %118 : vector<16x128xf32> to vector<16x128xbf16>
    %cst_42 = arith.constant dense<0.000000e+00> : vector<16x512xf32>
    %122 = tpu.matmul %121, %120, %cst_42 {dimension_numbers = #tpu.dot_dimension_numbers<[1], [0], [0], [1], [0, 0, 1, 1], [], []>} : vector<16x128xbf16>, vector<128x512xbf16>, vector<16x512xf32> -> vector<16x512xf32>
    %c0_43 = arith.constant 0 : index
    %c0_44 = arith.constant 0 : index
    %123 = vector.load %arg11[%c0_43, %c0_44] : memref<4x512xf32, #tpu.memory_space<vmem>>, vector<1x512xf32>
    %124 = vector.shape_cast %123 : vector<1x512xf32> to vector<512xf32>
    %125 = vector.shape_cast %124 : vector<512xf32> to vector<1x512xf32>
    %126 = vector.broadcast %125 : vector<1x512xf32> to vector<16x512xf32>
    %127 = arith.addf %122, %126 : vector<16x512xf32>
    %cst_45 = arith.constant 1.702000e+00 : f32
    %128 = vector.broadcast %cst_45 : f32 to vector<16x512xf32>
    %129 = arith.mulf %128, %127 : vector<16x512xf32>
    %130 = arith.negf %129 : vector<16x512xf32>
    %131 = math.exp %130 : vector<16x512xf32>
    %cst_46 = arith.constant 1.000000e+00 : f32
    %132 = vector.broadcast %cst_46 : f32 to vector<16x512xf32>
    %133 = arith.addf %132, %131 : vector<16x512xf32>
    %134 = arith.divf %132, %133 : vector<16x512xf32>
    %135 = arith.mulf %127, %134 : vector<16x512xf32>
    %c0_47 = arith.constant 0 : index
    %c0_48 = arith.constant 0 : index
    %c0_49 = arith.constant 0 : index
    %136 = vector.load %arg12[%c0_47, %c0_48, %c0_49] : memref<4x512x128xbf16, #tpu.memory_space<vmem>>, vector<1x512x128xbf16>
    %137 = vector.shape_cast %136 : vector<1x512x128xbf16> to vector<512x128xbf16>
    %138 = arith.truncf %135 : vector<16x512xf32> to vector<16x512xbf16>
    %cst_50 = arith.constant dense<0.000000e+00> : vector<16x128xf32>
    %139 = tpu.matmul %138, %137, %cst_50 {dimension_numbers = #tpu.dot_dimension_numbers<[1], [0], [0], [1], [0, 0, 1, 1], [], []>} : vector<16x512xbf16>, vector<512x128xbf16>, vector<16x128xf32> -> vector<16x128xf32>
    %c0_51 = arith.constant 0 : index
    %c0_52 = arith.constant 0 : index
    %140 = vector.load %arg13[%c0_51, %c0_52] : memref<4x128xf32, #tpu.memory_space<vmem>>, vector<1x128xf32>
    %141 = vector.shape_cast %140 : vector<1x128xf32> to vector<128xf32>
    %142 = vector.shape_cast %141 : vector<128xf32> to vector<1x128xf32>
    %143 = vector.broadcast %142 : vector<1x128xf32> to vector<16x128xf32>
    %144 = arith.addf %139, %143 : vector<16x128xf32>
    %145 = vector.shape_cast %144 : vector<16x128xf32> to vector<2x8x128xf32>
    %146 = arith.addf %91, %145 : vector<2x8x128xf32>
    %147 = vector.shape_cast %146 : vector<2x8x128xf32> to vector<16x128xf32>
    %c1 = arith.constant 1 : index
    %c0_53 = arith.constant 0 : index
    %148 = vector.load %arg2[%c1, %c0_53] : memref<4x128xf32, #tpu.memory_space<vmem>>, vector<1x128xf32>
    %149 = vector.shape_cast %148 : vector<1x128xf32> to vector<128xf32>
    %c1_54 = arith.constant 1 : index
    %c0_55 = arith.constant 0 : index
    %150 = vector.load %arg3[%c1_54, %c0_55] : memref<4x128xf32, #tpu.memory_space<vmem>>, vector<1x128xf32>
    %151 = vector.shape_cast %150 : vector<1x128xf32> to vector<128xf32>
    %cst_56 = arith.constant dense<0.000000e+00> : vector<16xf32>
    %152 = vector.multi_reduction <add>, %147, %cst_56 [1] : vector<16x128xf32> to vector<16xf32>
    %153 = vector.shape_cast %152 : vector<16xf32> to vector<16x1xf32>
    %cst_57 = arith.constant 1.280000e+02 : f32
    %154 = vector.broadcast %cst_57 : f32 to vector<16x1xf32>
    %155 = arith.divf %153, %154 : vector<16x1xf32>
    %156 = vector.broadcast %155 : vector<16x1xf32> to vector<16x128xf32>
    %157 = arith.subf %147, %156 : vector<16x128xf32>
    %158 = arith.mulf %157, %157 : vector<16x128xf32>
    %cst_58 = arith.constant dense<0.000000e+00> : vector<16xf32>
    %159 = vector.multi_reduction <add>, %158, %cst_58 [1] : vector<16x128xf32> to vector<16xf32>
    %160 = vector.shape_cast %159 : vector<16xf32> to vector<16x1xf32>
    %cst_59 = arith.constant 1.280000e+02 : f32
    %161 = vector.broadcast %cst_59 : f32 to vector<16x1xf32>
    %162 = arith.divf %160, %161 : vector<16x1xf32>
    %cst_60 = arith.constant 9.99999974E-6 : f32
    %163 = vector.broadcast %cst_60 : f32 to vector<16x1xf32>
    %164 = arith.addf %162, %163 : vector<16x1xf32>
    %165 = math.rsqrt %164 : vector<16x1xf32>
    %166 = vector.broadcast %165 : vector<16x1xf32> to vector<16x128xf32>
    %167 = arith.mulf %157, %166 : vector<16x128xf32>
    %168 = vector.shape_cast %149 : vector<128xf32> to vector<1x128xf32>
    %169 = vector.broadcast %168 : vector<1x128xf32> to vector<16x128xf32>
    %170 = arith.mulf %167, %169 : vector<16x128xf32>
    %171 = vector.shape_cast %151 : vector<128xf32> to vector<1x128xf32>
    %172 = vector.broadcast %171 : vector<1x128xf32> to vector<16x128xf32>
    %173 = arith.addf %170, %172 : vector<16x128xf32>
    %c1_61 = arith.constant 1 : index
    %c0_62 = arith.constant 0 : index
    %c0_63 = arith.constant 0 : index
    %174 = vector.load %arg4[%c1_61, %c0_62, %c0_63] : memref<4x128x384xbf16, #tpu.memory_space<vmem>>, vector<1x128x384xbf16>
    %175 = vector.shape_cast %174 : vector<1x128x384xbf16> to vector<128x384xbf16>
    %176 = arith.truncf %173 : vector<16x128xf32> to vector<16x128xbf16>
    %cst_64 = arith.constant dense<0.000000e+00> : vector<16x384xf32>
    %177 = tpu.matmul %176, %175, %cst_64 {dimension_numbers = #tpu.dot_dimension_numbers<[1], [0], [0], [1], [0, 0, 1, 1], [], []>} : vector<16x128xbf16>, vector<128x384xbf16>, vector<16x384xf32> -> vector<16x384xf32>
    %c1_65 = arith.constant 1 : index
    %c0_66 = arith.constant 0 : index
    %178 = vector.load %arg5[%c1_65, %c0_66] : memref<4x384xf32, #tpu.memory_space<vmem>>, vector<1x384xf32>
    %179 = vector.shape_cast %178 : vector<1x384xf32> to vector<384xf32>
    %180 = vector.shape_cast %179 : vector<384xf32> to vector<1x384xf32>
    %181 = vector.broadcast %180 : vector<1x384xf32> to vector<16x384xf32>
    %182 = arith.addf %177, %181 : vector<16x384xf32>
    %183 = vector.shape_cast %182 : vector<16x384xf32> to vector<2x8x384xf32>
    %184 = vector.extract_strided_slice %183 {offsets = [0, 0, 0], sizes = [2, 8, 128], strides = [1, 1, 1]} : vector<2x8x384xf32> to vector<2x8x128xf32>
    %185 = vector.extract_strided_slice %183 {offsets = [0, 0, 128], sizes = [2, 8, 128], strides = [1, 1, 1]} : vector<2x8x384xf32> to vector<2x8x128xf32>
    %186 = vector.extract_strided_slice %183 {offsets = [0, 0, 256], sizes = [2, 8, 128], strides = [1, 1, 1]} : vector<2x8x384xf32> to vector<2x8x128xf32>
    %187 = vector.extract_strided_slice %184 {offsets = [0, 0, 0], sizes = [2, 8, 64], strides = [1, 1, 1]} : vector<2x8x128xf32> to vector<2x8x64xf32>
    %188 = arith.truncf %187 : vector<2x8x64xf32> to vector<2x8x64xbf16>
    %189 = vector.extract_strided_slice %185 {offsets = [0, 0, 0], sizes = [2, 8, 64], strides = [1, 1, 1]} : vector<2x8x128xf32> to vector<2x8x64xf32>
    %190 = arith.truncf %189 : vector<2x8x64xf32> to vector<2x8x64xbf16>
    %191 = vector.extract_strided_slice %186 {offsets = [0, 0, 0], sizes = [2, 8, 64], strides = [1, 1, 1]} : vector<2x8x128xf32> to vector<2x8x64xf32>
    %192 = arith.truncf %191 : vector<2x8x64xf32> to vector<2x8x64xbf16>
    "tpu.trace_start"() <{level = 10 : i32, message = "bqd,bkd->bqk"}> : () -> ()
    %cst_67 = arith.constant dense<0.000000e+00> : vector<2x8x8xf32>
    %193 = tpu.matmul %188, %190, %cst_67 {dimension_numbers = #tpu.dot_dimension_numbers<[2], [2], [1], [1], [0, 0, 0, 1, 1, 1], [0], [0]>} : vector<2x8x64xbf16>, vector<2x8x64xbf16>, vector<2x8x8xf32> -> vector<2x8x8xf32>
    "tpu.trace_stop"() : () -> ()
    %cst_68 = arith.constant dense<0xFF800000> : vector<2x8xf32>
    %194 = vector.multi_reduction <maximumf>, %193, %cst_68 [2] : vector<2x8x8xf32> to vector<2x8xf32>
    %195 = vector.shape_cast %194 : vector<2x8xf32> to vector<2x8x1xf32>
    %196 = vector.broadcast %195 : vector<2x8x1xf32> to vector<2x8x8xf32>
    %197 = arith.subf %193, %196 : vector<2x8x8xf32>
    %198 = math.exp %197 : vector<2x8x8xf32>
    %cst_69 = arith.constant dense<0.000000e+00> : vector<2x8xf32>
    %199 = vector.multi_reduction <add>, %198, %cst_69 [2] : vector<2x8x8xf32> to vector<2x8xf32>
    %200 = vector.shape_cast %199 : vector<2x8xf32> to vector<2x8x1xf32>
    %201 = tpu.reciprocal %200 {approx = true} : vector<2x8x1xf32> -> vector<2x8x1xf32>
    %202 = vector.broadcast %201 : vector<2x8x1xf32> to vector<2x8x8xf32>
    %203 = arith.mulf %198, %202 : vector<2x8x8xf32>
    %204 = arith.truncf %203 : vector<2x8x8xf32> to vector<2x8x8xbf16>
    "tpu.trace_start"() <{level = 10 : i32, message = "bqk,bkd->bqd"}> : () -> ()
    %cst_70 = arith.constant dense<0.000000e+00> : vector<2x8x64xf32>
    %205 = tpu.matmul %204, %192, %cst_70 {dimension_numbers = #tpu.dot_dimension_numbers<[2], [1], [1], [2], [0, 0, 0, 1, 1, 2], [0], [0]>} : vector<2x8x8xbf16>, vector<2x8x64xbf16>, vector<2x8x64xf32> -> vector<2x8x64xf32>
    "tpu.trace_stop"() : () -> ()
    %206 = vector.extract_strided_slice %184 {offsets = [0, 0, 64], sizes = [2, 8, 64], strides = [1, 1, 1]} : vector<2x8x128xf32> to vector<2x8x64xf32>
    %207 = arith.truncf %206 : vector<2x8x64xf32> to vector<2x8x64xbf16>
    %208 = vector.extract_strided_slice %185 {offsets = [0, 0, 64], sizes = [2, 8, 64], strides = [1, 1, 1]} : vector<2x8x128xf32> to vector<2x8x64xf32>
    %209 = arith.truncf %208 : vector<2x8x64xf32> to vector<2x8x64xbf16>
    %210 = vector.extract_strided_slice %186 {offsets = [0, 0, 64], sizes = [2, 8, 64], strides = [1, 1, 1]} : vector<2x8x128xf32> to vector<2x8x64xf32>
    %211 = arith.truncf %210 : vector<2x8x64xf32> to vector<2x8x64xbf16>
    "tpu.trace_start"() <{level = 10 : i32, message = "bqd,bkd->bqk"}> : () -> ()
    %cst_71 = arith.constant dense<0.000000e+00> : vector<2x8x8xf32>
    %212 = tpu.matmul %207, %209, %cst_71 {dimension_numbers = #tpu.dot_dimension_numbers<[2], [2], [1], [1], [0, 0, 0, 1, 1, 1], [0], [0]>} : vector<2x8x64xbf16>, vector<2x8x64xbf16>, vector<2x8x8xf32> -> vector<2x8x8xf32>
    "tpu.trace_stop"() : () -> ()
    %cst_72 = arith.constant dense<0xFF800000> : vector<2x8xf32>
    %213 = vector.multi_reduction <maximumf>, %212, %cst_72 [2] : vector<2x8x8xf32> to vector<2x8xf32>
    %214 = vector.shape_cast %213 : vector<2x8xf32> to vector<2x8x1xf32>
    %215 = vector.broadcast %214 : vector<2x8x1xf32> to vector<2x8x8xf32>
    %216 = arith.subf %212, %215 : vector<2x8x8xf32>
    %217 = math.exp %216 : vector<2x8x8xf32>
    %cst_73 = arith.constant dense<0.000000e+00> : vector<2x8xf32>
    %218 = vector.multi_reduction <add>, %217, %cst_73 [2] : vector<2x8x8xf32> to vector<2x8xf32>
    %219 = vector.shape_cast %218 : vector<2x8xf32> to vector<2x8x1xf32>
    %220 = tpu.reciprocal %219 {approx = true} : vector<2x8x1xf32> -> vector<2x8x1xf32>
    %221 = vector.broadcast %220 : vector<2x8x1xf32> to vector<2x8x8xf32>
    %222 = arith.mulf %217, %221 : vector<2x8x8xf32>
    %223 = arith.truncf %222 : vector<2x8x8xf32> to vector<2x8x8xbf16>
    "tpu.trace_start"() <{level = 10 : i32, message = "bqk,bkd->bqd"}> : () -> ()
    %cst_74 = arith.constant dense<0.000000e+00> : vector<2x8x64xf32>
    %224 = tpu.matmul %223, %211, %cst_74 {dimension_numbers = #tpu.dot_dimension_numbers<[2], [1], [1], [2], [0, 0, 0, 1, 1, 2], [0], [0]>} : vector<2x8x8xbf16>, vector<2x8x64xbf16>, vector<2x8x64xf32> -> vector<2x8x64xf32>
    "tpu.trace_stop"() : () -> ()
    %225 = tpu.concatenate %205, %224 in 2 : vector<2x8x64xf32>, vector<2x8x64xf32> -> vector<2x8x128xf32>
    %226 = vector.shape_cast %225 : vector<2x8x128xf32> to vector<16x128xf32>
    %c1_75 = arith.constant 1 : index
    %c0_76 = arith.constant 0 : index
    %c0_77 = arith.constant 0 : index
    %227 = vector.load %arg6[%c1_75, %c0_76, %c0_77] : memref<4x128x128xbf16, #tpu.memory_space<vmem>>, vector<1x128x128xbf16>
    %228 = vector.shape_cast %227 : vector<1x128x128xbf16> to vector<128x128xbf16>
    %229 = arith.truncf %226 : vector<16x128xf32> to vector<16x128xbf16>
    %cst_78 = arith.constant dense<0.000000e+00> : vector<16x128xf32>
    %230 = tpu.matmul %229, %228, %cst_78 {dimension_numbers = #tpu.dot_dimension_numbers<[1], [0], [0], [1], [0, 0, 1, 1], [], []>} : vector<16x128xbf16>, vector<128x128xbf16>, vector<16x128xf32> -> vector<16x128xf32>
    %c1_79 = arith.constant 1 : index
    %c0_80 = arith.constant 0 : index
    %231 = vector.load %arg7[%c1_79, %c0_80] : memref<4x128xf32, #tpu.memory_space<vmem>>, vector<1x128xf32>
    %232 = vector.shape_cast %231 : vector<1x128xf32> to vector<128xf32>
    %233 = vector.shape_cast %232 : vector<128xf32> to vector<1x128xf32>
    %234 = vector.broadcast %233 : vector<1x128xf32> to vector<16x128xf32>
    %235 = arith.addf %230, %234 : vector<16x128xf32>
    %236 = vector.shape_cast %235 : vector<16x128xf32> to vector<2x8x128xf32>
    %237 = arith.addf %146, %236 : vector<2x8x128xf32>
    %238 = vector.shape_cast %237 : vector<2x8x128xf32> to vector<16x128xf32>
    %c1_81 = arith.constant 1 : index
    %c0_82 = arith.constant 0 : index
    %239 = vector.load %arg8[%c1_81, %c0_82] : memref<4x128xf32, #tpu.memory_space<vmem>>, vector<1x128xf32>
    %240 = vector.shape_cast %239 : vector<1x128xf32> to vector<128xf32>
    %c1_83 = arith.constant 1 : index
    %c0_84 = arith.constant 0 : index
    %241 = vector.load %arg9[%c1_83, %c0_84] : memref<4x128xf32, #tpu.memory_space<vmem>>, vector<1x128xf32>
    %242 = vector.shape_cast %241 : vector<1x128xf32> to vector<128xf32>
    %cst_85 = arith.constant dense<0.000000e+00> : vector<16xf32>
    %243 = vector.multi_reduction <add>, %238, %cst_85 [1] : vector<16x128xf32> to vector<16xf32>
    %244 = vector.shape_cast %243 : vector<16xf32> to vector<16x1xf32>
    %cst_86 = arith.constant 1.280000e+02 : f32
    %245 = vector.broadcast %cst_86 : f32 to vector<16x1xf32>
    %246 = arith.divf %244, %245 : vector<16x1xf32>
    %247 = vector.broadcast %246 : vector<16x1xf32> to vector<16x128xf32>
    %248 = arith.subf %238, %247 : vector<16x128xf32>
    %249 = arith.mulf %248, %248 : vector<16x128xf32>
    %cst_87 = arith.constant dense<0.000000e+00> : vector<16xf32>
    %250 = vector.multi_reduction <add>, %249, %cst_87 [1] : vector<16x128xf32> to vector<16xf32>
    %251 = vector.shape_cast %250 : vector<16xf32> to vector<16x1xf32>
    %cst_88 = arith.constant 1.280000e+02 : f32
    %252 = vector.broadcast %cst_88 : f32 to vector<16x1xf32>
    %253 = arith.divf %251, %252 : vector<16x1xf32>
    %cst_89 = arith.constant 9.99999974E-6 : f32
    %254 = vector.broadcast %cst_89 : f32 to vector<16x1xf32>
    %255 = arith.addf %253, %254 : vector<16x1xf32>
    %256 = math.rsqrt %255 : vector<16x1xf32>
    %257 = vector.broadcast %256 : vector<16x1xf32> to vector<16x128xf32>
    %258 = arith.mulf %248, %257 : vector<16x128xf32>
    %259 = vector.shape_cast %240 : vector<128xf32> to vector<1x128xf32>
    %260 = vector.broadcast %259 : vector<1x128xf32> to vector<16x128xf32>
    %261 = arith.mulf %258, %260 : vector<16x128xf32>
    %262 = vector.shape_cast %242 : vector<128xf32> to vector<1x128xf32>
    %263 = vector.broadcast %262 : vector<1x128xf32> to vector<16x128xf32>
    %264 = arith.addf %261, %263 : vector<16x128xf32>
    %c1_90 = arith.constant 1 : index
    %c0_91 = arith.constant 0 : index
    %c0_92 = arith.constant 0 : index
    %265 = vector.load %arg10[%c1_90, %c0_91, %c0_92] : memref<4x128x512xbf16, #tpu.memory_space<vmem>>, vector<1x128x512xbf16>
    %266 = vector.shape_cast %265 : vector<1x128x512xbf16> to vector<128x512xbf16>
    %267 = arith.truncf %264 : vector<16x128xf32> to vector<16x128xbf16>
    %cst_93 = arith.constant dense<0.000000e+00> : vector<16x512xf32>
    %268 = tpu.matmul %267, %266, %cst_93 {dimension_numbers = #tpu.dot_dimension_numbers<[1], [0], [0], [1], [0, 0, 1, 1], [], []>} : vector<16x128xbf16>, vector<128x512xbf16>, vector<16x512xf32> -> vector<16x512xf32>
    %c1_94 = arith.constant 1 : index
    %c0_95 = arith.constant 0 : index
    %269 = vector.load %arg11[%c1_94, %c0_95] : memref<4x512xf32, #tpu.memory_space<vmem>>, vector<1x512xf32>
    %270 = vector.shape_cast %269 : vector<1x512xf32> to vector<512xf32>
    %271 = vector.shape_cast %270 : vector<512xf32> to vector<1x512xf32>
    %272 = vector.broadcast %271 : vector<1x512xf32> to vector<16x512xf32>
    %273 = arith.addf %268, %272 : vector<16x512xf32>
    %cst_96 = arith.constant 1.702000e+00 : f32
    %274 = vector.broadcast %cst_96 : f32 to vector<16x512xf32>
    %275 = arith.mulf %274, %273 : vector<16x512xf32>
    %276 = arith.negf %275 : vector<16x512xf32>
    %277 = math.exp %276 : vector<16x512xf32>
    %cst_97 = arith.constant 1.000000e+00 : f32
    %278 = vector.broadcast %cst_97 : f32 to vector<16x512xf32>
    %279 = arith.addf %278, %277 : vector<16x512xf32>
    %280 = arith.divf %278, %279 : vector<16x512xf32>
    %281 = arith.mulf %273, %280 : vector<16x512xf32>
    %c1_98 = arith.constant 1 : index
    %c0_99 = arith.constant 0 : index
    %c0_100 = arith.constant 0 : index
    %282 = vector.load %arg12[%c1_98, %c0_99, %c0_100] : memref<4x512x128xbf16, #tpu.memory_space<vmem>>, vector<1x512x128xbf16>
    %283 = vector.shape_cast %282 : vector<1x512x128xbf16> to vector<512x128xbf16>
    %284 = arith.truncf %281 : vector<16x512xf32> to vector<16x512xbf16>
    %cst_101 = arith.constant dense<0.000000e+00> : vector<16x128xf32>
    %285 = tpu.matmul %284, %283, %cst_101 {dimension_numbers = #tpu.dot_dimension_numbers<[1], [0], [0], [1], [0, 0, 1, 1], [], []>} : vector<16x512xbf16>, vector<512x128xbf16>, vector<16x128xf32> -> vector<16x128xf32>
    %c1_102 = arith.constant 1 : index
    %c0_103 = arith.constant 0 : index
    %286 = vector.load %arg13[%c1_102, %c0_103] : memref<4x128xf32, #tpu.memory_space<vmem>>, vector<1x128xf32>
    %287 = vector.shape_cast %286 : vector<1x128xf32> to vector<128xf32>
    %288 = vector.shape_cast %287 : vector<128xf32> to vector<1x128xf32>
    %289 = vector.broadcast %288 : vector<1x128xf32> to vector<16x128xf32>
    %290 = arith.addf %285, %289 : vector<16x128xf32>
    %291 = vector.shape_cast %290 : vector<16x128xf32> to vector<2x8x128xf32>
    %292 = arith.addf %237, %291 : vector<2x8x128xf32>
    %293 = vector.shape_cast %292 : vector<2x8x128xf32> to vector<16x128xf32>
    %c2 = arith.constant 2 : index
    %c0_104 = arith.constant 0 : index
    %294 = vector.load %arg2[%c2, %c0_104] : memref<4x128xf32, #tpu.memory_space<vmem>>, vector<1x128xf32>
    %295 = vector.shape_cast %294 : vector<1x128xf32> to vector<128xf32>
    %c2_105 = arith.constant 2 : index
    %c0_106 = arith.constant 0 : index
    %296 = vector.load %arg3[%c2_105, %c0_106] : memref<4x128xf32, #tpu.memory_space<vmem>>, vector<1x128xf32>
    %297 = vector.shape_cast %296 : vector<1x128xf32> to vector<128xf32>
    %cst_107 = arith.constant dense<0.000000e+00> : vector<16xf32>
    %298 = vector.multi_reduction <add>, %293, %cst_107 [1] : vector<16x128xf32> to vector<16xf32>
    %299 = vector.shape_cast %298 : vector<16xf32> to vector<16x1xf32>
    %cst_108 = arith.constant 1.280000e+02 : f32
    %300 = vector.broadcast %cst_108 : f32 to vector<16x1xf32>
    %301 = arith.divf %299, %300 : vector<16x1xf32>
    %302 = vector.broadcast %301 : vector<16x1xf32> to vector<16x128xf32>
    %303 = arith.subf %293, %302 : vector<16x128xf32>
    %304 = arith.mulf %303, %303 : vector<16x128xf32>
    %cst_109 = arith.constant dense<0.000000e+00> : vector<16xf32>
    %305 = vector.multi_reduction <add>, %304, %cst_109 [1] : vector<16x128xf32> to vector<16xf32>
    %306 = vector.shape_cast %305 : vector<16xf32> to vector<16x1xf32>
    %cst_110 = arith.constant 1.280000e+02 : f32
    %307 = vector.broadcast %cst_110 : f32 to vector<16x1xf32>
    %308 = arith.divf %306, %307 : vector<16x1xf32>
    %cst_111 = arith.constant 9.99999974E-6 : f32
    %309 = vector.broadcast %cst_111 : f32 to vector<16x1xf32>
    %310 = arith.addf %308, %309 : vector<16x1xf32>
    %311 = math.rsqrt %310 : vector<16x1xf32>
    %312 = vector.broadcast %311 : vector<16x1xf32> to vector<16x128xf32>
    %313 = arith.mulf %303, %312 : vector<16x128xf32>
    %314 = vector.shape_cast %295 : vector<128xf32> to vector<1x128xf32>
    %315 = vector.broadcast %314 : vector<1x128xf32> to vector<16x128xf32>
    %316 = arith.mulf %313, %315 : vector<16x128xf32>
    %317 = vector.shape_cast %297 : vector<128xf32> to vector<1x128xf32>
    %318 = vector.broadcast %317 : vector<1x128xf32> to vector<16x128xf32>
    %319 = arith.addf %316, %318 : vector<16x128xf32>
    %c2_112 = arith.constant 2 : index
    %c0_113 = arith.constant 0 : index
    %c0_114 = arith.constant 0 : index
    %320 = vector.load %arg4[%c2_112, %c0_113, %c0_114] : memref<4x128x384xbf16, #tpu.memory_space<vmem>>, vector<1x128x384xbf16>
    %321 = vector.shape_cast %320 : vector<1x128x384xbf16> to vector<128x384xbf16>
    %322 = arith.truncf %319 : vector<16x128xf32> to vector<16x128xbf16>
    %cst_115 = arith.constant dense<0.000000e+00> : vector<16x384xf32>
    %323 = tpu.matmul %322, %321, %cst_115 {dimension_numbers = #tpu.dot_dimension_numbers<[1], [0], [0], [1], [0, 0, 1, 1], [], []>} : vector<16x128xbf16>, vector<128x384xbf16>, vector<16x384xf32> -> vector<16x384xf32>
    %c2_116 = arith.constant 2 : index
    %c0_117 = arith.constant 0 : index
    %324 = vector.load %arg5[%c2_116, %c0_117] : memref<4x384xf32, #tpu.memory_space<vmem>>, vector<1x384xf32>
    %325 = vector.shape_cast %324 : vector<1x384xf32> to vector<384xf32>
    %326 = vector.shape_cast %325 : vector<384xf32> to vector<1x384xf32>
    %327 = vector.broadcast %326 : vector<1x384xf32> to vector<16x384xf32>
    %328 = arith.addf %323, %327 : vector<16x384xf32>
    %329 = vector.shape_cast %328 : vector<16x384xf32> to vector<2x8x384xf32>
    %330 = vector.extract_strided_slice %329 {offsets = [0, 0, 0], sizes = [2, 8, 128], strides = [1, 1, 1]} : vector<2x8x384xf32> to vector<2x8x128xf32>
    %331 = vector.extract_strided_slice %329 {offsets = [0, 0, 128], sizes = [2, 8, 128], strides = [1, 1, 1]} : vector<2x8x384xf32> to vector<2x8x128xf32>
    %332 = vector.extract_strided_slice %329 {offsets = [0, 0, 256], sizes = [2, 8, 128], strides = [1, 1, 1]} : vector<2x8x384xf32> to vector<2x8x128xf32>
    %333 = vector.extract_strided_slice %330 {offsets = [0, 0, 0], sizes = [2, 8, 64], strides = [1, 1, 1]} : vector<2x8x128xf32> to vector<2x8x64xf32>
    %334 = arith.truncf %333 : vector<2x8x64xf32> to vector<2x8x64xbf16>
    %335 = vector.extract_strided_slice %331 {offsets = [0, 0, 0], sizes = [2, 8, 64], strides = [1, 1, 1]} : vector<2x8x128xf32> to vector<2x8x64xf32>
    %336 = arith.truncf %335 : vector<2x8x64xf32> to vector<2x8x64xbf16>
    %337 = vector.extract_strided_slice %332 {offsets = [0, 0, 0], sizes = [2, 8, 64], strides = [1, 1, 1]} : vector<2x8x128xf32> to vector<2x8x64xf32>
    %338 = arith.truncf %337 : vector<2x8x64xf32> to vector<2x8x64xbf16>
    "tpu.trace_start"() <{level = 10 : i32, message = "bqd,bkd->bqk"}> : () -> ()
    %cst_118 = arith.constant dense<0.000000e+00> : vector<2x8x8xf32>
    %339 = tpu.matmul %334, %336, %cst_118 {dimension_numbers = #tpu.dot_dimension_numbers<[2], [2], [1], [1], [0, 0, 0, 1, 1, 1], [0], [0]>} : vector<2x8x64xbf16>, vector<2x8x64xbf16>, vector<2x8x8xf32> -> vector<2x8x8xf32>
    "tpu.trace_stop"() : () -> ()
    %cst_119 = arith.constant dense<0xFF800000> : vector<2x8xf32>
    %340 = vector.multi_reduction <maximumf>, %339, %cst_119 [2] : vector<2x8x8xf32> to vector<2x8xf32>
    %341 = vector.shape_cast %340 : vector<2x8xf32> to vector<2x8x1xf32>
    %342 = vector.broadcast %341 : vector<2x8x1xf32> to vector<2x8x8xf32>
    %343 = arith.subf %339, %342 : vector<2x8x8xf32>
    %344 = math.exp %343 : vector<2x8x8xf32>
    %cst_120 = arith.constant dense<0.000000e+00> : vector<2x8xf32>
    %345 = vector.multi_reduction <add>, %344, %cst_120 [2] : vector<2x8x8xf32> to vector<2x8xf32>
    %346 = vector.shape_cast %345 : vector<2x8xf32> to vector<2x8x1xf32>
    %347 = tpu.reciprocal %346 {approx = true} : vector<2x8x1xf32> -> vector<2x8x1xf32>
    %348 = vector.broadcast %347 : vector<2x8x1xf32> to vector<2x8x8xf32>
    %349 = arith.mulf %344, %348 : vector<2x8x8xf32>
    %350 = arith.truncf %349 : vector<2x8x8xf32> to vector<2x8x8xbf16>
    "tpu.trace_start"() <{level = 10 : i32, message = "bqk,bkd->bqd"}> : () -> ()
    %cst_121 = arith.constant dense<0.000000e+00> : vector<2x8x64xf32>
    %351 = tpu.matmul %350, %338, %cst_121 {dimension_numbers = #tpu.dot_dimension_numbers<[2], [1], [1], [2], [0, 0, 0, 1, 1, 2], [0], [0]>} : vector<2x8x8xbf16>, vector<2x8x64xbf16>, vector<2x8x64xf32> -> vector<2x8x64xf32>
    "tpu.trace_stop"() : () -> ()
    %352 = vector.extract_strided_slice %330 {offsets = [0, 0, 64], sizes = [2, 8, 64], strides = [1, 1, 1]} : vector<2x8x128xf32> to vector<2x8x64xf32>
    %353 = arith.truncf %352 : vector<2x8x64xf32> to vector<2x8x64xbf16>
    %354 = vector.extract_strided_slice %331 {offsets = [0, 0, 64], sizes = [2, 8, 64], strides = [1, 1, 1]} : vector<2x8x128xf32> to vector<2x8x64xf32>
    %355 = arith.truncf %354 : vector<2x8x64xf32> to vector<2x8x64xbf16>
    %356 = vector.extract_strided_slice %332 {offsets = [0, 0, 64], sizes = [2, 8, 64], strides = [1, 1, 1]} : vector<2x8x128xf32> to vector<2x8x64xf32>
    %357 = arith.truncf %356 : vector<2x8x64xf32> to vector<2x8x64xbf16>
    "tpu.trace_start"() <{level = 10 : i32, message = "bqd,bkd->bqk"}> : () -> ()
    %cst_122 = arith.constant dense<0.000000e+00> : vector<2x8x8xf32>
    %358 = tpu.matmul %353, %355, %cst_122 {dimension_numbers = #tpu.dot_dimension_numbers<[2], [2], [1], [1], [0, 0, 0, 1, 1, 1], [0], [0]>} : vector<2x8x64xbf16>, vector<2x8x64xbf16>, vector<2x8x8xf32> -> vector<2x8x8xf32>
    "tpu.trace_stop"() : () -> ()
    %cst_123 = arith.constant dense<0xFF800000> : vector<2x8xf32>
    %359 = vector.multi_reduction <maximumf>, %358, %cst_123 [2] : vector<2x8x8xf32> to vector<2x8xf32>
    %360 = vector.shape_cast %359 : vector<2x8xf32> to vector<2x8x1xf32>
    %361 = vector.broadcast %360 : vector<2x8x1xf32> to vector<2x8x8xf32>
    %362 = arith.subf %358, %361 : vector<2x8x8xf32>
    %363 = math.exp %362 : vector<2x8x8xf32>
    %cst_124 = arith.constant dense<0.000000e+00> : vector<2x8xf32>
    %364 = vector.multi_reduction <add>, %363, %cst_124 [2] : vector<2x8x8xf32> to vector<2x8xf32>
    %365 = vector.shape_cast %364 : vector<2x8xf32> to vector<2x8x1xf32>
    %366 = tpu.reciprocal %365 {approx = true} : vector<2x8x1xf32> -> vector<2x8x1xf32>
    %367 = vector.broadcast %366 : vector<2x8x1xf32> to vector<2x8x8xf32>
    %368 = arith.mulf %363, %367 : vector<2x8x8xf32>
    %369 = arith.truncf %368 : vector<2x8x8xf32> to vector<2x8x8xbf16>
    "tpu.trace_start"() <{level = 10 : i32, message = "bqk,bkd->bqd"}> : () -> ()
    %cst_125 = arith.constant dense<0.000000e+00> : vector<2x8x64xf32>
    %370 = tpu.matmul %369, %357, %cst_125 {dimension_numbers = #tpu.dot_dimension_numbers<[2], [1], [1], [2], [0, 0, 0, 1, 1, 2], [0], [0]>} : vector<2x8x8xbf16>, vector<2x8x64xbf16>, vector<2x8x64xf32> -> vector<2x8x64xf32>
    "tpu.trace_stop"() : () -> ()
    %371 = tpu.concatenate %351, %370 in 2 : vector<2x8x64xf32>, vector<2x8x64xf32> -> vector<2x8x128xf32>
    %372 = vector.shape_cast %371 : vector<2x8x128xf32> to vector<16x128xf32>
    %c2_126 = arith.constant 2 : index
    %c0_127 = arith.constant 0 : index
    %c0_128 = arith.constant 0 : index
    %373 = vector.load %arg6[%c2_126, %c0_127, %c0_128] : memref<4x128x128xbf16, #tpu.memory_space<vmem>>, vector<1x128x128xbf16>
    %374 = vector.shape_cast %373 : vector<1x128x128xbf16> to vector<128x128xbf16>
    %375 = arith.truncf %372 : vector<16x128xf32> to vector<16x128xbf16>
    %cst_129 = arith.constant dense<0.000000e+00> : vector<16x128xf32>
    %376 = tpu.matmul %375, %374, %cst_129 {dimension_numbers = #tpu.dot_dimension_numbers<[1], [0], [0], [1], [0, 0, 1, 1], [], []>} : vector<16x128xbf16>, vector<128x128xbf16>, vector<16x128xf32> -> vector<16x128xf32>
    %c2_130 = arith.constant 2 : index
    %c0_131 = arith.constant 0 : index
    %377 = vector.load %arg7[%c2_130, %c0_131] : memref<4x128xf32, #tpu.memory_space<vmem>>, vector<1x128xf32>
    %378 = vector.shape_cast %377 : vector<1x128xf32> to vector<128xf32>
    %379 = vector.shape_cast %378 : vector<128xf32> to vector<1x128xf32>
    %380 = vector.broadcast %379 : vector<1x128xf32> to vector<16x128xf32>
    %381 = arith.addf %376, %380 : vector<16x128xf32>
    %382 = vector.shape_cast %381 : vector<16x128xf32> to vector<2x8x128xf32>
    %383 = arith.addf %292, %382 : vector<2x8x128xf32>
    %384 = vector.shape_cast %383 : vector<2x8x128xf32> to vector<16x128xf32>
    %c2_132 = arith.constant 2 : index
    %c0_133 = arith.constant 0 : index
    %385 = vector.load %arg8[%c2_132, %c0_133] : memref<4x128xf32, #tpu.memory_space<vmem>>, vector<1x128xf32>
    %386 = vector.shape_cast %385 : vector<1x128xf32> to vector<128xf32>
    %c2_134 = arith.constant 2 : index
    %c0_135 = arith.constant 0 : index
    %387 = vector.load %arg9[%c2_134, %c0_135] : memref<4x128xf32, #tpu.memory_space<vmem>>, vector<1x128xf32>
    %388 = vector.shape_cast %387 : vector<1x128xf32> to vector<128xf32>
    %cst_136 = arith.constant dense<0.000000e+00> : vector<16xf32>
    %389 = vector.multi_reduction <add>, %384, %cst_136 [1] : vector<16x128xf32> to vector<16xf32>
    %390 = vector.shape_cast %389 : vector<16xf32> to vector<16x1xf32>
    %cst_137 = arith.constant 1.280000e+02 : f32
    %391 = vector.broadcast %cst_137 : f32 to vector<16x1xf32>
    %392 = arith.divf %390, %391 : vector<16x1xf32>
    %393 = vector.broadcast %392 : vector<16x1xf32> to vector<16x128xf32>
    %394 = arith.subf %384, %393 : vector<16x128xf32>
    %395 = arith.mulf %394, %394 : vector<16x128xf32>
    %cst_138 = arith.constant dense<0.000000e+00> : vector<16xf32>
    %396 = vector.multi_reduction <add>, %395, %cst_138 [1] : vector<16x128xf32> to vector<16xf32>
    %397 = vector.shape_cast %396 : vector<16xf32> to vector<16x1xf32>
    %cst_139 = arith.constant 1.280000e+02 : f32
    %398 = vector.broadcast %cst_139 : f32 to vector<16x1xf32>
    %399 = arith.divf %397, %398 : vector<16x1xf32>
    %cst_140 = arith.constant 9.99999974E-6 : f32
    %400 = vector.broadcast %cst_140 : f32 to vector<16x1xf32>
    %401 = arith.addf %399, %400 : vector<16x1xf32>
    %402 = math.rsqrt %401 : vector<16x1xf32>
    %403 = vector.broadcast %402 : vector<16x1xf32> to vector<16x128xf32>
    %404 = arith.mulf %394, %403 : vector<16x128xf32>
    %405 = vector.shape_cast %386 : vector<128xf32> to vector<1x128xf32>
    %406 = vector.broadcast %405 : vector<1x128xf32> to vector<16x128xf32>
    %407 = arith.mulf %404, %406 : vector<16x128xf32>
    %408 = vector.shape_cast %388 : vector<128xf32> to vector<1x128xf32>
    %409 = vector.broadcast %408 : vector<1x128xf32> to vector<16x128xf32>
    %410 = arith.addf %407, %409 : vector<16x128xf32>
    %c2_141 = arith.constant 2 : index
    %c0_142 = arith.constant 0 : index
    %c0_143 = arith.constant 0 : index
    %411 = vector.load %arg10[%c2_141, %c0_142, %c0_143] : memref<4x128x512xbf16, #tpu.memory_space<vmem>>, vector<1x128x512xbf16>
    %412 = vector.shape_cast %411 : vector<1x128x512xbf16> to vector<128x512xbf16>
    %413 = arith.truncf %410 : vector<16x128xf32> to vector<16x128xbf16>
    %cst_144 = arith.constant dense<0.000000e+00> : vector<16x512xf32>
    %414 = tpu.matmul %413, %412, %cst_144 {dimension_numbers = #tpu.dot_dimension_numbers<[1], [0], [0], [1], [0, 0, 1, 1], [], []>} : vector<16x128xbf16>, vector<128x512xbf16>, vector<16x512xf32> -> vector<16x512xf32>
    %c2_145 = arith.constant 2 : index
    %c0_146 = arith.constant 0 : index
    %415 = vector.load %arg11[%c2_145, %c0_146] : memref<4x512xf32, #tpu.memory_space<vmem>>, vector<1x512xf32>
    %416 = vector.shape_cast %415 : vector<1x512xf32> to vector<512xf32>
    %417 = vector.shape_cast %416 : vector<512xf32> to vector<1x512xf32>
    %418 = vector.broadcast %417 : vector<1x512xf32> to vector<16x512xf32>
    %419 = arith.addf %414, %418 : vector<16x512xf32>
    %cst_147 = arith.constant 1.702000e+00 : f32
    %420 = vector.broadcast %cst_147 : f32 to vector<16x512xf32>
    %421 = arith.mulf %420, %419 : vector<16x512xf32>
    %422 = arith.negf %421 : vector<16x512xf32>
    %423 = math.exp %422 : vector<16x512xf32>
    %cst_148 = arith.constant 1.000000e+00 : f32
    %424 = vector.broadcast %cst_148 : f32 to vector<16x512xf32>
    %425 = arith.addf %424, %423 : vector<16x512xf32>
    %426 = arith.divf %424, %425 : vector<16x512xf32>
    %427 = arith.mulf %419, %426 : vector<16x512xf32>
    %c2_149 = arith.constant 2 : index
    %c0_150 = arith.constant 0 : index
    %c0_151 = arith.constant 0 : index
    %428 = vector.load %arg12[%c2_149, %c0_150, %c0_151] : memref<4x512x128xbf16, #tpu.memory_space<vmem>>, vector<1x512x128xbf16>
    %429 = vector.shape_cast %428 : vector<1x512x128xbf16> to vector<512x128xbf16>
    %430 = arith.truncf %427 : vector<16x512xf32> to vector<16x512xbf16>
    %cst_152 = arith.constant dense<0.000000e+00> : vector<16x128xf32>
    %431 = tpu.matmul %430, %429, %cst_152 {dimension_numbers = #tpu.dot_dimension_numbers<[1], [0], [0], [1], [0, 0, 1, 1], [], []>} : vector<16x512xbf16>, vector<512x128xbf16>, vector<16x128xf32> -> vector<16x128xf32>
    %c2_153 = arith.constant 2 : index
    %c0_154 = arith.constant 0 : index
    %432 = vector.load %arg13[%c2_153, %c0_154] : memref<4x128xf32, #tpu.memory_space<vmem>>, vector<1x128xf32>
    %433 = vector.shape_cast %432 : vector<1x128xf32> to vector<128xf32>
    %434 = vector.shape_cast %433 : vector<128xf32> to vector<1x128xf32>
    %435 = vector.broadcast %434 : vector<1x128xf32> to vector<16x128xf32>
    %436 = arith.addf %431, %435 : vector<16x128xf32>
    %437 = vector.shape_cast %436 : vector<16x128xf32> to vector<2x8x128xf32>
    %438 = arith.addf %383, %437 : vector<2x8x128xf32>
    %439 = vector.shape_cast %438 : vector<2x8x128xf32> to vector<16x128xf32>
    %c3 = arith.constant 3 : index
    %c0_155 = arith.constant 0 : index
    %440 = vector.load %arg2[%c3, %c0_155] : memref<4x128xf32, #tpu.memory_space<vmem>>, vector<1x128xf32>
    %441 = vector.shape_cast %440 : vector<1x128xf32> to vector<128xf32>
    %c3_156 = arith.constant 3 : index
    %c0_157 = arith.constant 0 : index
    %442 = vector.load %arg3[%c3_156, %c0_157] : memref<4x128xf32, #tpu.memory_space<vmem>>, vector<1x128xf32>
    %443 = vector.shape_cast %442 : vector<1x128xf32> to vector<128xf32>
    %cst_158 = arith.constant dense<0.000000e+00> : vector<16xf32>
    %444 = vector.multi_reduction <add>, %439, %cst_158 [1] : vector<16x128xf32> to vector<16xf32>
    %445 = vector.shape_cast %444 : vector<16xf32> to vector<16x1xf32>
    %cst_159 = arith.constant 1.280000e+02 : f32
    %446 = vector.broadcast %cst_159 : f32 to vector<16x1xf32>
    %447 = arith.divf %445, %446 : vector<16x1xf32>
    %448 = vector.broadcast %447 : vector<16x1xf32> to vector<16x128xf32>
    %449 = arith.subf %439, %448 : vector<16x128xf32>
    %450 = arith.mulf %449, %449 : vector<16x128xf32>
    %cst_160 = arith.constant dense<0.000000e+00> : vector<16xf32>
    %451 = vector.multi_reduction <add>, %450, %cst_160 [1] : vector<16x128xf32> to vector<16xf32>
    %452 = vector.shape_cast %451 : vector<16xf32> to vector<16x1xf32>
    %cst_161 = arith.constant 1.280000e+02 : f32
    %453 = vector.broadcast %cst_161 : f32 to vector<16x1xf32>
    %454 = arith.divf %452, %453 : vector<16x1xf32>
    %cst_162 = arith.constant 9.99999974E-6 : f32
    %455 = vector.broadcast %cst_162 : f32 to vector<16x1xf32>
    %456 = arith.addf %454, %455 : vector<16x1xf32>
    %457 = math.rsqrt %456 : vector<16x1xf32>
    %458 = vector.broadcast %457 : vector<16x1xf32> to vector<16x128xf32>
    %459 = arith.mulf %449, %458 : vector<16x128xf32>
    %460 = vector.shape_cast %441 : vector<128xf32> to vector<1x128xf32>
    %461 = vector.broadcast %460 : vector<1x128xf32> to vector<16x128xf32>
    %462 = arith.mulf %459, %461 : vector<16x128xf32>
    %463 = vector.shape_cast %443 : vector<128xf32> to vector<1x128xf32>
    %464 = vector.broadcast %463 : vector<1x128xf32> to vector<16x128xf32>
    %465 = arith.addf %462, %464 : vector<16x128xf32>
    %c3_163 = arith.constant 3 : index
    %c0_164 = arith.constant 0 : index
    %c0_165 = arith.constant 0 : index
    %466 = vector.load %arg4[%c3_163, %c0_164, %c0_165] : memref<4x128x384xbf16, #tpu.memory_space<vmem>>, vector<1x128x384xbf16>
    %467 = vector.shape_cast %466 : vector<1x128x384xbf16> to vector<128x384xbf16>
    %468 = arith.truncf %465 : vector<16x128xf32> to vector<16x128xbf16>
    %cst_166 = arith.constant dense<0.000000e+00> : vector<16x384xf32>
    %469 = tpu.matmul %468, %467, %cst_166 {dimension_numbers = #tpu.dot_dimension_numbers<[1], [0], [0], [1], [0, 0, 1, 1], [], []>} : vector<16x128xbf16>, vector<128x384xbf16>, vector<16x384xf32> -> vector<16x384xf32>
    %c3_167 = arith.constant 3 : index
    %c0_168 = arith.constant 0 : index
    %470 = vector.load %arg5[%c3_167, %c0_168] : memref<4x384xf32, #tpu.memory_space<vmem>>, vector<1x384xf32>
    %471 = vector.shape_cast %470 : vector<1x384xf32> to vector<384xf32>
    %472 = vector.shape_cast %471 : vector<384xf32> to vector<1x384xf32>
    %473 = vector.broadcast %472 : vector<1x384xf32> to vector<16x384xf32>
    %474 = arith.addf %469, %473 : vector<16x384xf32>
    %475 = vector.shape_cast %474 : vector<16x384xf32> to vector<2x8x384xf32>
    %476 = vector.extract_strided_slice %475 {offsets = [0, 0, 0], sizes = [2, 4, 128], strides = [1, 1, 1]} : vector<2x8x384xf32> to vector<2x4x128xf32>
    %477 = vector.extract_strided_slice %475 {offsets = [0, 0, 128], sizes = [2, 8, 128], strides = [1, 1, 1]} : vector<2x8x384xf32> to vector<2x8x128xf32>
    %478 = vector.extract_strided_slice %475 {offsets = [0, 0, 256], sizes = [2, 8, 128], strides = [1, 1, 1]} : vector<2x8x384xf32> to vector<2x8x128xf32>
    %479 = vector.extract_strided_slice %476 {offsets = [0, 0, 0], sizes = [2, 4, 64], strides = [1, 1, 1]} : vector<2x4x128xf32> to vector<2x4x64xf32>
    %480 = arith.truncf %479 : vector<2x4x64xf32> to vector<2x4x64xbf16>
    %481 = vector.extract_strided_slice %477 {offsets = [0, 0, 0], sizes = [2, 8, 64], strides = [1, 1, 1]} : vector<2x8x128xf32> to vector<2x8x64xf32>
    %482 = arith.truncf %481 : vector<2x8x64xf32> to vector<2x8x64xbf16>
    %483 = vector.extract_strided_slice %478 {offsets = [0, 0, 0], sizes = [2, 8, 64], strides = [1, 1, 1]} : vector<2x8x128xf32> to vector<2x8x64xf32>
    %484 = arith.truncf %483 : vector<2x8x64xf32> to vector<2x8x64xbf16>
    "tpu.trace_start"() <{level = 10 : i32, message = "bqd,bkd->bqk"}> : () -> ()
    %cst_169 = arith.constant dense<0.000000e+00> : vector<2x4x8xf32>
    %485 = tpu.matmul %480, %482, %cst_169 {dimension_numbers = #tpu.dot_dimension_numbers<[2], [2], [1], [1], [0, 0, 0, 1, 1, 1], [0], [0]>} : vector<2x4x64xbf16>, vector<2x8x64xbf16>, vector<2x4x8xf32> -> vector<2x4x8xf32>
    "tpu.trace_stop"() : () -> ()
    %cst_170 = arith.constant dense<0xFF800000> : vector<2x4xf32>
    %486 = vector.multi_reduction <maximumf>, %485, %cst_170 [2] : vector<2x4x8xf32> to vector<2x4xf32>
    %487 = vector.shape_cast %486 : vector<2x4xf32> to vector<2x4x1xf32>
    %488 = vector.broadcast %487 : vector<2x4x1xf32> to vector<2x4x8xf32>
    %489 = arith.subf %485, %488 : vector<2x4x8xf32>
    %490 = math.exp %489 : vector<2x4x8xf32>
    %cst_171 = arith.constant dense<0.000000e+00> : vector<2x4xf32>
    %491 = vector.multi_reduction <add>, %490, %cst_171 [2] : vector<2x4x8xf32> to vector<2x4xf32>
    %492 = vector.shape_cast %491 : vector<2x4xf32> to vector<2x4x1xf32>
    %493 = tpu.reciprocal %492 {approx = true} : vector<2x4x1xf32> -> vector<2x4x1xf32>
    %494 = vector.broadcast %493 : vector<2x4x1xf32> to vector<2x4x8xf32>
    %495 = arith.mulf %490, %494 : vector<2x4x8xf32>
    %496 = arith.truncf %495 : vector<2x4x8xf32> to vector<2x4x8xbf16>
    "tpu.trace_start"() <{level = 10 : i32, message = "bqk,bkd->bqd"}> : () -> ()
    %cst_172 = arith.constant dense<0.000000e+00> : vector<2x4x64xf32>
    %497 = tpu.matmul %496, %484, %cst_172 {dimension_numbers = #tpu.dot_dimension_numbers<[2], [1], [1], [2], [0, 0, 0, 1, 1, 2], [0], [0]>} : vector<2x4x8xbf16>, vector<2x8x64xbf16>, vector<2x4x64xf32> -> vector<2x4x64xf32>
    "tpu.trace_stop"() : () -> ()
    %498 = vector.extract_strided_slice %476 {offsets = [0, 0, 64], sizes = [2, 4, 64], strides = [1, 1, 1]} : vector<2x4x128xf32> to vector<2x4x64xf32>
    %499 = arith.truncf %498 : vector<2x4x64xf32> to vector<2x4x64xbf16>
    %500 = vector.extract_strided_slice %477 {offsets = [0, 0, 64], sizes = [2, 8, 64], strides = [1, 1, 1]} : vector<2x8x128xf32> to vector<2x8x64xf32>
    %501 = arith.truncf %500 : vector<2x8x64xf32> to vector<2x8x64xbf16>
    %502 = vector.extract_strided_slice %478 {offsets = [0, 0, 64], sizes = [2, 8, 64], strides = [1, 1, 1]} : vector<2x8x128xf32> to vector<2x8x64xf32>
    %503 = arith.truncf %502 : vector<2x8x64xf32> to vector<2x8x64xbf16>
    "tpu.trace_start"() <{level = 10 : i32, message = "bqd,bkd->bqk"}> : () -> ()
    %cst_173 = arith.constant dense<0.000000e+00> : vector<2x4x8xf32>
    %504 = tpu.matmul %499, %501, %cst_173 {dimension_numbers = #tpu.dot_dimension_numbers<[2], [2], [1], [1], [0, 0, 0, 1, 1, 1], [0], [0]>} : vector<2x4x64xbf16>, vector<2x8x64xbf16>, vector<2x4x8xf32> -> vector<2x4x8xf32>
    "tpu.trace_stop"() : () -> ()
    %cst_174 = arith.constant dense<0xFF800000> : vector<2x4xf32>
    %505 = vector.multi_reduction <maximumf>, %504, %cst_174 [2] : vector<2x4x8xf32> to vector<2x4xf32>
    %506 = vector.shape_cast %505 : vector<2x4xf32> to vector<2x4x1xf32>
    %507 = vector.broadcast %506 : vector<2x4x1xf32> to vector<2x4x8xf32>
    %508 = arith.subf %504, %507 : vector<2x4x8xf32>
    %509 = math.exp %508 : vector<2x4x8xf32>
    %cst_175 = arith.constant dense<0.000000e+00> : vector<2x4xf32>
    %510 = vector.multi_reduction <add>, %509, %cst_175 [2] : vector<2x4x8xf32> to vector<2x4xf32>
    %511 = vector.shape_cast %510 : vector<2x4xf32> to vector<2x4x1xf32>
    %512 = tpu.reciprocal %511 {approx = true} : vector<2x4x1xf32> -> vector<2x4x1xf32>
    %513 = vector.broadcast %512 : vector<2x4x1xf32> to vector<2x4x8xf32>
    %514 = arith.mulf %509, %513 : vector<2x4x8xf32>
    %515 = arith.truncf %514 : vector<2x4x8xf32> to vector<2x4x8xbf16>
    "tpu.trace_start"() <{level = 10 : i32, message = "bqk,bkd->bqd"}> : () -> ()
    %cst_176 = arith.constant dense<0.000000e+00> : vector<2x4x64xf32>
    %516 = tpu.matmul %515, %503, %cst_176 {dimension_numbers = #tpu.dot_dimension_numbers<[2], [1], [1], [2], [0, 0, 0, 1, 1, 2], [0], [0]>} : vector<2x4x8xbf16>, vector<2x8x64xbf16>, vector<2x4x64xf32> -> vector<2x4x64xf32>
    "tpu.trace_stop"() : () -> ()
    %517 = tpu.concatenate %497, %516 in 2 : vector<2x4x64xf32>, vector<2x4x64xf32> -> vector<2x4x128xf32>
    %518 = vector.shape_cast %517 : vector<2x4x128xf32> to vector<8x128xf32>
    %c3_177 = arith.constant 3 : index
    %c0_178 = arith.constant 0 : index
    %c0_179 = arith.constant 0 : index
    %519 = vector.load %arg6[%c3_177, %c0_178, %c0_179] : memref<4x128x128xbf16, #tpu.memory_space<vmem>>, vector<1x128x128xbf16>
    %520 = vector.shape_cast %519 : vector<1x128x128xbf16> to vector<128x128xbf16>
    %521 = arith.truncf %518 : vector<8x128xf32> to vector<8x128xbf16>
    %cst_180 = arith.constant dense<0.000000e+00> : vector<8x128xf32>
    %522 = tpu.matmul %521, %520, %cst_180 {dimension_numbers = #tpu.dot_dimension_numbers<[1], [0], [0], [1], [0, 0, 1, 1], [], []>} : vector<8x128xbf16>, vector<128x128xbf16>, vector<8x128xf32> -> vector<8x128xf32>
    %c3_181 = arith.constant 3 : index
    %c0_182 = arith.constant 0 : index
    %523 = vector.load %arg7[%c3_181, %c0_182] : memref<4x128xf32, #tpu.memory_space<vmem>>, vector<1x128xf32>
    %524 = vector.shape_cast %523 : vector<1x128xf32> to vector<128xf32>
    %525 = vector.shape_cast %524 : vector<128xf32> to vector<1x128xf32>
    %526 = vector.broadcast %525 : vector<1x128xf32> to vector<8x128xf32>
    %527 = arith.addf %522, %526 : vector<8x128xf32>
    %528 = vector.extract_strided_slice %438 {offsets = [0, 0, 0], sizes = [2, 4, 128], strides = [1, 1, 1]} : vector<2x8x128xf32> to vector<2x4x128xf32>
    %529 = vector.shape_cast %527 : vector<8x128xf32> to vector<2x4x128xf32>
    %530 = arith.addf %528, %529 : vector<2x4x128xf32>
    %531 = vector.shape_cast %530 : vector<2x4x128xf32> to vector<8x128xf32>
    %c3_183 = arith.constant 3 : index
    %c0_184 = arith.constant 0 : index
    %532 = vector.load %arg8[%c3_183, %c0_184] : memref<4x128xf32, #tpu.memory_space<vmem>>, vector<1x128xf32>
    %533 = vector.shape_cast %532 : vector<1x128xf32> to vector<128xf32>
    %c3_185 = arith.constant 3 : index
    %c0_186 = arith.constant 0 : index
    %534 = vector.load %arg9[%c3_185, %c0_186] : memref<4x128xf32, #tpu.memory_space<vmem>>, vector<1x128xf32>
    %535 = vector.shape_cast %534 : vector<1x128xf32> to vector<128xf32>
    %cst_187 = arith.constant dense<0.000000e+00> : vector<8xf32>
    %536 = vector.multi_reduction <add>, %531, %cst_187 [1] : vector<8x128xf32> to vector<8xf32>
    %537 = vector.shape_cast %536 : vector<8xf32> to vector<8x1xf32>
    %cst_188 = arith.constant 1.280000e+02 : f32
    %538 = vector.broadcast %cst_188 : f32 to vector<8x1xf32>
    %539 = arith.divf %537, %538 : vector<8x1xf32>
    %540 = vector.broadcast %539 : vector<8x1xf32> to vector<8x128xf32>
    %541 = arith.subf %531, %540 : vector<8x128xf32>
    %542 = arith.mulf %541, %541 : vector<8x128xf32>
    %cst_189 = arith.constant dense<0.000000e+00> : vector<8xf32>
    %543 = vector.multi_reduction <add>, %542, %cst_189 [1] : vector<8x128xf32> to vector<8xf32>
    %544 = vector.shape_cast %543 : vector<8xf32> to vector<8x1xf32>
    %cst_190 = arith.constant 1.280000e+02 : f32
    %545 = vector.broadcast %cst_190 : f32 to vector<8x1xf32>
    %546 = arith.divf %544, %545 : vector<8x1xf32>
    %cst_191 = arith.constant 9.99999974E-6 : f32
    %547 = vector.broadcast %cst_191 : f32 to vector<8x1xf32>
    %548 = arith.addf %546, %547 : vector<8x1xf32>
    %549 = math.rsqrt %548 : vector<8x1xf32>
    %550 = vector.broadcast %549 : vector<8x1xf32> to vector<8x128xf32>
    %551 = arith.mulf %541, %550 : vector<8x128xf32>
    %552 = vector.shape_cast %533 : vector<128xf32> to vector<1x128xf32>
    %553 = vector.broadcast %552 : vector<1x128xf32> to vector<8x128xf32>
    %554 = arith.mulf %551, %553 : vector<8x128xf32>
    %555 = vector.shape_cast %535 : vector<128xf32> to vector<1x128xf32>
    %556 = vector.broadcast %555 : vector<1x128xf32> to vector<8x128xf32>
    %557 = arith.addf %554, %556 : vector<8x128xf32>
    %c3_192 = arith.constant 3 : index
    %c0_193 = arith.constant 0 : index
    %c0_194 = arith.constant 0 : index
    %558 = vector.load %arg10[%c3_192, %c0_193, %c0_194] : memref<4x128x512xbf16, #tpu.memory_space<vmem>>, vector<1x128x512xbf16>
    %559 = vector.shape_cast %558 : vector<1x128x512xbf16> to vector<128x512xbf16>
    %560 = arith.truncf %557 : vector<8x128xf32> to vector<8x128xbf16>
    %cst_195 = arith.constant dense<0.000000e+00> : vector<8x512xf32>
    %561 = tpu.matmul %560, %559, %cst_195 {dimension_numbers = #tpu.dot_dimension_numbers<[1], [0], [0], [1], [0, 0, 1, 1], [], []>} : vector<8x128xbf16>, vector<128x512xbf16>, vector<8x512xf32> -> vector<8x512xf32>
    %c3_196 = arith.constant 3 : index
    %c0_197 = arith.constant 0 : index
    %562 = vector.load %arg11[%c3_196, %c0_197] : memref<4x512xf32, #tpu.memory_space<vmem>>, vector<1x512xf32>
    %563 = vector.shape_cast %562 : vector<1x512xf32> to vector<512xf32>
    %564 = vector.shape_cast %563 : vector<512xf32> to vector<1x512xf32>
    %565 = vector.broadcast %564 : vector<1x512xf32> to vector<8x512xf32>
    %566 = arith.addf %561, %565 : vector<8x512xf32>
    %cst_198 = arith.constant 1.702000e+00 : f32
    %567 = vector.broadcast %cst_198 : f32 to vector<8x512xf32>
    %568 = arith.mulf %567, %566 : vector<8x512xf32>
    %569 = arith.negf %568 : vector<8x512xf32>
    %570 = math.exp %569 : vector<8x512xf32>
    %cst_199 = arith.constant 1.000000e+00 : f32
    %571 = vector.broadcast %cst_199 : f32 to vector<8x512xf32>
    %572 = arith.addf %571, %570 : vector<8x512xf32>
    %573 = arith.divf %571, %572 : vector<8x512xf32>
    %574 = arith.mulf %566, %573 : vector<8x512xf32>
    %c3_200 = arith.constant 3 : index
    %c0_201 = arith.constant 0 : index
    %c0_202 = arith.constant 0 : index
    %575 = vector.load %arg12[%c3_200, %c0_201, %c0_202] : memref<4x512x128xbf16, #tpu.memory_space<vmem>>, vector<1x512x128xbf16>
    %576 = vector.shape_cast %575 : vector<1x512x128xbf16> to vector<512x128xbf16>
    %577 = arith.truncf %574 : vector<8x512xf32> to vector<8x512xbf16>
    %cst_203 = arith.constant dense<0.000000e+00> : vector<8x128xf32>
    %578 = tpu.matmul %577, %576, %cst_203 {dimension_numbers = #tpu.dot_dimension_numbers<[1], [0], [0], [1], [0, 0, 1, 1], [], []>} : vector<8x512xbf16>, vector<512x128xbf16>, vector<8x128xf32> -> vector<8x128xf32>
    %c3_204 = arith.constant 3 : index
    %c0_205 = arith.constant 0 : index
    %579 = vector.load %arg13[%c3_204, %c0_205] : memref<4x128xf32, #tpu.memory_space<vmem>>, vector<1x128xf32>
    %580 = vector.shape_cast %579 : vector<1x128xf32> to vector<128xf32>
    %581 = vector.shape_cast %580 : vector<128xf32> to vector<1x128xf32>
    %582 = vector.broadcast %581 : vector<1x128xf32> to vector<8x128xf32>
    %583 = arith.addf %578, %582 : vector<8x128xf32>
    %584 = vector.shape_cast %583 : vector<8x128xf32> to vector<2x4x128xf32>
    %585 = arith.addf %530, %584 : vector<2x4x128xf32>
    %586 = vector.shape_cast %585 : vector<2x4x128xf32> to vector<2x1x512xf32>
    %c0_206 = arith.constant 0 : index
    %c0_207 = arith.constant 0 : index
    %c0_208 = arith.constant 0 : index
    %587 = vector.load %arg14[%c0_206, %c0_207, %c0_208] : memref<2x1x512xf32, #tpu.memory_space<vmem>>, vector<2x1x512xf32>
    tpu.vector_store %arg14[%c0_206, %c0_207, %c0_208], %586 {strides = array<i32>} : memref<2x1x512xf32, #tpu.memory_space<vmem>>, vector<2x1x512xf32>,
    return
  }
  func.func @transform_0(%arg0: i32) -> (i32, i32, i32) {
    %c0_i32 = arith.constant 0 : i32
    %c0_i32_0 = arith.constant 0 : i32
    %c0_i32_1 = arith.constant 0 : i32
    return %arg0, %c0_i32, %c0_i32_0 : i32, i32, i32
  }
  func.func @transform_1(%arg0: i32) -> (i32, i32) {
    %c0_i32 = arith.constant 0 : i32
    %c0_i32_0 = arith.constant 0 : i32
    %c0_i32_1 = arith.constant 0 : i32
    return %c0_i32, %c0_i32_0 : i32, i32
  }
  func.func @transform_2(%arg0: i32) -> (i32, i32) {
    %c0_i32 = arith.constant 0 : i32
    %c0_i32_0 = arith.constant 0 : i32
    %c0_i32_1 = arith.constant 0 : i32
    return %c0_i32, %c0_i32_0 : i32, i32
  }
  func.func @transform_3(%arg0: i32) -> (i32, i32, i32) {
    %c0_i32 = arith.constant 0 : i32
    %c0_i32_0 = arith.constant 0 : i32
    %c0_i32_1 = arith.constant 0 : i32
    %c0_i32_2 = arith.constant 0 : i32
    return %c0_i32, %c0_i32_0, %c0_i32_1 : i32, i32, i32
  }
  func.func @transform_4(%arg0: i32) -> (i32, i32) {
    %c0_i32 = arith.constant 0 : i32
    %c0_i32_0 = arith.constant 0 : i32
    %c0_i32_1 = arith.constant 0 : i32
    return %c0_i32, %c0_i32_0 : i32, i32
  }
  func.func @transform_5(%arg0: i32) -> (i32, i32, i32) {
    %c0_i32 = arith.constant 0 : i32
    %c0_i32_0 = arith.constant 0 : i32
    %c0_i32_1 = arith.constant 0 : i32
    %c0_i32_2 = arith.constant 0 : i32
    return %c0_i32, %c0_i32_0, %c0_i32_1 : i32, i32, i32
  }
  func.func @transform_6(%arg0: i32) -> (i32, i32) {
    %c0_i32 = arith.constant 0 : i32
    %c0_i32_0 = arith.constant 0 : i32
    %c0_i32_1 = arith.constant 0 : i32
    return %c0_i32, %c0_i32_0 : i32, i32
  }
  func.func @transform_7(%arg0: i32) -> (i32, i32) {
    %c0_i32 = arith.constant 0 : i32
    %c0_i32_0 = arith.constant 0 : i32
    %c0_i32_1 = arith.constant 0 : i32
    return %c0_i32, %c0_i32_0 : i32, i32
  }
  func.func @transform_8(%arg0: i32) -> (i32, i32) {
    %c0_i32 = arith.constant 0 : i32
    %c0_i32_0 = arith.constant 0 : i32
    %c0_i32_1 = arith.constant 0 : i32
    return %c0_i32, %c0_i32_0 : i32, i32
  }
  func.func @transform_9(%arg0: i32) -> (i32, i32, i32) {
    %c0_i32 = arith.constant 0 : i32
    %c0_i32_0 = arith.constant 0 : i32
    %c0_i32_1 = arith.constant 0 : i32
    %c0_i32_2 = arith.constant 0 : i32
    return %c0_i32, %c0_i32_0, %c0_i32_1 : i32, i32, i32
  }
  func.func @transform_10(%arg0: i32) -> (i32, i32) {
    %c0_i32 = arith.constant 0 : i32
    %c0_i32_0 = arith.constant 0 : i32
    %c0_i32_1 = arith.constant 0 : i32
    return %c0_i32, %c0_i32_0 : i32, i32
  }
  func.func @transform_11(%arg0: i32) -> (i32, i32, i32) {
    %c0_i32 = arith.constant 0 : i32
    %c0_i32_0 = arith.constant 0 : i32
    %c0_i32_1 = arith.constant 0 : i32
    %c0_i32_2 = arith.constant 0 : i32
    return %c0_i32, %c0_i32_0, %c0_i32_1 : i32, i32, i32
  }
  func.func @transform_12(%arg0: i32) -> (i32, i32) {
    %c0_i32 = arith.constant 0 : i32
    %c0_i32_0 = arith.constant 0 : i32
    %c0_i32_1 = arith.constant 0 : i32
    return %c0_i32, %c0_i32_0 : i32, i32
  }
  func.func @transform_13(%arg0: i32) -> (i32, i32, i32) {
    %c0_i32 = arith.constant 0 : i32
    %c0_i32_0 = arith.constant 0 : i32
    %c0_i32_1 = arith.constant 0 : i32
    return %arg0, %c0_i32, %c0_i32_0 : i32, i32, i32
  }
}

</mosaic_0001>

<bundles_post_ra>
// kernel: tpu_custom_call.1
= control target key start
LH: loop header
LB: loop body
LE: loop exit
PB: predicated region body
PF: predicated region fallthrough
CT: control target
= control target key end

     0   :  { %18 = vsyncpa [#allocation3], 0  ;;  %s9803_s0 = inlined_call_operand.hbm [shape: f32[2,8,128], index: 0, kind: input, shape index: {}]   ;;  %s9804_s1 = inlined_call_operand.hbm [shape: f32[4,128], index: 1, kind: input, shape index: {}]   ;;  %s9805_s2 = inlined_call_operand.hbm [shape: f32[4,128], index: 2, kind: input, shape index: {}]   ;;  %s9806_s3 = inlined_call_operand.hbm [shape: bf16[4,128,384], index: 3, kind: input, shape index: {}]   ;;  %s9807_s4 = inlined_call_operand.vmem [shape: f32[4,384], index: 4, kind: input, shape index: {}]   ;;  %s9808_s5 = inlined_call_operand.hbm [shape: bf16[4,128,128], index: 5, kind: input, shape index: {}]   ;;  %s9809_s6 = inlined_call_operand.hbm [shape: f32[4,128], index: 6, kind: input, shape index: {}]   ;;  %s9810_s7 = inlined_call_operand.hbm [shape: f32[4,128], index: 7, kind: input, shape index: {}]   ;;  %s9811_s8 = inlined_call_operand.hbm [shape: f32[4,128], index: 8, kind: input, shape index: {}]   ;;  %s9812_s9 = inlined_call_operand.hbm [shape: bf16[4,128,512], index: 9, kind: input, shape index: {}]   ;;  %s9813_s10 = inlined_call_operand.vmem [shape: f32[4,512], index: 10, kind: input, shape index: {}]   ;;  %s9814_s11 = inlined_call_operand.hbm [shape: bf16[4,512,128], index: 11, kind: input, shape index: {}]   ;;  %s9815_s12 = inlined_call_operand.vmem [shape: f32[4,128], index: 12, kind: input, shape index: {}]   ;;  %s9816_s13 = inlined_call_operand.hbm [shape: f32[2,1,512], index: 13, kind: output, shape index: {}]  }
   0x1   :  { %19 = vsyncpa [#allocation6], 0 }
   0x2   :  { %20 = vsyncpa [#allocation9], 0 }
   0x3   :  { %21 = vsyncpa [#allocation12], 0 }
   0x4   :  { %22 = vsyncpa [#allocation15], 0 }
   0x5   :  { %23 = vsyncpa [#allocation18], 0 }
   0x6   :  { %24 = vsyncpa [#allocation4], 0  ;;  %s8914_s25 = smov [#allocation5]   ;;  %s8915_s27 = smov [#allocation8]  }
   0x7   :  { %s43_s26 = sshll.u32 %s8914_s25, 4  ;;  %s62_s28 = sshll.u32 %s8915_s27, 4  ;;  %s44_s26 = int_to_ptr.vmem [resolvable:$true] %s43_s26  ;;  %s9011_s28 = int_to_ptr.vmem [resolvable:$true] %s62_s28 }
   0x8   :  { %s8658_s14 = scalar_lea.hbm %s9804_s1, 64 }
   0x9   :  { %p8659_p0 = scmp.ne.s32.totalorder %s9804_s1, %s8658_s14  ;;  %p8662_p1 = scmp.lt.u32.totalorder %s8658_s14, %s9804_s1 }
   0xb   :  { %p8664_p2 = pnand %p8662_p1, %p8659_p0 }
   0xd   :  { %8667 = shalt.err (!%p8664_p2)
}
   0xe   :  { %s8668_s19 = scalar_lea.vmem %s44_s26, 64  ;;  %p8673_p4 = scmp.lt.s32.totalorder %s44_s26, %s44_s26 }
   0xf   :  { %p8669_p3 = scmp.ne.s32.totalorder %s44_s26, %s8668_s19  ;;  %p8674_p5 = scmp.lt.s32.totalorder %s8668_s19, %s8668_s19 }
  0x11   :  { %p8675_p6 = por %p8674_p5, %p8673_p4 }
  0x13   :  { %p8676_p7 = pnand %p8675_p6, %p8669_p3 }
  0x15   :  { %8679 = shalt.err (!%p8676_p7)
}
  0x16   :  { %46 = dma.hbm_to_vmem [thread:$0]  %s9804_s1, 64, %s44_s26, [#allocation6]  }
  0x17   :  { %s8680_s24 = scalar_lea.hbm %s9806_s3, 12288 }
  0x18   :  { %p8681_p8 = scmp.ne.s32.totalorder %s9806_s3, %s8680_s24  ;;  %p8684_p9 = scmp.lt.u32.totalorder %s8680_s24, %s9806_s3 }
  0x1a   :  { %p8686_p10 = pnand %p8684_p9, %p8681_p8 }
  0x1c   :  { %8689 = shalt.err (!%p8686_p10)
}
  0x1d   :  { %s8690_s14 = scalar_lea.vmem %s9011_s28, 12288  ;;  %p8695_p12 = scmp.lt.s32.totalorder %s9011_s28, %s9011_s28 }
  0x1e   :  { %p8691_p11 = scmp.ne.s32.totalorder %s9011_s28, %s8690_s14  ;;  %p8696_p13 = scmp.lt.s32.totalorder %s8690_s14, %s8690_s14 }
  0x20   :  { %p8697_p0 = por %p8696_p13, %p8695_p12 }
  0x22   :  { %p8698_p1 = pnand %p8697_p0, %p8691_p11 }
  0x24   :  { %8701 = shalt.err (!%p8698_p1)
}
  0x25   :  { %s8916_s1 = smov 192   ;;  %s8917_s26 = smov 12  }
  0x26   :  { %68 = dma.hbm_to_vmem [thread:$0]  %s9806_s3, 12288, %s9011_s28, [#allocation9], %s8916_s1, %s8916_s1, %s8917_s26  }
  0x27   :  { %s8918_s17 = smov [#allocation11]   ;;  %s8919_s19 = smov [#allocation14]  }
  0x28   :  { %s89_s18 = sshll.u32 %s8918_s17, 4  ;;  %s109_s20 = sshll.u32 %s8919_s19, 4  ;;  %s90_s18 = int_to_ptr.vmem [resolvable:$true] %s89_s18  ;;  %s110_s20 = int_to_ptr.vmem [resolvable:$true] %s109_s20 }
  0x29   :  { %s8702_s23 = scalar_lea.hbm %s9809_s6, 64 }
  0x2a   :  { %p8703_p2 = scmp.ne.s32.totalorder %s9809_s6, %s8702_s23  ;;  %p8706_p3 = scmp.lt.u32.totalorder %s8702_s23, %s9809_s6 }
  0x2c   :  { %p8708_p4 = pnand %p8706_p3, %p8703_p2 }
  0x2e   :  { %8711 = shalt.err (!%p8708_p4)
}
  0x2f   :  { %s8712_s3 = scalar_lea.vmem %s90_s18, 64  ;;  %p8717_p6 = scmp.lt.s32.totalorder %s90_s18, %s90_s18 }
  0x30   :  { %p8713_p5 = scmp.ne.s32.totalorder %s90_s18, %s8712_s3  ;;  %p8718_p7 = scmp.lt.s32.totalorder %s8712_s3, %s8712_s3 }
  0x32   :  { %p8719_p8 = por %p8718_p7, %p8717_p6 }
  0x34   :  { %p8720_p9 = pnand %p8719_p8, %p8713_p5 }
  0x36   :  { %8723 = shalt.err (!%p8720_p9)
}
  0x37   :  { %92 = dma.hbm_to_vmem [thread:$0]  %s9809_s6, 64, %s90_s18, [#allocation12]  }
  0x38   :  { %s8724_s26 = scalar_lea.hbm %s9811_s8, 64 }
  0x39   :  { %p8725_p10 = scmp.ne.s32.totalorder %s9811_s8, %s8724_s26  ;;  %p8728_p11 = scmp.lt.u32.totalorder %s8724_s26, %s9811_s8 }
  0x3b   :  { %p8730_p12 = pnand %p8728_p11, %p8725_p10 }
  0x3d   :  { %8733 = shalt.err (!%p8730_p12)
}
  0x3e   :  { %s8734_s21 = scalar_lea.vmem %s110_s20, 64  ;;  %p8739_p0 = scmp.lt.s32.totalorder %s110_s20, %s110_s20 }
  0x3f   :  { %p8735_p13 = scmp.ne.s32.totalorder %s110_s20, %s8734_s21  ;;  %p8740_p1 = scmp.lt.s32.totalorder %s8734_s21, %s8734_s21 }
  0x41   :  { %p8741_p2 = por %p8740_p1, %p8739_p0 }
  0x43   :  { %p8742_p3 = pnand %p8741_p2, %p8735_p13 }
  0x45   :  { %8745 = shalt.err (!%p8742_p3)
}
  0x46   :  { %112 = dma.hbm_to_vmem [thread:$0]  %s9811_s8, 64, %s110_s20, [#allocation15]  }
  0x47   :  { %s8920_s22 = smov [#allocation2]   ;;  %s8746_s27 = scalar_lea.hbm %s9803_s0, 256 }
  0x48   :  { %s30_s23 = sshll.u32 %s8920_s22, 4  ;;  %p8747_p4 = scmp.ne.s32.totalorder %s9803_s0, %s8746_s27  ;;  %s31_s23 = int_to_ptr.vmem [resolvable:$true] %s30_s23 }
  0x49   :  { %p8750_p5 = scmp.lt.u32.totalorder %s8746_s27, %s9803_s0 }
  0x4b   :  { %p8752_p6 = pnand %p8750_p5, %p8747_p4 }
  0x4d   :  { %8755 = shalt.err (!%p8752_p6)
}
  0x4e   :  { %s8756_s14 = scalar_lea.vmem %s31_s23, 256  ;;  %p8761_p8 = scmp.lt.s32.totalorder %s31_s23, %s31_s23 }
  0x4f   :  { %p8757_p7 = scmp.ne.s32.totalorder %s31_s23, %s8756_s14  ;;  %p8762_p9 = scmp.lt.s32.totalorder %s8756_s14, %s8756_s14 }
  0x51   :  { %p8763_p10 = por %p8762_p9, %p8761_p8 }
  0x53   :  { %p8764_p11 = pnand %p8763_p10, %p8757_p7 }
  0x55   :  { %8767 = shalt.err (!%p8764_p11)
}
  0x56   :  { %s8921_s8 = smov 128   ;;  %s8922_s20 = smov 8  }
  0x57   :  { %36 = dma.hbm_to_vmem [thread:$0]  %s9803_s0, 256, %s31_s23, [#allocation3], %s8921_s8, %s8921_s8, %s8922_s20  }
  0x58   :  { %s8923_s15 = smov [#allocation7]   ;;  %s8924_s17 = smov [#allocation10]  }
  0x59   :  { %s53_s16 = sshll.u32 %s8923_s15, 4  ;;  %s76_s19 = sshll.u32 %s8924_s17, 4  ;;  %s54_s16 = int_to_ptr.vmem [resolvable:$true] %s53_s16  ;;  %s77_s19 = int_to_ptr.vmem [resolvable:$true] %s76_s19 }
  0x5a   :  { %s8768_s18 = scalar_lea.hbm %s9805_s2, 64 }
  0x5b   :  { %p8769_p12 = scmp.ne.s32.totalorder %s9805_s2, %s8768_s18  ;;  %p8772_p13 = scmp.lt.u32.totalorder %s8768_s18, %s9805_s2 }
  0x5d   :  { %p8774_p0 = pnand %p8772_p13, %p8769_p12 }
  0x5f   :  { %8777 = shalt.err (!%p8774_p0)
}
  0x60   :  { %s8778_s0 = scalar_lea.vmem %s54_s16, 64  ;;  %p8783_p2 = scmp.lt.s32.totalorder %s54_s16, %s54_s16 }
  0x61   :  { %p8779_p1 = scmp.ne.s32.totalorder %s54_s16, %s8778_s0  ;;  %p8784_p3 = scmp.lt.s32.totalorder %s8778_s0, %s8778_s0 }
  0x63   :  { %p8785_p4 = por %p8784_p3, %p8783_p2 }
  0x65   :  { %p8786_p5 = pnand %p8785_p4, %p8779_p1 }
  0x67   :  { %8789 = shalt.err (!%p8786_p5)
}
  0x68   :  { %56 = dma.hbm_to_vmem [thread:$0]  %s9805_s2, 64, %s54_s16, [#allocation6]  }
  0x69   :  { %s8790_s30 = scalar_lea.hbm %s9808_s5, 4096 }
  0x6a   :  { %p8791_p6 = scmp.ne.s32.totalorder %s9808_s5, %s8790_s30  ;;  %p8794_p7 = scmp.lt.u32.totalorder %s8790_s30, %s9808_s5 }
  0x6c   :  { %p8796_p8 = pnand %p8794_p7, %p8791_p6 }
  0x6e   :  { %8799 = shalt.err (!%p8796_p8)
}
  0x6f   :  { %s8800_s26 = scalar_lea.vmem %s77_s19, 4096  ;;  %p8805_p10 = scmp.lt.s32.totalorder %s77_s19, %s77_s19 }
  0x70   :  { %p8801_p9 = scmp.ne.s32.totalorder %s77_s19, %s8800_s26  ;;  %p8806_p11 = scmp.lt.s32.totalorder %s8800_s26, %s8800_s26 }
  0x72   :  { %p8807_p12 = por %p8806_p11, %p8805_p10 }
  0x74   :  { %p8808_p13 = pnand %p8807_p12, %p8801_p9 }
  0x76   :  { %8811 = shalt.err (!%p8808_p13)
}
  0x77   :  { %s8925_s2 = smov 64   ;;  %s8926_s15 = smov 4  }
  0x78   :  { %82 = dma.hbm_to_vmem [thread:$0]  %s9808_s5, 4096, %s77_s19, [#allocation9], %s8925_s2, %s8925_s2, %s8926_s15  }
  0x79   :  { %s8927_s21 = smov [#allocation13]   ;;  %s8928_s18 = smov [#allocation16]  }
  0x7a   :  { %s99_s6 = sshll.u32 %s8927_s21, 4  ;;  %s118_s22 = sshll.u32 %s8928_s18, 4  ;;  %s100_s6 = int_to_ptr.vmem [resolvable:$true] %s99_s6  ;;  %s119_s22 = int_to_ptr.vmem [resolvable:$true] %s118_s22 }
  0x7b   :  { %s8812_s27 = scalar_lea.hbm %s9810_s7, 64 }
  0x7c   :  { %p8813_p0 = scmp.ne.s32.totalorder %s9810_s7, %s8812_s27  ;;  %p8816_p1 = scmp.lt.u32.totalorder %s8812_s27, %s9810_s7 }
  0x7e   :  { %p8818_p2 = pnand %p8816_p1, %p8813_p0 }
  0x80   :  { %8821 = shalt.err (!%p8818_p2)
}
  0x81   :  { %s8822_s5 = scalar_lea.vmem %s100_s6, 64  ;;  %p8827_p4 = scmp.lt.s32.totalorder %s100_s6, %s100_s6 }
  0x82   :  { %p8823_p3 = scmp.ne.s32.totalorder %s100_s6, %s8822_s5  ;;  %p8828_p5 = scmp.lt.s32.totalorder %s8822_s5, %s8822_s5 }
  0x84   :  { %p8829_p6 = por %p8828_p5, %p8827_p4 }
  0x86   :  { %p8830_p7 = pnand %p8829_p6, %p8823_p3 }
  0x88   :  { %8833 = shalt.err (!%p8830_p7)
}
  0x89   :  { %102 = dma.hbm_to_vmem [thread:$0]  %s9810_s7, 64, %s100_s6, [#allocation12]  }
  0x8a   :  { %s8834_s8 = scalar_lea.hbm %s9812_s9, 16384 }
  0x8b   :  { %p8835_p8 = scmp.ne.s32.totalorder %s9812_s9, %s8834_s8  ;;  %p8838_p9 = scmp.lt.u32.totalorder %s8834_s8, %s9812_s9 }
  0x8d   :  { %p8840_p10 = pnand %p8838_p9, %p8835_p8 }
  0x8f   :  { %8843 = shalt.err (!%p8840_p10)
}
  0x90   :  { %s8844_s17 = scalar_lea.vmem %s119_s22, 16384  ;;  %p8849_p12 = scmp.lt.s32.totalorder %s119_s22, %s119_s22 }
  0x91   :  { %p8845_p11 = scmp.ne.s32.totalorder %s119_s22, %s8844_s17  ;;  %p8850_p13 = scmp.lt.s32.totalorder %s8844_s17, %s8844_s17 }
  0x93   :  { %p8851_p0 = por %p8850_p13, %p8849_p12 }
  0x95   :  { %p8852_p1 = pnand %p8851_p0, %p8845_p11 }
  0x97   :  { %8855 = shalt.err (!%p8852_p1)
}
  0x98   :  { %s8929_s7 = smov 256   ;;  %s8930_s21 = smov 16  }
  0x99   :  { %124 = dma.hbm_to_vmem [thread:$0]  %s9812_s9, 16384, %s119_s22, [#allocation15], %s8929_s7, %s8929_s7, %s8930_s21  }
  0x9a   :  { %s8931_s24 = smov [#allocation17]   ;;  %s8856_s23 = scalar_lea.hbm %s9814_s11, 16384 }
  0x9b   :  { %s132_s25 = sshll.u32 %s8931_s24, 4  ;;  %p8857_p2 = scmp.ne.s32.totalorder %s9814_s11, %s8856_s23  ;;  %s133_s25 = int_to_ptr.vmem [resolvable:$true] %s132_s25 }
  0x9c   :  { %p8860_p3 = scmp.lt.u32.totalorder %s8856_s23, %s9814_s11 }
  0x9e   :  { %p8862_p4 = pnand %p8860_p3, %p8857_p2 }
  0xa0   :  { %8865 = shalt.err (!%p8862_p4)
}
  0xa1   :  { %s8866_s28 = scalar_lea.vmem %s133_s25, 16384  ;;  %p8871_p6 = scmp.lt.s32.totalorder %s133_s25, %s133_s25 }
  0xa2   :  { %p8867_p5 = scmp.ne.s32.totalorder %s133_s25, %s8866_s28  ;;  %p8872_p7 = scmp.lt.s32.totalorder %s8866_s28, %s8866_s28 }
  0xa4   :  { %p8873_p8 = por %p8872_p7, %p8871_p6 }
  0xa6   :  { %p8874_p9 = pnand %p8873_p8, %p8867_p5 }
  0xa8   :  { %8877 = shalt.err (!%p8874_p9)
}
  0xa9   :  { %138 = dma.hbm_to_vmem [thread:$0]  %s9814_s11, 16384, %s133_s25, [#allocation18], %s8925_s2, %s8925_s2, %s8926_s15  }
  0xaa   :  { %8900 = dma.done.wait [#allocation3], 256  }
  0xab   :  { %8901 = vsyncadd [#allocation3], 4294967040 }
  0xac   :  { %8902 = dma.done.wait [#allocation6], 128  }
  0xad   :  { %8903 = vsyncadd [#allocation6], 4294967168 }
  0xae   :  { %8904 = dma.done.wait [#allocation9], 16384  }
  0xaf   :  { %8905 = vsyncadd [#allocation9], 4294950912 }
  0xb0   :  { %8906 = dma.done.wait [#allocation12], 128  }
  0xb1   :  { %8907 = vsyncadd [#allocation12], 4294967168 }
  0xb2   :  { %8908 = dma.done.wait [#allocation15], 16448  }
  0xb3   :  { %8909 = vsyncadd [#allocation15], 4294950848 }
  0xb4   :  { %8910 = dma.done.wait [#allocation18], 16384  }
  0xb5   :  { %8911 = vsyncadd [#allocation18], 4294950912  ;;  %v172_v0 = vld [vmem:[#allocation2] sm:$0xff]  ;;  %v173_v1 = vld [vmem:[#allocation2 + $0x8] sm:$0xff]  ;;  %v8932_v4 = vmov 0.0   ;;  %v8933_v32 = vmov 0   ;;  %v246_v53 = vlaneseq }
  0xb6   :  { %176 = vadd.xlane.f32.xlu0 %v172_v0  ;;  %v7970_v2 = vld [vmem:[#allocation8 + $0x4] ss:$12 sps:$4 sm:$0xff]   ;;  %v7972_v3 = vld [vmem:[#allocation8] ss:$12 sps:$4 sm:$0xff]   ;;  %7576 = vmatprep.subr.bf16.mxu1 %v8932_v4  ;;  %v7973_v5 = vld [vmem:[#allocation8 + $0x8] ss:$12 sps:$4 sm:$0xff]  }
  0xb7   :  { %v7974_v6 = vld [vmem:[#allocation8 + $0x1c] ss:$12 sps:$4 sm:$0xff]   ;;  %389 = vmatprep.subr.bf16.mxu0 %v7970_v2  ;;  %7577 = vmatpush3.bf16.msra.mxu1 %v7973_v5  ;;  %v7976_v15 = vld [vmem:[#allocation8 + $0x18] ss:$12 sps:$4 sm:$0xff]   ;;  %v7977_v16 = vld [vmem:[#allocation8 + $0x20] ss:$12 sps:$4 sm:$0xff]  }
  0xb8   :  { %390 = vmatpush1.bf16.msra.mxu0 %v7972_v3  ;;  %7578 = vmatprep.subr.bf16.mxu1 %v8932_v4  ;;  %v7978_v17 = vld [vmem:[#allocation8 + $0x34] ss:$12 sps:$4 sm:$0xff]   ;;  %v7980_v18 = vld [vmem:[#allocation8 + $0x30] ss:$12 sps:$4 sm:$0xff]   ;;  %v7981_v19 = vld [vmem:[#allocation8 + $0x38] ss:$12 sps:$4 sm:$0xff]  }
  0xb9   :  { %391 = vmatprep.subr.bf16.mxu0 %v7974_v6  ;;  %v7982_v20 = vld [vmem:[#allocation8 + $0x4c] ss:$12 sps:$4 sm:$0xff]   ;;  %v7984_v21 = vld [vmem:[#allocation8 + $0x48] ss:$12 sps:$4 sm:$0xff]   ;;  %v7985_v22 = vld [vmem:[#allocation8 + $0x50] ss:$12 sps:$4 sm:$0xff]   ;;  %421 = vmatprep.mubr.bf16.mxu0 %v8933_v32 }
  0xba   :  { %178 = vadd.xlane.f32.xlu0 %v173_v1  ;;  %v7986_v23 = vld [vmem:[#allocation8 + $0x64] ss:$12 sps:$4 sm:$0xff]   ;;  %v7988_v24 = vld [vmem:[#allocation8 + $0x60] ss:$12 sps:$4 sm:$0xff]   ;;  %v7989_v25 = vld [vmem:[#allocation8 + $0x68] ss:$12 sps:$4 sm:$0xff]  }
  0xbb   :  { %7579 = vmatpush3.bf16.msra.mxu1 %v7977_v16  ;;  %v7990_v26 = vld [vmem:[#allocation8 + $0x7c] ss:$12 sps:$4 sm:$0xff]   ;;  %v7992_v27 = vld [vmem:[#allocation8 + $0x78] ss:$12 sps:$4 sm:$0xff]   ;;  %v7993_v28 = vld [vmem:[#allocation8 + $0x80] ss:$12 sps:$4 sm:$0xff]  }
  0xbc   :  { %392 = vmatpush1.bf16.msra.mxu0 %v7976_v15  ;;  %7580 = vmatprep.subr.bf16.mxu1 %v8932_v4  ;;  %v7994_v29 = vld [vmem:[#allocation8 + $0x94] ss:$12 sps:$4 sm:$0xff]   ;;  %v7996_v30 = vld [vmem:[#allocation8 + $0x90] ss:$12 sps:$4 sm:$0xff]   ;;  %v7997_v31 = vld [vmem:[#allocation8 + $0x98] ss:$12 sps:$4 sm:$0xff]  }
  0xbd   :  { %393 = vmatprep.subr.bf16.mxu0 %v7978_v17  ;;  %vm8934_vm0 = vmmov 0   ;;  %v7998_v33 = vld [vmem:[#allocation8 + $0xac] ss:$12 sps:$4 sm:$0xff]   ;;  %v8000_v34 = vld [vmem:[#allocation8 + $0xa8] ss:$12 sps:$4 sm:$0xff]   ;;  %v9172_v54 = vshrl.u32 %v246_v53, 7 }
  0xbe   :  { %7592 = vmatprep.mubr.msk.bf16.mxu1 %vm8934_vm0, %v8932_v4  ;;  %v8001_v35 = vld [vmem:[#allocation8 + $0xb0] ss:$12 sps:$4 sm:$0xff]   ;;  %v6790_v44 = vld [vmem:[#allocation5] ss:$0 sm:$0xff]  ;;  %vm479_vm1 = vcmask 523264   ;;  %vm600_vm2 = vcmask 1043456  }
  0xbf   :  { %7581 = vmatpush3.bf16.msra.mxu1 %v7981_v19  ;;  %v6791_v48 = vld [vmem:[#allocation7] ss:$0 sm:$0xff]  ;;  %v9175_v55 = vsub.s32 1, %v9172_v54  ;;  %v244_v56 = vld [vmem:[%s9807_s4] ss:$4 sm:$0x7] }
  0xc0   :  { %394 = vmatpush1.bf16.msra.mxu0 %v7980_v18  ;;  %7582 = vmatprep.subr.bf16.mxu1 %v8932_v4  ;;  %v9181_v57 = vsub.s32 2, %v9172_v54  ;;  %v9185_v59 = vsub.s32 0, %v9172_v54  ;;  %vm572_vm3 = vcmask 64512   ;;  %vm5421_vm4 = vcmask 60416  }
  0xc1   :  { %395 = vmatprep.subr.bf16.mxu0 %v7982_v20  ;;  %v253_v58 = vrot.slane %v244_v56, %v9175_v55  ;;  %vm6764_vm5 = vcmp.lt.s32.totalorder %v246_v53, 512 }
  0xc2   :  { %v257_v62 = vrot.slane %v244_v56, %v9181_v57 }
  0xc3   :  { %7583 = vmatpush3.bf16.msra.mxu1 %v7985_v22 }
  0xc4   :  { %396 = vmatpush1.bf16.msra.mxu0 %v7984_v21  ;;  %7584 = vmatprep.subr.bf16.mxu1 %v8932_v4 }
  0xc5   :  { %397 = vmatprep.subr.bf16.mxu0 %v7986_v23 }
  0xc7   :  { %7585 = vmatpush3.bf16.msra.mxu1 %v7989_v25 }
  0xc8   :  { %398 = vmatpush1.bf16.msra.mxu0 %v7988_v24  ;;  %7586 = vmatprep.subr.bf16.mxu1 %v8932_v4 }
  0xc9   :  { %399 = vmatprep.subr.bf16.mxu0 %v7990_v26 }
  0xcb   :  { %7587 = vmatpush3.bf16.msra.mxu1 %v7993_v28 }
  0xcc   :  { %400 = vmatpush1.bf16.msra.mxu0 %v7992_v27  ;;  %7588 = vmatprep.subr.bf16.mxu1 %v8932_v4 }
  0xcd   :  { %401 = vmatprep.subr.bf16.mxu0 %v7994_v29 }
  0xcf   :  { %7589 = vmatpush3.bf16.msra.mxu1 %v7997_v31 }
  0xd0   :  { %402 = vmatpush1.bf16.msra.mxu0 %v7996_v30  ;;  %7590 = vmatprep.subr.bf16.mxu1 %v8932_v4 }
  0xd1   :  { %403 = vmatprep.subr.bf16.mxu0 %v7998_v33 }
  0xd3   :  { %7591 = vmatpush3.bf16.msra.mxu1 %v8001_v35 }
  0xd4   :  { %404 = vmatpush1.bf16.msra.mxu0 %v8000_v34  ;;  %7596 = vmatprep.subr.bf16.mxu1 %v8932_v4 }
  0xd5   :  { %7620 = vmatprep.subr.bf16.mxu0 %v8932_v4 }
 0x143   :  { %v177_v7 = vpop.xlane.xlu0 %176 }
 0x144   :  { %v181_v8 = vmul.f32 0.0078125, %v177_v7 }
 0x146   :  { %v9146_v9 = vsub.f32 %v172_v0, %v181_v8  ;;  %v249_v8 = vrot.slane %v244_v56, %v9185_v59 }
 0x147   :  { %v179_v10 = vpop.xlane.xlu0 %178 }
 0x148   :  { %v182_v11 = vmul.f32 0.0078125, %v179_v10  ;;  %v185_v12 = vmul.f32 %v9146_v9, %v9146_v9 }
 0x14a   :  { %v9150_v13 = vsub.f32 %v173_v1, %v182_v11  ;;  %187 = vadd.xlane.f32.xlu1 %v185_v12 }
 0x14c   :  { %v186_v14 = vmul.f32 %v9150_v13, %v9150_v13 }
 0x14e   :  { %189 = vadd.xlane.f32.xlu1 %v186_v14 }
 0x1d7   :  { %v188_v36 = vpop.xlane.xlu1 %187 }
 0x1d8   :  { %v191_v37 = vmul.f32 0.0078125, %v188_v36 }
 0x1da   :  { %v193_v38 = vadd.f32 1e-05, %v191_v37 }
 0x1db   :  { %v190_v39 = vpop.xlane.xlu1 %189 }
 0x1dc   :  { %8450 = vrsqrt.f32 %v193_v38  ;;  %v192_v40 = vmul.f32 0.0078125, %v190_v39 }
 0x1de   :  { %v194_v41 = vadd.f32 1e-05, %v192_v40 }
 0x1e0   :  { %8452 = vrsqrt.f32 %v194_v41 }
 0x1e6   :  { %v8451_v42 = vpop.eup %8450 }
 0x1e7   :  { %v197_v43 = vmul.f32 %v8451_v42, %v9146_v9 }
 0x1e9   :  { %v203_v47 = vmul.f32 %v6790_v44, %v197_v43 }
 0x1ea   :  { %v8453_v45 = vpop.eup %8452 }
 0x1eb   :  { %v198_v46 = vmul.f32 %v8453_v45, %v9150_v13  ;;  %v209_v50 = vadd.f32 %v6791_v48, %v203_v47 }
 0x1ed   :  { %v204_v49 = vmul.f32 %v6790_v44, %v198_v46 }
 0x1ef   :  { %v210_v51 = vadd.f32 %v6791_v48, %v204_v49 }
 0x1f1   :  { %v243_v52 = vpack.c.bf16 %v210_v51, %v209_v50 }
 0x1f3   :  { %422 = vmatmul.mubr.bf16.vlgmr.msra.gmra.mrb[0].mxu0 %v243_v52  ;;  %7593 = vmatmul.mubr.bf16.vlgmr.msra.gmra.mrb[0].mxu1 %v243_v52 }
 0x1f4   :  { %7598 = vmatprep.mubr.msk.bf16.mxu1 %vm8934_vm0, %v8932_v4  ;;  %7622 = vmatprep.mubr.msk.bf16.mxu0 %vm8934_vm0, %v8932_v4 }
 0x2c6   :  { %v423_v60 = vpop.f32.mrb[0].mxu0  ;;  %v466_v61 = vpop.f32.mrb[0].mxu1 }
 0x2c7   :  { %v425_v63 = vpop.f32.mrb[1].mxu0  ;;  %v7594_v0 = vpop.f32.mrb[1].mxu1  ;;  %v424_v12 = vadd.f32 %v423_v60, %v249_v8  ;;  %v467_v15 = vadd.f32 %v466_v61, %v257_v62 }
 0x2c8   :  { %v426_v1 = vadd.f32 %v425_v63, %v253_v58  ;;  %v427_v2 = vpop.f32.mrb[2].mxu0  ;;  %v469_v3 = vpop.f32.mrb[2].mxu1 }
 0x2c9   :  { %v9188_v5 = vadd.f32 %v469_v3, %v257_v62  ;;  %v429_v6 = vpop.f32.mrb[3].mxu0  ;;  %v7595_v7 = vpop.f32.mrb[3].mxu1  ;;  %v473_v14 = vpack.c.bf16 %v424_v12, %v424_v12  ;;  %v428_v17 = vadd.f32 %v427_v2, %v249_v8  ;;  %v9198_v18 = vpack.c.bf16 %v467_v15, %v467_v15 }
 0x2ca   :  { %v475_v9 = vpack.c.bf16 %v426_v1, %v426_v1  ;;  %v430_v11 = vadd.f32 %v429_v6, %v253_v58 }
 0x2cb   :  { %v474_v19 = vpack.c.bf16 %v428_v17, %v428_v17  ;;  %v602_v20 = vsel %vm600_vm2, %v9198_v18, 0  ;;  %v478_v48 = vpack.c.bf16 %v9188_v5, %v9188_v5 }
 0x2cc   :  { %v484_v10 = vsel %vm479_vm1, %v475_v9, 0  ;;  %v476_v13 = vpack.c.bf16 %v430_v11, %v430_v11 }
 0x2cd   :  { %7597 = vmatpush3.bf16.xpose.msra.mxu1 %v484_v10  ;;  %v648_v52 = vsel %vm600_vm2, %v478_v48, 0 }
 0x2ce   :  { %7602 = vmatprep.subr.bf16.mxu1 %v8932_v4  ;;  %v530_v16 = vsel %vm479_vm1, %v476_v13, 0 }
 0x2d4   :  { %7599 = vmatmul.mubr.msk.bf16.vlgmr.msra.gmra.mrb[4].mxu1 %vm479_vm1, %v473_v14 }
 0x2d5   :  { %7603 = vmatpush3.bf16.xpose.msra.mxu1 %v530_v16  ;;  %7604 = vmatprep.mubr.msk.bf16.mxu1 %vm8934_vm0, %v8932_v4 }
 0x2d6   :  { %7608 = vmatprep.subr.bf16.mxu1 %v8932_v4 }
 0x2dc   :  { %7605 = vmatmul.mubr.msk.bf16.vlgmr.msra.gmra.mrb[8].mxu1 %vm479_vm1, %v474_v19 }
 0x2dd   :  { %7609 = vmatpush3.bf16.msra.mxu1 %v602_v20  ;;  %7610 = vmatprep.mubr.msk.bf16.mxu1 %vm8934_vm0, %v8932_v4 }
 0x2de   :  { %7614 = vmatprep.subr.bf16.mxu1 %v8932_v4 }
 0x3a7   :  { %v520_v21 = vpop.f32.mrb[4].mxu1 }
 0x3a8   :  { %v7600_v22 = vpop.f32.mrb[5].mxu1  ;;  %v573_v23 = vsel %vm572_vm3, %v520_v21, -inf }
 0x3a9   :  { %574 = vmax.xlane.f32.xlu0 %v573_v23  ;;  %v523_v24 = vpop.f32.mrb[6].mxu1 }
 0x3aa   :  { %v7601_v25 = vpop.f32.mrb[7].mxu1 }
 0x3af   :  { %v566_v26 = vpop.f32.mrb[8].mxu1 }
 0x3b0   :  { %v7606_v27 = vpop.f32.mrb[9].mxu1  ;;  %v576_v28 = vsel %vm572_vm3, %v566_v26, -inf }
 0x3b1   :  { %577 = vmax.xlane.f32.xlu1 %v576_v28  ;;  %v569_v29 = vpop.f32.mrb[10].mxu1 }
 0x3b2   :  { %v7607_v30 = vpop.f32.mrb[11].mxu1 }
 0x3c2   :  { %746 = vrot.lane.b32.xlu1 %v476_v13, %s8925_s2 }
 0x436   :  { %v575_v31 = vpop.xlane.xlu0 %574 }
 0x437   :  { %v579_v33 = vsub.f32 %v520_v21, %v575_v31 }
 0x439   :  { %v581_v34 = vmul.f32 1.442695, %v579_v33 }
 0x43b   :  { %8454 = vpow2.f32 %v581_v34 }
 0x43e   :  { %v578_v35 = vpop.xlane.xlu1 %577 }
 0x43f   :  { %v580_v36 = vsub.f32 %v566_v26, %v578_v35 }
 0x441   :  { %v583_v37 = vmul.f32 1.442695, %v580_v36 }
 0x442   :  { %v747_v43 = vpop.permute.xlu1 %746 }
 0x443   :  { %8456 = vpow2.f32 %v583_v37  ;;  %v752_v61 = vsel %vm479_vm1, %v747_v43, 0  ;;  %v8004_v43 = vld [vmem:[#allocation10 + $0x10] sm:$0xff]  }
 0x445   :  { %v8455_v38 = vpop.eup %8454 }
 0x446   :  { %v585_v39 = vsel %vm572_vm3, %v8455_v38, 0.0 }
 0x447   :  { %586 = vadd.xlane.f32.xlu0 %v585_v39 }
 0x44d   :  { %v8457_v40 = vpop.eup %8456 }
 0x44e   :  { %v588_v41 = vsel %vm572_vm3, %v8457_v40, 0.0 }
 0x44f   :  { %589 = vadd.xlane.f32.xlu1 %v588_v41  ;;  %v8002_v41 = vld [vmem:[#allocation10] sm:$0xff]  }
 0x45d   :  { %694 = vrot.lane.b32.xlu0 %v475_v9, %s8925_s2 }
 0x460   :  { %691 = vrot.lane.b32.xlu1 %v473_v14, %s8925_s2 }
 0x464   :  { %743 = vrot.lane.b32.xlu1 %v474_v19, %s8925_s2 }
 0x4d4   :  { %v587_v42 = vpop.xlane.xlu0 %586 }
 0x4d5   :  { %8458 = vrcp.f32 %v587_v42  ;;  %v8003_v42 = vld [vmem:[#allocation10 + $0x8] sm:$0xff]  }
 0x4d8   :  { %v695_v44 = vpop.permute.xlu0 %694 }
 0x4d9   :  { %v700_v45 = vsel %vm479_vm1, %v695_v44, 0  ;;  %v8005_v44 = vld [vmem:[#allocation10 + $0x18] sm:$0xff]  }
 0x4da   :  { %7621 = vmatpush3.bf16.xpose.msra.mxu0 %v700_v45  ;;  %v8006_v45 = vld [vmem:[#allocation10 + $0x20] sm:$0xff]  }
 0x4db   :  { %7632 = vmatprep.subr.bf16.mxu0 %v8932_v4 }
 0x4dc   :  { %v590_v46 = vpop.xlane.xlu1 %589 }
 0x4dd   :  { %8460 = vrcp.f32 %v590_v46  ;;  %v8007_v46 = vld [vmem:[#allocation10 + $0x28] sm:$0xff]  }
 0x4df   :  { %v8459_v47 = vpop.eup %8458 }
 0x4e0   :  { %v593_v49 = vmul.f32 %v8459_v47, %v8455_v38  ;;  %v692_v50 = vpop.permute.xlu1 %691  ;;  %v8008_v47 = vld [vmem:[#allocation10 + $0x30] sm:$0xff]  }
 0x4e1   :  { %7623 = vmatmul.mubr.msk.bf16.vlgmr.msra.gmra.mrb[4].mxu0 %vm479_vm1, %v692_v50 }
 0x4e2   :  { %v595_v51 = vpack.c.bf16 %v593_v49, %v593_v49  ;;  %7634 = vmatprep.mubr.msk.bf16.mxu0 %vm8934_vm0, %v8932_v4 }
 0x4e4   :  { %7611 = vmatmul.mubr.msk.bf16.vlgmr.msra.gmra.mrb[12].mxu1 %vm572_vm3, %v595_v51  ;;  %v744_v62 = vpop.permute.xlu1 %743 }
 0x4e5   :  { %7615 = vmatpush3.bf16.msra.mxu1 %v648_v52  ;;  %7616 = vmatprep.mubr.msk.bf16.mxu1 %vm8934_vm0, %v8932_v4 }
 0x4e6   :  { %7626 = vmatprep.subr.bf16.mxu1 %v8932_v4 }
 0x4e7   :  { %v8461_v56 = vpop.eup %8460 }
 0x4e8   :  { %v594_v58 = vmul.f32 %v8461_v56, %v8457_v40 }
 0x4ea   :  { %v596_v60 = vpack.c.bf16 %v594_v58, %v594_v58 }
 0x4ec   :  { %7617 = vmatmul.mubr.msk.bf16.vlgmr.msra.gmra.mrb[16].mxu1 %vm572_vm3, %v596_v60 }
 0x4ed   :  { %7628 = vmatprep.mubr.msk.bf16.mxu1 %vm8934_vm0, %v8932_v4 }
 0x4ee   :  { %7627 = vmatpush3.bf16.xpose.msra.mxu1 %v752_v61 }
 0x4ef   :  { %7638 = vmatprep.subr.bf16.mxu1 %v8932_v4 }
 0x4f5   :  { %7629 = vmatmul.mubr.msk.bf16.vlgmr.msra.gmra.mrb[20].mxu1 %vm479_vm1, %v744_v62 }
 0x4f6   :  { %7640 = vmatprep.mubr.msk.bf16.mxu1 %vm8934_vm0, %v8932_v4 }
 0x5b4   :  { %v736_v63 = vpop.f32.mrb[4].mxu0 }
 0x5b5   :  { %v7624_v0 = vpop.f32.mrb[5].mxu0  ;;  %v794_v1 = vsel %vm572_vm3, %v736_v63, -inf }
 0x5b6   :  { %795 = vmax.xlane.f32.xlu0 %v794_v1  ;;  %v739_v2 = vpop.f32.mrb[6].mxu0 }
 0x5b7   :  { %v9235_v3 = vpop.f32.mrb[12].mxu1  ;;  %v7625_v5 = vpop.f32.mrb[7].mxu0 }
 0x5b8   :  { %v7612_v6 = vpop.f32.mrb[13].mxu1 }
 0x5b9   :  { %v641_v7 = vpop.f32.mrb[14].mxu1 }
 0x5ba   :  { %v7613_v8 = vpop.f32.mrb[15].mxu1  ;;  %v6824_v7 = vld [vmem:[#allocation11] ss:$0 sm:$0xff] }
 0x5bf   :  { %v9237_v9 = vpop.f32.mrb[16].mxu1 }
 0x5c0   :  { %v7618_v10 = vpop.f32.mrb[17].mxu1 }
 0x5c1   :  { %v687_v11 = vpop.f32.mrb[18].mxu1 }
 0x5c2   :  { %v7619_v12 = vpop.f32.mrb[19].mxu1 }
 0x5c8   :  { %v788_v13 = vpop.f32.mrb[20].mxu1 }
 0x5c9   :  { %v7630_v14 = vpop.f32.mrb[21].mxu1  ;;  %v797_v15 = vsel %vm572_vm3, %v788_v13, -inf }
 0x5ca   :  { %798 = vmax.xlane.f32.xlu1 %v797_v15  ;;  %v791_v16 = vpop.f32.mrb[22].mxu1 }
 0x5cb   :  { %v7631_v17 = vpop.f32.mrb[23].mxu1 }
 0x5cc   :  { %v8657_v17 = vld [vmem:[#allocation2 + $0x8] sm:$0xff] }
 0x5db   :  { %868 = vrot.lane.b32.xlu1 %v478_v48, %s8925_s2  ;;  %v8009_v48 = vld [vmem:[#allocation10 + $0x38] sm:$0xff]  }
 0x643   :  { %v796_v19 = vpop.xlane.xlu0 %795 }
 0x644   :  { %v800_v20 = vsub.f32 %v736_v63, %v796_v19 }
 0x646   :  { %v802_v21 = vmul.f32 1.442695, %v800_v20  ;;  %v8013_v20 = vld [vmem:[#allocation16 + $0x8] ss:$16 sps:$4 sm:$0xff]  }
 0x648   :  { %8462 = vpow2.f32 %v802_v21  ;;  %v8015_v21 = vld [vmem:[#allocation16 + $0xc] ss:$16 sps:$4 sm:$0xff]  }
 0x652   :  { %v8463_v22 = vpop.eup %8462 }
 0x653   :  { %v806_v23 = vsel %vm572_vm3, %v8463_v22, 0.0 }
 0x654   :  { %807 = vadd.xlane.f32.xlu0 %v806_v23  ;;  %v8021_v23 = vld [vmem:[#allocation16 + $0x2c] ss:$16 sps:$4 sm:$0xff]  }
 0x657   :  { %v799_v24 = vpop.xlane.xlu1 %798 }
 0x658   :  { %v801_v25 = vsub.f32 %v788_v13, %v799_v24  ;;  %v8656_v13 = vld [vmem:[#allocation2] sm:$0xff] }
 0x659   :  { %v8016_v24 = vld [vmem:[#allocation16 + $0x20] ss:$16 sps:$4 sm:$0xff]  }
 0x65a   :  { %v804_v26 = vmul.f32 1.442695, %v801_v25  ;;  %v8019_v25 = vld [vmem:[#allocation16 + $0x28] ss:$16 sps:$4 sm:$0xff]  }
 0x65b   :  { %v869_v27 = vpop.permute.xlu1 %868 }
 0x65c   :  { %8464 = vpow2.f32 %v804_v26  ;;  %v874_v28 = vsel %vm600_vm2, %v869_v27, 0 }
 0x65d   :  { %7639 = vmatpush3.bf16.msra.mxu1 %v874_v28 }
 0x666   :  { %v8465_v29 = vpop.eup %8464 }
 0x667   :  { %v809_v30 = vsel %vm572_vm3, %v8465_v29, 0.0 }
 0x668   :  { %810 = vadd.xlane.f32.xlu0 %v809_v30 }
 0x67e   :  { %819 = vrot.lane.b32.xlu0 %v9198_v18, %s8925_s2 }
 0x6e1   :  { %v808_v31 = vpop.xlane.xlu0 %807 }
 0x6e2   :  { %8466 = vrcp.f32 %v808_v31 }
 0x6ec   :  { %v8467_v33 = vpop.eup %8466 }
 0x6ed   :  { %v814_v35 = vmul.f32 %v8467_v33, %v8463_v22  ;;  %v8018_v22 = vld [vmem:[#allocation16 + $0x24] ss:$16 sps:$4 sm:$0xff]  }
 0x6ef   :  { %v816_v38 = vpack.c.bf16 %v814_v35, %v814_v35  ;;  %v8024_v35 = vld [vmem:[#allocation16 + $0x44] ss:$16 sps:$4 sm:$0xff]  }
 0x6f5   :  { %v811_v34 = vpop.xlane.xlu0 %810 }
 0x6f6   :  { %8468 = vrcp.f32 %v811_v34 }
 0x6f9   :  { %v820_v36 = vpop.permute.xlu0 %819 }
 0x6fa   :  { %v825_v37 = vsel %vm600_vm2, %v820_v36, 0  ;;  %v8027_v36 = vld [vmem:[#allocation16 + $0x4c] ss:$16 sps:$4 sm:$0xff]  }
 0x6fb   :  { %7633 = vmatpush3.bf16.msra.mxu0 %v825_v37  ;;  %v8022_v37 = vld [vmem:[#allocation16 + $0x40] ss:$16 sps:$4 sm:$0xff]  }
 0x6fc   :  { %7644 = vmatprep.subr.bf16.mxu0 %v8932_v4 }
 0x6fe   :  { %7635 = vmatmul.mubr.msk.bf16.vlgmr.msra.gmra.mrb[8].mxu0 %vm572_vm3, %v816_v38  ;;  %v8025_v38 = vld [vmem:[#allocation16 + $0x48] ss:$16 sps:$4 sm:$0xff]  }
 0x6ff   :  { %7660 = vmatprep.mubr.msk.bf16.mxu0 %vm8934_vm0, %v8932_v4  ;;  %7645 = vmatpush3.bf16.msra.mxu0 %v8002_v41  ;;  %v8031_v41 = vld [vmem:[#allocation16 + $0x68] ss:$16 sps:$4 sm:$0xff]  }
 0x700   :  { %v8469_v39 = vpop.eup %8468  ;;  %7646 = vmatprep.subr.bf16.mxu0 %v8932_v4 }
 0x701   :  { %v815_v18 = vmul.f32 %v8469_v39, %v8465_v29  ;;  %v8030_v39 = vld [vmem:[#allocation16 + $0x64] ss:$16 sps:$4 sm:$0xff]  }
 0x703   :  { %v817_v40 = vpack.c.bf16 %v815_v18, %v815_v18  ;;  %7647 = vmatpush3.bf16.msra.mxu0 %v8003_v42  ;;  %v8033_v18 = vld [vmem:[#allocation16 + $0x6c] ss:$16 sps:$4 sm:$0xff]   ;;  %v8036_v42 = vld [vmem:[#allocation16 + $0x84] ss:$16 sps:$4 sm:$0xff]  }
 0x704   :  { %7648 = vmatprep.subr.bf16.mxu0 %v8932_v4 }
 0x705   :  { %7641 = vmatmul.mubr.msk.bf16.vlgmr.msra.gmra.mrb[24].mxu1 %vm572_vm3, %v817_v40  ;;  %v8028_v40 = vld [vmem:[#allocation16 + $0x60] ss:$16 sps:$4 sm:$0xff]  }
 0x706   :  { %1322 = vmatprep.mubr.bf16.mxu1 %v8933_v32 }
 0x707   :  { %7649 = vmatpush3.bf16.msra.mxu0 %v8004_v43  ;;  %v8039_v43 = vld [vmem:[#allocation16 + $0x8c] ss:$16 sps:$4 sm:$0xff]  }
 0x708   :  { %7650 = vmatprep.subr.bf16.mxu0 %v8932_v4 }
 0x70b   :  { %7651 = vmatpush3.bf16.msra.mxu0 %v8005_v44  ;;  %v8034_v44 = vld [vmem:[#allocation16 + $0x80] ss:$16 sps:$4 sm:$0xff]  }
 0x70c   :  { %7652 = vmatprep.subr.bf16.mxu0 %v8932_v4 }
 0x70f   :  { %7653 = vmatpush3.bf16.msra.mxu0 %v8006_v45  ;;  %v8037_v45 = vld [vmem:[#allocation16 + $0x88] ss:$16 sps:$4 sm:$0xff]  }
 0x710   :  { %7654 = vmatprep.subr.bf16.mxu0 %v8932_v4 }
 0x713   :  { %7655 = vmatpush3.bf16.msra.mxu0 %v8007_v46  ;;  %v8042_v46 = vld [vmem:[#allocation16 + $0xa4] ss:$16 sps:$4 sm:$0xff]  }
 0x714   :  { %7656 = vmatprep.subr.bf16.mxu0 %v8932_v4 }
 0x717   :  { %7657 = vmatpush3.bf16.msra.mxu0 %v8008_v47  ;;  %v8045_v47 = vld [vmem:[#allocation16 + $0xac] ss:$16 sps:$4 sm:$0xff]  }
 0x718   :  { %7658 = vmatprep.subr.bf16.mxu0 %v8932_v4 }
 0x71b   :  { %7659 = vmatpush3.bf16.msra.mxu0 %v8009_v48  ;;  %v8040_v48 = vld [vmem:[#allocation16 + $0xa0] ss:$16 sps:$4 sm:$0xff]  }
 0x71c   :  { %1333 = vmatprep.subr.bf16.mxu0 %v8015_v21  ;;  %v8059_v21 = vld [vmem:[#allocation17 + $0xc0] sm:$0xff]  }
 0x7d1   :  { %v861_v49 = vpop.f32.mrb[8].mxu0 }
 0x7d2   :  { %v7636_v50 = vpop.f32.mrb[9].mxu0 }
 0x7d3   :  { %v864_v51 = vpop.f32.mrb[10].mxu0  ;;  %v8048_v50 = vld [vmem:[#allocation16 + $0xc4] ss:$16 sps:$4 sm:$0xff]  }
 0x7d4   :  { %v7637_v52 = vpop.f32.mrb[11].mxu0  ;;  %v8051_v51 = vld [vmem:[#allocation16 + $0xcc] ss:$16 sps:$4 sm:$0xff]  }
 0x7d5   :  { %v8046_v52 = vld [vmem:[#allocation16 + $0xc0] ss:$16 sps:$4 sm:$0xff]  }
 0x7d8   :  { %v910_v56 = vpop.f32.mrb[24].mxu1 }
 0x7d9   :  { %v7955_v58 = vpack.i.bf16 %v910_v56, %v861_v49  ;;  %v7642_v60 = vpop.f32.mrb[25].mxu1  ;;  %v8043_v49 = vld [vmem:[#allocation16 + $0xa8] ss:$16 sps:$4 sm:$0xff]  }
 0x7da   :  { %v913_v61 = vpop.f32.mrb[26].mxu1  ;;  %v8049_v56 = vld [vmem:[#allocation16 + $0xc8] ss:$16 sps:$4 sm:$0xff]   ;;  %v8052_v60 = vld [vmem:[#allocation16 + $0xe0] ss:$16 sps:$4 sm:$0xff]  }
 0x7db   :  { %7956 = vrot.lane.b32.xlu1 %v7955_v58, %s8925_s2  ;;  %v7643_v62 = vpop.f32.mrb[27].mxu1  ;;  %v8054_v58 = vld [vmem:[#allocation16 + $0xe4] ss:$16 sps:$4 sm:$0xff]   ;;  %v8055_v61 = vld [vmem:[#allocation16 + $0xe8] ss:$16 sps:$4 sm:$0xff]  }
 0x7dc   :  { %v8057_v62 = vld [vmem:[#allocation16 + $0xec] ss:$16 sps:$4 sm:$0xff]  }
 0x84d   :  { %v7957_v63 = vpop.permute.xlu1 %7956 }
 0x84e   :  { %v7959_v0 = vunpack.i.h.bf16 %v7957_v63  ;;  %v7958_v1 = vunpack.i.l.bf16 %v7957_v63 }
 0x850   :  { %v925_v2 = vsel %vm479_vm1, %v9237_v9, %v7959_v0  ;;  %v924_v5 = vsel %vm479_vm1, %v9235_v3, %v7958_v1  ;;  %v8010_v3 = vld [vmem:[#allocation16] ss:$16 sps:$4 sm:$0xff]   ;;  %v8012_v9 = vld [vmem:[#allocation16 + $0x4] ss:$16 sps:$4 sm:$0xff]  }
 0x851   :  { %v942_v6 = vpack.c.bf16 %v925_v2, %v924_v5  ;;  %1290 = vmatprep.subr.bf16.mxu1 %v8012_v9 }
 0x852   :  { %1291 = vmatpush1.bf16.msra.mxu1 %v8010_v3 }
 0x853   :  { %7661 = vmatmul.mubr.bf16.vlgmr.msra.gmra.mrb[12].mxu0 %v942_v6  ;;  %1292 = vmatprep.subr.bf16.mxu1 %v8018_v22  ;;  %v8060_v22 = vld [vmem:[#allocation17] sm:$0xff]  }
 0x854   :  { %1365 = vmatprep.mubr.bf16.mxu0 %v8933_v32  ;;  %1334 = vmatpush1.bf16.msra.mxu0 %v8013_v20  ;;  %v8058_v20 = vld [vmem:[#allocation17 + $0x40] sm:$0xff]  }
 0x855   :  { %1335 = vmatprep.subr.bf16.mxu0 %v8021_v23  ;;  %v8061_v23 = vld [vmem:[#allocation17 + $0x80] sm:$0xff]  }
 0x856   :  { %1293 = vmatpush1.bf16.msra.mxu1 %v8016_v24  ;;  %v8062_v24 = vld [vmem:[#allocation17 + $0x48] sm:$0xff]  }
 0x857   :  { %1294 = vmatprep.subr.bf16.mxu1 %v8024_v35  ;;  %v8072_v35 = vld [vmem:[#allocation17 + $0x18] sm:$0xff]  }
 0x858   :  { %1336 = vmatpush1.bf16.msra.mxu0 %v8019_v25  ;;  %v8063_v25 = vld [vmem:[#allocation17 + $0xc8] sm:$0xff]  }
 0x859   :  { %1337 = vmatprep.subr.bf16.mxu0 %v8027_v36  ;;  %v8073_v36 = vld [vmem:[#allocation17 + $0x98] sm:$0xff]  }
 0x85a   :  { %1295 = vmatpush1.bf16.msra.mxu1 %v8022_v37  ;;  %v8074_v37 = vld [vmem:[#allocation17 + $0x60] sm:$0xff]  }
 0x85b   :  { %1296 = vmatprep.subr.bf16.mxu1 %v8030_v39  ;;  %v8076_v39 = vld [vmem:[#allocation17 + $0x20] sm:$0xff]  }
 0x85c   :  { %1338 = vmatpush1.bf16.msra.mxu0 %v8025_v38  ;;  %v8075_v38 = vld [vmem:[#allocation17 + $0xe0] sm:$0xff]  }
 0x85d   :  { %1339 = vmatprep.subr.bf16.mxu0 %v8033_v18  ;;  %v8077_v18 = vld [vmem:[#allocation17 + $0xa0] sm:$0xff]  }
 0x85e   :  { %1297 = vmatpush1.bf16.msra.mxu1 %v8028_v40  ;;  %v8078_v40 = vld [vmem:[#allocation17 + $0x68] sm:$0xff]  }
 0x85f   :  { %1298 = vmatprep.subr.bf16.mxu1 %v8036_v42  ;;  %v8080_v42 = vld [vmem:[#allocation17 + $0x28] sm:$0xff]  }
 0x860   :  { %1340 = vmatpush1.bf16.msra.mxu0 %v8031_v41  ;;  %v8079_v41 = vld [vmem:[#allocation17 + $0xe8] sm:$0xff]  }
 0x861   :  { %1341 = vmatprep.subr.bf16.mxu0 %v8039_v43  ;;  %v8081_v43 = vld [vmem:[#allocation17 + $0xa8] sm:$0xff]  }
 0x862   :  { %1299 = vmatpush1.bf16.msra.mxu1 %v8034_v44  ;;  %v8082_v44 = vld [vmem:[#allocation17 + $0x70] sm:$0xff]  }
 0x863   :  { %1300 = vmatprep.subr.bf16.mxu1 %v8042_v46  ;;  %v8084_v46 = vld [vmem:[#allocation17 + $0x30] sm:$0xff]  }
 0x864   :  { %1342 = vmatpush1.bf16.msra.mxu0 %v8037_v45  ;;  %v8083_v45 = vld [vmem:[#allocation17 + $0xf0] sm:$0xff]  }
 0x865   :  { %1343 = vmatprep.subr.bf16.mxu0 %v8045_v47  ;;  %v8085_v47 = vld [vmem:[#allocation17 + $0xb0] sm:$0xff]  }
 0x866   :  { %1301 = vmatpush1.bf16.msra.mxu1 %v8040_v48  ;;  %v8086_v48 = vld [vmem:[#allocation17 + $0x78] sm:$0xff]  }
 0x867   :  { %1302 = vmatprep.subr.bf16.mxu1 %v8048_v50  ;;  %v8088_v50 = vld [vmem:[#allocation17 + $0x38] sm:$0xff]  }
 0x868   :  { %1344 = vmatpush1.bf16.msra.mxu0 %v8043_v49  ;;  %v8087_v49 = vld [vmem:[#allocation17 + $0xf8] sm:$0xff]  }
 0x869   :  { %1345 = vmatprep.subr.bf16.mxu0 %v8051_v51  ;;  %v8089_v51 = vld [vmem:[#allocation17 + $0xb8] sm:$0xff]  }
 0x86a   :  { %1303 = vmatpush1.bf16.msra.mxu1 %v8046_v52  ;;  %v1108_v52 = vld [vmem:[%s9813_s10] ss:$4 sm:$0xf] }
 0x86b   :  { %1304 = vmatprep.subr.bf16.mxu1 %v8054_v58  ;;  %v1113_v58 = vrot.slane %v1108_v52, %v9185_v59 }
 0x86c   :  { %1346 = vmatpush1.bf16.msra.mxu0 %v8049_v56  ;;  %v9289_v56 = vsub.s32 3, %v9172_v54 }
 0x86d   :  { %1347 = vmatprep.subr.bf16.mxu0 %v8057_v62 }
 0x86e   :  { %1305 = vmatpush1.bf16.msra.mxu1 %v8052_v60  ;;  %v1121_v60 = vrot.slane %v1108_v52, %v9181_v57  ;;  %v1125_v62 = vrot.slane %v1108_v52, %v9289_v56 }
 0x86f   :  { %7298 = vmatprep.subr.bf16.mxu1 %v8058_v20 }
 0x870   :  { %1348 = vmatpush1.bf16.msra.mxu0 %v8055_v61  ;;  %v1117_v61 = vrot.slane %v1108_v52, %v9175_v55 }
 0x871   :  { %7320 = vmatprep.subr.bf16.mxu0 %v8059_v21 }
 0x926   :  { %v1030_v8 = vpop.f32.mrb[12].mxu0 }
 0x927   :  { %v1031_v10 = vadd.f32 %v6824_v7, %v1030_v8  ;;  %v7662_v11 = vpop.f32.mrb[13].mxu0 }
 0x928   :  { %v1033_v12 = vpop.f32.mrb[14].mxu0 }
 0x929   :  { %v9266_v14 = vadd.f32 %v8656_v13, %v1031_v10  ;;  %v1034_v15 = vadd.f32 %v6824_v7, %v1033_v12  ;;  %v7663_v16 = vpop.f32.mrb[15].mxu0  ;;  %v6833_v10 = vld [vmem:[#allocation13] ss:$0 sm:$0xff] }
 0x92b   :  { %v9268_v19 = vadd.f32 %v8657_v17, %v1034_v15  ;;  %1041 = vadd.xlane.f32.xlu1 %v9266_v14  ;;  %v6834_v15 = vld [vmem:[#allocation14] ss:$0 sm:$0xff] }
 0x92d   :  { %1043 = vadd.xlane.f32.xlu0 %v9268_v19 }
 0x9b8   :  { %v1042_v26 = vpop.xlane.xlu1 %1041 }
 0x9b9   :  { %v1045_v27 = vmul.f32 0.0078125, %v1042_v26  ;;  %v8064_v26 = vld [vmem:[#allocation17 + $0x8] sm:$0xff]  }
 0x9ba   :  { %v1044_v28 = vpop.xlane.xlu0 %1043 }
 0x9bb   :  { %v9273_v29 = vsub.f32 %v9266_v14, %v1045_v27  ;;  %v1046_v30 = vmul.f32 0.0078125, %v1044_v28  ;;  %v8065_v27 = vld [vmem:[#allocation17 + $0x88] sm:$0xff]   ;;  %v8066_v28 = vld [vmem:[#allocation17 + $0x50] sm:$0xff]  }
 0x9bd   :  { %v9276_v31 = vsub.f32 %v9268_v19, %v1046_v30  ;;  %v1049_v33 = vmul.f32 %v9273_v29, %v9273_v29  ;;  %v8068_v30 = vld [vmem:[#allocation17 + $0x10] sm:$0xff]  }
 0x9bf   :  { %1051 = vadd.xlane.f32.xlu0 %v1049_v33  ;;  %v1050_v34 = vmul.f32 %v9276_v31, %v9276_v31  ;;  %v8070_v33 = vld [vmem:[#allocation17 + $0x58] sm:$0xff]  }
 0x9c3   :  { %1053 = vadd.xlane.f32.xlu0 %v1050_v34  ;;  %v8071_v34 = vld [vmem:[#allocation17 + $0xd8] sm:$0xff]  }
 0xa4c   :  { %v1052_v63 = vpop.xlane.xlu0 %1051 }
 0xa4d   :  { %v1055_v0 = vmul.f32 0.0078125, %v1052_v63 }
 0xa4f   :  { %v1057_v1 = vadd.f32 1e-05, %v1055_v0 }
 0xa50   :  { %v1054_v2 = vpop.xlane.xlu0 %1053 }
 0xa51   :  { %8470 = vrsqrt.f32 %v1057_v1  ;;  %v1056_v5 = vmul.f32 0.0078125, %v1054_v2 }
 0xa53   :  { %v1058_v6 = vadd.f32 1e-05, %v1056_v5 }
 0xa55   :  { %8472 = vrsqrt.f32 %v1058_v6 }
 0xa5b   :  { %v8471_v7 = vpop.eup %8470 }
 0xa5c   :  { %v1061_v8 = vmul.f32 %v8471_v7, %v9273_v29  ;;  %v8067_v29 = vld [vmem:[#allocation17 + $0xd0] sm:$0xff]  }
 0xa5e   :  { %v1067_v13 = vmul.f32 %v6833_v10, %v1061_v8 }
 0xa5f   :  { %v8473_v11 = vpop.eup %8472 }
 0xa60   :  { %v1062_v12 = vmul.f32 %v8473_v11, %v9276_v31  ;;  %v1073_v17 = vadd.f32 %v6834_v15, %v1067_v13  ;;  %v8069_v31 = vld [vmem:[#allocation17 + $0x90] sm:$0xff]  }
 0xa62   :  { %v1068_v16 = vmul.f32 %v6833_v10, %v1062_v12 }
 0xa64   :  { %v1074_v3 = vadd.f32 %v6834_v15, %v1068_v16 }
 0xa66   :  { %v1107_v9 = vpack.c.bf16 %v1074_v3, %v1073_v17 }
 0xa68   :  { %1323 = vmatmul.mubr.bf16.vlgmr.msra.gmra.mrb[28].mxu1 %v1107_v9  ;;  %1366 = vmatmul.mubr.bf16.vlgmr.msra.gmra.mrb[16].mxu0 %v1107_v9 }
 0xa69   :  { %7299 = vmatpush3.bf16.msra.mxu1 %v8060_v22  ;;  %7321 = vmatpush3.bf16.msra.mxu0 %v8061_v23 }
 0xa6a   :  { %7300 = vmatprep.subr.bf16.mxu1 %v8062_v24  ;;  %7322 = vmatprep.subr.bf16.mxu0 %v8063_v25 }
 0xa6d   :  { %7301 = vmatpush3.bf16.msra.mxu1 %v8064_v26  ;;  %7323 = vmatpush3.bf16.msra.mxu0 %v8065_v27 }
 0xa6e   :  { %7302 = vmatprep.subr.bf16.mxu1 %v8066_v28  ;;  %7324 = vmatprep.subr.bf16.mxu0 %v8067_v29 }
 0xa71   :  { %7303 = vmatpush3.bf16.msra.mxu1 %v8068_v30  ;;  %7325 = vmatpush3.bf16.msra.mxu0 %v8069_v31 }
 0xa72   :  { %7304 = vmatprep.subr.bf16.mxu1 %v8070_v33  ;;  %7326 = vmatprep.subr.bf16.mxu0 %v8071_v34 }
 0xa75   :  { %7305 = vmatpush3.bf16.msra.mxu1 %v8072_v35  ;;  %7327 = vmatpush3.bf16.msra.mxu0 %v8073_v36 }
 0xa76   :  { %7306 = vmatprep.subr.bf16.mxu1 %v8074_v37  ;;  %7328 = vmatprep.subr.bf16.mxu0 %v8075_v38 }
 0xa79   :  { %7307 = vmatpush3.bf16.msra.mxu1 %v8076_v39  ;;  %7329 = vmatpush3.bf16.msra.mxu0 %v8077_v18 }
 0xa7a   :  { %7308 = vmatprep.subr.bf16.mxu1 %v8078_v40  ;;  %7330 = vmatprep.subr.bf16.mxu0 %v8079_v41 }
 0xa7d   :  { %7309 = vmatpush3.bf16.msra.mxu1 %v8080_v42  ;;  %7331 = vmatpush3.bf16.msra.mxu0 %v8081_v43 }
 0xa7e   :  { %7310 = vmatprep.subr.bf16.mxu1 %v8082_v44  ;;  %7332 = vmatprep.subr.bf16.mxu0 %v8083_v45 }
 0xa81   :  { %7311 = vmatpush3.bf16.msra.mxu1 %v8084_v46  ;;  %7333 = vmatpush3.bf16.msra.mxu0 %v8085_v47 }
 0xa82   :  { %7312 = vmatprep.subr.bf16.mxu1 %v8086_v48  ;;  %7334 = vmatprep.subr.bf16.mxu0 %v8087_v49 }
 0xa85   :  { %7313 = vmatpush3.bf16.msra.mxu1 %v8088_v50  ;;  %7335 = vmatpush3.bf16.msra.mxu0 %v8089_v51 }
 0xa86   :  { %7664 = vmatprep.subr.bf16.mxu0 %v8932_v4 }
 0xb3b   :  { %v1324_v63 = vpop.f32.mrb[28].mxu1  ;;  %v1367_v0 = vpop.f32.mrb[16].mxu0 }
 0xb3c   :  { %v9295_v1 = vadd.f32 %v1324_v63, %v1113_v58  ;;  %v9297_v2 = vadd.f32 %v1367_v0, %v1121_v60  ;;  %v1326_v5 = vpop.f32.mrb[29].mxu1  ;;  %v1369_v6 = vpop.f32.mrb[17].mxu0 }
 0xb3d   :  { %v9299_v7 = vadd.f32 %v1326_v5, %v1117_v61  ;;  %v9301_v8 = vadd.f32 %v1369_v6, %v1125_v62  ;;  %v1328_v10 = vpop.f32.mrb[30].mxu1  ;;  %v1371_v11 = vpop.f32.mrb[18].mxu0 }
 0xb3e   :  { %v6867_v12 = vmul.f32 -1.702, %v9295_v1  ;;  %v6869_v13 = vmul.f32 -1.702, %v9297_v2  ;;  %v1329_v15 = vadd.f32 %v1328_v10, %v1113_v58  ;;  %v1372_v16 = vadd.f32 %v1371_v11, %v1121_v60  ;;  %v1330_v17 = vpop.f32.mrb[31].mxu1  ;;  %v1373_v3 = vpop.f32.mrb[19].mxu0 }
 0xb3f   :  { %v6868_v9 = vmul.f32 -1.702, %v9299_v7  ;;  %v6870_v20 = vmul.f32 -1.702, %v9301_v8  ;;  %v1331_v21 = vadd.f32 %v1330_v17, %v1117_v61  ;;  %v1374_v22 = vadd.f32 %v1373_v3, %v1125_v62 }
 0xb40   :  { %v1392_v23 = vmul.f32 1.442695, %v6867_v12  ;;  %v1396_v24 = vmul.f32 1.442695, %v6869_v13  ;;  %v6871_v25 = vmul.f32 -1.702, %v1329_v15 }
 0xb41   :  { %v1394_v26 = vmul.f32 1.442695, %v6868_v9  ;;  %v1398_v27 = vmul.f32 1.442695, %v6870_v20  ;;  %v6873_v28 = vmul.f32 -1.702, %v1372_v16 }
 0xb42   :  { %8474 = vpow2.f32 %v1392_v23  ;;  %v1400_v29 = vmul.f32 1.442695, %v6871_v25  ;;  %v6872_v30 = vmul.f32 -1.702, %v1331_v21  ;;  %v6874_v31 = vmul.f32 -1.702, %v1374_v22 }
 0xb43   :  { %8476 = vpow2.f32 %v1396_v24  ;;  %v1404_v33 = vmul.f32 1.442695, %v6873_v28 }
 0xb44   :  { %8478 = vpow2.f32 %v1394_v26  ;;  %v1402_v34 = vmul.f32 1.442695, %v6872_v30  ;;  %v1406_v35 = vmul.f32 1.442695, %v6874_v31 }
 0xb45   :  { %8480 = vpow2.f32 %v1398_v27 }
 0xb46   :  { %8482 = vpow2.f32 %v1400_v29 }
 0xb47   :  { %8484 = vpow2.f32 %v1404_v33 }
 0xb48   :  { %8486 = vpow2.f32 %v1402_v34 }
 0xb49   :  { %8488 = vpow2.f32 %v1406_v35 }
 0xb4c   :  { %v8475_v36 = vpop.eup %8474 }
 0xb4d   :  { %v8477_v37 = vpop.eup %8476  ;;  %v1408_v38 = vadd.f32 1.0, %v8475_v36 }
 0xb4e   :  { %v8479_v39 = vpop.eup %8478  ;;  %v1410_v18 = vadd.f32 1.0, %v8477_v37  ;;  %v8090_v37 = vld [vmem:[#allocation8 + $0xc0] ss:$12 sps:$4 sm:$0xff]  }
 0xb4f   :  { %v8481_v40 = vpop.eup %8480  ;;  %8490 = vrcp.f32 %v1408_v38  ;;  %v1409_v41 = vadd.f32 1.0, %v8479_v39  ;;  %v8092_v38 = vld [vmem:[#allocation8 + $0xc4] ss:$12 sps:$4 sm:$0xff]   ;;  %v8093_v39 = vld [vmem:[#allocation8 + $0xc8] ss:$12 sps:$4 sm:$0xff]  }
 0xb50   :  { %v8483_v42 = vpop.eup %8482  ;;  %8492 = vrcp.f32 %v1410_v18  ;;  %v1411_v43 = vadd.f32 1.0, %v8481_v40  ;;  %v8096_v18 = vld [vmem:[#allocation8 + $0xdc] ss:$12 sps:$4 sm:$0xff]   ;;  %2005 = vmatprep.subr.bf16.mxu1 %v8092_v38  ;;  %v8097_v40 = vld [vmem:[#allocation8 + $0xe0] ss:$12 sps:$4 sm:$0xff]  }
 0xb51   :  { %v8485_v44 = vpop.eup %8484  ;;  %8494 = vrcp.f32 %v1409_v41  ;;  %v1412_v45 = vadd.f32 1.0, %v8483_v42  ;;  %v8094_v41 = vld [vmem:[#allocation8 + $0xd8] ss:$12 sps:$4 sm:$0xff]  }
 0xb52   :  { %v8487_v46 = vpop.eup %8486  ;;  %8496 = vrcp.f32 %v1411_v43  ;;  %v1414_v47 = vadd.f32 1.0, %v8485_v44 }
 0xb53   :  { %v8489_v48 = vpop.eup %8488  ;;  %8498 = vrcp.f32 %v1412_v45  ;;  %v1413_v49 = vadd.f32 1.0, %v8487_v46 }
 0xb54   :  { %8500 = vrcp.f32 %v1414_v47  ;;  %v1415_v50 = vadd.f32 1.0, %v8489_v48  ;;  %v8100_v48 = vld [vmem:[#allocation8 + $0xf4] ss:$12 sps:$4 sm:$0xff]  }
 0xb55   :  { %8502 = vrcp.f32 %v1413_v49  ;;  %v8098_v49 = vld [vmem:[#allocation8 + $0xf0] ss:$12 sps:$4 sm:$0xff]  }
 0xb56   :  { %8504 = vrcp.f32 %v1415_v50  ;;  %v8101_v50 = vld [vmem:[#allocation8 + $0xf8] ss:$12 sps:$4 sm:$0xff]  }
 0xb59   :  { %v8491_v51 = vpop.eup %8490 }
 0xb5a   :  { %v8493_v52 = vpop.eup %8492  ;;  %v1432_v63 = vmul.f32 %v8491_v51, %v9295_v1  ;;  %v8104_v51 = vld [vmem:[#allocation8 + $0x10c] ss:$12 sps:$4 sm:$0xff]  }
 0xb5b   :  { %v8495_v58 = vpop.eup %8494  ;;  %v1434_v6 = vmul.f32 %v8493_v52, %v9297_v2  ;;  %v8102_v52 = vld [vmem:[#allocation8 + $0x108] ss:$12 sps:$4 sm:$0xff]  }
 0xb5c   :  { %v8497_v60 = vpop.eup %8496  ;;  %v1433_v12 = vmul.f32 %v8495_v58, %v9299_v7  ;;  %v6875_v7 = vld [vmem:[%s9815_s12] ss:$0 sm:$0xff]  ;;  %v8105_v58 = vld [vmem:[#allocation8 + $0x110] ss:$12 sps:$4 sm:$0xff]  }
 0xb5d   :  { %v8499_v61 = vpop.eup %8498  ;;  %v1435_v3 = vmul.f32 %v8497_v60, %v9301_v8  ;;  %v8108_v60 = vld [vmem:[#allocation8 + $0x124] ss:$12 sps:$4 sm:$0xff]  }
 0xb5e   :  { %v8501_v62 = vpop.eup %8500  ;;  %v1436_v0 = vmul.f32 %v8499_v61, %v1329_v15  ;;  %v8106_v61 = vld [vmem:[#allocation8 + $0x120] ss:$12 sps:$4 sm:$0xff]  }
 0xb5f   :  { %v8503_v5 = vpop.eup %8502  ;;  %v1438_v10 = vmul.f32 %v8501_v62, %v1372_v16  ;;  %v8109_v62 = vld [vmem:[#allocation8 + $0x128] ss:$12 sps:$4 sm:$0xff]  }
 0xb60   :  { %v8505_v11 = vpop.eup %8504  ;;  %v1504_v13 = vpack.c.bf16 %v1436_v0, %v1432_v63  ;;  %v1437_v17 = vmul.f32 %v8503_v5, %v1331_v21  ;;  %v8112_v63 = vld [vmem:[#allocation8 + $0x13c] ss:$12 sps:$4 sm:$0xff]   ;;  %v8110_v0 = vld [vmem:[#allocation8 + $0x138] ss:$12 sps:$4 sm:$0xff]   ;;  %v8113_v5 = vld [vmem:[#allocation8 + $0x140] ss:$12 sps:$4 sm:$0xff]  }
 0xb61   :  { %v1506_v9 = vpack.c.bf16 %v1438_v10, %v1434_v6  ;;  %v1439_v20 = vmul.f32 %v8505_v11, %v1374_v22  ;;  %v8116_v6 = vld [vmem:[#allocation8 + $0x154] ss:$12 sps:$4 sm:$0xff]   ;;  %v8114_v10 = vld [vmem:[#allocation8 + $0x150] ss:$12 sps:$4 sm:$0xff]   ;;  %v8117_v11 = vld [vmem:[#allocation8 + $0x158] ss:$12 sps:$4 sm:$0xff]  }
 0xb62   :  { %v1505_v23 = vpack.c.bf16 %v1437_v17, %v1433_v12  ;;  %v8120_v12 = vld [vmem:[#allocation8 + $0x16c] ss:$12 sps:$4 sm:$0xff]   ;;  %v8121_v17 = vld [vmem:[#allocation8 + $0x170] ss:$12 sps:$4 sm:$0xff]  }
 0xb63   :  { %v1507_v24 = vpack.c.bf16 %v1439_v20, %v1435_v3 }
 0xb64   :  { %1737 = vmatprep.mubr.bf16.mxu1 %v1505_v23 }
 0xb65   :  { %1778 = vmatprep.mubr.bf16.mxu0 %v1507_v24  ;;  %1738 = vmatmul.mubr.bf16.vlgmr.msra.gmra.mrb[32].mxu1 %v1504_v13  ;;  %v8118_v13 = vld [vmem:[#allocation8 + $0x168] ss:$12 sps:$4 sm:$0xff]  }
 0xb66   :  { %1779 = vmatmul.mubr.bf16.vlgmr.msra.gmra.mrb[20].mxu0 %v1506_v9  ;;  %2037 = vmatprep.mubr.bf16.mxu1 %v8933_v32 }
 0xb67   :  { %7680 = vmatprep.mubr.msk.bf16.mxu0 %vm8934_vm0, %v8932_v4  ;;  %7665 = vmatpush3.bf16.msra.mxu0 %v8093_v39 }
 0xb68   :  { %2006 = vmatpush1.bf16.msra.mxu1 %v8090_v37  ;;  %7666 = vmatprep.subr.bf16.mxu0 %v8932_v4 }
 0xb69   :  { %2007 = vmatprep.subr.bf16.mxu1 %v8096_v18 }
 0xb6b   :  { %7667 = vmatpush3.bf16.msra.mxu0 %v8097_v40 }
 0xb6c   :  { %2008 = vmatpush1.bf16.msra.mxu1 %v8094_v41  ;;  %7668 = vmatprep.subr.bf16.mxu0 %v8932_v4 }
 0xb6d   :  { %2009 = vmatprep.subr.bf16.mxu1 %v8100_v48 }
 0xb6f   :  { %7669 = vmatpush3.bf16.msra.mxu0 %v8101_v50 }
 0xb70   :  { %2010 = vmatpush1.bf16.msra.mxu1 %v8098_v49  ;;  %7670 = vmatprep.subr.bf16.mxu0 %v8932_v4 }
 0xb71   :  { %2011 = vmatprep.subr.bf16.mxu1 %v8104_v51 }
 0xb73   :  { %7671 = vmatpush3.bf16.msra.mxu0 %v8105_v58 }
 0xb74   :  { %2012 = vmatpush1.bf16.msra.mxu1 %v8102_v52  ;;  %7672 = vmatprep.subr.bf16.mxu0 %v8932_v4 }
 0xb75   :  { %2013 = vmatprep.subr.bf16.mxu1 %v8108_v60 }
 0xb77   :  { %7673 = vmatpush3.bf16.msra.mxu0 %v8109_v62 }
 0xb78   :  { %2014 = vmatpush1.bf16.msra.mxu1 %v8106_v61  ;;  %7674 = vmatprep.subr.bf16.mxu0 %v8932_v4 }
 0xb79   :  { %2015 = vmatprep.subr.bf16.mxu1 %v8112_v63 }
 0xb7b   :  { %7675 = vmatpush3.bf16.msra.mxu0 %v8113_v5 }
 0xb7c   :  { %2016 = vmatpush1.bf16.msra.mxu1 %v8110_v0  ;;  %7676 = vmatprep.subr.bf16.mxu0 %v8932_v4 }
 0xb7d   :  { %2017 = vmatprep.subr.bf16.mxu1 %v8116_v6 }
 0xb7f   :  { %7677 = vmatpush3.bf16.msra.mxu0 %v8117_v11 }
 0xb80   :  { %2018 = vmatpush1.bf16.msra.mxu1 %v8114_v10  ;;  %7678 = vmatprep.subr.bf16.mxu0 %v8932_v4 }
 0xb81   :  { %2019 = vmatprep.subr.bf16.mxu1 %v8120_v12 }
 0xb83   :  { %7679 = vmatpush3.bf16.msra.mxu0 %v8121_v17 }
 0xb84   :  { %2020 = vmatpush1.bf16.msra.mxu1 %v8118_v13  ;;  %7708 = vmatprep.subr.bf16.mxu0 %v8932_v4 }
 0xb85   :  { %7684 = vmatprep.subr.bf16.mxu1 %v8932_v4 }
 0xc38   :  { %v7314_v1 = vpop.f32.mrb[32].mxu1 }
 0xc39   :  { %v7336_v2 = vpop.f32.mrb[20].mxu0  ;;  %v7315_v8 = vpop.f32.mrb[33].mxu1 }
 0xc3a   :  { %v7316_v15 = vadd.f32 %v7315_v8, %v7314_v1  ;;  %v7337_v16 = vpop.f32.mrb[21].mxu0  ;;  %v7317_v21 = vpop.f32.mrb[34].mxu1 }
 0xc3b   :  { %v7338_v22 = vadd.f32 %v7337_v16, %v7336_v2  ;;  %v7339_v25 = vpop.f32.mrb[22].mxu0  ;;  %v7318_v26 = vpop.f32.mrb[35].mxu1 }
 0xc3c   :  { %v1740_v27 = vadd.f32 %v7316_v15, %v6875_v7  ;;  %v7319_v28 = vadd.f32 %v7318_v26, %v7317_v21  ;;  %v7340_v29 = vpop.f32.mrb[23].mxu0 }
 0xc3d   :  { %v7341_v30 = vadd.f32 %v7340_v29, %v7339_v25  ;;  %v6910_v29 = vld [vmem:[%s9807_s4 + $0x1] ss:$4 sm:$0x7] }
 0xc3e   :  { %v1781_v31 = vadd.f32 %v7338_v22, %v1740_v27  ;;  %v1743_v33 = vadd.f32 %v7319_v28, %v6875_v7  ;;  %v6908_v7 = vld [vmem:[#allocation5 + $0x1] ss:$0 sm:$0xff]  ;;  %v6909_v22 = vld [vmem:[#allocation7 + $0x1] ss:$0 sm:$0xff] }
 0xc40   :  { %v1784_v34 = vadd.f32 %v7341_v30, %v1743_v33  ;;  %v9318_v35 = vadd.f32 %v1781_v31, %v9266_v14  ;;  %v1869_v30 = vrot.slane %v6910_v29, %v9175_v55 }
 0xc42   :  { %1791 = vadd.xlane.f32.xlu1 %v9318_v35  ;;  %v9322_v36 = vadd.f32 %v1784_v34, %v9268_v19  ;;  %v1873_v34 = vrot.slane %v6910_v29, %v9181_v57 }
 0xc44   :  { %1793 = vadd.xlane.f32.xlu0 %v9322_v36 }
 0xccf   :  { %v1792_v14 = vpop.xlane.xlu1 %1791 }
 0xcd0   :  { %v1795_v19 = vmul.f32 0.0078125, %v1792_v14 }
 0xcd1   :  { %v1794_v42 = vpop.xlane.xlu0 %1793 }
 0xcd2   :  { %v1797_v43 = vsub.f32 %v9318_v35, %v1795_v19  ;;  %v1796_v44 = vmul.f32 0.0078125, %v1794_v42  ;;  %v1865_v42 = vrot.slane %v6910_v29, %v9185_v59 }
 0xcd4   :  { %v1798_v45 = vsub.f32 %v9322_v36, %v1796_v44  ;;  %v1799_v46 = vmul.f32 %v1797_v43, %v1797_v43 }
 0xcd6   :  { %1801 = vadd.xlane.f32.xlu1 %v1799_v46  ;;  %v1800_v47 = vmul.f32 %v1798_v45, %v1798_v45 }
 0xcd8   :  { %1803 = vadd.xlane.f32.xlu0 %v1800_v47 }
 0xd63   :  { %v1802_v3 = vpop.xlane.xlu1 %1801 }
 0xd64   :  { %v1805_v9 = vmul.f32 0.0078125, %v1802_v3 }
 0xd65   :  { %v1804_v20 = vpop.xlane.xlu0 %1803 }
 0xd66   :  { %v1807_v23 = vadd.f32 1e-05, %v1805_v9  ;;  %v1806_v24 = vmul.f32 0.0078125, %v1804_v20 }
 0xd68   :  { %8506 = vrsqrt.f32 %v1807_v23  ;;  %v1808_v1 = vadd.f32 1e-05, %v1806_v24 }
 0xd6a   :  { %8508 = vrsqrt.f32 %v1808_v1 }
 0xd72   :  { %v8507_v2 = vpop.eup %8506 }
 0xd73   :  { %v1811_v8 = vmul.f32 %v8507_v2, %v1797_v43 }
 0xd74   :  { %v8509_v15 = vpop.eup %8508 }
 0xd75   :  { %v1812_v16 = vmul.f32 %v8509_v15, %v1798_v45  ;;  %v1817_v21 = vmul.f32 %v6908_v7, %v1811_v8 }
 0xd77   :  { %v1818_v25 = vmul.f32 %v6908_v7, %v1812_v16  ;;  %v1823_v26 = vadd.f32 %v6909_v22, %v1817_v21 }
 0xd79   :  { %v1824_v27 = vadd.f32 %v6909_v22, %v1818_v25 }
 0xd7b   :  { %v1858_v28 = vpack.c.bf16 %v1824_v27, %v1823_v26 }
 0xd7d   :  { %2038 = vmatmul.mubr.bf16.vlgmr.msra.gmra.mrb[36].mxu1 %v1858_v28  ;;  %7681 = vmatmul.mubr.bf16.vlgmr.msra.gmra.mrb[24].mxu0 %v1858_v28 }
 0xd7e   :  { %7686 = vmatprep.mubr.msk.bf16.mxu1 %vm8934_vm0, %v8932_v4  ;;  %7710 = vmatprep.mubr.msk.bf16.mxu0 %vm8934_vm0, %v8932_v4 }
 0xe50   :  { %v2039_v31 = vpop.f32.mrb[36].mxu1  ;;  %v2082_v33 = vpop.f32.mrb[24].mxu0 }
 0xe51   :  { %v2041_v37 = vpop.f32.mrb[37].mxu1  ;;  %v7682_v38 = vpop.f32.mrb[25].mxu0  ;;  %v2040_v46 = vadd.f32 %v2039_v31, %v1865_v42  ;;  %v2083_v49 = vadd.f32 %v2082_v33, %v1873_v34 }
 0xe52   :  { %v2042_v39 = vadd.f32 %v2041_v37, %v1869_v30  ;;  %v2043_v18 = vpop.f32.mrb[38].mxu1  ;;  %v2085_v40 = vpop.f32.mrb[26].mxu0 }
 0xe53   :  { %v9345_v41 = vadd.f32 %v2085_v40, %v1873_v34  ;;  %v2045_v14 = vpop.f32.mrb[39].mxu1  ;;  %v7683_v19 = vpop.f32.mrb[27].mxu0  ;;  %v2089_v48 = vpack.c.bf16 %v2040_v46, %v2040_v46  ;;  %v2044_v51 = vadd.f32 %v2043_v18, %v1865_v42  ;;  %v9355_v52 = vpack.c.bf16 %v2083_v49, %v2083_v49 }
 0xe54   :  { %v2091_v43 = vpack.c.bf16 %v2042_v39, %v2042_v39  ;;  %v2046_v45 = vadd.f32 %v2045_v14, %v1869_v30 }
 0xe55   :  { %v2090_v58 = vpack.c.bf16 %v2044_v51, %v2044_v51  ;;  %v2215_v60 = vsel %vm600_vm2, %v9355_v52, 0  ;;  %v2094_v26 = vpack.c.bf16 %v9345_v41, %v9345_v41 }
 0xe56   :  { %v2099_v44 = vsel %vm479_vm1, %v2091_v43, 0  ;;  %v2092_v47 = vpack.c.bf16 %v2046_v45, %v2046_v45 }
 0xe57   :  { %7685 = vmatpush3.bf16.xpose.msra.mxu1 %v2099_v44  ;;  %v2261_v30 = vsel %vm600_vm2, %v2094_v26, 0 }
 0xe58   :  { %7690 = vmatprep.subr.bf16.mxu1 %v8932_v4  ;;  %v2145_v50 = vsel %vm479_vm1, %v2092_v47, 0 }
 0xe5e   :  { %7687 = vmatmul.mubr.msk.bf16.vlgmr.msra.gmra.mrb[40].mxu1 %vm479_vm1, %v2089_v48 }
 0xe5f   :  { %7691 = vmatpush3.bf16.xpose.msra.mxu1 %v2145_v50  ;;  %7692 = vmatprep.mubr.msk.bf16.mxu1 %vm8934_vm0, %v8932_v4 }
 0xe60   :  { %7696 = vmatprep.subr.bf16.mxu1 %v8932_v4 }
 0xe66   :  { %7693 = vmatmul.mubr.msk.bf16.vlgmr.msra.gmra.mrb[44].mxu1 %vm479_vm1, %v2090_v58 }
 0xe67   :  { %7697 = vmatpush3.bf16.msra.mxu1 %v2215_v60  ;;  %7698 = vmatprep.mubr.msk.bf16.mxu1 %vm8934_vm0, %v8932_v4 }
 0xe68   :  { %7702 = vmatprep.subr.bf16.mxu1 %v8932_v4 }
 0xf31   :  { %v2135_v61 = vpop.f32.mrb[40].mxu1 }
 0xf32   :  { %v7688_v62 = vpop.f32.mrb[41].mxu1  ;;  %v2187_v63 = vsel %vm572_vm3, %v2135_v61, -inf }
 0xf33   :  { %2188 = vmax.xlane.f32.xlu1 %v2187_v63  ;;  %v2138_v0 = vpop.f32.mrb[42].mxu1 }
 0xf34   :  { %v7689_v5 = vpop.f32.mrb[43].mxu1 }
 0xf39   :  { %v2181_v6 = vpop.f32.mrb[44].mxu1 }
 0xf3a   :  { %v7694_v10 = vpop.f32.mrb[45].mxu1  ;;  %v2190_v11 = vsel %vm572_vm3, %v2181_v6, -inf }
 0xf3b   :  { %2191 = vmax.xlane.f32.xlu0 %v2190_v11  ;;  %v2184_v12 = vpop.f32.mrb[46].mxu1 }
 0xf3c   :  { %v7695_v13 = vpop.f32.mrb[47].mxu1 }
 0xfc0   :  { %v2189_v17 = vpop.xlane.xlu1 %2188 }
 0xfc1   :  { %v2193_v3 = vsub.f32 %v2135_v61, %v2189_v17 }
 0xfc3   :  { %v2195_v9 = vmul.f32 1.442695, %v2193_v3 }
 0xfc5   :  { %8510 = vpow2.f32 %v2195_v9 }
 0xfc8   :  { %v2192_v20 = vpop.xlane.xlu0 %2191 }
 0xfc9   :  { %v2194_v23 = vsub.f32 %v2181_v6, %v2192_v20 }
 0xfcb   :  { %v2197_v24 = vmul.f32 1.442695, %v2194_v23 }
 0xfcd   :  { %8512 = vpow2.f32 %v2197_v24 }
 0xfcf   :  { %v8511_v1 = vpop.eup %8510 }
 0xfd0   :  { %v2199_v2 = vsel %vm572_vm3, %v8511_v1, 0.0 }
 0xfd1   :  { %2200 = vadd.xlane.f32.xlu1 %v2199_v2 }
 0xfd7   :  { %v8513_v7 = vpop.eup %8512 }
 0xfd8   :  { %v2202_v8 = vsel %vm572_vm3, %v8513_v7, 0.0 }
 0xfd9   :  { %2203 = vadd.xlane.f32.xlu0 %v2202_v8 }
 0xfe2   :  { %2307 = vrot.lane.b32.xlu1 %v2091_v43, %s8925_s2 }
 0xfe6   :  { %2304 = vrot.lane.b32.xlu1 %v2089_v48, %s8925_s2 }
 0xfea   :  { %2356 = vrot.lane.b32.xlu1 %v2090_v58, %s8925_s2 }
 0xfef   :  { %2359 = vrot.lane.b32.xlu0 %v2092_v47, %s8925_s2 }
0x105e   :  { %v2201_v15 = vpop.xlane.xlu1 %2200 }
0x105f   :  { %8514 = vrcp.f32 %v2201_v15 }
0x1062   :  { %v2308_v16 = vpop.permute.xlu1 %2307 }
0x1063   :  { %v2313_v21 = vsel %vm479_vm1, %v2308_v16, 0 }
0x1064   :  { %7709 = vmatpush3.bf16.xpose.msra.mxu0 %v2313_v21  ;;  %v8122_v21 = vld [vmem:[#allocation10 + $0x40] sm:$0xff]  }
0x1065   :  { %7720 = vmatprep.subr.bf16.mxu0 %v8932_v4 }
0x1066   :  { %v2204_v22 = vpop.xlane.xlu0 %2203  ;;  %v2305_v28 = vpop.permute.xlu1 %2304 }
0x1067   :  { %8516 = vrcp.f32 %v2204_v22  ;;  %v8123_v22 = vld [vmem:[#allocation10 + $0x48] sm:$0xff]  }
0x1069   :  { %v8515_v25 = vpop.eup %8514 }
0x106a   :  { %v2207_v27 = vmul.f32 %v8515_v25, %v8511_v1  ;;  %v2360_v34 = vpop.permute.xlu0 %2359  ;;  %v2357_v39 = vpop.permute.xlu1 %2356  ;;  %v8124_v25 = vld [vmem:[#allocation10 + $0x50] sm:$0xff]  }
0x106b   :  { %7711 = vmatmul.mubr.msk.bf16.vlgmr.msra.gmra.mrb[28].mxu0 %vm479_vm1, %v2305_v28  ;;  %v2365_v38 = vsel %vm479_vm1, %v2360_v34, 0  ;;  %v8127_v28 = vld [vmem:[#allocation10 + $0x68] sm:$0xff]  }
0x106c   :  { %v2209_v29 = vpack.c.bf16 %v2207_v27, %v2207_v27  ;;  %7722 = vmatprep.mubr.msk.bf16.mxu0 %vm8934_vm0, %v8932_v4  ;;  %v8126_v27 = vld [vmem:[#allocation10 + $0x60] sm:$0xff]  }
0x106e   :  { %7699 = vmatmul.mubr.msk.bf16.vlgmr.msra.gmra.mrb[48].mxu1 %vm572_vm3, %v2209_v29  ;;  %v8128_v29 = vld [vmem:[#allocation10 + $0x70] sm:$0xff]  }
0x106f   :  { %7703 = vmatpush3.bf16.msra.mxu1 %v2261_v30  ;;  %7704 = vmatprep.mubr.msk.bf16.mxu1 %vm8934_vm0, %v8932_v4 }
0x1070   :  { %7714 = vmatprep.subr.bf16.mxu1 %v8932_v4 }
0x1071   :  { %v8517_v31 = vpop.eup %8516 }
0x1072   :  { %v2208_v33 = vmul.f32 %v8517_v31, %v8513_v7 }
0x1074   :  { %v2210_v37 = vpack.c.bf16 %v2208_v33, %v2208_v33 }
0x1076   :  { %7705 = vmatmul.mubr.msk.bf16.vlgmr.msra.gmra.mrb[52].mxu1 %vm572_vm3, %v2210_v37  ;;  %v8129_v37 = vld [vmem:[#allocation10 + $0x78] sm:$0xff]  }
0x1077   :  { %7716 = vmatprep.mubr.msk.bf16.mxu1 %vm8934_vm0, %v8932_v4 }
0x1078   :  { %7715 = vmatpush3.bf16.xpose.msra.mxu1 %v2365_v38 }
0x1079   :  { %7726 = vmatprep.subr.bf16.mxu1 %v8932_v4 }
0x107f   :  { %7717 = vmatmul.mubr.msk.bf16.vlgmr.msra.gmra.mrb[56].mxu1 %vm479_vm1, %v2357_v39 }
0x1080   :  { %7728 = vmatprep.mubr.msk.bf16.mxu1 %vm8934_vm0, %v8932_v4 }
0x113e   :  { %v2349_v18 = vpop.f32.mrb[28].mxu0 }
0x113f   :  { %v7712_v40 = vpop.f32.mrb[29].mxu0  ;;  %v2407_v41 = vsel %vm572_vm3, %v2349_v18, -inf }
0x1140   :  { %2408 = vmax.xlane.f32.xlu1 %v2407_v41  ;;  %v2352_v14 = vpop.f32.mrb[30].mxu0 }
0x1141   :  { %v9392_v19 = vpop.f32.mrb[48].mxu1  ;;  %v7713_v42 = vpop.f32.mrb[31].mxu0 }
0x1142   :  { %v7700_v43 = vpop.f32.mrb[49].mxu1 }
0x1143   :  { %v2254_v44 = vpop.f32.mrb[50].mxu1 }
0x1144   :  { %v7701_v45 = vpop.f32.mrb[51].mxu1 }
0x1149   :  { %v9394_v46 = vpop.f32.mrb[52].mxu1 }
0x114a   :  { %v7706_v47 = vpop.f32.mrb[53].mxu1 }
0x114b   :  { %v2300_v48 = vpop.f32.mrb[54].mxu1 }
0x114c   :  { %v7707_v49 = vpop.f32.mrb[55].mxu1  ;;  %v6943_v48 = vld [vmem:[#allocation11 + $0x1] ss:$0 sm:$0xff] }
0x1151   :  { %2432 = vrot.lane.b32.xlu1 %v9355_v52, %s8925_s2 }
0x1152   :  { %v2401_v50 = vpop.f32.mrb[56].mxu1 }
0x1153   :  { %v7718_v51 = vpop.f32.mrb[57].mxu1  ;;  %v2410_v58 = vsel %vm572_vm3, %v2401_v50, -inf }
0x1154   :  { %2411 = vmax.xlane.f32.xlu0 %v2410_v58  ;;  %v2404_v60 = vpop.f32.mrb[58].mxu1 }
0x1155   :  { %v7719_v61 = vpop.f32.mrb[59].mxu1 }
0x11cd   :  { %v2409_v62 = vpop.xlane.xlu1 %2408 }
0x11ce   :  { %v2413_v63 = vsub.f32 %v2349_v18, %v2409_v62 }
0x11d0   :  { %v2415_v0 = vmul.f32 1.442695, %v2413_v63 }
0x11d1   :  { %v2433_v5 = vpop.permute.xlu1 %2432 }
0x11d2   :  { %8518 = vpow2.f32 %v2415_v0  ;;  %v2438_v6 = vsel %vm600_vm2, %v2433_v5, 0  ;;  %v8133_v0 = vld [vmem:[#allocation16 + $0x108] ss:$16 sps:$4 sm:$0xff]   ;;  %v8135_v5 = vld [vmem:[#allocation16 + $0x10c] ss:$16 sps:$4 sm:$0xff]  }
0x11d3   :  { %7721 = vmatpush3.bf16.msra.mxu0 %v2438_v6  ;;  %v8138_v6 = vld [vmem:[#allocation16 + $0x124] ss:$16 sps:$4 sm:$0xff]  }
0x11d4   :  { %7732 = vmatprep.subr.bf16.mxu0 %v8932_v4 }
0x11dc   :  { %v8519_v10 = vpop.eup %8518 }
0x11dd   :  { %v2419_v52 = vsel %vm572_vm3, %v8519_v10, 0.0 }
0x11de   :  { %2420 = vadd.xlane.f32.xlu0 %v2419_v52  ;;  %v8139_v52 = vld [vmem:[#allocation16 + $0x128] ss:$16 sps:$4 sm:$0xff]  }
0x11e1   :  { %v2412_v11 = vpop.xlane.xlu0 %2411 }
0x11e2   :  { %v2414_v12 = vsub.f32 %v2401_v50, %v2412_v11 }
0x11e4   :  { %v2417_v13 = vmul.f32 1.442695, %v2414_v12 }
0x11e6   :  { %8520 = vpow2.f32 %v2417_v13 }
0x11f0   :  { %v8521_v17 = vpop.eup %8520 }
0x11f1   :  { %v2422_v3 = vsel %vm572_vm3, %v8521_v17, 0.0 }
0x11f2   :  { %2423 = vadd.xlane.f32.xlu0 %v2422_v3 }
0x1208   :  { %2481 = vrot.lane.b32.xlu0 %v2094_v26, %s8925_s2  ;;  %v8125_v26 = vld [vmem:[#allocation10 + $0x58] sm:$0xff]  }
0x126b   :  { %v2421_v9 = vpop.xlane.xlu0 %2420 }
0x126c   :  { %8522 = vrcp.f32 %v2421_v9 }
0x1276   :  { %v8523_v20 = vpop.eup %8522 }
0x1277   :  { %v2427_v23 = vmul.f32 %v8523_v20, %v8519_v10  ;;  %v8141_v10 = vld [vmem:[#allocation16 + $0x12c] ss:$16 sps:$4 sm:$0xff]  }
0x1279   :  { %v2429_v24 = vpack.c.bf16 %v2427_v23, %v2427_v23  ;;  %v8144_v23 = vld [vmem:[#allocation16 + $0x144] ss:$16 sps:$4 sm:$0xff]  }
0x127b   :  { %7723 = vmatmul.mubr.msk.bf16.vlgmr.msra.gmra.mrb[32].mxu0 %vm572_vm3, %v2429_v24  ;;  %v8147_v24 = vld [vmem:[#allocation16 + $0x14c] ss:$16 sps:$4 sm:$0xff]  }
0x127c   :  { %7748 = vmatprep.mubr.msk.bf16.mxu0 %vm8934_vm0, %v8932_v4  ;;  %7733 = vmatpush3.bf16.msra.mxu0 %v8122_v21  ;;  %v8156_v21 = vld [vmem:[#allocation16 + $0x184] ss:$16 sps:$4 sm:$0xff]  }
0x127d   :  { %7734 = vmatprep.subr.bf16.mxu0 %v8932_v4 }
0x127f   :  { %v2424_v1 = vpop.xlane.xlu0 %2423 }
0x1280   :  { %8524 = vrcp.f32 %v2424_v1  ;;  %7735 = vmatpush3.bf16.msra.mxu0 %v8123_v22  ;;  %v8142_v1 = vld [vmem:[#allocation16 + $0x140] ss:$16 sps:$4 sm:$0xff]   ;;  %v8159_v22 = vld [vmem:[#allocation16 + $0x18c] ss:$16 sps:$4 sm:$0xff]  }
0x1281   :  { %7736 = vmatprep.subr.bf16.mxu0 %v8932_v4 }
0x1283   :  { %v2482_v2 = vpop.permute.xlu0 %2481 }
0x1284   :  { %v2487_v7 = vsel %vm600_vm2, %v2482_v2, 0  ;;  %7737 = vmatpush3.bf16.msra.mxu0 %v8124_v25  ;;  %v8145_v2 = vld [vmem:[#allocation16 + $0x148] ss:$16 sps:$4 sm:$0xff]   ;;  %v8154_v25 = vld [vmem:[#allocation16 + $0x180] ss:$16 sps:$4 sm:$0xff]  }
0x1285   :  { %7727 = vmatpush3.bf16.msra.mxu1 %v2487_v7  ;;  %7738 = vmatprep.subr.bf16.mxu0 %v8932_v4  ;;  %v8150_v7 = vld [vmem:[#allocation16 + $0x164] ss:$16 sps:$4 sm:$0xff]  }
0x1288   :  { %7739 = vmatpush3.bf16.msra.mxu0 %v8125_v26  ;;  %v8157_v26 = vld [vmem:[#allocation16 + $0x188] ss:$16 sps:$4 sm:$0xff]  }
0x1289   :  { %7740 = vmatprep.subr.bf16.mxu0 %v8932_v4 }
0x128a   :  { %v8525_v8 = vpop.eup %8524 }
0x128b   :  { %v2428_v15 = vmul.f32 %v8525_v8, %v8521_v17  ;;  %v8153_v8 = vld [vmem:[#allocation16 + $0x16c] ss:$16 sps:$4 sm:$0xff]  }
0x128c   :  { %7741 = vmatpush3.bf16.msra.mxu0 %v8126_v27  ;;  %v8162_v27 = vld [vmem:[#allocation16 + $0x1a4] ss:$16 sps:$4 sm:$0xff]  }
0x128d   :  { %v2430_v16 = vpack.c.bf16 %v2428_v15, %v2428_v15  ;;  %7742 = vmatprep.subr.bf16.mxu0 %v8932_v4  ;;  %v8148_v15 = vld [vmem:[#allocation16 + $0x160] ss:$16 sps:$4 sm:$0xff]  }
0x128f   :  { %7729 = vmatmul.mubr.msk.bf16.vlgmr.msra.gmra.mrb[60].mxu1 %vm572_vm3, %v2430_v16  ;;  %v8151_v16 = vld [vmem:[#allocation16 + $0x168] ss:$16 sps:$4 sm:$0xff]  }
0x1290   :  { %2938 = vmatprep.mubr.bf16.mxu1 %v8933_v32  ;;  %7743 = vmatpush3.bf16.msra.mxu0 %v8127_v28  ;;  %v8165_v28 = vld [vmem:[#allocation16 + $0x1ac] ss:$16 sps:$4 sm:$0xff]  }
0x1291   :  { %7744 = vmatprep.subr.bf16.mxu0 %v8932_v4 }
0x1294   :  { %7745 = vmatpush3.bf16.msra.mxu0 %v8128_v29  ;;  %v8160_v29 = vld [vmem:[#allocation16 + $0x1a0] ss:$16 sps:$4 sm:$0xff]  }
0x1295   :  { %7746 = vmatprep.subr.bf16.mxu0 %v8932_v4 }
0x1298   :  { %7747 = vmatpush3.bf16.msra.mxu0 %v8129_v37  ;;  %v8169_v37 = vld [vmem:[#allocation16 + $0x1c8] ss:$16 sps:$4 sm:$0xff]  }
0x1299   :  { %2949 = vmatprep.subr.bf16.mxu0 %v8135_v5  ;;  %v8178_v5 = vld [vmem:[#allocation17 + $0x140] sm:$0xff]  }
0x134e   :  { %v2474_v30 = vpop.f32.mrb[32].mxu0 }
0x134f   :  { %v7724_v31 = vpop.f32.mrb[33].mxu0 }
0x1350   :  { %v2477_v33 = vpop.f32.mrb[34].mxu0  ;;  %v8168_v31 = vld [vmem:[#allocation16 + $0x1c4] ss:$16 sps:$4 sm:$0xff]  }
0x1351   :  { %v7725_v34 = vpop.f32.mrb[35].mxu0  ;;  %v8171_v33 = vld [vmem:[#allocation16 + $0x1cc] ss:$16 sps:$4 sm:$0xff]  }
0x1352   :  { %v8166_v34 = vld [vmem:[#allocation16 + $0x1c0] ss:$16 sps:$4 sm:$0xff]  }
0x1362   :  { %v2523_v38 = vpop.f32.mrb[60].mxu1 }
0x1363   :  { %v7960_v39 = vpack.i.bf16 %v2523_v38, %v2474_v30  ;;  %v7730_v18 = vpop.f32.mrb[61].mxu1  ;;  %v8163_v30 = vld [vmem:[#allocation16 + $0x1a8] ss:$16 sps:$4 sm:$0xff]   ;;  %v8174_v38 = vld [vmem:[#allocation16 + $0x1e4] ss:$16 sps:$4 sm:$0xff]  }
0x1364   :  { %v2526_v40 = vpop.f32.mrb[62].mxu1  ;;  %v8175_v18 = vld [vmem:[#allocation16 + $0x1e8] ss:$16 sps:$4 sm:$0xff]  }
0x1365   :  { %7961 = vrot.lane.b32.xlu1 %v7960_v39, %s8925_s2  ;;  %v7731_v41 = vpop.f32.mrb[63].mxu1  ;;  %v8172_v39 = vld [vmem:[#allocation16 + $0x1e0] ss:$16 sps:$4 sm:$0xff]   ;;  %v8177_v40 = vld [vmem:[#allocation16 + $0x1ec] ss:$16 sps:$4 sm:$0xff]  }
0x13d7   :  { %v7962_v14 = vpop.permute.xlu1 %7961 }
0x13d8   :  { %v7964_v42 = vunpack.i.h.bf16 %v7962_v14  ;;  %v7963_v43 = vunpack.i.l.bf16 %v7962_v14 }
0x13da   :  { %v2538_v44 = vsel %vm479_vm1, %v9394_v46, %v7964_v42  ;;  %v2537_v45 = vsel %vm479_vm1, %v9392_v19, %v7963_v43  ;;  %v8130_v19 = vld [vmem:[#allocation16 + $0x100] ss:$16 sps:$4 sm:$0xff]   ;;  %v8132_v46 = vld [vmem:[#allocation16 + $0x104] ss:$16 sps:$4 sm:$0xff]  }
0x13db   :  { %v2556_v47 = vpack.c.bf16 %v2538_v44, %v2537_v45  ;;  %2906 = vmatprep.subr.bf16.mxu1 %v8132_v46 }
0x13dc   :  { %2907 = vmatpush1.bf16.msra.mxu1 %v8130_v19 }
0x13dd   :  { %7749 = vmatmul.mubr.bf16.vlgmr.msra.gmra.mrb[36].mxu0 %v2556_v47  ;;  %2908 = vmatprep.subr.bf16.mxu1 %v8138_v6  ;;  %v8179_v6 = vld [vmem:[#allocation17 + $0x1c0] sm:$0xff]  }
0x13de   :  { %2981 = vmatprep.mubr.bf16.mxu0 %v8933_v32  ;;  %2950 = vmatpush1.bf16.msra.mxu0 %v8133_v0 }
0x13df   :  { %2951 = vmatprep.subr.bf16.mxu0 %v8141_v10  ;;  %v8180_v10 = vld [vmem:[#allocation17 + $0x100] sm:$0xff]  }
0x13e2   :  { %2952 = vmatpush1.bf16.msra.mxu0 %v8139_v52  ;;  %v8182_v52 = vld [vmem:[#allocation17 + $0x148] sm:$0xff]  }
0x13e3   :  { %2953 = vmatprep.subr.bf16.mxu0 %v8147_v24  ;;  %v8192_v24 = vld [vmem:[#allocation17 + $0x118] sm:$0xff]  }
0x13e6   :  { %2954 = vmatpush1.bf16.msra.mxu0 %v8145_v2  ;;  %v8194_v2 = vld [vmem:[#allocation17 + $0x160] sm:$0xff]  }
0x13e7   :  { %2955 = vmatprep.subr.bf16.mxu0 %v8153_v8  ;;  %v8196_v8 = vld [vmem:[#allocation17 + $0x120] sm:$0xff]  }
0x13ea   :  { %2956 = vmatpush1.bf16.msra.mxu0 %v8151_v16  ;;  %v8198_v16 = vld [vmem:[#allocation17 + $0x168] sm:$0xff]  }
0x13eb   :  { %2957 = vmatprep.subr.bf16.mxu0 %v8159_v22  ;;  %v8200_v22 = vld [vmem:[#allocation17 + $0x128] sm:$0xff]  }
0x13ee   :  { %2958 = vmatpush1.bf16.msra.mxu0 %v8157_v26  ;;  %v8202_v26 = vld [vmem:[#allocation17 + $0x170] sm:$0xff]  }
0x13ef   :  { %2959 = vmatprep.subr.bf16.mxu0 %v8165_v28  ;;  %v8204_v28 = vld [vmem:[#allocation17 + $0x130] sm:$0xff]  }
0x13f2   :  { %2960 = vmatpush1.bf16.msra.mxu0 %v8163_v30  ;;  %v8206_v30 = vld [vmem:[#allocation17 + $0x178] sm:$0xff]  }
0x13f3   :  { %2961 = vmatprep.subr.bf16.mxu0 %v8171_v33  ;;  %v8208_v33 = vld [vmem:[#allocation17 + $0x138] sm:$0xff]  }
0x13f6   :  { %2962 = vmatpush1.bf16.msra.mxu0 %v8169_v37  ;;  %v6954_v37 = vld [vmem:[%s9813_s10 + $0x1] ss:$4 sm:$0xf] }
0x13f7   :  { %2963 = vmatprep.subr.bf16.mxu0 %v8177_v40  ;;  %v2741_v40 = vrot.slane %v6954_v37, %v9289_v56 }
0x13fa   :  { %2964 = vmatpush1.bf16.msra.mxu0 %v8175_v18  ;;  %v2733_v18 = vrot.slane %v6954_v37, %v9175_v55 }
0x13fb   :  { %7398 = vmatprep.subr.bf16.mxu0 %v8179_v6 }
0x14b0   :  { %v2644_v49 = vpop.f32.mrb[36].mxu0 }
0x14b1   :  { %v2645_v50 = vadd.f32 %v6943_v48, %v2644_v49  ;;  %v7750_v51 = vpop.f32.mrb[37].mxu0 }
0x14b2   :  { %v2647_v58 = vpop.f32.mrb[38].mxu0 }
0x14b3   :  { %v9424_v60 = vadd.f32 %v2645_v50, %v9318_v35  ;;  %v2648_v61 = vadd.f32 %v6943_v48, %v2647_v58  ;;  %v7751_v62 = vpop.f32.mrb[39].mxu0  ;;  %v8136_v35 = vld [vmem:[#allocation16 + $0x120] ss:$16 sps:$4 sm:$0xff]   ;;  %v6952_v48 = vld [vmem:[#allocation13 + $0x1] ss:$0 sm:$0xff] }
0x14b4   :  { %2909 = vmatpush1.bf16.msra.mxu1 %v8136_v35  ;;  %v8181_v35 = vld [vmem:[#allocation17 + $0x180] sm:$0xff]  }
0x14b5   :  { %v9427_v63 = vadd.f32 %v2648_v61, %v9322_v36  ;;  %2655 = vadd.xlane.f32.xlu1 %v9424_v60  ;;  %2910 = vmatprep.subr.bf16.mxu1 %v8144_v23  ;;  %v6953_v61 = vld [vmem:[#allocation14 + $0x1] ss:$0 sm:$0xff] }
0x14b6   :  { %v8191_v23 = vld [vmem:[#allocation17 + $0x1d8] sm:$0xff]  }
0x14b7   :  { %2657 = vadd.xlane.f32.xlu0 %v9427_v63 }
0x14b8   :  { %2911 = vmatpush1.bf16.msra.mxu1 %v8142_v1  ;;  %v8193_v1 = vld [vmem:[#allocation17 + $0x198] sm:$0xff]  }
0x14b9   :  { %2912 = vmatprep.subr.bf16.mxu1 %v8150_v7  ;;  %v8195_v7 = vld [vmem:[#allocation17 + $0x1e0] sm:$0xff]  }
0x14bc   :  { %2913 = vmatpush1.bf16.msra.mxu1 %v8148_v15  ;;  %v8197_v15 = vld [vmem:[#allocation17 + $0x1a0] sm:$0xff]  }
0x14bd   :  { %2914 = vmatprep.subr.bf16.mxu1 %v8156_v21  ;;  %v8199_v21 = vld [vmem:[#allocation17 + $0x1e8] sm:$0xff]  }
0x14c0   :  { %2915 = vmatpush1.bf16.msra.mxu1 %v8154_v25  ;;  %v8201_v25 = vld [vmem:[#allocation17 + $0x1a8] sm:$0xff]  }
0x14c1   :  { %2916 = vmatprep.subr.bf16.mxu1 %v8162_v27  ;;  %v8203_v27 = vld [vmem:[#allocation17 + $0x1f0] sm:$0xff]  }
0x14c4   :  { %2917 = vmatpush1.bf16.msra.mxu1 %v8160_v29  ;;  %v8205_v29 = vld [vmem:[#allocation17 + $0x1b0] sm:$0xff]  }
0x14c5   :  { %2918 = vmatprep.subr.bf16.mxu1 %v8168_v31  ;;  %v8207_v31 = vld [vmem:[#allocation17 + $0x1f8] sm:$0xff]  }
0x14c8   :  { %2919 = vmatpush1.bf16.msra.mxu1 %v8166_v34  ;;  %v8209_v34 = vld [vmem:[#allocation17 + $0x1b8] sm:$0xff]  }
0x14c9   :  { %2920 = vmatprep.subr.bf16.mxu1 %v8174_v38  ;;  %v2729_v38 = vrot.slane %v6954_v37, %v9185_v59 }
0x14cc   :  { %2921 = vmatpush1.bf16.msra.mxu1 %v8172_v39  ;;  %v2737_v39 = vrot.slane %v6954_v37, %v9181_v57 }
0x14cd   :  { %7376 = vmatprep.subr.bf16.mxu1 %v8178_v5 }
0x1542   :  { %v2656_v36 = vpop.xlane.xlu1 %2655 }
0x1543   :  { %v2659_v11 = vmul.f32 0.0078125, %v2656_v36  ;;  %v8183_v36 = vld [vmem:[#allocation17 + $0x1c8] sm:$0xff]  }
0x1544   :  { %v2658_v12 = vpop.xlane.xlu0 %2657 }
0x1545   :  { %v9432_v13 = vsub.f32 %v9424_v60, %v2659_v11  ;;  %v2660_v17 = vmul.f32 0.0078125, %v2658_v12  ;;  %v8184_v11 = vld [vmem:[#allocation17 + $0x108] sm:$0xff]  }
0x1546   :  { %v8185_v12 = vld [vmem:[#allocation17 + $0x188] sm:$0xff]  }
0x1547   :  { %v9435_v3 = vsub.f32 %v9427_v63, %v2660_v17  ;;  %v2663_v9 = vmul.f32 %v9432_v13, %v9432_v13  ;;  %v8187_v17 = vld [vmem:[#allocation17 + $0x1d0] sm:$0xff]  }
0x1549   :  { %2665 = vadd.xlane.f32.xlu0 %v2663_v9  ;;  %v2664_v20 = vmul.f32 %v9435_v3, %v9435_v3  ;;  %v8189_v9 = vld [vmem:[#allocation17 + $0x190] sm:$0xff]  }
0x154b   :  { %2667 = vadd.xlane.f32.xlu1 %v2664_v20  ;;  %v8190_v20 = vld [vmem:[#allocation17 + $0x158] sm:$0xff]  }
0x15d6   :  { %v2666_v41 = vpop.xlane.xlu0 %2665 }
0x15d7   :  { %v2669_v14 = vmul.f32 0.0078125, %v2666_v41 }
0x15d8   :  { %v2668_v42 = vpop.xlane.xlu1 %2667 }
0x15d9   :  { %v2671_v43 = vadd.f32 1e-05, %v2669_v14  ;;  %v2670_v44 = vmul.f32 0.0078125, %v2668_v42 }
0x15db   :  { %8526 = vrsqrt.f32 %v2671_v43  ;;  %v2672_v45 = vadd.f32 1e-05, %v2670_v44 }
0x15dd   :  { %8528 = vrsqrt.f32 %v2672_v45 }
0x15e5   :  { %v8527_v47 = vpop.eup %8526 }
0x15e6   :  { %v2675_v49 = vmul.f32 %v8527_v47, %v9432_v13  ;;  %v8186_v13 = vld [vmem:[#allocation17 + $0x150] sm:$0xff]  }
0x15e7   :  { %v8529_v50 = vpop.eup %8528 }
0x15e8   :  { %v2676_v51 = vmul.f32 %v8529_v50, %v9435_v3  ;;  %v2681_v58 = vmul.f32 %v6952_v48, %v2675_v49  ;;  %v8188_v3 = vld [vmem:[#allocation17 + $0x110] sm:$0xff]  }
0x15ea   :  { %v2682_v62 = vmul.f32 %v6952_v48, %v2676_v51  ;;  %v2687_v19 = vadd.f32 %v6953_v61, %v2681_v58 }
0x15ec   :  { %v2688_v46 = vadd.f32 %v6953_v61, %v2682_v62 }
0x15ee   :  { %v2722_v0 = vpack.c.bf16 %v2688_v46, %v2687_v19 }
0x15f0   :  { %2939 = vmatmul.mubr.bf16.vlgmr.msra.gmra.mrb[64].mxu1 %v2722_v0  ;;  %2982 = vmatmul.mubr.bf16.vlgmr.msra.gmra.mrb[40].mxu0 %v2722_v0 }
0x15f1   :  { %7377 = vmatpush3.bf16.msra.mxu1 %v8180_v10  ;;  %7399 = vmatpush3.bf16.msra.mxu0 %v8181_v35 }
0x15f2   :  { %7378 = vmatprep.subr.bf16.mxu1 %v8182_v52  ;;  %7400 = vmatprep.subr.bf16.mxu0 %v8183_v36 }
0x15f5   :  { %7379 = vmatpush3.bf16.msra.mxu1 %v8184_v11  ;;  %7401 = vmatpush3.bf16.msra.mxu0 %v8185_v12 }
0x15f6   :  { %7380 = vmatprep.subr.bf16.mxu1 %v8186_v13  ;;  %7402 = vmatprep.subr.bf16.mxu0 %v8187_v17 }
0x15f9   :  { %7381 = vmatpush3.bf16.msra.mxu1 %v8188_v3  ;;  %7403 = vmatpush3.bf16.msra.mxu0 %v8189_v9 }
0x15fa   :  { %7382 = vmatprep.subr.bf16.mxu1 %v8190_v20  ;;  %7404 = vmatprep.subr.bf16.mxu0 %v8191_v23 }
0x15fd   :  { %7383 = vmatpush3.bf16.msra.mxu1 %v8192_v24  ;;  %7405 = vmatpush3.bf16.msra.mxu0 %v8193_v1 }
0x15fe   :  { %7384 = vmatprep.subr.bf16.mxu1 %v8194_v2  ;;  %7406 = vmatprep.subr.bf16.mxu0 %v8195_v7 }
0x1601   :  { %7385 = vmatpush3.bf16.msra.mxu1 %v8196_v8  ;;  %7407 = vmatpush3.bf16.msra.mxu0 %v8197_v15 }
0x1602   :  { %7386 = vmatprep.subr.bf16.mxu1 %v8198_v16  ;;  %7408 = vmatprep.subr.bf16.mxu0 %v8199_v21 }
0x1605   :  { %7387 = vmatpush3.bf16.msra.mxu1 %v8200_v22  ;;  %7409 = vmatpush3.bf16.msra.mxu0 %v8201_v25 }
0x1606   :  { %7388 = vmatprep.subr.bf16.mxu1 %v8202_v26  ;;  %7410 = vmatprep.subr.bf16.mxu0 %v8203_v27 }
0x1609   :  { %7389 = vmatpush3.bf16.msra.mxu1 %v8204_v28  ;;  %7411 = vmatpush3.bf16.msra.mxu0 %v8205_v29 }
0x160a   :  { %7390 = vmatprep.subr.bf16.mxu1 %v8206_v30  ;;  %7412 = vmatprep.subr.bf16.mxu0 %v8207_v31 }
0x160d   :  { %7391 = vmatpush3.bf16.msra.mxu1 %v8208_v33  ;;  %7413 = vmatpush3.bf16.msra.mxu0 %v8209_v34 }
0x160e   :  { %7752 = vmatprep.subr.bf16.mxu0 %v8932_v4 }
0x16c3   :  { %v2940_v41 = vpop.f32.mrb[64].mxu1  ;;  %v2983_v14 = vpop.f32.mrb[40].mxu0 }
0x16c4   :  { %v9451_v42 = vadd.f32 %v2940_v41, %v2729_v38  ;;  %v9453_v43 = vadd.f32 %v2983_v14, %v2737_v39  ;;  %v2942_v44 = vpop.f32.mrb[65].mxu1  ;;  %v2985_v45 = vpop.f32.mrb[41].mxu0 }
0x16c5   :  { %v9455_v47 = vadd.f32 %v2942_v44, %v2733_v18  ;;  %v9457_v48 = vadd.f32 %v2985_v45, %v2741_v40  ;;  %v2944_v49 = vpop.f32.mrb[66].mxu1  ;;  %v2987_v50 = vpop.f32.mrb[42].mxu0 }
0x16c6   :  { %v6987_v51 = vmul.f32 -1.702, %v9451_v42  ;;  %v6989_v58 = vmul.f32 -1.702, %v9453_v43  ;;  %v2945_v61 = vadd.f32 %v2944_v49, %v2729_v38  ;;  %v2988_v62 = vadd.f32 %v2987_v50, %v2737_v39  ;;  %v2946_v19 = vpop.f32.mrb[67].mxu1  ;;  %v2989_v46 = vpop.f32.mrb[43].mxu0 }
0x16c7   :  { %v6988_v0 = vmul.f32 -1.702, %v9455_v47  ;;  %v6990_v5 = vmul.f32 -1.702, %v9457_v48  ;;  %v2947_v6 = vadd.f32 %v2946_v19, %v2733_v18  ;;  %v2990_v10 = vadd.f32 %v2989_v46, %v2741_v40 }
0x16c8   :  { %v3008_v35 = vmul.f32 1.442695, %v6987_v51  ;;  %v3012_v52 = vmul.f32 1.442695, %v6989_v58  ;;  %v6991_v36 = vmul.f32 -1.702, %v2945_v61 }
0x16c9   :  { %v3010_v11 = vmul.f32 1.442695, %v6988_v0  ;;  %v3014_v12 = vmul.f32 1.442695, %v6990_v5  ;;  %v6993_v13 = vmul.f32 -1.702, %v2988_v62 }
0x16ca   :  { %8530 = vpow2.f32 %v3008_v35  ;;  %v3016_v17 = vmul.f32 1.442695, %v6991_v36  ;;  %v6992_v3 = vmul.f32 -1.702, %v2947_v6  ;;  %v6994_v9 = vmul.f32 -1.702, %v2990_v10 }
0x16cb   :  { %8532 = vpow2.f32 %v3012_v52  ;;  %v3020_v20 = vmul.f32 1.442695, %v6993_v13 }
0x16cc   :  { %8534 = vpow2.f32 %v3010_v11  ;;  %v3018_v23 = vmul.f32 1.442695, %v6992_v3  ;;  %v3022_v24 = vmul.f32 1.442695, %v6994_v9 }
0x16cd   :  { %8536 = vpow2.f32 %v3014_v12 }
0x16ce   :  { %8538 = vpow2.f32 %v3016_v17 }
0x16cf   :  { %8540 = vpow2.f32 %v3020_v20 }
0x16d0   :  { %8542 = vpow2.f32 %v3018_v23 }
0x16d1   :  { %8544 = vpow2.f32 %v3022_v24 }
0x16d4   :  { %v8531_v1 = vpop.eup %8530 }
0x16d5   :  { %v8533_v2 = vpop.eup %8532  ;;  %v3024_v7 = vadd.f32 1.0, %v8531_v1 }
0x16d6   :  { %v8535_v8 = vpop.eup %8534  ;;  %v3026_v15 = vadd.f32 1.0, %v8533_v2  ;;  %v8210_v2 = vld [vmem:[#allocation8 + $0x180] ss:$12 sps:$4 sm:$0xff]  }
0x16d7   :  { %v8537_v16 = vpop.eup %8536  ;;  %8546 = vrcp.f32 %v3024_v7  ;;  %v3025_v21 = vadd.f32 1.0, %v8535_v8  ;;  %v8212_v7 = vld [vmem:[#allocation8 + $0x184] ss:$12 sps:$4 sm:$0xff]   ;;  %v8213_v8 = vld [vmem:[#allocation8 + $0x188] ss:$12 sps:$4 sm:$0xff]  }
0x16d8   :  { %v8539_v22 = vpop.eup %8538  ;;  %8548 = vrcp.f32 %v3026_v15  ;;  %v3027_v25 = vadd.f32 1.0, %v8537_v16  ;;  %v8216_v15 = vld [vmem:[#allocation8 + $0x19c] ss:$12 sps:$4 sm:$0xff]   ;;  %3622 = vmatprep.subr.bf16.mxu1 %v8212_v7  ;;  %v8217_v16 = vld [vmem:[#allocation8 + $0x1a0] ss:$12 sps:$4 sm:$0xff]  }
0x16d9   :  { %v8541_v26 = vpop.eup %8540  ;;  %8550 = vrcp.f32 %v3025_v21  ;;  %v3028_v27 = vadd.f32 1.0, %v8539_v22  ;;  %v8214_v21 = vld [vmem:[#allocation8 + $0x198] ss:$12 sps:$4 sm:$0xff]  }
0x16da   :  { %v8543_v28 = vpop.eup %8542  ;;  %8552 = vrcp.f32 %v3027_v25  ;;  %v3030_v29 = vadd.f32 1.0, %v8541_v26 }
0x16db   :  { %v8545_v30 = vpop.eup %8544  ;;  %8554 = vrcp.f32 %v3028_v27  ;;  %v3029_v31 = vadd.f32 1.0, %v8543_v28 }
0x16dc   :  { %8556 = vrcp.f32 %v3030_v29  ;;  %v3031_v33 = vadd.f32 1.0, %v8545_v30  ;;  %v8220_v30 = vld [vmem:[#allocation8 + $0x1b4] ss:$12 sps:$4 sm:$0xff]  }
0x16dd   :  { %8558 = vrcp.f32 %v3029_v31  ;;  %v8218_v31 = vld [vmem:[#allocation8 + $0x1b0] ss:$12 sps:$4 sm:$0xff]  }
0x16de   :  { %8560 = vrcp.f32 %v3031_v33  ;;  %v8221_v33 = vld [vmem:[#allocation8 + $0x1b8] ss:$12 sps:$4 sm:$0xff]  }
0x16e1   :  { %v8547_v34 = vpop.eup %8546 }
0x16e2   :  { %v8549_v37 = vpop.eup %8548  ;;  %v3048_v41 = vmul.f32 %v8547_v34, %v9451_v42  ;;  %v8224_v34 = vld [vmem:[#allocation8 + $0x1cc] ss:$12 sps:$4 sm:$0xff]  }
0x16e3   :  { %v8551_v38 = vpop.eup %8550  ;;  %v3050_v45 = vmul.f32 %v8549_v37, %v9453_v43  ;;  %v8222_v37 = vld [vmem:[#allocation8 + $0x1c8] ss:$12 sps:$4 sm:$0xff]  }
0x16e4   :  { %v8553_v39 = vpop.eup %8552  ;;  %v3049_v51 = vmul.f32 %v8551_v38, %v9455_v47  ;;  %v6995_v47 = vld [vmem:[%s9815_s12 + $0x1] ss:$0 sm:$0xff]  ;;  %v8225_v38 = vld [vmem:[#allocation8 + $0x1d0] ss:$12 sps:$4 sm:$0xff]  }
0x16e5   :  { %v8555_v18 = vpop.eup %8554  ;;  %v3051_v46 = vmul.f32 %v8553_v39, %v9457_v48  ;;  %v8228_v39 = vld [vmem:[#allocation8 + $0x1e4] ss:$12 sps:$4 sm:$0xff]  }
0x16e6   :  { %v8557_v40 = vpop.eup %8556  ;;  %v3052_v14 = vmul.f32 %v8555_v18, %v2945_v61  ;;  %v8226_v18 = vld [vmem:[#allocation8 + $0x1e0] ss:$12 sps:$4 sm:$0xff]  }
0x16e7   :  { %v8559_v44 = vpop.eup %8558  ;;  %v3054_v49 = vmul.f32 %v8557_v40, %v2988_v62  ;;  %v8229_v40 = vld [vmem:[#allocation8 + $0x1e8] ss:$12 sps:$4 sm:$0xff]  }
0x16e8   :  { %v8561_v50 = vpop.eup %8560  ;;  %v3121_v58 = vpack.c.bf16 %v3052_v14, %v3048_v41  ;;  %v3053_v19 = vmul.f32 %v8559_v44, %v2947_v6  ;;  %v8232_v41 = vld [vmem:[#allocation8 + $0x1fc] ss:$12 sps:$4 sm:$0xff]   ;;  %v8230_v14 = vld [vmem:[#allocation8 + $0x1f8] ss:$12 sps:$4 sm:$0xff]   ;;  %v8233_v44 = vld [vmem:[#allocation8 + $0x200] ss:$12 sps:$4 sm:$0xff]  }
0x16e9   :  { %v3123_v0 = vpack.c.bf16 %v3054_v49, %v3050_v45  ;;  %v3055_v5 = vmul.f32 %v8561_v50, %v2990_v10  ;;  %v8236_v45 = vld [vmem:[#allocation8 + $0x214] ss:$12 sps:$4 sm:$0xff]   ;;  %v8234_v49 = vld [vmem:[#allocation8 + $0x210] ss:$12 sps:$4 sm:$0xff]   ;;  %v8237_v50 = vld [vmem:[#allocation8 + $0x218] ss:$12 sps:$4 sm:$0xff]  }
0x16ea   :  { %v3122_v35 = vpack.c.bf16 %v3053_v19, %v3049_v51  ;;  %v8240_v51 = vld [vmem:[#allocation8 + $0x22c] ss:$12 sps:$4 sm:$0xff]   ;;  %v8241_v19 = vld [vmem:[#allocation8 + $0x230] ss:$12 sps:$4 sm:$0xff]  }
0x16eb   :  { %v3124_v52 = vpack.c.bf16 %v3055_v5, %v3051_v46 }
0x16ec   :  { %3354 = vmatprep.mubr.bf16.mxu1 %v3122_v35 }
0x16ed   :  { %3395 = vmatprep.mubr.bf16.mxu0 %v3124_v52  ;;  %3355 = vmatmul.mubr.bf16.vlgmr.msra.gmra.mrb[68].mxu1 %v3121_v58  ;;  %v8238_v58 = vld [vmem:[#allocation8 + $0x228] ss:$12 sps:$4 sm:$0xff]  }
0x16ee   :  { %3396 = vmatmul.mubr.bf16.vlgmr.msra.gmra.mrb[44].mxu0 %v3123_v0  ;;  %3654 = vmatprep.mubr.bf16.mxu1 %v8933_v32 }
0x16ef   :  { %7768 = vmatprep.mubr.msk.bf16.mxu0 %vm8934_vm0, %v8932_v4  ;;  %7753 = vmatpush3.bf16.msra.mxu0 %v8213_v8 }
0x16f0   :  { %3623 = vmatpush1.bf16.msra.mxu1 %v8210_v2  ;;  %7754 = vmatprep.subr.bf16.mxu0 %v8932_v4 }
0x16f1   :  { %3624 = vmatprep.subr.bf16.mxu1 %v8216_v15 }
0x16f3   :  { %7755 = vmatpush3.bf16.msra.mxu0 %v8217_v16 }
0x16f4   :  { %3625 = vmatpush1.bf16.msra.mxu1 %v8214_v21  ;;  %7756 = vmatprep.subr.bf16.mxu0 %v8932_v4 }
0x16f5   :  { %3626 = vmatprep.subr.bf16.mxu1 %v8220_v30 }
0x16f7   :  { %7757 = vmatpush3.bf16.msra.mxu0 %v8221_v33 }
0x16f8   :  { %3627 = vmatpush1.bf16.msra.mxu1 %v8218_v31  ;;  %7758 = vmatprep.subr.bf16.mxu0 %v8932_v4 }
0x16f9   :  { %3628 = vmatprep.subr.bf16.mxu1 %v8224_v34 }
0x16fb   :  { %7759 = vmatpush3.bf16.msra.mxu0 %v8225_v38 }
0x16fc   :  { %3629 = vmatpush1.bf16.msra.mxu1 %v8222_v37  ;;  %7760 = vmatprep.subr.bf16.mxu0 %v8932_v4 }
0x16fd   :  { %3630 = vmatprep.subr.bf16.mxu1 %v8228_v39 }
0x16ff   :  { %7761 = vmatpush3.bf16.msra.mxu0 %v8229_v40 }
0x1700   :  { %3631 = vmatpush1.bf16.msra.mxu1 %v8226_v18  ;;  %7762 = vmatprep.subr.bf16.mxu0 %v8932_v4 }
0x1701   :  { %3632 = vmatprep.subr.bf16.mxu1 %v8232_v41 }
0x1703   :  { %7763 = vmatpush3.bf16.msra.mxu0 %v8233_v44 }
0x1704   :  { %3633 = vmatpush1.bf16.msra.mxu1 %v8230_v14  ;;  %7764 = vmatprep.subr.bf16.mxu0 %v8932_v4 }
0x1705   :  { %3634 = vmatprep.subr.bf16.mxu1 %v8236_v45 }
0x1707   :  { %7765 = vmatpush3.bf16.msra.mxu0 %v8237_v50 }
0x1708   :  { %3635 = vmatpush1.bf16.msra.mxu1 %v8234_v49  ;;  %7766 = vmatprep.subr.bf16.mxu0 %v8932_v4 }
0x1709   :  { %3636 = vmatprep.subr.bf16.mxu1 %v8240_v51 }
0x170b   :  { %7767 = vmatpush3.bf16.msra.mxu0 %v8241_v19 }
0x170c   :  { %3637 = vmatpush1.bf16.msra.mxu1 %v8238_v58  ;;  %7796 = vmatprep.subr.bf16.mxu0 %v8932_v4 }
0x170d   :  { %7772 = vmatprep.subr.bf16.mxu1 %v8932_v4 }
0x17c0   :  { %v7392_v42 = vpop.f32.mrb[68].mxu1 }
0x17c1   :  { %v7414_v43 = vpop.f32.mrb[44].mxu0  ;;  %v7393_v48 = vpop.f32.mrb[69].mxu1 }
0x17c2   :  { %v7394_v61 = vadd.f32 %v7393_v48, %v7392_v42  ;;  %v7415_v62 = vpop.f32.mrb[45].mxu0  ;;  %v7395_v6 = vpop.f32.mrb[70].mxu1 }
0x17c3   :  { %v7416_v10 = vadd.f32 %v7415_v62, %v7414_v43  ;;  %v7417_v36 = vpop.f32.mrb[46].mxu0  ;;  %v7396_v11 = vpop.f32.mrb[71].mxu1 }
0x17c4   :  { %v3357_v12 = vadd.f32 %v7394_v61, %v6995_v47  ;;  %v7397_v13 = vadd.f32 %v7396_v11, %v7395_v6  ;;  %v7418_v17 = vpop.f32.mrb[47].mxu0 }
0x17c5   :  { %v7419_v3 = vadd.f32 %v7418_v17, %v7417_v36  ;;  %v7030_v17 = vld [vmem:[%s9807_s4 + $0x2] ss:$4 sm:$0x7] }
0x17c6   :  { %v3398_v9 = vadd.f32 %v7416_v10, %v3357_v12  ;;  %v3360_v20 = vadd.f32 %v7397_v13, %v6995_v47  ;;  %v7028_v47 = vld [vmem:[#allocation5 + $0x2] ss:$0 sm:$0xff]  ;;  %v7029_v10 = vld [vmem:[#allocation7 + $0x2] ss:$0 sm:$0xff] }
0x17c8   :  { %v3401_v23 = vadd.f32 %v7419_v3, %v3360_v20  ;;  %v9474_v24 = vadd.f32 %v3398_v9, %v9424_v60  ;;  %v3486_v3 = vrot.slane %v7030_v17, %v9175_v55 }
0x17ca   :  { %3408 = vadd.xlane.f32.xlu0 %v9474_v24  ;;  %v9478_v1 = vadd.f32 %v3401_v23, %v9427_v63  ;;  %v3490_v23 = vrot.slane %v7030_v17, %v9181_v57 }
0x17cc   :  { %3410 = vadd.xlane.f32.xlu1 %v9478_v1 }
0x1857   :  { %v3409_v60 = vpop.xlane.xlu0 %3408 }
0x1858   :  { %v3412_v63 = vmul.f32 0.0078125, %v3409_v60 }
0x1859   :  { %v3411_v22 = vpop.xlane.xlu1 %3410 }
0x185a   :  { %v3414_v25 = vsub.f32 %v9474_v24, %v3412_v63  ;;  %v3413_v26 = vmul.f32 0.0078125, %v3411_v22  ;;  %v3482_v22 = vrot.slane %v7030_v17, %v9185_v59 }
0x185c   :  { %v3415_v27 = vsub.f32 %v9478_v1, %v3413_v26  ;;  %v3416_v28 = vmul.f32 %v3414_v25, %v3414_v25 }
0x185e   :  { %3418 = vadd.xlane.f32.xlu0 %v3416_v28  ;;  %v3417_v29 = vmul.f32 %v3415_v27, %v3415_v27 }
0x1860   :  { %3420 = vadd.xlane.f32.xlu1 %v3417_v29 }
0x18eb   :  { %v3419_v46 = vpop.xlane.xlu0 %3418 }
0x18ec   :  { %v3422_v0 = vmul.f32 0.0078125, %v3419_v46 }
0x18ed   :  { %v3421_v5 = vpop.xlane.xlu1 %3420 }
0x18ee   :  { %v3424_v35 = vadd.f32 1e-05, %v3422_v0  ;;  %v3423_v52 = vmul.f32 0.0078125, %v3421_v5 }
0x18f0   :  { %8562 = vrsqrt.f32 %v3424_v35  ;;  %v3425_v42 = vadd.f32 1e-05, %v3423_v52 }
0x18f2   :  { %8564 = vrsqrt.f32 %v3425_v42 }
0x18fa   :  { %v8563_v43 = vpop.eup %8562 }
0x18fb   :  { %v3428_v48 = vmul.f32 %v8563_v43, %v3414_v25 }
0x18fc   :  { %v8565_v61 = vpop.eup %8564 }
0x18fd   :  { %v3429_v62 = vmul.f32 %v8565_v61, %v3415_v27  ;;  %v3434_v6 = vmul.f32 %v7028_v47, %v3428_v48 }
0x18ff   :  { %v3435_v36 = vmul.f32 %v7028_v47, %v3429_v62  ;;  %v3440_v11 = vadd.f32 %v7029_v10, %v3434_v6 }
0x1901   :  { %v3441_v12 = vadd.f32 %v7029_v10, %v3435_v36 }
0x1903   :  { %v3475_v13 = vpack.c.bf16 %v3441_v12, %v3440_v11 }
0x1905   :  { %3655 = vmatmul.mubr.bf16.vlgmr.msra.gmra.mrb[72].mxu1 %v3475_v13  ;;  %7769 = vmatmul.mubr.bf16.vlgmr.msra.gmra.mrb[48].mxu0 %v3475_v13 }
0x1906   :  { %7774 = vmatprep.mubr.msk.bf16.mxu1 %vm8934_vm0, %v8932_v4  ;;  %7798 = vmatprep.mubr.msk.bf16.mxu0 %vm8934_vm0, %v8932_v4 }
0x19d8   :  { %v3656_v9 = vpop.f32.mrb[72].mxu1  ;;  %v3699_v20 = vpop.f32.mrb[48].mxu0 }
0x19d9   :  { %v3658_v2 = vpop.f32.mrb[73].mxu1  ;;  %v7770_v7 = vpop.f32.mrb[49].mxu0  ;;  %v3657_v28 = vadd.f32 %v3656_v9, %v3482_v22  ;;  %v3700_v31 = vadd.f32 %v3699_v20, %v3490_v23 }
0x19da   :  { %v3659_v8 = vadd.f32 %v3658_v2, %v3486_v3  ;;  %v3660_v15 = vpop.f32.mrb[74].mxu1  ;;  %v3702_v16 = vpop.f32.mrb[50].mxu0 }
0x19db   :  { %v9501_v21 = vadd.f32 %v3702_v16, %v3490_v23  ;;  %v3662_v60 = vpop.f32.mrb[75].mxu1  ;;  %v7771_v63 = vpop.f32.mrb[51].mxu0  ;;  %v3706_v30 = vpack.c.bf16 %v3657_v28, %v3657_v28  ;;  %v3661_v34 = vadd.f32 %v3660_v15, %v3482_v22  ;;  %v9511_v37 = vpack.c.bf16 %v3700_v31, %v3700_v31 }
0x19dc   :  { %v3708_v25 = vpack.c.bf16 %v3659_v8, %v3659_v8  ;;  %v3663_v27 = vadd.f32 %v3662_v60, %v3486_v3 }
0x19dd   :  { %v3707_v38 = vpack.c.bf16 %v3661_v34, %v3661_v34  ;;  %v3832_v39 = vsel %vm600_vm2, %v9511_v37, 0  ;;  %v3711_v12 = vpack.c.bf16 %v9501_v21, %v9501_v21 }
0x19de   :  { %v3716_v26 = vsel %vm479_vm1, %v3708_v25, 0  ;;  %v3709_v29 = vpack.c.bf16 %v3663_v27, %v3663_v27 }
0x19df   :  { %7773 = vmatpush3.bf16.xpose.msra.mxu1 %v3716_v26  ;;  %v3878_v9 = vsel %vm600_vm2, %v3711_v12, 0 }
0x19e0   :  { %7778 = vmatprep.subr.bf16.mxu1 %v8932_v4  ;;  %v3762_v33 = vsel %vm479_vm1, %v3709_v29, 0 }
0x19e6   :  { %7775 = vmatmul.mubr.msk.bf16.vlgmr.msra.gmra.mrb[76].mxu1 %vm479_vm1, %v3706_v30 }
0x19e7   :  { %7779 = vmatpush3.bf16.xpose.msra.mxu1 %v3762_v33  ;;  %7780 = vmatprep.mubr.msk.bf16.mxu1 %vm8934_vm0, %v8932_v4 }
0x19e8   :  { %7784 = vmatprep.subr.bf16.mxu1 %v8932_v4 }
0x19ee   :  { %7781 = vmatmul.mubr.msk.bf16.vlgmr.msra.gmra.mrb[80].mxu1 %vm479_vm1, %v3707_v38 }
0x19ef   :  { %7785 = vmatpush3.bf16.msra.mxu1 %v3832_v39  ;;  %7786 = vmatprep.mubr.msk.bf16.mxu1 %vm8934_vm0, %v8932_v4 }
0x19f0   :  { %7790 = vmatprep.subr.bf16.mxu1 %v8932_v4 }
0x1ab9   :  { %v3752_v18 = vpop.f32.mrb[76].mxu1 }
0x1aba   :  { %v7776_v40 = vpop.f32.mrb[77].mxu1  ;;  %v3804_v41 = vsel %vm572_vm3, %v3752_v18, -inf }
0x1abb   :  { %3805 = vmax.xlane.f32.xlu0 %v3804_v41  ;;  %v3755_v14 = vpop.f32.mrb[78].mxu1 }
0x1abc   :  { %v7777_v44 = vpop.f32.mrb[79].mxu1 }
0x1ac1   :  { %v3798_v45 = vpop.f32.mrb[80].mxu1 }
0x1ac2   :  { %v7782_v49 = vpop.f32.mrb[81].mxu1  ;;  %v3807_v50 = vsel %vm572_vm3, %v3798_v45, -inf }
0x1ac3   :  { %3808 = vmax.xlane.f32.xlu1 %v3807_v50  ;;  %v3801_v51 = vpop.f32.mrb[82].mxu1 }
0x1ac4   :  { %v7783_v58 = vpop.f32.mrb[83].mxu1 }
0x1ad4   :  { %3976 = vrot.lane.b32.xlu1 %v3709_v29, %s8925_s2 }
0x1b48   :  { %v3806_v19 = vpop.xlane.xlu0 %3805 }
0x1b49   :  { %v3810_v46 = vsub.f32 %v3752_v18, %v3806_v19 }
0x1b4b   :  { %v3812_v0 = vmul.f32 1.442695, %v3810_v46 }
0x1b4d   :  { %8566 = vpow2.f32 %v3812_v0 }
0x1b50   :  { %v3809_v5 = vpop.xlane.xlu1 %3808 }
0x1b51   :  { %v3811_v35 = vsub.f32 %v3798_v45, %v3809_v5 }
0x1b53   :  { %v3814_v52 = vmul.f32 1.442695, %v3811_v35 }
0x1b54   :  { %v3977_v62 = vpop.permute.xlu1 %3976 }
0x1b55   :  { %8568 = vpow2.f32 %v3814_v52  ;;  %v3982_v7 = vsel %vm479_vm1, %v3977_v62, 0 }
0x1b57   :  { %v8567_v42 = vpop.eup %8566 }
0x1b58   :  { %v3816_v43 = vsel %vm572_vm3, %v8567_v42, 0.0 }
0x1b59   :  { %3817 = vadd.xlane.f32.xlu0 %v3816_v43 }
0x1b5f   :  { %v8569_v47 = vpop.eup %8568 }
0x1b60   :  { %v3819_v48 = vsel %vm572_vm3, %v8569_v47, 0.0 }
0x1b61   :  { %3820 = vadd.xlane.f32.xlu1 %v3819_v48 }
0x1b6f   :  { %3924 = vrot.lane.b32.xlu0 %v3708_v25, %s8925_s2 }
0x1b72   :  { %3921 = vrot.lane.b32.xlu1 %v3706_v30, %s8925_s2 }
0x1b76   :  { %3973 = vrot.lane.b32.xlu1 %v3707_v38, %s8925_s2 }
0x1be6   :  { %v3818_v61 = vpop.xlane.xlu0 %3817 }
0x1be7   :  { %8570 = vrcp.f32 %v3818_v61 }
0x1bea   :  { %v3925_v6 = vpop.permute.xlu0 %3924 }
0x1beb   :  { %v3930_v10 = vsel %vm479_vm1, %v3925_v6, 0  ;;  %v8242_v6 = vld [vmem:[#allocation10 + $0x80] sm:$0xff]  }
0x1bec   :  { %7797 = vmatpush3.bf16.xpose.msra.mxu0 %v3930_v10  ;;  %v8243_v10 = vld [vmem:[#allocation10 + $0x88] sm:$0xff]  }
0x1bed   :  { %7808 = vmatprep.subr.bf16.mxu0 %v8932_v4 }
0x1bee   :  { %v3821_v36 = vpop.xlane.xlu1 %3820 }
0x1bef   :  { %8572 = vrcp.f32 %v3821_v36  ;;  %v8244_v36 = vld [vmem:[#allocation10 + $0x90] sm:$0xff]  }
0x1bf1   :  { %v8571_v11 = vpop.eup %8570 }
0x1bf2   :  { %v3824_v13 = vmul.f32 %v8571_v11, %v8567_v42  ;;  %v3922_v17 = vpop.permute.xlu1 %3921  ;;  %v8245_v11 = vld [vmem:[#allocation10 + $0x98] sm:$0xff]  }
0x1bf3   :  { %7799 = vmatmul.mubr.msk.bf16.vlgmr.msra.gmra.mrb[52].mxu0 %vm479_vm1, %v3922_v17  ;;  %v8248_v17 = vld [vmem:[#allocation10 + $0xb0] sm:$0xff]  }
0x1bf4   :  { %v3826_v3 = vpack.c.bf16 %v3824_v13, %v3824_v13  ;;  %7810 = vmatprep.mubr.msk.bf16.mxu0 %vm8934_vm0, %v8932_v4  ;;  %v8247_v13 = vld [vmem:[#allocation10 + $0xa8] sm:$0xff]  }
0x1bf6   :  { %7787 = vmatmul.mubr.msk.bf16.vlgmr.msra.gmra.mrb[84].mxu1 %vm572_vm3, %v3826_v3  ;;  %v3974_v8 = vpop.permute.xlu1 %3973  ;;  %v8249_v3 = vld [vmem:[#allocation10 + $0xb8] sm:$0xff]  }
0x1bf7   :  { %7791 = vmatpush3.bf16.msra.mxu1 %v3878_v9  ;;  %7792 = vmatprep.mubr.msk.bf16.mxu1 %vm8934_vm0, %v8932_v4 }
0x1bf8   :  { %7802 = vmatprep.subr.bf16.mxu1 %v8932_v4 }
0x1bf9   :  { %v8573_v20 = vpop.eup %8572 }
0x1bfa   :  { %v3825_v23 = vmul.f32 %v8573_v20, %v8569_v47 }
0x1bfc   :  { %v3827_v2 = vpack.c.bf16 %v3825_v23, %v3825_v23 }
0x1bfe   :  { %7793 = vmatmul.mubr.msk.bf16.vlgmr.msra.gmra.mrb[88].mxu1 %vm572_vm3, %v3827_v2 }
0x1bff   :  { %7804 = vmatprep.mubr.msk.bf16.mxu1 %vm8934_vm0, %v8932_v4 }
0x1c00   :  { %7803 = vmatpush3.bf16.xpose.msra.mxu1 %v3982_v7 }
0x1c01   :  { %7814 = vmatprep.subr.bf16.mxu1 %v8932_v4 }
0x1c07   :  { %7805 = vmatmul.mubr.msk.bf16.vlgmr.msra.gmra.mrb[92].mxu1 %vm479_vm1, %v3974_v8 }
0x1c08   :  { %7816 = vmatprep.mubr.msk.bf16.mxu1 %vm8934_vm0, %v8932_v4 }
0x1cc6   :  { %v3966_v15 = vpop.f32.mrb[52].mxu0 }
0x1cc7   :  { %v7800_v16 = vpop.f32.mrb[53].mxu0  ;;  %v4024_v21 = vsel %vm572_vm3, %v3966_v15, -inf }
0x1cc8   :  { %4025 = vmax.xlane.f32.xlu0 %v4024_v21  ;;  %v3969_v60 = vpop.f32.mrb[54].mxu0 }
0x1cc9   :  { %v9548_v63 = vpop.f32.mrb[84].mxu1  ;;  %v7801_v22 = vpop.f32.mrb[55].mxu0 }
0x1cca   :  { %v7788_v25 = vpop.f32.mrb[85].mxu1 }
0x1ccb   :  { %v3871_v26 = vpop.f32.mrb[86].mxu1 }
0x1ccc   :  { %v7789_v27 = vpop.f32.mrb[87].mxu1 }
0x1cd1   :  { %v9550_v28 = vpop.f32.mrb[88].mxu1 }
0x1cd2   :  { %v7794_v29 = vpop.f32.mrb[89].mxu1 }
0x1cd3   :  { %v3917_v30 = vpop.f32.mrb[90].mxu1 }
0x1cd4   :  { %v7795_v31 = vpop.f32.mrb[91].mxu1  ;;  %v7063_v30 = vld [vmem:[#allocation11 + $0x2] ss:$0 sm:$0xff] }
0x1cda   :  { %v4018_v33 = vpop.f32.mrb[92].mxu1 }
0x1cdb   :  { %v7806_v34 = vpop.f32.mrb[93].mxu1  ;;  %v4027_v38 = vsel %vm572_vm3, %v4018_v33, -inf }
0x1cdc   :  { %4028 = vmax.xlane.f32.xlu1 %v4027_v38  ;;  %v4021_v39 = vpop.f32.mrb[94].mxu1 }
0x1cdd   :  { %v7807_v18 = vpop.f32.mrb[95].mxu1 }
0x1ced   :  { %4098 = vrot.lane.b32.xlu1 %v3711_v12, %s8925_s2  ;;  %v8246_v12 = vld [vmem:[#allocation10 + $0xa0] sm:$0xff]  }
0x1d55   :  { %v4026_v40 = vpop.xlane.xlu0 %4025 }
0x1d56   :  { %v4030_v41 = vsub.f32 %v3966_v15, %v4026_v40 }
0x1d58   :  { %v4032_v14 = vmul.f32 1.442695, %v4030_v41 }
0x1d5a   :  { %8574 = vpow2.f32 %v4032_v14  ;;  %v8253_v14 = vld [vmem:[#allocation16 + $0x208] ss:$16 sps:$4 sm:$0xff]  }
0x1d64   :  { %v8575_v44 = vpop.eup %8574 }
0x1d65   :  { %v4036_v45 = vsel %vm572_vm3, %v8575_v44, 0.0 }
0x1d66   :  { %4037 = vadd.xlane.f32.xlu0 %v4036_v45  ;;  %v8258_v45 = vld [vmem:[#allocation16 + $0x224] ss:$16 sps:$4 sm:$0xff]  }
0x1d69   :  { %v4029_v49 = vpop.xlane.xlu1 %4028 }
0x1d6a   :  { %v4031_v50 = vsub.f32 %v4018_v33, %v4029_v49  ;;  %v8261_v49 = vld [vmem:[#allocation16 + $0x22c] ss:$16 sps:$4 sm:$0xff]  }
0x1d6c   :  { %v4034_v51 = vmul.f32 1.442695, %v4031_v50  ;;  %v8259_v50 = vld [vmem:[#allocation16 + $0x228] ss:$16 sps:$4 sm:$0xff]  }
0x1d6d   :  { %v4099_v58 = vpop.permute.xlu1 %4098 }
0x1d6e   :  { %8576 = vpow2.f32 %v4034_v51  ;;  %v4104_v19 = vsel %vm600_vm2, %v4099_v58, 0 }
0x1d6f   :  { %7815 = vmatpush3.bf16.msra.mxu1 %v4104_v19 }
0x1d78   :  { %v8577_v46 = vpop.eup %8576 }
0x1d79   :  { %v4039_v0 = vsel %vm572_vm3, %v8577_v46, 0.0 }
0x1d7a   :  { %4040 = vadd.xlane.f32.xlu0 %v4039_v0 }
0x1d90   :  { %4049 = vrot.lane.b32.xlu0 %v9511_v37, %s8925_s2 }
0x1df3   :  { %v4038_v5 = vpop.xlane.xlu0 %4037 }
0x1df4   :  { %8578 = vrcp.f32 %v4038_v5 }
0x1dfe   :  { %v8579_v35 = vpop.eup %8578 }
0x1dff   :  { %v4044_v42 = vmul.f32 %v8579_v35, %v8575_v44  ;;  %v8255_v44 = vld [vmem:[#allocation16 + $0x20c] ss:$16 sps:$4 sm:$0xff]  }
0x1e01   :  { %v4046_v48 = vpack.c.bf16 %v4044_v42, %v4044_v42  ;;  %v8267_v42 = vld [vmem:[#allocation16 + $0x24c] ss:$16 sps:$4 sm:$0xff]  }
0x1e07   :  { %v4041_v52 = vpop.xlane.xlu0 %4040 }
0x1e08   :  { %8580 = vrcp.f32 %v4041_v52  ;;  %v8264_v52 = vld [vmem:[#allocation16 + $0x244] ss:$16 sps:$4 sm:$0xff]  }
0x1e0b   :  { %v4050_v43 = vpop.permute.xlu0 %4049 }
0x1e0c   :  { %v4055_v47 = vsel %vm600_vm2, %v4050_v43, 0  ;;  %v8262_v43 = vld [vmem:[#allocation16 + $0x240] ss:$16 sps:$4 sm:$0xff]  }
0x1e0d   :  { %7809 = vmatpush3.bf16.msra.mxu0 %v4055_v47  ;;  %v8265_v47 = vld [vmem:[#allocation16 + $0x248] ss:$16 sps:$4 sm:$0xff]  }
0x1e0e   :  { %7820 = vmatprep.subr.bf16.mxu0 %v8932_v4 }
0x1e10   :  { %7811 = vmatmul.mubr.msk.bf16.vlgmr.msra.gmra.mrb[56].mxu0 %vm572_vm3, %v4046_v48  ;;  %v8270_v48 = vld [vmem:[#allocation16 + $0x264] ss:$16 sps:$4 sm:$0xff]  }
0x1e11   :  { %7836 = vmatprep.mubr.msk.bf16.mxu0 %vm8934_vm0, %v8932_v4  ;;  %7821 = vmatpush3.bf16.msra.mxu0 %v8242_v6  ;;  %v8276_v6 = vld [vmem:[#allocation16 + $0x284] ss:$16 sps:$4 sm:$0xff]  }
0x1e12   :  { %v8581_v61 = vpop.eup %8580  ;;  %7822 = vmatprep.subr.bf16.mxu0 %v8932_v4 }
0x1e13   :  { %v4045_v37 = vmul.f32 %v8581_v61, %v8577_v46  ;;  %v8273_v61 = vld [vmem:[#allocation16 + $0x26c] ss:$16 sps:$4 sm:$0xff]  }
0x1e15   :  { %v4047_v62 = vpack.c.bf16 %v4045_v37, %v4045_v37  ;;  %7823 = vmatpush3.bf16.msra.mxu0 %v8243_v10  ;;  %v8268_v37 = vld [vmem:[#allocation16 + $0x260] ss:$16 sps:$4 sm:$0xff]   ;;  %v8279_v10 = vld [vmem:[#allocation16 + $0x28c] ss:$16 sps:$4 sm:$0xff]  }
0x1e16   :  { %7824 = vmatprep.subr.bf16.mxu0 %v8932_v4 }
0x1e17   :  { %7817 = vmatmul.mubr.msk.bf16.vlgmr.msra.gmra.mrb[96].mxu1 %vm572_vm3, %v4047_v62  ;;  %v8271_v62 = vld [vmem:[#allocation16 + $0x268] ss:$16 sps:$4 sm:$0xff]  }
0x1e18   :  { %4555 = vmatprep.mubr.bf16.mxu1 %v8933_v32 }
0x1e19   :  { %7825 = vmatpush3.bf16.msra.mxu0 %v8244_v36  ;;  %v8274_v36 = vld [vmem:[#allocation16 + $0x280] ss:$16 sps:$4 sm:$0xff]  }
0x1e1a   :  { %7826 = vmatprep.subr.bf16.mxu0 %v8932_v4 }
0x1e1d   :  { %7827 = vmatpush3.bf16.msra.mxu0 %v8245_v11  ;;  %v8277_v11 = vld [vmem:[#allocation16 + $0x288] ss:$16 sps:$4 sm:$0xff]  }
0x1e1e   :  { %7828 = vmatprep.subr.bf16.mxu0 %v8932_v4 }
0x1e21   :  { %7829 = vmatpush3.bf16.msra.mxu0 %v8246_v12  ;;  %v8282_v12 = vld [vmem:[#allocation16 + $0x2a4] ss:$16 sps:$4 sm:$0xff]  }
0x1e22   :  { %7830 = vmatprep.subr.bf16.mxu0 %v8932_v4 }
0x1e25   :  { %7831 = vmatpush3.bf16.msra.mxu0 %v8247_v13  ;;  %v8285_v13 = vld [vmem:[#allocation16 + $0x2ac] ss:$16 sps:$4 sm:$0xff]  }
0x1e26   :  { %7832 = vmatprep.subr.bf16.mxu0 %v8932_v4 }
0x1e29   :  { %7833 = vmatpush3.bf16.msra.mxu0 %v8248_v17  ;;  %v8280_v17 = vld [vmem:[#allocation16 + $0x2a0] ss:$16 sps:$4 sm:$0xff]  }
0x1e2a   :  { %7834 = vmatprep.subr.bf16.mxu0 %v8932_v4 }
0x1e2d   :  { %7835 = vmatpush3.bf16.msra.mxu0 %v8249_v3  ;;  %v8283_v3 = vld [vmem:[#allocation16 + $0x2a8] ss:$16 sps:$4 sm:$0xff]  }
0x1e2e   :  { %4566 = vmatprep.subr.bf16.mxu0 %v8255_v44  ;;  %v8298_v44 = vld [vmem:[#allocation17 + $0x240] sm:$0xff]  }
0x1ee3   :  { %v4091_v9 = vpop.f32.mrb[56].mxu0 }
0x1ee4   :  { %v7812_v20 = vpop.f32.mrb[57].mxu0 }
0x1ee5   :  { %v4094_v23 = vpop.f32.mrb[58].mxu0  ;;  %v8291_v20 = vld [vmem:[#allocation16 + $0x2cc] ss:$16 sps:$4 sm:$0xff]  }
0x1ee6   :  { %v7813_v2 = vpop.f32.mrb[59].mxu0  ;;  %v8286_v23 = vld [vmem:[#allocation16 + $0x2c0] ss:$16 sps:$4 sm:$0xff]  }
0x1ee7   :  { %v8289_v2 = vld [vmem:[#allocation16 + $0x2c8] ss:$16 sps:$4 sm:$0xff]  }
0x1eea   :  { %v4140_v7 = vpop.f32.mrb[96].mxu1 }
0x1eeb   :  { %v7965_v8 = vpack.i.bf16 %v4140_v7, %v4091_v9  ;;  %v7818_v15 = vpop.f32.mrb[97].mxu1  ;;  %v8288_v9 = vld [vmem:[#allocation16 + $0x2c4] ss:$16 sps:$4 sm:$0xff]  }
0x1eec   :  { %v4143_v16 = vpop.f32.mrb[98].mxu1  ;;  %v8294_v7 = vld [vmem:[#allocation16 + $0x2e4] ss:$16 sps:$4 sm:$0xff]   ;;  %v8295_v15 = vld [vmem:[#allocation16 + $0x2e8] ss:$16 sps:$4 sm:$0xff]  }
0x1eed   :  { %7966 = vrot.lane.b32.xlu1 %v7965_v8, %s8925_s2  ;;  %v7819_v21 = vpop.f32.mrb[99].mxu1  ;;  %v8292_v8 = vld [vmem:[#allocation16 + $0x2e0] ss:$16 sps:$4 sm:$0xff]   ;;  %v8297_v16 = vld [vmem:[#allocation16 + $0x2ec] ss:$16 sps:$4 sm:$0xff]  }
0x1f5f   :  { %v7967_v60 = vpop.permute.xlu1 %7966 }
0x1f60   :  { %v7969_v22 = vunpack.i.h.bf16 %v7967_v60  ;;  %v7968_v25 = vunpack.i.l.bf16 %v7967_v60 }
0x1f62   :  { %v4155_v26 = vsel %vm479_vm1, %v9550_v28, %v7969_v22  ;;  %v4154_v27 = vsel %vm479_vm1, %v9548_v63, %v7968_v25  ;;  %v8250_v63 = vld [vmem:[#allocation16 + $0x200] ss:$16 sps:$4 sm:$0xff]   ;;  %v8252_v28 = vld [vmem:[#allocation16 + $0x204] ss:$16 sps:$4 sm:$0xff]  }
0x1f63   :  { %v4173_v29 = vpack.c.bf16 %v4155_v26, %v4154_v27  ;;  %4523 = vmatprep.subr.bf16.mxu1 %v8252_v28 }
0x1f64   :  { %4524 = vmatpush1.bf16.msra.mxu1 %v8250_v63 }
0x1f65   :  { %7837 = vmatmul.mubr.bf16.vlgmr.msra.gmra.mrb[60].mxu0 %v4173_v29  ;;  %4525 = vmatprep.subr.bf16.mxu1 %v8258_v45  ;;  %v8299_v45 = vld [vmem:[#allocation17 + $0x2c0] sm:$0xff]  }
0x1f66   :  { %4598 = vmatprep.mubr.bf16.mxu0 %v8933_v32  ;;  %4567 = vmatpush1.bf16.msra.mxu0 %v8253_v14 }
0x1f67   :  { %4568 = vmatprep.subr.bf16.mxu0 %v8261_v49  ;;  %v8300_v49 = vld [vmem:[#allocation17 + $0x200] sm:$0xff]  }
0x1f6a   :  { %4569 = vmatpush1.bf16.msra.mxu0 %v8259_v50  ;;  %v8302_v50 = vld [vmem:[#allocation17 + $0x248] sm:$0xff]  }
0x1f6b   :  { %4570 = vmatprep.subr.bf16.mxu0 %v8267_v42  ;;  %v8312_v42 = vld [vmem:[#allocation17 + $0x218] sm:$0xff]  }
0x1f6e   :  { %4571 = vmatpush1.bf16.msra.mxu0 %v8265_v47  ;;  %v8314_v47 = vld [vmem:[#allocation17 + $0x260] sm:$0xff]  }
0x1f6f   :  { %4572 = vmatprep.subr.bf16.mxu0 %v8273_v61  ;;  %v8316_v61 = vld [vmem:[#allocation17 + $0x220] sm:$0xff]  }
0x1f72   :  { %4573 = vmatpush1.bf16.msra.mxu0 %v8271_v62  ;;  %v8318_v62 = vld [vmem:[#allocation17 + $0x268] sm:$0xff]  }
0x1f73   :  { %4574 = vmatprep.subr.bf16.mxu0 %v8279_v10  ;;  %v8320_v10 = vld [vmem:[#allocation17 + $0x228] sm:$0xff]  }
0x1f76   :  { %4575 = vmatpush1.bf16.msra.mxu0 %v8277_v11  ;;  %v8322_v11 = vld [vmem:[#allocation17 + $0x270] sm:$0xff]  }
0x1f77   :  { %4576 = vmatprep.subr.bf16.mxu0 %v8285_v13  ;;  %v8324_v13 = vld [vmem:[#allocation17 + $0x230] sm:$0xff]  }
0x1f7a   :  { %4577 = vmatpush1.bf16.msra.mxu0 %v8283_v3  ;;  %v8326_v3 = vld [vmem:[#allocation17 + $0x278] sm:$0xff]  }
0x1f7b   :  { %4578 = vmatprep.subr.bf16.mxu0 %v8291_v20  ;;  %v8328_v20 = vld [vmem:[#allocation17 + $0x238] sm:$0xff]  }
0x1f7e   :  { %4579 = vmatpush1.bf16.msra.mxu0 %v8289_v2  ;;  %v7074_v2 = vld [vmem:[%s9813_s10 + $0x2] ss:$4 sm:$0xf] }
0x1f7f   :  { %4580 = vmatprep.subr.bf16.mxu0 %v8297_v16  ;;  %v4358_v16 = vrot.slane %v7074_v2, %v9289_v56 }
0x1f82   :  { %4581 = vmatpush1.bf16.msra.mxu0 %v8295_v15  ;;  %v4350_v15 = vrot.slane %v7074_v2, %v9175_v55 }
0x1f83   :  { %7476 = vmatprep.subr.bf16.mxu0 %v8299_v45 }
0x2038   :  { %v4261_v31 = vpop.f32.mrb[60].mxu0 }
0x2039   :  { %v4262_v33 = vadd.f32 %v7063_v30, %v4261_v31  ;;  %v7838_v34 = vpop.f32.mrb[61].mxu0  ;;  %v7072_v31 = vld [vmem:[#allocation13 + $0x2] ss:$0 sm:$0xff] }
0x203a   :  { %v4264_v38 = vpop.f32.mrb[62].mxu0 }
0x203b   :  { %v9580_v39 = vadd.f32 %v4262_v33, %v9474_v24  ;;  %v4265_v18 = vadd.f32 %v7063_v30, %v4264_v38  ;;  %v7839_v40 = vpop.f32.mrb[63].mxu0  ;;  %v8256_v24 = vld [vmem:[#allocation16 + $0x220] ss:$16 sps:$4 sm:$0xff]  }
0x203c   :  { %4526 = vmatpush1.bf16.msra.mxu1 %v8256_v24  ;;  %v8301_v24 = vld [vmem:[#allocation17 + $0x280] sm:$0xff]  }
0x203d   :  { %v9583_v41 = vadd.f32 %v4265_v18, %v9478_v1  ;;  %4272 = vadd.xlane.f32.xlu1 %v9580_v39  ;;  %4527 = vmatprep.subr.bf16.mxu1 %v8264_v52  ;;  %v7073_v18 = vld [vmem:[#allocation14 + $0x2] ss:$0 sm:$0xff] }
0x203e   :  { %v8311_v52 = vld [vmem:[#allocation17 + $0x2d8] sm:$0xff]  }
0x203f   :  { %4274 = vadd.xlane.f32.xlu0 %v9583_v41 }
0x2040   :  { %4528 = vmatpush1.bf16.msra.mxu1 %v8262_v43  ;;  %v8313_v43 = vld [vmem:[#allocation17 + $0x298] sm:$0xff]  }
0x2041   :  { %4529 = vmatprep.subr.bf16.mxu1 %v8270_v48  ;;  %v8315_v48 = vld [vmem:[#allocation17 + $0x2e0] sm:$0xff]  }
0x2044   :  { %4530 = vmatpush1.bf16.msra.mxu1 %v8268_v37  ;;  %v8317_v37 = vld [vmem:[#allocation17 + $0x2a0] sm:$0xff]  }
0x2045   :  { %4531 = vmatprep.subr.bf16.mxu1 %v8276_v6  ;;  %v8319_v6 = vld [vmem:[#allocation17 + $0x2e8] sm:$0xff]  }
0x2048   :  { %4532 = vmatpush1.bf16.msra.mxu1 %v8274_v36  ;;  %v8321_v36 = vld [vmem:[#allocation17 + $0x2a8] sm:$0xff]  }
0x2049   :  { %4533 = vmatprep.subr.bf16.mxu1 %v8282_v12  ;;  %v8323_v12 = vld [vmem:[#allocation17 + $0x2f0] sm:$0xff]  }
0x204c   :  { %4534 = vmatpush1.bf16.msra.mxu1 %v8280_v17  ;;  %v8325_v17 = vld [vmem:[#allocation17 + $0x2b0] sm:$0xff]  }
0x204d   :  { %4535 = vmatprep.subr.bf16.mxu1 %v8288_v9  ;;  %v8327_v9 = vld [vmem:[#allocation17 + $0x2f8] sm:$0xff]  }
0x2050   :  { %4536 = vmatpush1.bf16.msra.mxu1 %v8286_v23  ;;  %v8329_v23 = vld [vmem:[#allocation17 + $0x2b8] sm:$0xff]  }
0x2051   :  { %4537 = vmatprep.subr.bf16.mxu1 %v8294_v7  ;;  %v4346_v7 = vrot.slane %v7074_v2, %v9185_v59 }
0x2054   :  { %4538 = vmatpush1.bf16.msra.mxu1 %v8292_v8  ;;  %v4354_v8 = vrot.slane %v7074_v2, %v9181_v57 }
0x2055   :  { %7454 = vmatprep.subr.bf16.mxu1 %v8298_v44 }
0x20ca   :  { %v4273_v1 = vpop.xlane.xlu1 %4272 }
0x20cb   :  { %v4276_v51 = vmul.f32 0.0078125, %v4273_v1  ;;  %v8303_v1 = vld [vmem:[#allocation17 + $0x2c8] sm:$0xff]  }
0x20cc   :  { %v4275_v58 = vpop.xlane.xlu0 %4274 }
0x20cd   :  { %v9588_v19 = vsub.f32 %v9580_v39, %v4276_v51  ;;  %v4277_v46 = vmul.f32 0.0078125, %v4275_v58  ;;  %v8304_v51 = vld [vmem:[#allocation17 + $0x208] sm:$0xff]  }
0x20ce   :  { %v8305_v58 = vld [vmem:[#allocation17 + $0x288] sm:$0xff]  }
0x20cf   :  { %v9591_v0 = vsub.f32 %v9583_v41, %v4277_v46  ;;  %v4280_v5 = vmul.f32 %v9588_v19, %v9588_v19  ;;  %v8307_v46 = vld [vmem:[#allocation17 + $0x2d0] sm:$0xff]  }
0x20d1   :  { %4282 = vadd.xlane.f32.xlu0 %v4280_v5  ;;  %v4281_v35 = vmul.f32 %v9591_v0, %v9591_v0  ;;  %v8309_v5 = vld [vmem:[#allocation17 + $0x290] sm:$0xff]  }
0x20d5   :  { %4284 = vadd.xlane.f32.xlu0 %v4281_v35  ;;  %v8310_v35 = vld [vmem:[#allocation17 + $0x258] sm:$0xff]  }
0x215e   :  { %v4283_v21 = vpop.xlane.xlu0 %4282 }
0x215f   :  { %v4286_v60 = vmul.f32 0.0078125, %v4283_v21 }
0x2161   :  { %v4288_v22 = vadd.f32 1e-05, %v4286_v60 }
0x2162   :  { %v4285_v25 = vpop.xlane.xlu0 %4284 }
0x2163   :  { %8582 = vrsqrt.f32 %v4288_v22  ;;  %v4287_v26 = vmul.f32 0.0078125, %v4285_v25 }
0x2165   :  { %v4289_v27 = vadd.f32 1e-05, %v4287_v26 }
0x2167   :  { %8584 = vrsqrt.f32 %v4289_v27 }
0x216d   :  { %v8583_v29 = vpop.eup %8582 }
0x216e   :  { %v4292_v30 = vmul.f32 %v8583_v29, %v9588_v19  ;;  %v8306_v19 = vld [vmem:[#allocation17 + $0x250] sm:$0xff]  }
0x2170   :  { %v4298_v38 = vmul.f32 %v7072_v31, %v4292_v30 }
0x2171   :  { %v8585_v33 = vpop.eup %8584 }
0x2172   :  { %v4293_v34 = vmul.f32 %v8585_v33, %v9591_v0  ;;  %v4304_v63 = vadd.f32 %v7073_v18, %v4298_v38  ;;  %v8308_v0 = vld [vmem:[#allocation17 + $0x210] sm:$0xff]  }
0x2174   :  { %v4299_v40 = vmul.f32 %v7072_v31, %v4293_v34 }
0x2176   :  { %v4305_v28 = vadd.f32 %v7073_v18, %v4299_v40 }
0x2178   :  { %v4339_v14 = vpack.c.bf16 %v4305_v28, %v4304_v63 }
0x217a   :  { %4556 = vmatmul.mubr.bf16.vlgmr.msra.gmra.mrb[100].mxu1 %v4339_v14  ;;  %4599 = vmatmul.mubr.bf16.vlgmr.msra.gmra.mrb[64].mxu0 %v4339_v14 }
0x217b   :  { %7455 = vmatpush3.bf16.msra.mxu1 %v8300_v49  ;;  %7477 = vmatpush3.bf16.msra.mxu0 %v8301_v24 }
0x217c   :  { %7456 = vmatprep.subr.bf16.mxu1 %v8302_v50  ;;  %7478 = vmatprep.subr.bf16.mxu0 %v8303_v1 }
0x217f   :  { %7457 = vmatpush3.bf16.msra.mxu1 %v8304_v51  ;;  %7479 = vmatpush3.bf16.msra.mxu0 %v8305_v58 }
0x2180   :  { %7458 = vmatprep.subr.bf16.mxu1 %v8306_v19  ;;  %7480 = vmatprep.subr.bf16.mxu0 %v8307_v46 }
0x2183   :  { %7459 = vmatpush3.bf16.msra.mxu1 %v8308_v0  ;;  %7481 = vmatpush3.bf16.msra.mxu0 %v8309_v5 }
0x2184   :  { %7460 = vmatprep.subr.bf16.mxu1 %v8310_v35  ;;  %7482 = vmatprep.subr.bf16.mxu0 %v8311_v52 }
0x2187   :  { %7461 = vmatpush3.bf16.msra.mxu1 %v8312_v42  ;;  %7483 = vmatpush3.bf16.msra.mxu0 %v8313_v43 }
0x2188   :  { %7462 = vmatprep.subr.bf16.mxu1 %v8314_v47  ;;  %7484 = vmatprep.subr.bf16.mxu0 %v8315_v48 }
0x218b   :  { %7463 = vmatpush3.bf16.msra.mxu1 %v8316_v61  ;;  %7485 = vmatpush3.bf16.msra.mxu0 %v8317_v37 }
0x218c   :  { %7464 = vmatprep.subr.bf16.mxu1 %v8318_v62  ;;  %7486 = vmatprep.subr.bf16.mxu0 %v8319_v6 }
0x218f   :  { %7465 = vmatpush3.bf16.msra.mxu1 %v8320_v10  ;;  %7487 = vmatpush3.bf16.msra.mxu0 %v8321_v36 }
0x2190   :  { %7466 = vmatprep.subr.bf16.mxu1 %v8322_v11  ;;  %7488 = vmatprep.subr.bf16.mxu0 %v8323_v12 }
0x2193   :  { %7467 = vmatpush3.bf16.msra.mxu1 %v8324_v13  ;;  %7489 = vmatpush3.bf16.msra.mxu0 %v8325_v17 }
0x2194   :  { %7468 = vmatprep.subr.bf16.mxu1 %v8326_v3  ;;  %7490 = vmatprep.subr.bf16.mxu0 %v8327_v9 }
0x2197   :  { %7469 = vmatpush3.bf16.msra.mxu1 %v8328_v20  ;;  %7491 = vmatpush3.bf16.msra.mxu0 %v8329_v23 }
0x2198   :  { %7840 = vmatprep.subr.bf16.mxu0 %v8932_v4 }
0x224d   :  { %v4557_v21 = vpop.f32.mrb[100].mxu1  ;;  %v4600_v60 = vpop.f32.mrb[64].mxu0 }
0x224e   :  { %v9607_v22 = vadd.f32 %v4557_v21, %v4346_v7  ;;  %v9609_v25 = vadd.f32 %v4600_v60, %v4354_v8  ;;  %v4559_v26 = vpop.f32.mrb[101].mxu1  ;;  %v4602_v27 = vpop.f32.mrb[65].mxu0 }
0x224f   :  { %v9611_v29 = vadd.f32 %v4559_v26, %v4350_v15  ;;  %v9613_v30 = vadd.f32 %v4602_v27, %v4358_v16  ;;  %v4561_v31 = vpop.f32.mrb[102].mxu1  ;;  %v4604_v33 = vpop.f32.mrb[66].mxu0 }
0x2250   :  { %v7107_v34 = vmul.f32 -1.702, %v9607_v22  ;;  %v7109_v38 = vmul.f32 -1.702, %v9609_v25  ;;  %v4562_v18 = vadd.f32 %v4561_v31, %v4346_v7  ;;  %v4605_v40 = vadd.f32 %v4604_v33, %v4354_v8  ;;  %v4563_v63 = vpop.f32.mrb[103].mxu1  ;;  %v4606_v28 = vpop.f32.mrb[67].mxu0 }
0x2251   :  { %v7108_v14 = vmul.f32 -1.702, %v9611_v29  ;;  %v7110_v44 = vmul.f32 -1.702, %v9613_v30  ;;  %v4564_v45 = vadd.f32 %v4563_v63, %v4350_v15  ;;  %v4607_v49 = vadd.f32 %v4606_v28, %v4358_v16 }
0x2252   :  { %v4625_v24 = vmul.f32 1.442695, %v7107_v34  ;;  %v4629_v50 = vmul.f32 1.442695, %v7109_v38  ;;  %v7111_v1 = vmul.f32 -1.702, %v4562_v18 }
0x2253   :  { %v4627_v51 = vmul.f32 1.442695, %v7108_v14  ;;  %v4631_v58 = vmul.f32 1.442695, %v7110_v44  ;;  %v7113_v19 = vmul.f32 -1.702, %v4605_v40 }
0x2254   :  { %8586 = vpow2.f32 %v4625_v24  ;;  %v4633_v46 = vmul.f32 1.442695, %v7111_v1  ;;  %v7112_v0 = vmul.f32 -1.702, %v4564_v45  ;;  %v7114_v5 = vmul.f32 -1.702, %v4607_v49 }
0x2255   :  { %8588 = vpow2.f32 %v4629_v50  ;;  %v4637_v35 = vmul.f32 1.442695, %v7113_v19 }
0x2256   :  { %8590 = vpow2.f32 %v4627_v51  ;;  %v4635_v52 = vmul.f32 1.442695, %v7112_v0  ;;  %v4639_v42 = vmul.f32 1.442695, %v7114_v5 }
0x2257   :  { %8592 = vpow2.f32 %v4631_v58 }
0x2258   :  { %8594 = vpow2.f32 %v4633_v46 }
0x2259   :  { %8596 = vpow2.f32 %v4637_v35 }
0x225a   :  { %8598 = vpow2.f32 %v4635_v52 }
0x225b   :  { %8600 = vpow2.f32 %v4639_v42 }
0x225e   :  { %v8587_v43 = vpop.eup %8586 }
0x225f   :  { %v8589_v47 = vpop.eup %8588  ;;  %v4641_v48 = vadd.f32 1.0, %v8587_v43 }
0x2260   :  { %v8591_v61 = vpop.eup %8590  ;;  %v4643_v37 = vadd.f32 1.0, %v8589_v47  ;;  %v8330_v47 = vld [vmem:[#allocation8 + $0x240] ss:$12 sps:$4 sm:$0xff]  }
0x2261   :  { %v8593_v62 = vpop.eup %8592  ;;  %8602 = vrcp.f32 %v4641_v48  ;;  %v4642_v6 = vadd.f32 1.0, %v8591_v61  ;;  %v8332_v48 = vld [vmem:[#allocation8 + $0x244] ss:$12 sps:$4 sm:$0xff]   ;;  %v8333_v61 = vld [vmem:[#allocation8 + $0x248] ss:$12 sps:$4 sm:$0xff]  }
0x2262   :  { %v8595_v10 = vpop.eup %8594  ;;  %8604 = vrcp.f32 %v4643_v37  ;;  %v4644_v36 = vadd.f32 1.0, %v8593_v62  ;;  %v8336_v37 = vld [vmem:[#allocation8 + $0x25c] ss:$12 sps:$4 sm:$0xff]   ;;  %5239 = vmatprep.subr.bf16.mxu1 %v8332_v48  ;;  %v8337_v62 = vld [vmem:[#allocation8 + $0x260] ss:$12 sps:$4 sm:$0xff]  }
0x2263   :  { %v8597_v11 = vpop.eup %8596  ;;  %8606 = vrcp.f32 %v4642_v6  ;;  %v4645_v12 = vadd.f32 1.0, %v8595_v10  ;;  %v8334_v6 = vld [vmem:[#allocation8 + $0x258] ss:$12 sps:$4 sm:$0xff]  }
0x2264   :  { %v8599_v13 = vpop.eup %8598  ;;  %8608 = vrcp.f32 %v4644_v36  ;;  %v4647_v17 = vadd.f32 1.0, %v8597_v11 }
0x2265   :  { %v8601_v3 = vpop.eup %8600  ;;  %8610 = vrcp.f32 %v4645_v12  ;;  %v4646_v9 = vadd.f32 1.0, %v8599_v13 }
0x2266   :  { %8612 = vrcp.f32 %v4647_v17  ;;  %v4648_v20 = vadd.f32 1.0, %v8601_v3  ;;  %v8340_v3 = vld [vmem:[#allocation8 + $0x274] ss:$12 sps:$4 sm:$0xff]  }
0x2267   :  { %8614 = vrcp.f32 %v4646_v9  ;;  %v8338_v9 = vld [vmem:[#allocation8 + $0x270] ss:$12 sps:$4 sm:$0xff]  }
0x2268   :  { %8616 = vrcp.f32 %v4648_v20  ;;  %v8341_v20 = vld [vmem:[#allocation8 + $0x278] ss:$12 sps:$4 sm:$0xff]  }
0x226b   :  { %v8603_v23 = vpop.eup %8602 }
0x226c   :  { %v8605_v2 = vpop.eup %8604  ;;  %v4665_v21 = vmul.f32 %v8603_v23, %v9607_v22  ;;  %v8344_v23 = vld [vmem:[#allocation8 + $0x28c] ss:$12 sps:$4 sm:$0xff]  }
0x226d   :  { %v8607_v7 = vpop.eup %8606  ;;  %v4667_v27 = vmul.f32 %v8605_v2, %v9609_v25  ;;  %v8342_v2 = vld [vmem:[#allocation8 + $0x288] ss:$12 sps:$4 sm:$0xff]  }
0x226e   :  { %v8609_v8 = vpop.eup %8608  ;;  %v4666_v34 = vmul.f32 %v8607_v7, %v9611_v29  ;;  %v7115_v29 = vld [vmem:[%s9815_s12 + $0x2] ss:$0 sm:$0xff]  ;;  %v8345_v7 = vld [vmem:[#allocation8 + $0x290] ss:$12 sps:$4 sm:$0xff]  }
0x226f   :  { %v8611_v15 = vpop.eup %8610  ;;  %v4668_v28 = vmul.f32 %v8609_v8, %v9613_v30  ;;  %v8348_v8 = vld [vmem:[#allocation8 + $0x2a4] ss:$12 sps:$4 sm:$0xff]  }
0x2270   :  { %v8613_v16 = vpop.eup %8612  ;;  %v4669_v60 = vmul.f32 %v8611_v15, %v4562_v18  ;;  %v8346_v15 = vld [vmem:[#allocation8 + $0x2a0] ss:$12 sps:$4 sm:$0xff]  }
0x2271   :  { %v8615_v26 = vpop.eup %8614  ;;  %v4671_v31 = vmul.f32 %v8613_v16, %v4605_v40  ;;  %v8349_v16 = vld [vmem:[#allocation8 + $0x2a8] ss:$12 sps:$4 sm:$0xff]  }
0x2272   :  { %v8617_v33 = vpop.eup %8616  ;;  %v4738_v38 = vpack.c.bf16 %v4669_v60, %v4665_v21  ;;  %v4670_v63 = vmul.f32 %v8615_v26, %v4564_v45  ;;  %v8352_v21 = vld [vmem:[#allocation8 + $0x2bc] ss:$12 sps:$4 sm:$0xff]   ;;  %v8350_v60 = vld [vmem:[#allocation8 + $0x2b8] ss:$12 sps:$4 sm:$0xff]   ;;  %v8353_v26 = vld [vmem:[#allocation8 + $0x2c0] ss:$12 sps:$4 sm:$0xff]  }
0x2273   :  { %v4740_v14 = vpack.c.bf16 %v4671_v31, %v4667_v27  ;;  %v4672_v44 = vmul.f32 %v8617_v33, %v4607_v49  ;;  %v8356_v27 = vld [vmem:[#allocation8 + $0x2d4] ss:$12 sps:$4 sm:$0xff]   ;;  %v8354_v31 = vld [vmem:[#allocation8 + $0x2d0] ss:$12 sps:$4 sm:$0xff]   ;;  %v8357_v33 = vld [vmem:[#allocation8 + $0x2d8] ss:$12 sps:$4 sm:$0xff]  }
0x2274   :  { %v4739_v24 = vpack.c.bf16 %v4670_v63, %v4666_v34  ;;  %v8360_v34 = vld [vmem:[#allocation8 + $0x2ec] ss:$12 sps:$4 sm:$0xff]   ;;  %v8361_v63 = vld [vmem:[#allocation8 + $0x2f0] ss:$12 sps:$4 sm:$0xff]  }
0x2275   :  { %v4741_v50 = vpack.c.bf16 %v4672_v44, %v4668_v28 }
0x2276   :  { %4971 = vmatprep.mubr.bf16.mxu1 %v4739_v24 }
0x2277   :  { %5012 = vmatprep.mubr.bf16.mxu0 %v4741_v50  ;;  %4972 = vmatmul.mubr.bf16.vlgmr.msra.gmra.mrb[104].mxu1 %v4738_v38  ;;  %v8358_v38 = vld [vmem:[#allocation8 + $0x2e8] ss:$12 sps:$4 sm:$0xff]  }
0x2278   :  { %5013 = vmatmul.mubr.bf16.vlgmr.msra.gmra.mrb[68].mxu0 %v4740_v14  ;;  %5271 = vmatprep.mubr.bf16.mxu1 %v8933_v32 }
0x2279   :  { %7856 = vmatprep.mubr.msk.bf16.mxu0 %vm8934_vm0, %v8932_v4  ;;  %7841 = vmatpush3.bf16.msra.mxu0 %v8333_v61 }
0x227a   :  { %5240 = vmatpush1.bf16.msra.mxu1 %v8330_v47  ;;  %7842 = vmatprep.subr.bf16.mxu0 %v8932_v4 }
0x227b   :  { %5241 = vmatprep.subr.bf16.mxu1 %v8336_v37 }
0x227d   :  { %7843 = vmatpush3.bf16.msra.mxu0 %v8337_v62 }
0x227e   :  { %5242 = vmatpush1.bf16.msra.mxu1 %v8334_v6  ;;  %7844 = vmatprep.subr.bf16.mxu0 %v8932_v4 }
0x227f   :  { %5243 = vmatprep.subr.bf16.mxu1 %v8340_v3 }
0x2281   :  { %7845 = vmatpush3.bf16.msra.mxu0 %v8341_v20 }
0x2282   :  { %5244 = vmatpush1.bf16.msra.mxu1 %v8338_v9  ;;  %7846 = vmatprep.subr.bf16.mxu0 %v8932_v4 }
0x2283   :  { %5245 = vmatprep.subr.bf16.mxu1 %v8344_v23 }
0x2285   :  { %7847 = vmatpush3.bf16.msra.mxu0 %v8345_v7 }
0x2286   :  { %5246 = vmatpush1.bf16.msra.mxu1 %v8342_v2  ;;  %7848 = vmatprep.subr.bf16.mxu0 %v8932_v4 }
0x2287   :  { %5247 = vmatprep.subr.bf16.mxu1 %v8348_v8 }
0x2289   :  { %7849 = vmatpush3.bf16.msra.mxu0 %v8349_v16 }
0x228a   :  { %5248 = vmatpush1.bf16.msra.mxu1 %v8346_v15  ;;  %7850 = vmatprep.subr.bf16.mxu0 %v8932_v4 }
0x228b   :  { %5249 = vmatprep.subr.bf16.mxu1 %v8352_v21 }
0x228d   :  { %7851 = vmatpush3.bf16.msra.mxu0 %v8353_v26 }
0x228e   :  { %5250 = vmatpush1.bf16.msra.mxu1 %v8350_v60  ;;  %7852 = vmatprep.subr.bf16.mxu0 %v8932_v4 }
0x228f   :  { %5251 = vmatprep.subr.bf16.mxu1 %v8356_v27 }
0x2291   :  { %7853 = vmatpush3.bf16.msra.mxu0 %v8357_v33 }
0x2292   :  { %5252 = vmatpush1.bf16.msra.mxu1 %v8354_v31  ;;  %7854 = vmatprep.subr.bf16.mxu0 %v8932_v4 }
0x2293   :  { %5253 = vmatprep.subr.bf16.mxu1 %v8360_v34 }
0x2295   :  { %7855 = vmatpush3.bf16.msra.mxu0 %v8361_v63 }
0x2296   :  { %5254 = vmatpush1.bf16.msra.mxu1 %v8358_v38  ;;  %7884 = vmatprep.subr.bf16.mxu0 %v8932_v4 }
0x2297   :  { %7860 = vmatprep.subr.bf16.mxu1 %v8932_v4 }
0x234a   :  { %v7470_v22 = vpop.f32.mrb[104].mxu1 }
0x234b   :  { %v7492_v25 = vpop.f32.mrb[68].mxu0  ;;  %v7471_v30 = vpop.f32.mrb[105].mxu1 }
0x234c   :  { %v7472_v18 = vadd.f32 %v7471_v30, %v7470_v22  ;;  %v7493_v40 = vpop.f32.mrb[69].mxu0  ;;  %v7473_v45 = vpop.f32.mrb[106].mxu1 }
0x234d   :  { %v7494_v49 = vadd.f32 %v7493_v40, %v7492_v25  ;;  %v7495_v1 = vpop.f32.mrb[70].mxu0  ;;  %v7474_v51 = vpop.f32.mrb[107].mxu1 }
0x234e   :  { %v4974_v58 = vadd.f32 %v7472_v18, %v7115_v29  ;;  %v7475_v19 = vadd.f32 %v7474_v51, %v7473_v45  ;;  %v7496_v46 = vpop.f32.mrb[71].mxu0 }
0x234f   :  { %v7497_v0 = vadd.f32 %v7496_v46, %v7495_v1  ;;  %v7150_v46 = vld [vmem:[%s9807_s4 + $0x3] ss:$4 sm:$0x7] }
0x2350   :  { %v5015_v5 = vadd.f32 %v7494_v49, %v4974_v58  ;;  %v4977_v35 = vadd.f32 %v7475_v19, %v7115_v29  ;;  %v7148_v29 = vld [vmem:[#allocation5 + $0x3] ss:$0 sm:$0xff]  ;;  %v7149_v49 = vld [vmem:[#allocation7 + $0x3] ss:$0 sm:$0xff] }
0x2352   :  { %v5018_v52 = vadd.f32 %v7497_v0, %v4977_v35  ;;  %v9630_v42 = vadd.f32 %v5015_v5, %v9580_v39  ;;  %v5103_v0 = vrot.slane %v7150_v46, %v9175_v55 }
0x2354   :  { %5025 = vadd.xlane.f32.xlu1 %v9630_v42  ;;  %v9634_v43 = vadd.f32 %v5018_v52, %v9583_v41  ;;  %v5107_v52 = vrot.slane %v7150_v46, %v9181_v57 }
0x2356   :  { %5027 = vadd.xlane.f32.xlu0 %v9634_v43 }
0x23e1   :  { %v5026_v39 = vpop.xlane.xlu1 %5025 }
0x23e2   :  { %v5029_v41 = vmul.f32 0.0078125, %v5026_v39 }
0x23e3   :  { %v5028_v10 = vpop.xlane.xlu0 %5027 }
0x23e4   :  { %v5031_v36 = vsub.f32 %v9630_v42, %v5029_v41  ;;  %v5030_v11 = vmul.f32 0.0078125, %v5028_v10  ;;  %v5099_v10 = vrot.slane %v7150_v46, %v9185_v59 }
0x23e6   :  { %v5032_v12 = vsub.f32 %v9634_v43, %v5030_v11  ;;  %v5033_v13 = vmul.f32 %v5031_v36, %v5031_v36 }
0x23e8   :  { %5035 = vadd.xlane.f32.xlu1 %v5033_v13  ;;  %v5034_v17 = vmul.f32 %v5032_v12, %v5032_v12 }
0x23ea   :  { %5037 = vadd.xlane.f32.xlu0 %v5034_v17 }
0x2475   :  { %v5036_v28 = vpop.xlane.xlu1 %5035 }
0x2476   :  { %v5039_v14 = vmul.f32 0.0078125, %v5036_v28 }
0x2477   :  { %v5038_v44 = vpop.xlane.xlu0 %5037 }
0x2478   :  { %v5041_v24 = vadd.f32 1e-05, %v5039_v14  ;;  %v5040_v50 = vmul.f32 0.0078125, %v5038_v44 }
0x247a   :  { %8618 = vrsqrt.f32 %v5041_v24  ;;  %v5042_v22 = vadd.f32 1e-05, %v5040_v50 }
0x247c   :  { %8620 = vrsqrt.f32 %v5042_v22 }
0x2484   :  { %v8619_v25 = vpop.eup %8618 }
0x2485   :  { %v5045_v30 = vmul.f32 %v8619_v25, %v5031_v36 }
0x2486   :  { %v8621_v18 = vpop.eup %8620 }
0x2487   :  { %v5046_v40 = vmul.f32 %v8621_v18, %v5032_v12  ;;  %v5051_v45 = vmul.f32 %v7148_v29, %v5045_v30 }
0x2489   :  { %v5052_v1 = vmul.f32 %v7148_v29, %v5046_v40  ;;  %v5057_v51 = vadd.f32 %v7149_v49, %v5051_v45 }
0x248b   :  { %v5058_v58 = vadd.f32 %v7149_v49, %v5052_v1 }
0x248d   :  { %v5092_v19 = vpack.c.bf16 %v5058_v58, %v5057_v51 }
0x248f   :  { %5272 = vmatmul.mubr.bf16.vlgmr.msra.gmra.mrb[108].mxu1 %v5092_v19  ;;  %7857 = vmatmul.mubr.bf16.vlgmr.msra.gmra.mrb[72].mxu0 %v5092_v19 }
0x2490   :  { %7862 = vmatprep.mubr.msk.bf16.mxu1 %vm8934_vm0, %v8932_v4  ;;  %7886 = vmatprep.mubr.msk.bf16.mxu0 %vm8934_vm0, %v8932_v4 }
0x2562   :  { %v5273_v5 = vpop.f32.mrb[108].mxu1  ;;  %v5316_v35 = vpop.f32.mrb[72].mxu0 }
0x2563   :  { %v5275_v47 = vpop.f32.mrb[109].mxu1  ;;  %v7858_v48 = vpop.f32.mrb[73].mxu0  ;;  %v5274_v13 = vadd.f32 %v5273_v5, %v5099_v10  ;;  %v5317_v9 = vadd.f32 %v5316_v35, %v5107_v52 }
0x2564   :  { %v5276_v61 = vadd.f32 %v5275_v47, %v5103_v0  ;;  %v5277_v37 = vpop.f32.mrb[110].mxu1  ;;  %v5319_v62 = vpop.f32.mrb[74].mxu0 }
0x2565   :  { %v9657_v6 = vadd.f32 %v5319_v62, %v5107_v52  ;;  %v5279_v39 = vpop.f32.mrb[111].mxu1  ;;  %v7859_v41 = vpop.f32.mrb[75].mxu0  ;;  %v5323_v3 = vpack.c.bf16 %v5274_v13, %v5274_v13  ;;  %v5278_v23 = vadd.f32 %v5277_v37, %v5099_v10  ;;  %v9667_v2 = vpack.c.bf16 %v5317_v9, %v5317_v9 }
0x2566   :  { %v5325_v36 = vpack.c.bf16 %v5276_v61, %v5276_v61  ;;  %v5280_v12 = vadd.f32 %v5279_v39, %v5103_v0 }
0x2567   :  { %v5324_v7 = vpack.c.bf16 %v5278_v23, %v5278_v23  ;;  %v5450_v8 = vsel %vm600_vm2, %v9667_v2, 0  ;;  %v5328_v51 = vpack.c.bf16 %v9657_v6, %v9657_v6 }
0x2568   :  { %v5333_v11 = vsel %vm479_vm1, %v5325_v36, 0  ;;  %v5326_v17 = vpack.c.bf16 %v5280_v12, %v5280_v12 }
0x2569   :  { %7861 = vmatpush3.bf16.xpose.msra.mxu1 %v5333_v11  ;;  %v5496_v0 = vsel %vm600_vm2, %v5328_v51, 0 }
0x256a   :  { %7866 = vmatprep.subr.bf16.mxu1 %v8932_v4  ;;  %v5379_v20 = vsel %vm479_vm1, %v5326_v17, 0 }
0x2570   :  { %7863 = vmatmul.mubr.msk.bf16.vlgmr.msra.gmra.mrb[112].mxu1 %vm479_vm1, %v5323_v3 }
0x2571   :  { %7867 = vmatpush3.bf16.xpose.msra.mxu1 %v5379_v20  ;;  %7868 = vmatprep.mubr.msk.bf16.mxu1 %vm8934_vm0, %v8932_v4 }
0x2572   :  { %7872 = vmatprep.subr.bf16.mxu1 %v8932_v4 }
0x2578   :  { %7869 = vmatmul.mubr.msk.bf16.vlgmr.msra.gmra.mrb[116].mxu1 %vm479_vm1, %v5324_v7 }
0x2579   :  { %7873 = vmatpush3.bf16.msra.mxu1 %v5450_v8  ;;  %7874 = vmatprep.mubr.msk.bf16.mxu1 %vm8934_vm0, %v8932_v4 }
0x257a   :  { %7878 = vmatprep.subr.bf16.mxu1 %v8932_v4 }
0x2643   :  { %v5369_v15 = vpop.f32.mrb[112].mxu1 }
0x2644   :  { %v7864_v16 = vpop.f32.mrb[113].mxu1  ;;  %v5422_v21 = vsel %vm5421_vm4, %v5369_v15, -inf }
0x2645   :  { %5423 = vmax.xlane.f32.xlu1 %v5422_v21  ;;  %v5372_v60 = vpop.f32.mrb[114].mxu1 }
0x2646   :  { %v7865_v26 = vpop.f32.mrb[115].mxu1 }
0x264b   :  { %v5415_v27 = vpop.f32.mrb[116].mxu1 }
0x264c   :  { %v7870_v31 = vpop.f32.mrb[117].mxu1  ;;  %v5425_v33 = vsel %vm5421_vm4, %v5415_v27, -inf }
0x264d   :  { %5426 = vmax.xlane.f32.xlu0 %v5425_v33  ;;  %v5418_v34 = vpop.f32.mrb[118].mxu1 }
0x264e   :  { %v7871_v38 = vpop.f32.mrb[119].mxu1 }
0x26d2   :  { %v5424_v63 = vpop.xlane.xlu1 %5423 }
0x26d3   :  { %v5428_v28 = vsub.f32 %v5369_v15, %v5424_v63 }
0x26d5   :  { %v5430_v14 = vmul.f32 1.442695, %v5428_v28 }
0x26d7   :  { %8622 = vpow2.f32 %v5430_v14 }
0x26da   :  { %v5427_v44 = vpop.xlane.xlu0 %5426 }
0x26db   :  { %v5429_v24 = vsub.f32 %v5415_v27, %v5427_v44 }
0x26dd   :  { %v5432_v50 = vmul.f32 1.442695, %v5429_v24 }
0x26df   :  { %8624 = vpow2.f32 %v5432_v50 }
0x26e1   :  { %v8623_v22 = vpop.eup %8622 }
0x26e2   :  { %v5434_v25 = vsel %vm5421_vm4, %v8623_v22, 0.0 }
0x26e3   :  { %5435 = vadd.xlane.f32.xlu1 %v5434_v25 }
0x26e9   :  { %v8625_v29 = vpop.eup %8624 }
0x26ea   :  { %v5437_v30 = vsel %vm5421_vm4, %v8625_v29, 0.0 }
0x26eb   :  { %5438 = vadd.xlane.f32.xlu0 %v5437_v30 }
0x26f4   :  { %5542 = vrot.lane.b32.xlu1 %v5325_v36, %s8925_s2 }
0x26f8   :  { %5539 = vrot.lane.b32.xlu1 %v5323_v3, %s8925_s2 }
0x26fc   :  { %5591 = vrot.lane.b32.xlu1 %v5324_v7, %s8925_s2 }
0x2701   :  { %5594 = vrot.lane.b32.xlu0 %v5326_v17, %s8925_s2 }
0x2770   :  { %v5436_v18 = vpop.xlane.xlu1 %5435 }
0x2771   :  { %8626 = vrcp.f32 %v5436_v18 }
0x2774   :  { %v5543_v40 = vpop.permute.xlu1 %5542 }
0x2775   :  { %v5548_v45 = vsel %vm479_vm1, %v5543_v40, 0 }
0x2776   :  { %7885 = vmatpush3.bf16.xpose.msra.mxu0 %v5548_v45  ;;  %v8362_v45 = vld [vmem:[#allocation10 + $0xc0] sm:$0xff]  }
0x2777   :  { %7896 = vmatprep.subr.bf16.mxu0 %v8932_v4 }
0x2778   :  { %v5439_v49 = vpop.xlane.xlu0 %5438  ;;  %v5540_v19 = vpop.permute.xlu1 %5539 }
0x2779   :  { %8628 = vrcp.f32 %v5439_v49  ;;  %v8363_v49 = vld [vmem:[#allocation10 + $0xc8] sm:$0xff]  }
0x277b   :  { %v8627_v1 = vpop.eup %8626 }
0x277c   :  { %v5442_v58 = vmul.f32 %v8627_v1, %v8623_v22  ;;  %v5595_v52 = vpop.permute.xlu0 %5594  ;;  %v5592_v61 = vpop.permute.xlu1 %5591  ;;  %v8364_v1 = vld [vmem:[#allocation10 + $0xd0] sm:$0xff]  }
0x277d   :  { %7887 = vmatmul.mubr.msk.bf16.vlgmr.msra.gmra.mrb[76].mxu0 %vm479_vm1, %v5540_v19  ;;  %v5600_v48 = vsel %vm479_vm1, %v5595_v52, 0  ;;  %v8367_v19 = vld [vmem:[#allocation10 + $0xe8] sm:$0xff]  }
0x277e   :  { %v5444_v46 = vpack.c.bf16 %v5442_v58, %v5442_v58  ;;  %7898 = vmatprep.mubr.msk.bf16.mxu0 %vm8934_vm0, %v8932_v4  ;;  %v8366_v58 = vld [vmem:[#allocation10 + $0xe0] sm:$0xff]  }
0x2780   :  { %7875 = vmatmul.mubr.msk.bf16.vlgmr.msra.gmra.mrb[120].mxu1 %vm572_vm3, %v5444_v46 }
0x2781   :  { %7879 = vmatpush3.bf16.msra.mxu1 %v5496_v0  ;;  %7880 = vmatprep.mubr.msk.bf16.mxu1 %vm8934_vm0, %v8932_v4 }
0x2782   :  { %7890 = vmatprep.subr.bf16.mxu1 %v8932_v4 }
0x2783   :  { %v8629_v5 = vpop.eup %8628 }
0x2784   :  { %v5443_v35 = vmul.f32 %v8629_v5, %v8625_v29 }
0x2786   :  { %v5445_v47 = vpack.c.bf16 %v5443_v35, %v5443_v35  ;;  %v8368_v35 = vld [vmem:[#allocation10 + $0xf0] sm:$0xff]  }
0x2788   :  { %7881 = vmatmul.mubr.msk.bf16.vlgmr.msra.gmra.mrb[124].mxu1 %vm572_vm3, %v5445_v47  ;;  %v8369_v47 = vld [vmem:[#allocation10 + $0xf8] sm:$0xff]  }
0x2789   :  { %7892 = vmatprep.mubr.msk.bf16.mxu1 %vm8934_vm0, %v8932_v4 }
0x278a   :  { %7891 = vmatpush3.bf16.xpose.msra.mxu1 %v5600_v48 }
0x278b   :  { %7902 = vmatprep.subr.bf16.mxu1 %v8932_v4 }
0x2791   :  { %7893 = vmatmul.mubr.msk.bf16.vlgmr.msra.gmra.mrb[128].mxu1 %vm479_vm1, %v5592_v61 }
0x2792   :  { %7904 = vmatprep.mubr.msk.bf16.mxu1 %vm8934_vm0, %v8932_v4 }
0x2850   :  { %v5584_v37 = vpop.f32.mrb[76].mxu0 }
0x2851   :  { %v7888_v62 = vpop.f32.mrb[77].mxu0  ;;  %v5642_v6 = vsel %vm5421_vm4, %v5584_v37, -inf }
0x2852   :  { %5643 = vmax.xlane.f32.xlu1 %v5642_v6  ;;  %v5587_v39 = vpop.f32.mrb[78].mxu0 }
0x2853   :  { %v9704_v41 = vpop.f32.mrb[120].mxu1  ;;  %v7889_v10 = vpop.f32.mrb[79].mxu0 }
0x2854   :  { %v7876_v36 = vpop.f32.mrb[121].mxu1 }
0x2855   :  { %v5489_v11 = vpop.f32.mrb[122].mxu1 }
0x2856   :  { %v7877_v12 = vpop.f32.mrb[123].mxu1 }
0x285b   :  { %v9706_v13 = vpop.f32.mrb[124].mxu1 }
0x285c   :  { %v7882_v17 = vpop.f32.mrb[125].mxu1 }
0x285d   :  { %v5535_v3 = vpop.f32.mrb[126].mxu1  ;;  %v7183_v17 = vld [vmem:[#allocation11 + $0x3] ss:$0 sm:$0xff] }
0x285e   :  { %v7883_v9 = vpop.f32.mrb[127].mxu1 }
0x2863   :  { %5667 = vrot.lane.b32.xlu1 %v9667_v2, %s8925_s2 }
0x2864   :  { %v5636_v20 = vpop.f32.mrb[128].mxu1 }
0x2865   :  { %v7894_v23 = vpop.f32.mrb[129].mxu1  ;;  %v5645_v7 = vsel %vm5421_vm4, %v5636_v20, -inf }
0x2866   :  { %5646 = vmax.xlane.f32.xlu0 %v5645_v7  ;;  %v5639_v8 = vpop.f32.mrb[130].mxu1 }
0x2867   :  { %v7895_v15 = vpop.f32.mrb[131].mxu1 }
0x28df   :  { %v5644_v16 = vpop.xlane.xlu1 %5643 }
0x28e0   :  { %v5648_v21 = vsub.f32 %v5584_v37, %v5644_v16  ;;  %v8370_v16 = vld [vmem:[#allocation16 + $0x300] ss:$16 sps:$4 sm:$0xff]  }
0x28e2   :  { %v5650_v60 = vmul.f32 1.442695, %v5648_v21  ;;  %v8372_v21 = vld [vmem:[#allocation16 + $0x304] ss:$16 sps:$4 sm:$0xff]  }
0x28e3   :  { %v5668_v26 = vpop.permute.xlu1 %5667 }
0x28e4   :  { %8630 = vpow2.f32 %v5650_v60  ;;  %v5673_v27 = vsel %vm600_vm2, %v5668_v26, 0  ;;  %v8375_v60 = vld [vmem:[#allocation16 + $0x30c] ss:$16 sps:$4 sm:$0xff]   ;;  %v8378_v26 = vld [vmem:[#allocation16 + $0x324] ss:$16 sps:$4 sm:$0xff]  }
0x28e5   :  { %7897 = vmatpush3.bf16.msra.mxu0 %v5673_v27  ;;  %v8381_v27 = vld [vmem:[#allocation16 + $0x32c] ss:$16 sps:$4 sm:$0xff]  }
0x28e6   :  { %7908 = vmatprep.subr.bf16.mxu0 %v8932_v4 }
0x28ee   :  { %v8631_v31 = vpop.eup %8630 }
0x28ef   :  { %v5654_v2 = vsel %vm5421_vm4, %v8631_v31, 0.0 }
0x28f0   :  { %5655 = vadd.xlane.f32.xlu0 %v5654_v2 }
0x28f3   :  { %v5647_v33 = vpop.xlane.xlu0 %5646 }
0x28f4   :  { %v5649_v34 = vsub.f32 %v5636_v20, %v5647_v33  ;;  %v8936_v33 = vmov 1985246804  }
0x28f6   :  { %v5652_v38 = vmul.f32 1.442695, %v5649_v34  ;;  %v5912_v34 = vunpack.c.l.s4 %v8936_v33 }
0x28f8   :  { %8632 = vpow2.f32 %v5652_v38 }
0x2902   :  { %v8633_v63 = vpop.eup %8632 }
0x2903   :  { %v5657_v28 = vsel %vm5421_vm4, %v8633_v63, 0.0 }
0x2904   :  { %5658 = vadd.xlane.f32.xlu0 %v5657_v28 }
0x291a   :  { %5716 = vrot.lane.b32.xlu0 %v5328_v51, %s8925_s2  ;;  %v8365_v51 = vld [vmem:[#allocation10 + $0xd8] sm:$0xff]  }
0x297d   :  { %v5656_v14 = vpop.xlane.xlu0 %5655 }
0x297e   :  { %8634 = vrcp.f32 %v5656_v14 }
0x2988   :  { %v8635_v44 = vpop.eup %8634 }
0x2989   :  { %v5662_v24 = vmul.f32 %v8635_v44, %v8631_v31  ;;  %v8376_v31 = vld [vmem:[#allocation16 + $0x320] ss:$16 sps:$4 sm:$0xff]  }
0x298b   :  { %v5664_v50 = vpack.c.bf16 %v5662_v24, %v5662_v24 }
0x298d   :  { %7899 = vmatmul.mubr.msk.bf16.vlgmr.msra.gmra.mrb[80].mxu0 %vm572_vm3, %v5664_v50 }
0x298e   :  { %7924 = vmatprep.mubr.msk.bf16.mxu0 %vm8934_vm0, %v8932_v4  ;;  %7909 = vmatpush3.bf16.msra.mxu0 %v8362_v45  ;;  %v8384_v45 = vld [vmem:[#allocation16 + $0x344] ss:$16 sps:$4 sm:$0xff]  }
0x298f   :  { %7910 = vmatprep.subr.bf16.mxu0 %v8932_v4 }
0x2991   :  { %v5659_v22 = vpop.xlane.xlu0 %5658 }
0x2992   :  { %8636 = vrcp.f32 %v5659_v22  ;;  %7911 = vmatpush3.bf16.msra.mxu0 %v8363_v49  ;;  %v8387_v49 = vld [vmem:[#allocation16 + $0x34c] ss:$16 sps:$4 sm:$0xff]  }
0x2993   :  { %7912 = vmatprep.subr.bf16.mxu0 %v8932_v4 }
0x2995   :  { %v5717_v25 = vpop.permute.xlu0 %5716 }
0x2996   :  { %v5722_v29 = vsel %vm600_vm2, %v5717_v25, 0  ;;  %7913 = vmatpush3.bf16.msra.mxu0 %v8364_v1  ;;  %v8382_v1 = vld [vmem:[#allocation16 + $0x340] ss:$16 sps:$4 sm:$0xff]  }
0x2997   :  { %7903 = vmatpush3.bf16.msra.mxu1 %v5722_v29  ;;  %7914 = vmatprep.subr.bf16.mxu0 %v8932_v4 }
0x2998   :  { %6191 = vmatprep.subr.bf16.mxu1 %v8372_v21 }
0x299a   :  { %7915 = vmatpush3.bf16.msra.mxu0 %v8365_v51  ;;  %v8385_v51 = vld [vmem:[#allocation16 + $0x348] ss:$16 sps:$4 sm:$0xff]  }
0x299b   :  { %7916 = vmatprep.subr.bf16.mxu0 %v8932_v4 }
0x299c   :  { %v8637_v30 = vpop.eup %8636 }
0x299d   :  { %v5663_v18 = vmul.f32 %v8637_v30, %v8633_v63  ;;  %v5913_v63 = vunpack.c.0.s8 %v5912_v34 }
0x299e   :  { %7917 = vmatpush3.bf16.msra.mxu0 %v8366_v58  ;;  %v8390_v58 = vld [vmem:[#allocation16 + $0x364] ss:$16 sps:$4 sm:$0xff]  }
0x299f   :  { %v5665_v40 = vpack.c.bf16 %v5663_v18, %v5663_v18  ;;  %7918 = vmatprep.subr.bf16.mxu0 %v8932_v4  ;;  %v9748_v14 = vsub.s32 %v5913_v63, %v9172_v54  ;;  %v8419_v63 = vld [vmem:[#allocation17 + $0x3c0] sm:$0xff]  }
0x29a1   :  { %7905 = vmatmul.mubr.msk.bf16.vlgmr.msra.gmra.mrb[132].mxu1 %vm572_vm3, %v5665_v40 }
0x29a2   :  { %6223 = vmatprep.mubr.bf16.mxu1 %v8933_v32  ;;  %7919 = vmatpush3.bf16.msra.mxu0 %v8367_v19  ;;  %v8393_v19 = vld [vmem:[#allocation16 + $0x36c] ss:$16 sps:$4 sm:$0xff]  }
0x29a3   :  { %7920 = vmatprep.subr.bf16.mxu0 %v8932_v4  ;;  %6192 = vmatpush1.bf16.msra.mxu1 %v8370_v16 }
0x29a4   :  { %6193 = vmatprep.subr.bf16.mxu1 %v8378_v26 }
0x29a6   :  { %7921 = vmatpush3.bf16.msra.mxu0 %v8368_v35  ;;  %v8399_v35 = vld [vmem:[#allocation16 + $0x38c] ss:$16 sps:$4 sm:$0xff]  }
0x29a7   :  { %7922 = vmatprep.subr.bf16.mxu0 %v8932_v4  ;;  %6194 = vmatpush1.bf16.msra.mxu1 %v8376_v31 }
0x29a8   :  { %6195 = vmatprep.subr.bf16.mxu1 %v8384_v45  ;;  %v8431_v45 = vld [vmem:[#allocation17 + $0x3d8] sm:$0xff]  }
0x29aa   :  { %7923 = vmatpush3.bf16.msra.mxu0 %v8369_v47  ;;  %v8397_v47 = vld [vmem:[#allocation16 + $0x388] ss:$16 sps:$4 sm:$0xff]  }
0x29ab   :  { %6232 = vmatprep.subr.bf16.mxu0 %v8375_v60  ;;  %6196 = vmatpush1.bf16.msra.mxu1 %v8382_v1  ;;  %v8433_v1 = vld [vmem:[#allocation17 + $0x398] sm:$0xff]  }
0x29ac   :  { %6197 = vmatprep.subr.bf16.mxu1 %v8390_v58  ;;  %v8435_v58 = vld [vmem:[#allocation17 + $0x3e0] sm:$0xff]  }
0x2a60   :  { %v5709_v46 = vpop.f32.mrb[80].mxu0 }
0x2a61   :  { %5766 = vrot.lane.b32.xlu1 %v5709_v46, %s8925_s2  ;;  %v7900_v0 = vpop.f32.mrb[81].mxu0  ;;  %v8388_v46 = vld [vmem:[#allocation16 + $0x360] ss:$16 sps:$4 sm:$0xff]  }
0x2a62   :  { %v5712_v5 = vpop.f32.mrb[82].mxu0  ;;  %v8391_v0 = vld [vmem:[#allocation16 + $0x368] ss:$16 sps:$4 sm:$0xff]   ;;  %6198 = vmatpush1.bf16.msra.mxu1 %v8388_v46  ;;  %v8437_v46 = vld [vmem:[#allocation17 + $0x3a0] sm:$0xff]  }
0x2a63   :  { %v7901_v52 = vpop.f32.mrb[83].mxu0  ;;  %v8396_v5 = vld [vmem:[#allocation16 + $0x384] ss:$16 sps:$4 sm:$0xff]  }
0x2a64   :  { %v8394_v52 = vld [vmem:[#allocation16 + $0x380] ss:$16 sps:$4 sm:$0xff]   ;;  %6199 = vmatprep.subr.bf16.mxu1 %v8396_v5  ;;  %v8439_v5 = vld [vmem:[#allocation17 + $0x3e8] sm:$0xff]  }
0x2a66   :  { %6200 = vmatpush1.bf16.msra.mxu1 %v8394_v52  ;;  %v8441_v52 = vld [vmem:[#allocation17 + $0x3a8] sm:$0xff]  }
0x2a74   :  { %v5758_v48 = vpop.f32.mrb[132].mxu1 }
0x2a75   :  { %5768 = vrot.lane.b32.xlu1 %v5758_v48, %s8925_s2  ;;  %v7906_v61 = vpop.f32.mrb[133].mxu1  ;;  %v8402_v48 = vld [vmem:[#allocation16 + $0x3a4] ss:$16 sps:$4 sm:$0xff]  }
0x2a76   :  { %v5761_v37 = vpop.f32.mrb[134].mxu1  ;;  %v8405_v61 = vld [vmem:[#allocation16 + $0x3ac] ss:$16 sps:$4 sm:$0xff]   ;;  %6201 = vmatprep.subr.bf16.mxu1 %v8402_v48  ;;  %v8443_v48 = vld [vmem:[#allocation17 + $0x3f0] sm:$0xff]  }
0x2a77   :  { %v7907_v62 = vpop.f32.mrb[135].mxu1  ;;  %v8400_v37 = vld [vmem:[#allocation16 + $0x3a0] ss:$16 sps:$4 sm:$0xff]  }
0x2a78   :  { %v8403_v62 = vld [vmem:[#allocation16 + $0x3a8] ss:$16 sps:$4 sm:$0xff]   ;;  %6202 = vmatpush1.bf16.msra.mxu1 %v8400_v37  ;;  %v8445_v37 = vld [vmem:[#allocation17 + $0x3b0] sm:$0xff]  }
0x2ad3   :  { %v5767_v6 = vpop.permute.xlu1 %5766 }
0x2ad4   :  { %v5772_v10 = vsel %vm479_vm1, %v9704_v41, %v5767_v6  ;;  %v8406_v6 = vld [vmem:[#allocation16 + $0x3c0] ss:$16 sps:$4 sm:$0xff]  }
0x2ae7   :  { %v5769_v39 = vpop.permute.xlu1 %5768 }
0x2ae8   :  { %v5773_v36 = vsel %vm479_vm1, %v9706_v13, %v5769_v39  ;;  %v8408_v39 = vld [vmem:[#allocation16 + $0x3c4] ss:$16 sps:$4 sm:$0xff]  }
0x2ae9   :  { %v5793_v11 = vcombine.low %v5772_v10, %v5773_v36  ;;  %v8409_v10 = vld [vmem:[#allocation16 + $0x3c8] ss:$16 sps:$4 sm:$0xff]   ;;  %v8411_v36 = vld [vmem:[#allocation16 + $0x3cc] ss:$16 sps:$4 sm:$0xff]   ;;  %6203 = vmatprep.subr.bf16.mxu1 %v8408_v39 }
0x2aea   :  { %6204 = vmatpush1.bf16.msra.mxu1 %v8406_v6  ;;  %v8447_v6 = vld [vmem:[#allocation17 + $0x3f8] sm:$0xff]  }
0x2aeb   :  { %v5795_v12 = vpack.c.bf16 %v5793_v11, %v5793_v11  ;;  %v8414_v11 = vld [vmem:[#allocation16 + $0x3e4] ss:$16 sps:$4 sm:$0xff]   ;;  %v8448_v39 = vld [vmem:[#allocation17 + $0x338] sm:$0xff]  }
0x2aec   :  { %6205 = vmatprep.subr.bf16.mxu1 %v8414_v11 }
0x2aed   :  { %7925 = vmatmul.mubr.bf16.vlgmr.msra.gmra.mrb[84].mxu0 %v5795_v12  ;;  %v8417_v12 = vld [vmem:[#allocation16 + $0x3ec] ss:$16 sps:$4 sm:$0xff]  }
0x2aee   :  { %6264 = vmatprep.mubr.bf16.mxu0 %v8933_v32  ;;  %v8373_v32 = vld [vmem:[#allocation16 + $0x308] ss:$16 sps:$4 sm:$0xff]  }
0x2aef   :  { %6233 = vmatpush1.bf16.msra.mxu0 %v8373_v32 }
0x2af0   :  { %6234 = vmatprep.subr.bf16.mxu0 %v8381_v27 }
0x2bc0   :  { %v5883_v3 = vpop.f32.mrb[84].mxu0 }
0x2bc1   :  { %v5884_v9 = vadd.f32 %v7183_v17, %v5883_v3  ;;  %v7926_v20 = vpop.f32.mrb[85].mxu0  ;;  %v8412_v17 = vld [vmem:[#allocation16 + $0x3e0] ss:$16 sps:$4 sm:$0xff]   ;;  %v8415_v3 = vld [vmem:[#allocation16 + $0x3e8] ss:$16 sps:$4 sm:$0xff]  }
0x2bc2   :  { %v5886_v23 = vpop.f32.mrb[86].mxu0  ;;  %6206 = vmatpush1.bf16.msra.mxu1 %v8412_v17 }
0x2bc3   :  { %v5890_v7 = vcombine.high %v5884_v9, %v5884_v9  ;;  %v7927_v8 = vpop.f32.mrb[87].mxu0  ;;  %v9737_v15 = vadd.f32 %v5884_v9, %v9630_v42  ;;  %v8379_v42 = vld [vmem:[#allocation16 + $0x328] ss:$16 sps:$4 sm:$0xff]  }
0x2bc4   :  { %6235 = vmatpush1.bf16.msra.mxu0 %v8379_v42 }
0x2bc5   :  { %v9740_v41 = vadd.f32 %v5890_v7, %v9634_v43  ;;  %v8935_v43 = vmov 839922192   ;;  %6236 = vmatprep.subr.bf16.mxu0 %v8387_v49  ;;  %v7192_v7 = vld [vmem:[#allocation13 + $0x3] ss:$0 sm:$0xff] }
0x2bc6   :  { %v5905_v2 = vunpack.c.l.s4 %v8935_v43  ;;  %v5957_v32 = vcombine.high %v7192_v7, %v7192_v7  ;;  %v8432_v49 = vld [vmem:[#allocation17 + $0x318] sm:$0xff]  }
0x2bc7   :  { %v5898_v13 = vcombine.low %v9737_v15, %v9740_v41 }
0x2bc8   :  { %v5906_v38 = vunpack.c.0.s8 %v5905_v2  ;;  %6237 = vmatpush1.bf16.msra.mxu0 %v8385_v51  ;;  %v8434_v51 = vld [vmem:[#allocation17 + $0x360] sm:$0xff]  }
0x2bc9   :  { %5900 = vadd.xlane.f32.xlu1 %v5898_v13  ;;  %6238 = vmatprep.subr.bf16.mxu0 %v8393_v19  ;;  %v7193_v13 = vld [vmem:[#allocation14 + $0x3] ss:$0 sm:$0xff]  ;;  %v8436_v19 = vld [vmem:[#allocation17 + $0x320] sm:$0xff]  }
0x2bca   :  { %v9745_v28 = vsub.s32 %v5906_v38, %v9172_v54  ;;  %v5966_v27 = vcombine.high %v7193_v13, %v7193_v13  ;;  %v8418_v38 = vld [vmem:[#allocation17 + $0x340] sm:$0xff]  }
0x2bcb   :  { %7532 = vmatprep.subr.bf16.mxu1 %v8418_v38 }
0x2bcc   :  { %6239 = vmatpush1.bf16.msra.mxu0 %v8391_v0  ;;  %v8438_v0 = vld [vmem:[#allocation17 + $0x368] sm:$0xff]  }
0x2bcd   :  { %6240 = vmatprep.subr.bf16.mxu0 %v8399_v35  ;;  %v8440_v35 = vld [vmem:[#allocation17 + $0x328] sm:$0xff]  }
0x2bd0   :  { %6241 = vmatpush1.bf16.msra.mxu0 %v8397_v47  ;;  %v8442_v47 = vld [vmem:[#allocation17 + $0x370] sm:$0xff]  }
0x2bd1   :  { %6242 = vmatprep.subr.bf16.mxu0 %v8405_v61  ;;  %v8444_v61 = vld [vmem:[#allocation17 + $0x330] sm:$0xff]  }
0x2bd4   :  { %6243 = vmatpush1.bf16.msra.mxu0 %v8403_v62  ;;  %v8446_v62 = vld [vmem:[#allocation17 + $0x378] sm:$0xff]  }
0x2bd5   :  { %6244 = vmatprep.subr.bf16.mxu0 %v8411_v36  ;;  %v7194_v36 = vld [vmem:[%s9813_s10 + $0x3] ss:$4 sm:$0xf] }
0x2bd6   :  { %v6014_v11 = vrot.slane %v7194_v36, %v9185_v59  ;;  %v6018_v17 = vrot.slane %v7194_v36, %v9175_v55 }
0x2bd8   :  { %6245 = vmatpush1.bf16.msra.mxu0 %v8409_v10  ;;  %v8449_v10 = vld [vmem:[#allocation17 + $0x3b8] sm:$0xff]  }
0x2bd9   :  { %6246 = vmatprep.subr.bf16.mxu0 %v8417_v12  ;;  %v6022_v12 = vrot.slane %v7194_v36, %v9181_v57 }
0x2bdc   :  { %6247 = vmatpush1.bf16.msra.mxu0 %v8415_v3  ;;  %v6026_v3 = vrot.slane %v7194_v36, %v9289_v56 }
0x2bdd   :  { %7554 = vmatprep.subr.bf16.mxu0 %v8419_v63 }
0x2c56   :  { %v5901_v44 = vpop.xlane.xlu1 %5900 }
0x2c57   :  { %v5902_v24 = vmul.f32 0.0078125, %v5901_v44  ;;  %v8420_v44 = vld [vmem:[#allocation17 + $0x300] sm:$0xff]  }
0x2c59   :  { %v5910_v50 = vrot.slane %v5902_v24, %v9745_v28  ;;  %v5917_v22 = vrot.slane %v5902_v24, %v9748_v14  ;;  %v8423_v24 = vld [vmem:[#allocation17 + $0x3c8] sm:$0xff]  }
0x2c5b   :  { %v9753_v25 = vsub.f32 %v9737_v15, %v5910_v50  ;;  %v9756_v29 = vsub.f32 %v9740_v41, %v5917_v22  ;;  %v8424_v50 = vld [vmem:[#allocation17 + $0x308] sm:$0xff]  }
0x2c5c   :  { %v8425_v22 = vld [vmem:[#allocation17 + $0x388] sm:$0xff]  }
0x2c5d   :  { %v5922_v30 = vmul.f32 %v9753_v25, %v9753_v25  ;;  %v5923_v18 = vmul.f32 %v9756_v29, %v9756_v29 }
0x2c5f   :  { %v5926_v40 = vcombine.low %v5922_v30, %v5923_v18  ;;  %v8428_v30 = vld [vmem:[#allocation17 + $0x310] sm:$0xff]  }
0x2c60   :  { %v8429_v18 = vld [vmem:[#allocation17 + $0x390] sm:$0xff]  }
0x2c61   :  { %5928 = vadd.xlane.f32.xlu0 %v5926_v40  ;;  %v8430_v40 = vld [vmem:[#allocation17 + $0x358] sm:$0xff]  }
0x2cee   :  { %v5929_v9 = vpop.xlane.xlu0 %5928 }
0x2cef   :  { %v5930_v20 = vmul.f32 0.0078125, %v5929_v9 }
0x2cf1   :  { %v5931_v23 = vadd.f32 1e-05, %v5930_v20 }
0x2cf3   :  { %8638 = vrsqrt.f32 %v5931_v23 }
0x2cfd   :  { %v8639_v8 = vpop.eup %8638 }
0x2cfe   :  { %v5940_v16 = vrot.slane %v8639_v8, %v9745_v28  ;;  %v5947_v21 = vrot.slane %v8639_v8, %v9748_v14  ;;  %v8421_v28 = vld [vmem:[#allocation17 + $0x380] sm:$0xff]   ;;  %v8422_v14 = vld [vmem:[#allocation17 + $0x348] sm:$0xff]  }
0x2d00   :  { %v5950_v60 = vmul.f32 %v5940_v16, %v9753_v25  ;;  %v5951_v26 = vmul.f32 %v5947_v21, %v9756_v29  ;;  %v8426_v25 = vld [vmem:[#allocation17 + $0x350] sm:$0xff]  }
0x2d01   :  { %v8427_v29 = vld [vmem:[#allocation17 + $0x3d0] sm:$0xff]  }
0x2d02   :  { %v5959_v31 = vmul.f32 %v7192_v7, %v5950_v60  ;;  %v5960_v42 = vmul.f32 %v5957_v32, %v5951_v26 }
0x2d04   :  { %v5968_v43 = vadd.f32 %v7193_v13, %v5959_v31  ;;  %v5969_v2 = vadd.f32 %v5966_v27, %v5960_v42 }
0x2d06   :  { %v6005_v33 = vcombine.low %v5968_v43, %v5969_v2 }
0x2d08   :  { %v6007_v34 = vpack.c.bf16 %v6005_v33, %v6005_v33 }
0x2d0a   :  { %6224 = vmatmul.mubr.bf16.vlgmr.msra.gmra.mrb[136].mxu1 %v6007_v34  ;;  %6265 = vmatmul.mubr.bf16.vlgmr.msra.gmra.mrb[88].mxu0 %v6007_v34 }
0x2d0b   :  { %7533 = vmatpush3.bf16.msra.mxu1 %v8420_v44  ;;  %7555 = vmatpush3.bf16.msra.mxu0 %v8421_v28 }
0x2d0c   :  { %7534 = vmatprep.subr.bf16.mxu1 %v8422_v14  ;;  %7556 = vmatprep.subr.bf16.mxu0 %v8423_v24 }
0x2d0f   :  { %7535 = vmatpush3.bf16.msra.mxu1 %v8424_v50  ;;  %7557 = vmatpush3.bf16.msra.mxu0 %v8425_v22 }
0x2d10   :  { %7536 = vmatprep.subr.bf16.mxu1 %v8426_v25  ;;  %7558 = vmatprep.subr.bf16.mxu0 %v8427_v29 }
0x2d13   :  { %7537 = vmatpush3.bf16.msra.mxu1 %v8428_v30  ;;  %7559 = vmatpush3.bf16.msra.mxu0 %v8429_v18 }
0x2d14   :  { %7538 = vmatprep.subr.bf16.mxu1 %v8430_v40  ;;  %7560 = vmatprep.subr.bf16.mxu0 %v8431_v45 }
0x2d17   :  { %7539 = vmatpush3.bf16.msra.mxu1 %v8432_v49  ;;  %7561 = vmatpush3.bf16.msra.mxu0 %v8433_v1 }
0x2d18   :  { %7540 = vmatprep.subr.bf16.mxu1 %v8434_v51  ;;  %7562 = vmatprep.subr.bf16.mxu0 %v8435_v58 }
0x2d1b   :  { %7541 = vmatpush3.bf16.msra.mxu1 %v8436_v19  ;;  %7563 = vmatpush3.bf16.msra.mxu0 %v8437_v46  ;;  %v8937_v19 = vmov 1983009808  }
0x2d1c   :  { %7542 = vmatprep.subr.bf16.mxu1 %v8438_v0  ;;  %7564 = vmatprep.subr.bf16.mxu0 %v8439_v5  ;;  %v6656_v46 = vunpack.c.l.s4 %v8937_v19  ;;  %v8938_v5 = vmov 1934713408  }
0x2d1f   :  { %7543 = vmatpush3.bf16.msra.mxu1 %v8440_v35  ;;  %7565 = vmatpush3.bf16.msra.mxu0 %v8441_v52  ;;  %v6664_v35 = vunpack.c.l.s4 %v8938_v5 }
0x2d20   :  { %7544 = vmatprep.subr.bf16.mxu1 %v8442_v47  ;;  %7566 = vmatprep.subr.bf16.mxu0 %v8443_v48  ;;  %v7231_v47 = vld [vmem:[%s9815_s12 + $0x3] ss:$0 sm:$0xff]  ;;  %s8940_s12 = smov [#allocation19]  }
0x2d21   :  { %s6773_s28 = sshll.u32 %s8940_s12, 4  ;;  %s6774_s28 = int_to_ptr.vmem [resolvable:$true] %s6773_s28 }
0x2d22   :  { %s8878_s9 = scalar_lea.vmem %s6774_s28, 128  ;;  %p8883_p11 = scmp.lt.s32.totalorder %s6774_s28, %s6774_s28 }
0x2d23   :  { %7545 = vmatpush3.bf16.msra.mxu1 %v8444_v61  ;;  %7567 = vmatpush3.bf16.msra.mxu0 %v8445_v37  ;;  %p8879_p10 = scmp.ne.s32.totalorder %s6774_s28, %s8878_s9  ;;  %p8884_p12 = scmp.lt.s32.totalorder %s8878_s9, %s8878_s9 }
0x2d24   :  { %7546 = vmatprep.subr.bf16.mxu1 %v8446_v62  ;;  %7568 = vmatprep.subr.bf16.mxu0 %v8447_v6  ;;  %v6657_v62 = vunpack.c.0.s8 %v6656_v46 }
0x2d25   :  { %p8885_p13 = por %p8884_p12, %p8883_p11 }
0x2d27   :  { %7547 = vmatpush3.bf16.msra.mxu1 %v8448_v39  ;;  %7569 = vmatpush3.bf16.msra.mxu0 %v8449_v10  ;;  %p8886_p0 = pnand %p8885_p13, %p8879_p10 }
0x2ddd   :  { %v6225_v9 = vpop.f32.mrb[136].mxu1  ;;  %v6266_v20 = vpop.f32.mrb[88].mxu0 }
0x2dde   :  { %v6226_v23 = vadd.f32 %v6225_v9, %v6014_v11  ;;  %v6267_v7 = vadd.f32 %v6266_v20, %v6022_v12  ;;  %v6227_v8 = vpop.f32.mrb[137].mxu1  ;;  %v6268_v13 = vpop.f32.mrb[89].mxu0  ;;  %v6665_v12 = vunpack.c.0.s8 %v6664_v35  ;;  %v6660_v9 = vsub.s32 %v6657_v62, %v9172_v54 }
0x2ddf   :  { %v6228_v16 = vadd.f32 %v6227_v8, %v6018_v17  ;;  %v6269_v21 = vadd.f32 %v6268_v13, %v6026_v3  ;;  %v6229_v32 = vpop.f32.mrb[138].mxu1  ;;  %v6270_v60 = vpop.f32.mrb[90].mxu0  ;;  %v8939_v20 = vmov 1966171168  }
0x2de0   :  { %v7227_v26 = vmul.f32 -1.702, %v6226_v23  ;;  %v7229_v27 = vmul.f32 -1.702, %v6267_v7  ;;  %v6230_v31 = vpop.f32.mrb[139].mxu1  ;;  %v6271_v59 = vpop.f32.mrb[91].mxu0  ;;  %v6668_v13 = vsub.s32 %v6665_v12, %v9172_v54 }
0x2de1   :  { %v7228_v42 = vmul.f32 -1.702, %v6228_v16  ;;  %v7230_v57 = vmul.f32 -1.702, %v6269_v21 }
0x2de2   :  { %v6281_v43 = vmul.f32 1.442695, %v7227_v26  ;;  %v6285_v55 = vmul.f32 1.442695, %v7229_v27 }
0x2de3   :  { %v6283_v2 = vmul.f32 1.442695, %v7228_v42  ;;  %v6287_v56 = vmul.f32 1.442695, %v7230_v57 }
0x2de4   :  { %8640 = vpow2.f32 %v6281_v43 }
0x2de5   :  { %8642 = vpow2.f32 %v6285_v55 }
0x2de6   :  { %8644 = vpow2.f32 %v6283_v2 }
0x2de7   :  { %8646 = vpow2.f32 %v6287_v56 }
0x2dee   :  { %v8641_v33 = vpop.eup %8640 }
0x2def   :  { %v8643_v34 = vpop.eup %8642  ;;  %v6289_v38 = vadd.f32 1.0, %v8641_v33 }
0x2df0   :  { %v8645_v63 = vpop.eup %8644  ;;  %v6291_v44 = vadd.f32 1.0, %v8643_v34 }
0x2df1   :  { %v8647_v28 = vpop.eup %8646  ;;  %8648 = vrcp.f32 %v6289_v38  ;;  %v6290_v14 = vadd.f32 1.0, %v8645_v63 }
0x2df2   :  { %8650 = vrcp.f32 %v6291_v44  ;;  %v6292_v24 = vadd.f32 1.0, %v8647_v28 }
0x2df3   :  { %8652 = vrcp.f32 %v6290_v14 }
0x2df4   :  { %8654 = vrcp.f32 %v6292_v24 }
0x2dfb   :  { %v8649_v50 = vpop.eup %8648 }
0x2dfc   :  { %v8651_v22 = vpop.eup %8650  ;;  %v6301_v29 = vmul.f32 %v8649_v50, %v6226_v23  ;;  %v6715_v23 = vunpack.c.l.s4 %v8939_v20 }
0x2dfd   :  { %v8653_v25 = vpop.eup %8652  ;;  %v6303_v18 = vmul.f32 %v8651_v22, %v6267_v7 }
0x2dfe   :  { %v8655_v30 = vpop.eup %8654  ;;  %v6302_v40 = vmul.f32 %v8653_v25, %v6228_v16  ;;  %v6370_v1 = vpack.c.bf16 %v6301_v29, %v6301_v29  ;;  %v6716_v32 = vunpack.c.0.s8 %v6715_v23 }
0x2dff   :  { %v6304_v45 = vmul.f32 %v8655_v30, %v6269_v21  ;;  %v6372_v58 = vpack.c.bf16 %v6303_v18, %v6303_v18 }
0x2e00   :  { %v6371_v49 = vpack.c.bf16 %v6302_v40, %v6302_v40  ;;  %v6719_v43 = vsub.s32 %v6716_v32, %v9172_v54 }
0x2e01   :  { %v6373_v51 = vpack.c.bf16 %v6304_v45, %v6304_v45 }
0x2e02   :  { %6603 = vmatprep.mubr.bf16.mxu1 %v6371_v49 }
0x2e03   :  { %6643 = vmatprep.mubr.bf16.mxu0 %v6373_v51  ;;  %6604 = vmatmul.mubr.bf16.vlgmr.msra.gmra.mrb[140].mxu1 %v6370_v1 }
0x2e04   :  { %6644 = vmatmul.mubr.bf16.vlgmr.msra.gmra.mrb[92].mxu0 %v6372_v58 }
0x2ed6   :  { %v7548_v0 = vpop.f32.mrb[140].mxu1 }
0x2ed7   :  { %v7570_v52 = vpop.f32.mrb[92].mxu0  ;;  %v7549_v48 = vpop.f32.mrb[141].mxu1 }
0x2ed8   :  { %v7550_v61 = vadd.f32 %v7549_v48, %v7548_v0  ;;  %v7571_v37 = vpop.f32.mrb[93].mxu0  ;;  %v7551_v6 = vpop.f32.mrb[142].mxu1 }
0x2ed9   :  { %v7572_v39 = vadd.f32 %v7571_v37, %v7570_v52  ;;  %v7573_v10 = vpop.f32.mrb[94].mxu0  ;;  %v7552_v36 = vpop.f32.mrb[143].mxu1 }
0x2eda   :  { %v6606_v11 = vadd.f32 %v7550_v61, %v7231_v47  ;;  %v7574_v17 = vpop.f32.mrb[95].mxu0 }
0x2edc   :  { %v6646_v3 = vadd.f32 %v7572_v39, %v6606_v11 }
0x2ede   :  { %v6652_v7 = vcombine.high %v6646_v3, %v6646_v3  ;;  %v6654_v8 = vadd.f32 %v6646_v3, %v9737_v15 }
0x2ee0   :  { %v6661_v16 = vrot.slane %v6654_v8, %v6660_v9  ;;  %v6679_v21 = vadd.f32 %v6652_v7, %v9740_v41 }
0x2ee2   :  { %v6662_v60 = vcombine.high %v6661_v16, %v8932_v4  ;;  %v6669_v26 = vrot.slane %v6661_v16, %v6668_v13  ;;  %v6686_v27 = vrot.slane %v6679_v21, %v6660_v9 }
0x2ee4   :  { %v6676_v31 = vrot.slane %v6662_v60, %v6668_v13  ;;  %v6677_v59 = vcombine.high %v6669_v26, %v8932_v4  ;;  %v6687_v42 = vcombine.high %v6686_v27, %v8932_v4  ;;  %v6694_v57 = vrot.slane %v6686_v27, %v6668_v13 }
0x2ee6   :  { %v6678_v15 = vcombine.high %v6676_v31, %v8932_v4  ;;  %v6701_v55 = vrot.slane %v6687_v42, %v6668_v13  ;;  %v6702_v2 = vcombine.high %v6694_v57, %v8932_v4  ;;  %v6712_v56 = vcombine.low %v6669_v26, %v6677_v59 }
0x2ee8   :  { %v6703_v41 = vcombine.high %v6701_v55, %v8932_v4  ;;  %v6713_v33 = vcombine.low %v6676_v31, %v6678_v15  ;;  %v6736_v34 = vcombine.low %v6694_v57, %v6702_v2  ;;  %v6720_v38 = vrot.slane %v6712_v56, %v6719_v43 }
0x2eea   :  { %v6727_v63 = vrot.slane %v6713_v33, %v6719_v43  ;;  %v6737_v44 = vcombine.low %v6701_v55, %v6703_v41  ;;  %v6744_v14 = vrot.slane %v6736_v34, %v6719_v43 }
0x2eec   :  { %v6728_v28 = vcombine.low %v6720_v38, %v6727_v63  ;;  %v6751_v24 = vrot.slane %v6737_v44, %v6719_v43 }
0x2eee   :  { %v6735_v54 = vrot.slane %v6728_v28, %v6719_v43  ;;  %v6752_v50 = vcombine.low %v6744_v14, %v6751_v24 }
0x2ef0   :  { %v6759_v22 = vrot.slane %v6752_v50, %v6719_v43  ;;  %6766 = vst.msk [vmem:[#allocation19] sm:$0xf] %vm6764_vm5, %v6735_v54 }
0x2ef2   :  { %6767 = vst.msk [vmem:[#allocation19 + $0x4] sm:$0xf] %vm6764_vm5, %v6759_v22 }
0x2ef3   :  { %8889 = shalt.err (!%p8886_p0)
}
0x2ef4   :  { %s8890_s30 = scalar_lea.hbm %s9816_s13, 128 }
0x2ef5   :  { %p8891_p1 = scmp.ne.s32.totalorder %s9816_s13, %s8890_s30  ;;  %p8894_p2 = scmp.lt.u32.totalorder %s8890_s30, %s9816_s13 }
0x2ef7   :  { %p8896_p3 = pnand %p8894_p2, %p8891_p1 }
0x2ef9   :  { %8899 = shalt.err (!%p8896_p3)
}
0x2efa   :  { %6779 = dma.vmem_to_hbm [thread:$0]  %s6774_s28, 128, %s9816_s13, [#allocation4], %s8925_s2, %s8925_s2, %s8926_s15  }
0x2efb   :  { %8912 = dma.done.wait [#allocation4], 128  }
0x2efc   :  { %8913 = vsyncadd [#allocation4], 4294967168 }
0x2efd   :  { %6783 = vsyncpa [#allocation3], 1 }
0x2efe   :  { %6784 = vsyncpa [#allocation6], 1 }
0x2eff   :  { %6785 = vsyncpa [#allocation9], 1 }
0x2f00   :  { %6786 = vsyncpa [#allocation12], 1 }
0x2f01   :  { %6787 = vsyncpa [#allocation15], 1 }
0x2f02   :  { %6788 = vsyncpa [#allocation18], 1 }
0x2f03   :  { %6789 = vsyncpa [#allocation4], 1 }

// kernel: tpu_custom_call.1
= control target key start
LH: loop header
LB: loop body
LE: loop exit
PB: predicated region body
PF: predicated region fallthrough
CT: control target
= control target key end

     0   :  { %18 = vsyncpa [#allocation3], 0  ;;  %s9803_s0 = inlined_call_operand.hbm [shape: f32[2,8,128], index: 0, kind: input, shape index: {}]   ;;  %s9804_s1 = inlined_call_operand.hbm [shape: f32[4,128], index: 1, kind: input, shape index: {}]   ;;  %s9805_s2 = inlined_call_operand.hbm [shape: f32[4,128], index: 2, kind: input, shape index: {}]   ;;  %s9806_s3 = inlined_call_operand.hbm [shape: bf16[4,128,384], index: 3, kind: input, shape index: {}]   ;;  %s9807_s4 = inlined_call_operand.vmem [shape: f32[4,384], index: 4, kind: input, shape index: {}]   ;;  %s9808_s5 = inlined_call_operand.hbm [shape: bf16[4,128,128], index: 5, kind: input, shape index: {}]   ;;  %s9809_s6 = inlined_call_operand.hbm [shape: f32[4,128], index: 6, kind: input, shape index: {}]   ;;  %s9810_s7 = inlined_call_operand.hbm [shape: f32[4,128], index: 7, kind: input, shape index: {}]   ;;  %s9811_s8 = inlined_call_operand.hbm [shape: f32[4,128], index: 8, kind: input, shape index: {}]   ;;  %s9812_s9 = inlined_call_operand.hbm [shape: bf16[4,128,512], index: 9, kind: input, shape index: {}]   ;;  %s9813_s10 = inlined_call_operand.vmem [shape: f32[4,512], index: 10, kind: input, shape index: {}]   ;;  %s9814_s11 = inlined_call_operand.hbm [shape: bf16[4,512,128], index: 11, kind: input, shape index: {}]   ;;  %s9815_s12 = inlined_call_operand.vmem [shape: f32[4,128], index: 12, kind: input, shape index: {}]   ;;  %s9816_s13 = inlined_call_operand.hbm [shape: f32[2,1,512], index: 13, kind: output, shape index: {}]  }
   0x1   :  { %19 = vsyncpa [#allocation6], 0 }
   0x2   :  { %20 = vsyncpa [#allocation9], 0 }
   0x3   :  { %21 = vsyncpa [#allocation12], 0 }
   0x4   :  { %22 = vsyncpa [#allocation15], 0 }
   0x5   :  { %23 = vsyncpa [#allocation18], 0 }
   0x6   :  { %24 = vsyncpa [#allocation4], 0  ;;  %s8914_s25 = smov [#allocation5]   ;;  %s8915_s27 = smov [#allocation8]  }
   0x7   :  { %s43_s26 = sshll.u32 %s8914_s25, 4  ;;  %s62_s28 = sshll.u32 %s8915_s27, 4  ;;  %s44_s26 = int_to_ptr.vmem [resolvable:$true] %s43_s26  ;;  %s9011_s28 = int_to_ptr.vmem [resolvable:$true] %s62_s28 }
   0x8   :  { %s8658_s14 = scalar_lea.hbm %s9804_s1, 64 }
   0x9   :  { %p8659_p0 = scmp.ne.s32.totalorder %s9804_s1, %s8658_s14  ;;  %p8662_p1 = scmp.lt.u32.totalorder %s8658_s14, %s9804_s1 }
   0xb   :  { %p8664_p2 = pnand %p8662_p1, %p8659_p0 }
   0xd   :  { %8667 = shalt.err (!%p8664_p2)
}
   0xe   :  { %s8668_s19 = scalar_lea.vmem %s44_s26, 64  ;;  %p8673_p4 = scmp.lt.s32.totalorder %s44_s26, %s44_s26 }
   0xf   :  { %p8669_p3 = scmp.ne.s32.totalorder %s44_s26, %s8668_s19  ;;  %p8674_p5 = scmp.lt.s32.totalorder %s8668_s19, %s8668_s19 }
  0x11   :  { %p8675_p6 = por %p8674_p5, %p8673_p4 }
  0x13   :  { %p8676_p7 = pnand %p8675_p6, %p8669_p3 }
  0x15   :  { %8679 = shalt.err (!%p8676_p7)
}
  0x16   :  { %46 = dma.hbm_to_vmem [thread:$0]  %s9804_s1, 64, %s44_s26, [#allocation6]  }
  0x17   :  { %s8680_s24 = scalar_lea.hbm %s9806_s3, 12288 }
  0x18   :  { %p8681_p8 = scmp.ne.s32.totalorder %s9806_s3, %s8680_s24  ;;  %p8684_p9 = scmp.lt.u32.totalorder %s8680_s24, %s9806_s3 }
  0x1a   :  { %p8686_p10 = pnand %p8684_p9, %p8681_p8 }
  0x1c   :  { %8689 = shalt.err (!%p8686_p10)
}
  0x1d   :  { %s8690_s14 = scalar_lea.vmem %s9011_s28, 12288  ;;  %p8695_p12 = scmp.lt.s32.totalorder %s9011_s28, %s9011_s28 }
  0x1e   :  { %p8691_p11 = scmp.ne.s32.totalorder %s9011_s28, %s8690_s14  ;;  %p8696_p13 = scmp.lt.s32.totalorder %s8690_s14, %s8690_s14 }
  0x20   :  { %p8697_p0 = por %p8696_p13, %p8695_p12 }
  0x22   :  { %p8698_p1 = pnand %p8697_p0, %p8691_p11 }
  0x24   :  { %8701 = shalt.err (!%p8698_p1)
}
  0x25   :  { %s8916_s1 = smov 192   ;;  %s8917_s26 = smov 12  }
  0x26   :  { %68 = dma.hbm_to_vmem [thread:$0]  %s9806_s3, 12288, %s9011_s28, [#allocation9], %s8916_s1, %s8916_s1, %s8917_s26  }
  0x27   :  { %s8918_s17 = smov [#allocation11]   ;;  %s8919_s19 = smov [#allocation14]  }
  0x28   :  { %s89_s18 = sshll.u32 %s8918_s17, 4  ;;  %s109_s20 = sshll.u32 %s8919_s19, 4  ;;  %s90_s18 = int_to_ptr.vmem [resolvable:$true] %s89_s18  ;;  %s110_s20 = int_to_ptr.vmem [resolvable:$true] %s109_s20 }
  0x29   :  { %s8702_s23 = scalar_lea.hbm %s9809_s6, 64 }
  0x2a   :  { %p8703_p2 = scmp.ne.s32.totalorder %s9809_s6, %s8702_s23  ;;  %p8706_p3 = scmp.lt.u32.totalorder %s8702_s23, %s9809_s6 }
  0x2c   :  { %p8708_p4 = pnand %p8706_p3, %p8703_p2 }
  0x2e   :  { %8711 = shalt.err (!%p8708_p4)
}
  0x2f   :  { %s8712_s3 = scalar_lea.vmem %s90_s18, 64  ;;  %p8717_p6 = scmp.lt.s32.totalorder %s90_s18, %s90_s18 }
  0x30   :  { %p8713_p5 = scmp.ne.s32.totalorder %s90_s18, %s8712_s3  ;;  %p8718_p7 = scmp.lt.s32.totalorder %s8712_s3, %s8712_s3 }
  0x32   :  { %p8719_p8 = por %p8718_p7, %p8717_p6 }
  0x34   :  { %p8720_p9 = pnand %p8719_p8, %p8713_p5 }
  0x36   :  { %8723 = shalt.err (!%p8720_p9)
}
  0x37   :  { %92 = dma.hbm_to_vmem [thread:$0]  %s9809_s6, 64, %s90_s18, [#allocation12]  }
  0x38   :  { %s8724_s26 = scalar_lea.hbm %s9811_s8, 64 }
  0x39   :  { %p8725_p10 = scmp.ne.s32.totalorder %s9811_s8, %s8724_s26  ;;  %p8728_p11 = scmp.lt.u32.totalorder %s8724_s26, %s9811_s8 }
  0x3b   :  { %p8730_p12 = pnand %p8728_p11, %p8725_p10 }
  0x3d   :  { %8733 = shalt.err (!%p8730_p12)
}
  0x3e   :  { %s8734_s21 = scalar_lea.vmem %s110_s20, 64  ;;  %p8739_p0 = scmp.lt.s32.totalorder %s110_s20, %s110_s20 }
  0x3f   :  { %p8735_p13 = scmp.ne.s32.totalorder %s110_s20, %s8734_s21  ;;  %p8740_p1 = scmp.lt.s32.totalorder %s8734_s21, %s8734_s21 }
  0x41   :  { %p8741_p2 = por %p8740_p1, %p8739_p0 }
  0x43   :  { %p8742_p3 = pnand %p8741_p2, %p8735_p13 }
  0x45   :  { %8745 = shalt.err (!%p8742_p3)
}
  0x46   :  { %112 = dma.hbm_to_vmem [thread:$0]  %s9811_s8, 64, %s110_s20, [#allocation15]  }
  0x47   :  { %s8920_s22 = smov [#allocation2]   ;;  %s8746_s27 = scalar_lea.hbm %s9803_s0, 256 }
  0x48   :  { %s30_s23 = sshll.u32 %s8920_s22, 4  ;;  %p8747_p4 = scmp.ne.s32.totalorder %s9803_s0, %s8746_s27  ;;  %s31_s23 = int_to_ptr.vmem [resolvable:$true] %s30_s23 }
  0x49   :  { %p8750_p5 = scmp.lt.u32.totalorder %s8746_s27, %s9803_s0 }
  0x4b   :  { %p8752_p6 = pnand %p8750_p5, %p8747_p4 }
  0x4d   :  { %8755 = shalt.err (!%p8752_p6)
}
  0x4e   :  { %s8756_s14 = scalar_lea.vmem %s31_s23, 256  ;;  %p8761_p8 = scmp.lt.s32.totalorder %s31_s23, %s31_s23 }
  0x4f   :  { %p8757_p7 = scmp.ne.s32.totalorder %s31_s23, %s8756_s14  ;;  %p8762_p9 = scmp.lt.s32.totalorder %s8756_s14, %s8756_s14 }
  0x51   :  { %p8763_p10 = por %p8762_p9, %p8761_p8 }
  0x53   :  { %p8764_p11 = pnand %p8763_p10, %p8757_p7 }
  0x55   :  { %8767 = shalt.err (!%p8764_p11)
}
  0x56   :  { %s8921_s8 = smov 128   ;;  %s8922_s20 = smov 8  }
  0x57   :  { %36 = dma.hbm_to_vmem [thread:$0]  %s9803_s0, 256, %s31_s23, [#allocation3], %s8921_s8, %s8921_s8, %s8922_s20  }
  0x58   :  { %s8923_s15 = smov [#allocation7]   ;;  %s8924_s17 = smov [#allocation10]  }
  0x59   :  { %s53_s16 = sshll.u32 %s8923_s15, 4  ;;  %s76_s19 = sshll.u32 %s8924_s17, 4  ;;  %s54_s16 = int_to_ptr.vmem [resolvable:$true] %s53_s16  ;;  %s77_s19 = int_to_ptr.vmem [resolvable:$true] %s76_s19 }
  0x5a   :  { %s8768_s18 = scalar_lea.hbm %s9805_s2, 64 }
  0x5b   :  { %p8769_p12 = scmp.ne.s32.totalorder %s9805_s2, %s8768_s18  ;;  %p8772_p13 = scmp.lt.u32.totalorder %s8768_s18, %s9805_s2 }
  0x5d   :  { %p8774_p0 = pnand %p8772_p13, %p8769_p12 }
  0x5f   :  { %8777 = shalt.err (!%p8774_p0)
}
  0x60   :  { %s8778_s0 = scalar_lea.vmem %s54_s16, 64  ;;  %p8783_p2 = scmp.lt.s32.totalorder %s54_s16, %s54_s16 }
  0x61   :  { %p8779_p1 = scmp.ne.s32.totalorder %s54_s16, %s8778_s0  ;;  %p8784_p3 = scmp.lt.s32.totalorder %s8778_s0, %s8778_s0 }
  0x63   :  { %p8785_p4 = por %p8784_p3, %p8783_p2 }
  0x65   :  { %p8786_p5 = pnand %p8785_p4, %p8779_p1 }
  0x67   :  { %8789 = shalt.err (!%p8786_p5)
}
  0x68   :  { %56 = dma.hbm_to_vmem [thread:$0]  %s9805_s2, 64, %s54_s16, [#allocation6]  }
  0x69   :  { %s8790_s30 = scalar_lea.hbm %s9808_s5, 4096 }
  0x6a   :  { %p8791_p6 = scmp.ne.s32.totalorder %s9808_s5, %s8790_s30  ;;  %p8794_p7 = scmp.lt.u32.totalorder %s8790_s30, %s9808_s5 }
  0x6c   :  { %p8796_p8 = pnand %p8794_p7, %p8791_p6 }
  0x6e   :  { %8799 = shalt.err (!%p8796_p8)
}
  0x6f   :  { %s8800_s26 = scalar_lea.vmem %s77_s19, 4096  ;;  %p8805_p10 = scmp.lt.s32.totalorder %s77_s19, %s77_s19 }
  0x70   :  { %p8801_p9 = scmp.ne.s32.totalorder %s77_s19, %s8800_s26  ;;  %p8806_p11 = scmp.lt.s32.totalorder %s8800_s26, %s8800_s26 }
  0x72   :  { %p8807_p12 = por %p8806_p11, %p8805_p10 }
  0x74   :  { %p8808_p13 = pnand %p8807_p12, %p8801_p9 }
  0x76   :  { %8811 = shalt.err (!%p8808_p13)
}
  0x77   :  { %s8925_s2 = smov 64   ;;  %s8926_s15 = smov 4  }
  0x78   :  { %82 = dma.hbm_to_vmem [thread:$0]  %s9808_s5, 4096, %s77_s19, [#allocation9], %s8925_s2, %s8925_s2, %s8926_s15  }
  0x79   :  { %s8927_s21 = smov [#allocation13]   ;;  %s8928_s18 = smov [#allocation16]  }
  0x7a   :  { %s99_s6 = sshll.u32 %s8927_s21, 4  ;;  %s118_s22 = sshll.u32 %s8928_s18, 4  ;;  %s100_s6 = int_to_ptr.vmem [resolvable:$true] %s99_s6  ;;  %s119_s22 = int_to_ptr.vmem [resolvable:$true] %s118_s22 }
  0x7b   :  { %s8812_s27 = scalar_lea.hbm %s9810_s7, 64 }
  0x7c   :  { %p8813_p0 = scmp.ne.s32.totalorder %s9810_s7, %s8812_s27  ;;  %p8816_p1 = scmp.lt.u32.totalorder %s8812_s27, %s9810_s7 }
  0x7e   :  { %p8818_p2 = pnand %p8816_p1, %p8813_p0 }
  0x80   :  { %8821 = shalt.err (!%p8818_p2)
}
  0x81   :  { %s8822_s5 = scalar_lea.vmem %s100_s6, 64  ;;  %p8827_p4 = scmp.lt.s32.totalorder %s100_s6, %s100_s6 }
  0x82   :  { %p8823_p3 = scmp.ne.s32.totalorder %s100_s6, %s8822_s5  ;;  %p8828_p5 = scmp.lt.s32.totalorder %s8822_s5, %s8822_s5 }
  0x84   :  { %p8829_p6 = por %p8828_p5, %p8827_p4 }
  0x86   :  { %p8830_p7 = pnand %p8829_p6, %p8823_p3 }
  0x88   :  { %8833 = shalt.err (!%p8830_p7)
}
  0x89   :  { %102 = dma.hbm_to_vmem [thread:$0]  %s9810_s7, 64, %s100_s6, [#allocation12]  }
  0x8a   :  { %s8834_s8 = scalar_lea.hbm %s9812_s9, 16384 }
  0x8b   :  { %p8835_p8 = scmp.ne.s32.totalorder %s9812_s9, %s8834_s8  ;;  %p8838_p9 = scmp.lt.u32.totalorder %s8834_s8, %s9812_s9 }
  0x8d   :  { %p8840_p10 = pnand %p8838_p9, %p8835_p8 }
  0x8f   :  { %8843 = shalt.err (!%p8840_p10)
}
  0x90   :  { %s8844_s17 = scalar_lea.vmem %s119_s22, 16384  ;;  %p8849_p12 = scmp.lt.s32.totalorder %s119_s22, %s119_s22 }
  0x91   :  { %p8845_p11 = scmp.ne.s32.totalorder %s119_s22, %s8844_s17  ;;  %p8850_p13 = scmp.lt.s32.totalorder %s8844_s17, %s8844_s17 }
  0x93   :  { %p8851_p0 = por %p8850_p13, %p8849_p12 }
  0x95   :  { %p8852_p1 = pnand %p8851_p0, %p8845_p11 }
  0x97   :  { %8855 = shalt.err (!%p8852_p1)
}
  0x98   :  { %s8929_s7 = smov 256   ;;  %s8930_s21 = smov 16  }
  0x99   :  { %124 = dma.hbm_to_vmem [thread:$0]  %s9812_s9, 16384, %s119_s22, [#allocation15], %s8929_s7, %s8929_s7, %s8930_s21  }
  0x9a   :  { %s8931_s24 = smov [#allocation17]   ;;  %s8856_s23 = scalar_lea.hbm %s9814_s11, 16384 }
  0x9b   :  { %s132_s25 = sshll.u32 %s8931_s24, 4  ;;  %p8857_p2 = scmp.ne.s32.totalorder %s9814_s11, %s8856_s23  ;;  %s133_s25 = int_to_ptr.vmem [resolvable:$true] %s132_s25 }
  0x9c   :  { %p8860_p3 = scmp.lt.u32.totalorder %s8856_s23, %s9814_s11 }
  0x9e   :  { %p8862_p4 = pnand %p8860_p3, %p8857_p2 }
  0xa0   :  { %8865 = shalt.err (!%p8862_p4)
}
  0xa1   :  { %s8866_s28 = scalar_lea.vmem %s133_s25, 16384  ;;  %p8871_p6 = scmp.lt.s32.totalorder %s133_s25, %s133_s25 }
  0xa2   :  { %p8867_p5 = scmp.ne.s32.totalorder %s133_s25, %s8866_s28  ;;  %p8872_p7 = scmp.lt.s32.totalorder %s8866_s28, %s8866_s28 }
  0xa4   :  { %p8873_p8 = por %p8872_p7, %p8871_p6 }
  0xa6   :  { %p8874_p9 = pnand %p8873_p8, %p8867_p5 }
  0xa8   :  { %8877 = shalt.err (!%p8874_p9)
}
  0xa9   :  { %138 = dma.hbm_to_vmem [thread:$0]  %s9814_s11, 16384, %s133_s25, [#allocation18], %s8925_s2, %s8925_s2, %s8926_s15  }
  0xaa   :  { %8900 = dma.done.wait [#allocation3], 256  }
  0xab   :  { %8901 = vsyncadd [#allocation3], 4294967040 }
  0xac   :  { %8902 = dma.done.wait [#allocation6], 128  }
  0xad   :  { %8903 = vsyncadd [#allocation6], 4294967168 }
  0xae   :  { %8904 = dma.done.wait [#allocation9], 16384  }
  0xaf   :  { %8905 = vsyncadd [#allocation9], 4294950912 }
  0xb0   :  { %8906 = dma.done.wait [#allocation12], 128  }
  0xb1   :  { %8907 = vsyncadd [#allocation12], 4294967168 }
  0xb2   :  { %8908 = dma.done.wait [#allocation15], 16448  }
  0xb3   :  { %8909 = vsyncadd [#allocation15], 4294950848 }
  0xb4   :  { %8910 = dma.done.wait [#allocation18], 16384  }
  0xb5   :  { %8911 = vsyncadd [#allocation18], 4294950912  ;;  %v172_v0 = vld [vmem:[#allocation2] sm:$0xff]  ;;  %v173_v1 = vld [vmem:[#allocation2 + $0x8] sm:$0xff]  ;;  %v8932_v4 = vmov 0.0   ;;  %v8933_v32 = vmov 0   ;;  %v246_v53 = vlaneseq }
  0xb6   :  { %176 = vadd.xlane.f32.xlu0 %v172_v0  ;;  %v7970_v2 = vld [vmem:[#allocation8 + $0x4] ss:$12 sps:$4 sm:$0xff]   ;;  %v7972_v3 = vld [vmem:[#allocation8] ss:$12 sps:$4 sm:$0xff]   ;;  %7576 = vmatprep.subr.bf16.mxu1 %v8932_v4  ;;  %v7973_v5 = vld [vmem:[#allocation8 + $0x8] ss:$12 sps:$4 sm:$0xff]  }
  0xb7   :  { %v7974_v6 = vld [vmem:[#allocation8 + $0x1c] ss:$12 sps:$4 sm:$0xff]   ;;  %389 = vmatprep.subr.bf16.mxu0 %v7970_v2  ;;  %7577 = vmatpush3.bf16.msra.mxu1 %v7973_v5  ;;  %v7976_v15 = vld [vmem:[#allocation8 + $0x18] ss:$12 sps:$4 sm:$0xff]   ;;  %v7977_v16 = vld [vmem:[#allocation8 + $0x20] ss:$12 sps:$4 sm:$0xff]  }
  0xb8   :  { %390 = vmatpush1.bf16.msra.mxu0 %v7972_v3  ;;  %7578 = vmatprep.subr.bf16.mxu1 %v8932_v4  ;;  %v7978_v17 = vld [vmem:[#allocation8 + $0x34] ss:$12 sps:$4 sm:$0xff]   ;;  %v7980_v18 = vld [vmem:[#allocation8 + $0x30] ss:$12 sps:$4 sm:$0xff]   ;;  %v7981_v19 = vld [vmem:[#allocation8 + $0x38] ss:$12 sps:$4 sm:$0xff]  }
  0xb9   :  { %391 = vmatprep.subr.bf16.mxu0 %v7974_v6  ;;  %v7982_v20 = vld [vmem:[#allocation8 + $0x4c] ss:$12 sps:$4 sm:$0xff]   ;;  %v7984_v21 = vld [vmem:[#allocation8 + $0x48] ss:$12 sps:$4 sm:$0xff]   ;;  %v7985_v22 = vld [vmem:[#allocation8 + $0x50] ss:$12 sps:$4 sm:$0xff]   ;;  %421 = vmatprep.mubr.bf16.mxu0 %v8933_v32 }
  0xba   :  { %178 = vadd.xlane.f32.xlu0 %v173_v1  ;;  %v7986_v23 = vld [vmem:[#allocation8 + $0x64] ss:$12 sps:$4 sm:$0xff]   ;;  %v7988_v24 = vld [vmem:[#allocation8 + $0x60] ss:$12 sps:$4 sm:$0xff]   ;;  %v7989_v25 = vld [vmem:[#allocation8 + $0x68] ss:$12 sps:$4 sm:$0xff]  }
  0xbb   :  { %7579 = vmatpush3.bf16.msra.mxu1 %v7977_v16  ;;  %v7990_v26 = vld [vmem:[#allocation8 + $0x7c] ss:$12 sps:$4 sm:$0xff]   ;;  %v7992_v27 = vld [vmem:[#allocation8 + $0x78] ss:$12 sps:$4 sm:$0xff]   ;;  %v7993_v28 = vld [vmem:[#allocation8 + $0x80] ss:$12 sps:$4 sm:$0xff]  }
  0xbc   :  { %392 = vmatpush1.bf16.msra.mxu0 %v7976_v15  ;;  %7580 = vmatprep.subr.bf16.mxu1 %v8932_v4  ;;  %v7994_v29 = vld [vmem:[#allocation8 + $0x94] ss:$12 sps:$4 sm:$0xff]   ;;  %v7996_v30 = vld [vmem:[#allocation8 + $0x90] ss:$12 sps:$4 sm:$0xff]   ;;  %v7997_v31 = vld [vmem:[#allocation8 + $0x98] ss:$12 sps:$4 sm:$0xff]  }
  0xbd   :  { %393 = vmatprep.subr.bf16.mxu0 %v7978_v17  ;;  %vm8934_vm0 = vmmov 0   ;;  %v7998_v33 = vld [vmem:[#allocation8 + $0xac] ss:$12 sps:$4 sm:$0xff]   ;;  %v8000_v34 = vld [vmem:[#allocation8 + $0xa8] ss:$12 sps:$4 sm:$0xff]   ;;  %v9172_v54 = vshrl.u32 %v246_v53, 7 }
  0xbe   :  { %7592 = vmatprep.mubr.msk.bf16.mxu1 %vm8934_vm0, %v8932_v4  ;;  %v8001_v35 = vld [vmem:[#allocation8 + $0xb0] ss:$12 sps:$4 sm:$0xff]   ;;  %v6790_v44 = vld [vmem:[#allocation5] ss:$0 sm:$0xff]  ;;  %vm479_vm1 = vcmask 523264   ;;  %vm600_vm2 = vcmask 1043456  }
  0xbf   :  { %7581 = vmatpush3.bf16.msra.mxu1 %v7981_v19  ;;  %v6791_v48 = vld [vmem:[#allocation7] ss:$0 sm:$0xff]  ;;  %v9175_v55 = vsub.s32 1, %v9172_v54  ;;  %v244_v56 = vld [vmem:[%s9807_s4] ss:$4 sm:$0x7] }
  0xc0   :  { %394 = vmatpush1.bf16.msra.mxu0 %v7980_v18  ;;  %7582 = vmatprep.subr.bf16.mxu1 %v8932_v4  ;;  %v9181_v57 = vsub.s32 2, %v9172_v54  ;;  %v9185_v59 = vsub.s32 0, %v9172_v54  ;;  %vm572_vm3 = vcmask 64512   ;;  %vm5421_vm4 = vcmask 60416  }
  0xc1   :  { %395 = vmatprep.subr.bf16.mxu0 %v7982_v20  ;;  %v253_v58 = vrot.slane %v244_v56, %v9175_v55  ;;  %vm6764_vm5 = vcmp.lt.s32.totalorder %v246_v53, 512 }
  0xc2   :  { %v257_v62 = vrot.slane %v244_v56, %v9181_v57 }
  0xc3   :  { %7583 = vmatpush3.bf16.msra.mxu1 %v7985_v22 }
  0xc4   :  { %396 = vmatpush1.bf16.msra.mxu0 %v7984_v21  ;;  %7584 = vmatprep.subr.bf16.mxu1 %v8932_v4 }
  0xc5   :  { %397 = vmatprep.subr.bf16.mxu0 %v7986_v23 }
  0xc7   :  { %7585 = vmatpush3.bf16.msra.mxu1 %v7989_v25 }
  0xc8   :  { %398 = vmatpush1.bf16.msra.mxu0 %v7988_v24  ;;  %7586 = vmatprep.subr.bf16.mxu1 %v8932_v4 }
  0xc9   :  { %399 = vmatprep.subr.bf16.mxu0 %v7990_v26 }
  0xcb   :  { %7587 = vmatpush3.bf16.msra.mxu1 %v7993_v28 }
  0xcc   :  { %400 = vmatpush1.bf16.msra.mxu0 %v7992_v27  ;;  %7588 = vmatprep.subr.bf16.mxu1 %v8932_v4 }
  0xcd   :  { %401 = vmatprep.subr.bf16.mxu0 %v7994_v29 }
  0xcf   :  { %7589 = vmatpush3.bf16.msra.mxu1 %v7997_v31 }
  0xd0   :  { %402 = vmatpush1.bf16.msra.mxu0 %v7996_v30  ;;  %7590 = vmatprep.subr.bf16.mxu1 %v8932_v4 }
  0xd1   :  { %403 = vmatprep.subr.bf16.mxu0 %v7998_v33 }
  0xd3   :  { %7591 = vmatpush3.bf16.msra.mxu1 %v8001_v35 }
  0xd4   :  { %404 = vmatpush1.bf16.msra.mxu0 %v8000_v34  ;;  %7596 = vmatprep.subr.bf16.mxu1 %v8932_v4 }
  0xd5   :  { %7620 = vmatprep.subr.bf16.mxu0 %v8932_v4 }
 0x143   :  { %v177_v7 = vpop.xlane.xlu0 %176 }
 0x144   :  { %v181_v8 = vmul.f32 0.0078125, %v177_v7 }
 0x146   :  { %v9146_v9 = vsub.f32 %v172_v0, %v181_v8  ;;  %v249_v8 = vrot.slane %v244_v56, %v9185_v59 }
 0x147   :  { %v179_v10 = vpop.xlane.xlu0 %178 }
 0x148   :  { %v182_v11 = vmul.f32 0.0078125, %v179_v10  ;;  %v185_v12 = vmul.f32 %v9146_v9, %v9146_v9 }
 0x14a   :  { %v9150_v13 = vsub.f32 %v173_v1, %v182_v11  ;;  %187 = vadd.xlane.f32.xlu1 %v185_v12 }
 0x14c   :  { %v186_v14 = vmul.f32 %v9150_v13, %v9150_v13 }
 0x14e   :  { %189 = vadd.xlane.f32.xlu1 %v186_v14 }
 0x1d7   :  { %v188_v36 = vpop.xlane.xlu1 %187 }
 0x1d8   :  { %v191_v37 = vmul.f32 0.0078125, %v188_v36 }
 0x1da   :  { %v193_v38 = vadd.f32 1e-05, %v191_v37 }
 0x1db   :  { %v190_v39 = vpop.xlane.xlu1 %189 }
 0x1dc   :  { %8450 = vrsqrt.f32 %v193_v38  ;;  %v192_v40 = vmul.f32 0.0078125, %v190_v39 }
 0x1de   :  { %v194_v41 = vadd.f32 1e-05, %v192_v40 }
 0x1e0   :  { %8452 = vrsqrt.f32 %v194_v41 }
 0x1e6   :  { %v8451_v42 = vpop.eup %8450 }
 0x1e7   :  { %v197_v43 = vmul.f32 %v8451_v42, %v9146_v9 }
 0x1e9   :  { %v203_v47 = vmul.f32 %v6790_v44, %v197_v43 }
 0x1ea   :  { %v8453_v45 = vpop.eup %8452 }
 0x1eb   :  { %v198_v46 = vmul.f32 %v8453_v45, %v9150_v13  ;;  %v209_v50 = vadd.f32 %v6791_v48, %v203_v47 }
 0x1ed   :  { %v204_v49 = vmul.f32 %v6790_v44, %v198_v46 }
 0x1ef   :  { %v210_v51 = vadd.f32 %v6791_v48, %v204_v49 }
 0x1f1   :  { %v243_v52 = vpack.c.bf16 %v210_v51, %v209_v50 }
 0x1f3   :  { %422 = vmatmul.mubr.bf16.vlgmr.msra.gmra.mrb[0].mxu0 %v243_v52  ;;  %7593 = vmatmul.mubr.bf16.vlgmr.msra.gmra.mrb[0].mxu1 %v243_v52 }
 0x1f4   :  { %7598 = vmatprep.mubr.msk.bf16.mxu1 %vm8934_vm0, %v8932_v4  ;;  %7622 = vmatprep.mubr.msk.bf16.mxu0 %vm8934_vm0, %v8932_v4 }
 0x2c6   :  { %v423_v60 = vpop.f32.mrb[0].mxu0  ;;  %v466_v61 = vpop.f32.mrb[0].mxu1 }
 0x2c7   :  { %v425_v63 = vpop.f32.mrb[1].mxu0  ;;  %v7594_v0 = vpop.f32.mrb[1].mxu1  ;;  %v424_v12 = vadd.f32 %v423_v60, %v249_v8  ;;  %v467_v15 = vadd.f32 %v466_v61, %v257_v62 }
 0x2c8   :  { %v426_v1 = vadd.f32 %v425_v63, %v253_v58  ;;  %v427_v2 = vpop.f32.mrb[2].mxu0  ;;  %v469_v3 = vpop.f32.mrb[2].mxu1 }
 0x2c9   :  { %v9188_v5 = vadd.f32 %v469_v3, %v257_v62  ;;  %v429_v6 = vpop.f32.mrb[3].mxu0  ;;  %v7595_v7 = vpop.f32.mrb[3].mxu1  ;;  %v473_v14 = vpack.c.bf16 %v424_v12, %v424_v12  ;;  %v428_v17 = vadd.f32 %v427_v2, %v249_v8  ;;  %v9198_v18 = vpack.c.bf16 %v467_v15, %v467_v15 }
 0x2ca   :  { %v475_v9 = vpack.c.bf16 %v426_v1, %v426_v1  ;;  %v430_v11 = vadd.f32 %v429_v6, %v253_v58 }
 0x2cb   :  { %v474_v19 = vpack.c.bf16 %v428_v17, %v428_v17  ;;  %v602_v20 = vsel %vm600_vm2, %v9198_v18, 0  ;;  %v478_v48 = vpack.c.bf16 %v9188_v5, %v9188_v5 }
 0x2cc   :  { %v484_v10 = vsel %vm479_vm1, %v475_v9, 0  ;;  %v476_v13 = vpack.c.bf16 %v430_v11, %v430_v11 }
 0x2cd   :  { %7597 = vmatpush3.bf16.xpose.msra.mxu1 %v484_v10  ;;  %v648_v52 = vsel %vm600_vm2, %v478_v48, 0 }
 0x2ce   :  { %7602 = vmatprep.subr.bf16.mxu1 %v8932_v4  ;;  %v530_v16 = vsel %vm479_vm1, %v476_v13, 0 }
 0x2d4   :  { %7599 = vmatmul.mubr.msk.bf16.vlgmr.msra.gmra.mrb[4].mxu1 %vm479_vm1, %v473_v14 }
 0x2d5   :  { %7603 = vmatpush3.bf16.xpose.msra.mxu1 %v530_v16  ;;  %7604 = vmatprep.mubr.msk.bf16.mxu1 %vm8934_vm0, %v8932_v4 }
 0x2d6   :  { %7608 = vmatprep.subr.bf16.mxu1 %v8932_v4 }
 0x2dc   :  { %7605 = vmatmul.mubr.msk.bf16.vlgmr.msra.gmra.mrb[8].mxu1 %vm479_vm1, %v474_v19 }
 0x2dd   :  { %7609 = vmatpush3.bf16.msra.mxu1 %v602_v20  ;;  %7610 = vmatprep.mubr.msk.bf16.mxu1 %vm8934_vm0, %v8932_v4 }
 0x2de   :  { %7614 = vmatprep.subr.bf16.mxu1 %v8932_v4 }
 0x3a7   :  { %v520_v21 = vpop.f32.mrb[4].mxu1 }
 0x3a8   :  { %v7600_v22 = vpop.f32.mrb[5].mxu1  ;;  %v573_v23 = vsel %vm572_vm3, %v520_v21, -inf }
 0x3a9   :  { %574 = vmax.xlane.f32.xlu0 %v573_v23  ;;  %v523_v24 = vpop.f32.mrb[6].mxu1 }
 0x3aa   :  { %v7601_v25 = vpop.f32.mrb[7].mxu1 }
 0x3af   :  { %v566_v26 = vpop.f32.mrb[8].mxu1 }
 0x3b0   :  { %v7606_v27 = vpop.f32.mrb[9].mxu1  ;;  %v576_v28 = vsel %vm572_vm3, %v566_v26, -inf }
 0x3b1   :  { %577 = vmax.xlane.f32.xlu1 %v576_v28  ;;  %v569_v29 = vpop.f32.mrb[10].mxu1 }
 0x3b2   :  { %v7607_v30 = vpop.f32.mrb[11].mxu1 }
 0x3c2   :  { %746 = vrot.lane.b32.xlu1 %v476_v13, %s8925_s2 }
 0x436   :  { %v575_v31 = vpop.xlane.xlu0 %574 }
 0x437   :  { %v579_v33 = vsub.f32 %v520_v21, %v575_v31 }
 0x439   :  { %v581_v34 = vmul.f32 1.442695, %v579_v33 }
 0x43b   :  { %8454 = vpow2.f32 %v581_v34 }
 0x43e   :  { %v578_v35 = vpop.xlane.xlu1 %577 }
 0x43f   :  { %v580_v36 = vsub.f32 %v566_v26, %v578_v35 }
 0x441   :  { %v583_v37 = vmul.f32 1.442695, %v580_v36 }
 0x442   :  { %v747_v43 = vpop.permute.xlu1 %746 }
 0x443   :  { %8456 = vpow2.f32 %v583_v37  ;;  %v752_v61 = vsel %vm479_vm1, %v747_v43, 0  ;;  %v8004_v43 = vld [vmem:[#allocation10 + $0x10] sm:$0xff]  }
 0x445   :  { %v8455_v38 = vpop.eup %8454 }
 0x446   :  { %v585_v39 = vsel %vm572_vm3, %v8455_v38, 0.0 }
 0x447   :  { %586 = vadd.xlane.f32.xlu0 %v585_v39 }
 0x44d   :  { %v8457_v40 = vpop.eup %8456 }
 0x44e   :  { %v588_v41 = vsel %vm572_vm3, %v8457_v40, 0.0 }
 0x44f   :  { %589 = vadd.xlane.f32.xlu1 %v588_v41  ;;  %v8002_v41 = vld [vmem:[#allocation10] sm:$0xff]  }
 0x45d   :  { %694 = vrot.lane.b32.xlu0 %v475_v9, %s8925_s2 }
 0x460   :  { %691 = vrot.lane.b32.xlu1 %v473_v14, %s8925_s2 }
 0x464   :  { %743 = vrot.lane.b32.xlu1 %v474_v19, %s8925_s2 }
 0x4d4   :  { %v587_v42 = vpop.xlane.xlu0 %586 }
 0x4d5   :  { %8458 = vrcp.f32 %v587_v42  ;;  %v8003_v42 = vld [vmem:[#allocation10 + $0x8] sm:$0xff]  }
 0x4d8   :  { %v695_v44 = vpop.permute.xlu0 %694 }
 0x4d9   :  { %v700_v45 = vsel %vm479_vm1, %v695_v44, 0  ;;  %v8005_v44 = vld [vmem:[#allocation10 + $0x18] sm:$0xff]  }
 0x4da   :  { %7621 = vmatpush3.bf16.xpose.msra.mxu0 %v700_v45  ;;  %v8006_v45 = vld [vmem:[#allocation10 + $0x20] sm:$0xff]  }
 0x4db   :  { %7632 = vmatprep.subr.bf16.mxu0 %v8932_v4 }
 0x4dc   :  { %v590_v46 = vpop.xlane.xlu1 %589 }
 0x4dd   :  { %8460 = vrcp.f32 %v590_v46  ;;  %v8007_v46 = vld [vmem:[#allocation10 + $0x28] sm:$0xff]  }
 0x4df   :  { %v8459_v47 = vpop.eup %8458 }
 0x4e0   :  { %v593_v49 = vmul.f32 %v8459_v47, %v8455_v38  ;;  %v692_v50 = vpop.permute.xlu1 %691  ;;  %v8008_v47 = vld [vmem:[#allocation10 + $0x30] sm:$0xff]  }
 0x4e1   :  { %7623 = vmatmul.mubr.msk.bf16.vlgmr.msra.gmra.mrb[4].mxu0 %vm479_vm1, %v692_v50 }
 0x4e2   :  { %v595_v51 = vpack.c.bf16 %v593_v49, %v593_v49  ;;  %7634 = vmatprep.mubr.msk.bf16.mxu0 %vm8934_vm0, %v8932_v4 }
 0x4e4   :  { %7611 = vmatmul.mubr.msk.bf16.vlgmr.msra.gmra.mrb[12].mxu1 %vm572_vm3, %v595_v51  ;;  %v744_v62 = vpop.permute.xlu1 %743 }
 0x4e5   :  { %7615 = vmatpush3.bf16.msra.mxu1 %v648_v52  ;;  %7616 = vmatprep.mubr.msk.bf16.mxu1 %vm8934_vm0, %v8932_v4 }
 0x4e6   :  { %7626 = vmatprep.subr.bf16.mxu1 %v8932_v4 }
 0x4e7   :  { %v8461_v56 = vpop.eup %8460 }
 0x4e8   :  { %v594_v58 = vmul.f32 %v8461_v56, %v8457_v40 }
 0x4ea   :  { %v596_v60 = vpack.c.bf16 %v594_v58, %v594_v58 }
 0x4ec   :  { %7617 = vmatmul.mubr.msk.bf16.vlgmr.msra.gmra.mrb[16].mxu1 %vm572_vm3, %v596_v60 }
 0x4ed   :  { %7628 = vmatprep.mubr.msk.bf16.mxu1 %vm8934_vm0, %v8932_v4 }
 0x4ee   :  { %7627 = vmatpush3.bf16.xpose.msra.mxu1 %v752_v61 }
 0x4ef   :  { %7638 = vmatprep.subr.bf16.mxu1 %v8932_v4 }
 0x4f5   :  { %7629 = vmatmul.mubr.msk.bf16.vlgmr.msra.gmra.mrb[20].mxu1 %vm479_vm1, %v744_v62 }
 0x4f6   :  { %7640 = vmatprep.mubr.msk.bf16.mxu1 %vm8934_vm0, %v8932_v4 }
 0x5b4   :  { %v736_v63 = vpop.f32.mrb[4].mxu0 }
 0x5b5   :  { %v7624_v0 = vpop.f32.mrb[5].mxu0  ;;  %v794_v1 = vsel %vm572_vm3, %v736_v63, -inf }
 0x5b6   :  { %795 = vmax.xlane.f32.xlu0 %v794_v1  ;;  %v739_v2 = vpop.f32.mrb[6].mxu0 }
 0x5b7   :  { %v9235_v3 = vpop.f32.mrb[12].mxu1  ;;  %v7625_v5 = vpop.f32.mrb[7].mxu0 }
 0x5b8   :  { %v7612_v6 = vpop.f32.mrb[13].mxu1 }
 0x5b9   :  { %v641_v7 = vpop.f32.mrb[14].mxu1 }
 0x5ba   :  { %v7613_v8 = vpop.f32.mrb[15].mxu1  ;;  %v6824_v7 = vld [vmem:[#allocation11] ss:$0 sm:$0xff] }
 0x5bf   :  { %v9237_v9 = vpop.f32.mrb[16].mxu1 }
 0x5c0   :  { %v7618_v10 = vpop.f32.mrb[17].mxu1 }
 0x5c1   :  { %v687_v11 = vpop.f32.mrb[18].mxu1 }
 0x5c2   :  { %v7619_v12 = vpop.f32.mrb[19].mxu1 }
 0x5c8   :  { %v788_v13 = vpop.f32.mrb[20].mxu1 }
 0x5c9   :  { %v7630_v14 = vpop.f32.mrb[21].mxu1  ;;  %v797_v15 = vsel %vm572_vm3, %v788_v13, -inf }
 0x5ca   :  { %798 = vmax.xlane.f32.xlu1 %v797_v15  ;;  %v791_v16 = vpop.f32.mrb[22].mxu1 }
 0x5cb   :  { %v7631_v17 = vpop.f32.mrb[23].mxu1 }
 0x5cc   :  { %v8657_v17 = vld [vmem:[#allocation2 + $0x8] sm:$0xff] }
 0x5db   :  { %868 = vrot.lane.b32.xlu1 %v478_v48, %s8925_s2  ;;  %v8009_v48 = vld [vmem:[#allocation10 + $0x38] sm:$0xff]  }
 0x643   :  { %v796_v19 = vpop.xlane.xlu0 %795 }
 0x644   :  { %v800_v20 = vsub.f32 %v736_v63, %v796_v19 }
 0x646   :  { %v802_v21 = vmul.f32 1.442695, %v800_v20  ;;  %v8013_v20 = vld [vmem:[#allocation16 + $0x8] ss:$16 sps:$4 sm:$0xff]  }
 0x648   :  { %8462 = vpow2.f32 %v802_v21  ;;  %v8015_v21 = vld [vmem:[#allocation16 + $0xc] ss:$16 sps:$4 sm:$0xff]  }
 0x652   :  { %v8463_v22 = vpop.eup %8462 }
 0x653   :  { %v806_v23 = vsel %vm572_vm3, %v8463_v22, 0.0 }
 0x654   :  { %807 = vadd.xlane.f32.xlu0 %v806_v23  ;;  %v8021_v23 = vld [vmem:[#allocation16 + $0x2c] ss:$16 sps:$4 sm:$0xff]  }
 0x657   :  { %v799_v24 = vpop.xlane.xlu1 %798 }
 0x658   :  { %v801_v25 = vsub.f32 %v788_v13, %v799_v24  ;;  %v8656_v13 = vld [vmem:[#allocation2] sm:$0xff] }
 0x659   :  { %v8016_v24 = vld [vmem:[#allocation16 + $0x20] ss:$16 sps:$4 sm:$0xff]  }
 0x65a   :  { %v804_v26 = vmul.f32 1.442695, %v801_v25  ;;  %v8019_v25 = vld [vmem:[#allocation16 + $0x28] ss:$16 sps:$4 sm:$0xff]  }
 0x65b   :  { %v869_v27 = vpop.permute.xlu1 %868 }
 0x65c   :  { %8464 = vpow2.f32 %v804_v26  ;;  %v874_v28 = vsel %vm600_vm2, %v869_v27, 0 }
 0x65d   :  { %7639 = vmatpush3.bf16.msra.mxu1 %v874_v28 }
 0x666   :  { %v8465_v29 = vpop.eup %8464 }
 0x667   :  { %v809_v30 = vsel %vm572_vm3, %v8465_v29, 0.0 }
 0x668   :  { %810 = vadd.xlane.f32.xlu0 %v809_v30 }
 0x67e   :  { %819 = vrot.lane.b32.xlu0 %v9198_v18, %s8925_s2 }
 0x6e1   :  { %v808_v31 = vpop.xlane.xlu0 %807 }
 0x6e2   :  { %8466 = vrcp.f32 %v808_v31 }
 0x6ec   :  { %v8467_v33 = vpop.eup %8466 }
 0x6ed   :  { %v814_v35 = vmul.f32 %v8467_v33, %v8463_v22  ;;  %v8018_v22 = vld [vmem:[#allocation16 + $0x24] ss:$16 sps:$4 sm:$0xff]  }
 0x6ef   :  { %v816_v38 = vpack.c.bf16 %v814_v35, %v814_v35  ;;  %v8024_v35 = vld [vmem:[#allocation16 + $0x44] ss:$16 sps:$4 sm:$0xff]  }
 0x6f5   :  { %v811_v34 = vpop.xlane.xlu0 %810 }
 0x6f6   :  { %8468 = vrcp.f32 %v811_v34 }
 0x6f9   :  { %v820_v36 = vpop.permute.xlu0 %819 }
 0x6fa   :  { %v825_v37 = vsel %vm600_vm2, %v820_v36, 0  ;;  %v8027_v36 = vld [vmem:[#allocation16 + $0x4c] ss:$16 sps:$4 sm:$0xff]  }
 0x6fb   :  { %7633 = vmatpush3.bf16.msra.mxu0 %v825_v37  ;;  %v8022_v37 = vld [vmem:[#allocation16 + $0x40] ss:$16 sps:$4 sm:$0xff]  }
 0x6fc   :  { %7644 = vmatprep.subr.bf16.mxu0 %v8932_v4 }
 0x6fe   :  { %7635 = vmatmul.mubr.msk.bf16.vlgmr.msra.gmra.mrb[8].mxu0 %vm572_vm3, %v816_v38  ;;  %v8025_v38 = vld [vmem:[#allocation16 + $0x48] ss:$16 sps:$4 sm:$0xff]  }
 0x6ff   :  { %7660 = vmatprep.mubr.msk.bf16.mxu0 %vm8934_vm0, %v8932_v4  ;;  %7645 = vmatpush3.bf16.msra.mxu0 %v8002_v41  ;;  %v8031_v41 = vld [vmem:[#allocation16 + $0x68] ss:$16 sps:$4 sm:$0xff]  }
 0x700   :  { %v8469_v39 = vpop.eup %8468  ;;  %7646 = vmatprep.subr.bf16.mxu0 %v8932_v4 }
 0x701   :  { %v815_v18 = vmul.f32 %v8469_v39, %v8465_v29  ;;  %v8030_v39 = vld [vmem:[#allocation16 + $0x64] ss:$16 sps:$4 sm:$0xff]  }
 0x703   :  { %v817_v40 = vpack.c.bf16 %v815_v18, %v815_v18  ;;  %7647 = vmatpush3.bf16.msra.mxu0 %v8003_v42  ;;  %v8033_v18 = vld [vmem:[#allocation16 + $0x6c] ss:$16 sps:$4 sm:$0xff]   ;;  %v8036_v42 = vld [vmem:[#allocation16 + $0x84] ss:$16 sps:$4 sm:$0xff]  }
 0x704   :  { %7648 = vmatprep.subr.bf16.mxu0 %v8932_v4 }
 0x705   :  { %7641 = vmatmul.mubr.msk.bf16.vlgmr.msra.gmra.mrb[24].mxu1 %vm572_vm3, %v817_v40  ;;  %v8028_v40 = vld [vmem:[#allocation16 + $0x60] ss:$16 sps:$4 sm:$0xff]  }
 0x706   :  { %1322 = vmatprep.mubr.bf16.mxu1 %v8933_v32 }
 0x707   :  { %7649 = vmatpush3.bf16.msra.mxu0 %v8004_v43  ;;  %v8039_v43 = vld [vmem:[#allocation16 + $0x8c] ss:$16 sps:$4 sm:$0xff]  }
 0x708   :  { %7650 = vmatprep.subr.bf16.mxu0 %v8932_v4 }
 0x70b   :  { %7651 = vmatpush3.bf16.msra.mxu0 %v8005_v44  ;;  %v8034_v44 = vld [vmem:[#allocation16 + $0x80] ss:$16 sps:$4 sm:$0xff]  }
 0x70c   :  { %7652 = vmatprep.subr.bf16.mxu0 %v8932_v4 }
 0x70f   :  { %7653 = vmatpush3.bf16.msra.mxu0 %v8006_v45  ;;  %v8037_v45 = vld [vmem:[#allocation16 + $0x88] ss:$16 sps:$4 sm:$0xff]  }
 0x710   :  { %7654 = vmatprep.subr.bf16.mxu0 %v8932_v4 }
 0x713   :  { %7655 = vmatpush3.bf16.msra.mxu0 %v8007_v46  ;;  %v8042_v46 = vld [vmem:[#allocation16 + $0xa4] ss:$16 sps:$4 sm:$0xff]  }
 0x714   :  { %7656 = vmatprep.subr.bf16.mxu0 %v8932_v4 }
 0x717   :  { %7657 = vmatpush3.bf16.msra.mxu0 %v8008_v47  ;;  %v8045_v47 = vld [vmem:[#allocation16 + $0xac] ss:$16 sps:$4 sm:$0xff]  }
 0x718   :  { %7658 = vmatprep.subr.bf16.mxu0 %v8932_v4 }
 0x71b   :  { %7659 = vmatpush3.bf16.msra.mxu0 %v8009_v48  ;;  %v8040_v48 = vld [vmem:[#allocation16 + $0xa0] ss:$16 sps:$4 sm:$0xff]  }
 0x71c   :  { %1333 = vmatprep.subr.bf16.mxu0 %v8015_v21  ;;  %v8059_v21 = vld [vmem:[#allocation17 + $0xc0] sm:$0xff]  }
 0x7d1   :  { %v861_v49 = vpop.f32.mrb[8].mxu0 }
 0x7d2   :  { %v7636_v50 = vpop.f32.mrb[9].mxu0 }
 0x7d3   :  { %v864_v51 = vpop.f32.mrb[10].mxu0  ;;  %v8048_v50 = vld [vmem:[#allocation16 + $0xc4] ss:$16 sps:$4 sm:$0xff]  }
 0x7d4   :  { %v7637_v52 = vpop.f32.mrb[11].mxu0  ;;  %v8051_v51 = vld [vmem:[#allocation16 + $0xcc] ss:$16 sps:$4 sm:$0xff]  }
 0x7d5   :  { %v8046_v52 = vld [vmem:[#allocation16 + $0xc0] ss:$16 sps:$4 sm:$0xff]  }
 0x7d8   :  { %v910_v56 = vpop.f32.mrb[24].mxu1 }
 0x7d9   :  { %v7955_v58 = vpack.i.bf16 %v910_v56, %v861_v49  ;;  %v7642_v60 = vpop.f32.mrb[25].mxu1  ;;  %v8043_v49 = vld [vmem:[#allocation16 + $0xa8] ss:$16 sps:$4 sm:$0xff]  }
 0x7da   :  { %v913_v61 = vpop.f32.mrb[26].mxu1  ;;  %v8049_v56 = vld [vmem:[#allocation16 + $0xc8] ss:$16 sps:$4 sm:$0xff]   ;;  %v8052_v60 = vld [vmem:[#allocation16 + $0xe0] ss:$16 sps:$4 sm:$0xff]  }
 0x7db   :  { %7956 = vrot.lane.b32.xlu1 %v7955_v58, %s8925_s2  ;;  %v7643_v62 = vpop.f32.mrb[27].mxu1  ;;  %v8054_v58 = vld [vmem:[#allocation16 + $0xe4] ss:$16 sps:$4 sm:$0xff]   ;;  %v8055_v61 = vld [vmem:[#allocation16 + $0xe8] ss:$16 sps:$4 sm:$0xff]  }
 0x7dc   :  { %v8057_v62 = vld [vmem:[#allocation16 + $0xec] ss:$16 sps:$4 sm:$0xff]  }
 0x84d   :  { %v7957_v63 = vpop.permute.xlu1 %7956 }
 0x84e   :  { %v7959_v0 = vunpack.i.h.bf16 %v7957_v63  ;;  %v7958_v1 = vunpack.i.l.bf16 %v7957_v63 }
 0x850   :  { %v925_v2 = vsel %vm479_vm1, %v9237_v9, %v7959_v0  ;;  %v924_v5 = vsel %vm479_vm1, %v9235_v3, %v7958_v1  ;;  %v8010_v3 = vld [vmem:[#allocation16] ss:$16 sps:$4 sm:$0xff]   ;;  %v8012_v9 = vld [vmem:[#allocation16 + $0x4] ss:$16 sps:$4 sm:$0xff]  }
 0x851   :  { %v942_v6 = vpack.c.bf16 %v925_v2, %v924_v5  ;;  %1290 = vmatprep.subr.bf16.mxu1 %v8012_v9 }
 0x852   :  { %1291 = vmatpush1.bf16.msra.mxu1 %v8010_v3 }
 0x853   :  { %7661 = vmatmul.mubr.bf16.vlgmr.msra.gmra.mrb[12].mxu0 %v942_v6  ;;  %1292 = vmatprep.subr.bf16.mxu1 %v8018_v22  ;;  %v8060_v22 = vld [vmem:[#allocation17] sm:$0xff]  }
 0x854   :  { %1365 = vmatprep.mubr.bf16.mxu0 %v8933_v32  ;;  %1334 = vmatpush1.bf16.msra.mxu0 %v8013_v20  ;;  %v8058_v20 = vld [vmem:[#allocation17 + $0x40] sm:$0xff]  }
 0x855   :  { %1335 = vmatprep.subr.bf16.mxu0 %v8021_v23  ;;  %v8061_v23 = vld [vmem:[#allocation17 + $0x80] sm:$0xff]  }
 0x856   :  { %1293 = vmatpush1.bf16.msra.mxu1 %v8016_v24  ;;  %v8062_v24 = vld [vmem:[#allocation17 + $0x48] sm:$0xff]  }
 0x857   :  { %1294 = vmatprep.subr.bf16.mxu1 %v8024_v35  ;;  %v8072_v35 = vld [vmem:[#allocation17 + $0x18] sm:$0xff]  }
 0x858   :  { %1336 = vmatpush1.bf16.msra.mxu0 %v8019_v25  ;;  %v8063_v25 = vld [vmem:[#allocation17 + $0xc8] sm:$0xff]  }
 0x859   :  { %1337 = vmatprep.subr.bf16.mxu0 %v8027_v36  ;;  %v8073_v36 = vld [vmem:[#allocation17 + $0x98] sm:$0xff]  }
 0x85a   :  { %1295 = vmatpush1.bf16.msra.mxu1 %v8022_v37  ;;  %v8074_v37 = vld [vmem:[#allocation17 + $0x60] sm:$0xff]  }
 0x85b   :  { %1296 = vmatprep.subr.bf16.mxu1 %v8030_v39  ;;  %v8076_v39 = vld [vmem:[#allocation17 + $0x20] sm:$0xff]  }
 0x85c   :  { %1338 = vmatpush1.bf16.msra.mxu0 %v8025_v38  ;;  %v8075_v38 = vld [vmem:[#allocation17 + $0xe0] sm:$0xff]  }
 0x85d   :  { %1339 = vmatprep.subr.bf16.mxu0 %v8033_v18  ;;  %v8077_v18 = vld [vmem:[#allocation17 + $0xa0] sm:$0xff]  }
 0x85e   :  { %1297 = vmatpush1.bf16.msra.mxu1 %v8028_v40  ;;  %v8078_v40 = vld [vmem:[#allocation17 + $0x68] sm:$0xff]  }
 0x85f   :  { %1298 = vmatprep.subr.bf16.mxu1 %v8036_v42  ;;  %v8080_v42 = vld [vmem:[#allocation17 + $0x28] sm:$0xff]  }
 0x860   :  { %1340 = vmatpush1.bf16.msra.mxu0 %v8031_v41  ;;  %v8079_v41 = vld [vmem:[#allocation17 + $0xe8] sm:$0xff]  }
 0x861   :  { %1341 = vmatprep.subr.bf16.mxu0 %v8039_v43  ;;  %v8081_v43 = vld [vmem:[#allocation17 + $0xa8] sm:$0xff]  }
 0x862   :  { %1299 = vmatpush1.bf16.msra.mxu1 %v8034_v44  ;;  %v8082_v44 = vld [vmem:[#allocation17 + $0x70] sm:$0xff]  }
 0x863   :  { %1300 = vmatprep.subr.bf16.mxu1 %v8042_v46  ;;  %v8084_v46 = vld [vmem:[#allocation17 + $0x30] sm:$0xff]  }
 0x864   :  { %1342 = vmatpush1.bf16.msra.mxu0 %v8037_v45  ;;  %v8083_v45 = vld [vmem:[#allocation17 + $0xf0] sm:$0xff]  }
 0x865   :  { %1343 = vmatprep.subr.bf16.mxu0 %v8045_v47  ;;  %v8085_v47 = vld [vmem:[#allocation17 + $0xb0] sm:$0xff]  }
 0x866   :  { %1301 = vmatpush1.bf16.msra.mxu1 %v8040_v48  ;;  %v8086_v48 = vld [vmem:[#allocation17 + $0x78] sm:$0xff]  }
 0x867   :  { %1302 = vmatprep.subr.bf16.mxu1 %v8048_v50  ;;  %v8088_v50 = vld [vmem:[#allocation17 + $0x38] sm:$0xff]  }
 0x868   :  { %1344 = vmatpush1.bf16.msra.mxu0 %v8043_v49  ;;  %v8087_v49 = vld [vmem:[#allocation17 + $0xf8] sm:$0xff]  }
 0x869   :  { %1345 = vmatprep.subr.bf16.mxu0 %v8051_v51  ;;  %v8089_v51 = vld [vmem:[#allocation17 + $0xb8] sm:$0xff]  }
 0x86a   :  { %1303 = vmatpush1.bf16.msra.mxu1 %v8046_v52  ;;  %v1108_v52 = vld [vmem:[%s9813_s10] ss:$4 sm:$0xf] }
 0x86b   :  { %1304 = vmatprep.subr.bf16.mxu1 %v8054_v58  ;;  %v1113_v58 = vrot.slane %v1108_v52, %v9185_v59 }
 0x86c   :  { %1346 = vmatpush1.bf16.msra.mxu0 %v8049_v56  ;;  %v9289_v56 = vsub.s32 3, %v9172_v54 }
 0x86d   :  { %1347 = vmatprep.subr.bf16.mxu0 %v8057_v62 }
 0x86e   :  { %1305 = vmatpush1.bf16.msra.mxu1 %v8052_v60  ;;  %v1121_v60 = vrot.slane %v1108_v52, %v9181_v57  ;;  %v1125_v62 = vrot.slane %v1108_v52, %v9289_v56 }
 0x86f   :  { %7298 = vmatprep.subr.bf16.mxu1 %v8058_v20 }
 0x870   :  { %1348 = vmatpush1.bf16.msra.mxu0 %v8055_v61  ;;  %v1117_v61 = vrot.slane %v1108_v52, %v9175_v55 }
 0x871   :  { %7320 = vmatprep.subr.bf16.mxu0 %v8059_v21 }
 0x926   :  { %v1030_v8 = vpop.f32.mrb[12].mxu0 }
 0x927   :  { %v1031_v10 = vadd.f32 %v6824_v7, %v1030_v8  ;;  %v7662_v11 = vpop.f32.mrb[13].mxu0 }
 0x928   :  { %v1033_v12 = vpop.f32.mrb[14].mxu0 }
 0x929   :  { %v9266_v14 = vadd.f32 %v8656_v13, %v1031_v10  ;;  %v1034_v15 = vadd.f32 %v6824_v7, %v1033_v12  ;;  %v7663_v16 = vpop.f32.mrb[15].mxu0  ;;  %v6833_v10 = vld [vmem:[#allocation13] ss:$0 sm:$0xff] }
 0x92b   :  { %v9268_v19 = vadd.f32 %v8657_v17, %v1034_v15  ;;  %1041 = vadd.xlane.f32.xlu1 %v9266_v14  ;;  %v6834_v15 = vld [vmem:[#allocation14] ss:$0 sm:$0xff] }
 0x92d   :  { %1043 = vadd.xlane.f32.xlu0 %v9268_v19 }
 0x9b8   :  { %v1042_v26 = vpop.xlane.xlu1 %1041 }
 0x9b9   :  { %v1045_v27 = vmul.f32 0.0078125, %v1042_v26  ;;  %v8064_v26 = vld [vmem:[#allocation17 + $0x8] sm:$0xff]  }
 0x9ba   :  { %v1044_v28 = vpop.xlane.xlu0 %1043 }
 0x9bb   :  { %v9273_v29 = vsub.f32 %v9266_v14, %v1045_v27  ;;  %v1046_v30 = vmul.f32 0.0078125, %v1044_v28  ;;  %v8065_v27 = vld [vmem:[#allocation17 + $0x88] sm:$0xff]   ;;  %v8066_v28 = vld [vmem:[#allocation17 + $0x50] sm:$0xff]  }
 0x9bd   :  { %v9276_v31 = vsub.f32 %v9268_v19, %v1046_v30  ;;  %v1049_v33 = vmul.f32 %v9273_v29, %v9273_v29  ;;  %v8068_v30 = vld [vmem:[#allocation17 + $0x10] sm:$0xff]  }
 0x9bf   :  { %1051 = vadd.xlane.f32.xlu0 %v1049_v33  ;;  %v1050_v34 = vmul.f32 %v9276_v31, %v9276_v31  ;;  %v8070_v33 = vld [vmem:[#allocation17 + $0x58] sm:$0xff]  }
 0x9c3   :  { %1053 = vadd.xlane.f32.xlu0 %v1050_v34  ;;  %v8071_v34 = vld [vmem:[#allocation17 + $0xd8] sm:$0xff]  }
 0xa4c   :  { %v1052_v63 = vpop.xlane.xlu0 %1051 }
 0xa4d   :  { %v1055_v0 = vmul.f32 0.0078125, %v1052_v63 }
 0xa4f   :  { %v1057_v1 = vadd.f32 1e-05, %v1055_v0 }
 0xa50   :  { %v1054_v2 = vpop.xlane.xlu0 %1053 }
 0xa51   :  { %8470 = vrsqrt.f32 %v1057_v1  ;;  %v1056_v5 = vmul.f32 0.0078125, %v1054_v2 }
 0xa53   :  { %v1058_v6 = vadd.f32 1e-05, %v1056_v5 }
 0xa55   :  { %8472 = vrsqrt.f32 %v1058_v6 }
 0xa5b   :  { %v8471_v7 = vpop.eup %8470 }
 0xa5c   :  { %v1061_v8 = vmul.f32 %v8471_v7, %v9273_v29  ;;  %v8067_v29 = vld [vmem:[#allocation17 + $0xd0] sm:$0xff]  }
 0xa5e   :  { %v1067_v13 = vmul.f32 %v6833_v10, %v1061_v8 }
 0xa5f   :  { %v8473_v11 = vpop.eup %8472 }
 0xa60   :  { %v1062_v12 = vmul.f32 %v8473_v11, %v9276_v31  ;;  %v1073_v17 = vadd.f32 %v6834_v15, %v1067_v13  ;;  %v8069_v31 = vld [vmem:[#allocation17 + $0x90] sm:$0xff]  }
 0xa62   :  { %v1068_v16 = vmul.f32 %v6833_v10, %v1062_v12 }
 0xa64   :  { %v1074_v3 = vadd.f32 %v6834_v15, %v1068_v16 }
 0xa66   :  { %v1107_v9 = vpack.c.bf16 %v1074_v3, %v1073_v17 }
 0xa68   :  { %1323 = vmatmul.mubr.bf16.vlgmr.msra.gmra.mrb[28].mxu1 %v1107_v9  ;;  %1366 = vmatmul.mubr.bf16.vlgmr.msra.gmra.mrb[16].mxu0 %v1107_v9 }
 0xa69   :  { %7299 = vmatpush3.bf16.msra.mxu1 %v8060_v22  ;;  %7321 = vmatpush3.bf16.msra.mxu0 %v8061_v23 }
 0xa6a   :  { %7300 = vmatprep.subr.bf16.mxu1 %v8062_v24  ;;  %7322 = vmatprep.subr.bf16.mxu0 %v8063_v25 }
 0xa6d   :  { %7301 = vmatpush3.bf16.msra.mxu1 %v8064_v26  ;;  %7323 = vmatpush3.bf16.msra.mxu0 %v8065_v27 }
 0xa6e   :  { %7302 = vmatprep.subr.bf16.mxu1 %v8066_v28  ;;  %7324 = vmatprep.subr.bf16.mxu0 %v8067_v29 }
 0xa71   :  { %7303 = vmatpush3.bf16.msra.mxu1 %v8068_v30  ;;  %7325 = vmatpush3.bf16.msra.mxu0 %v8069_v31 }
 0xa72   :  { %7304 = vmatprep.subr.bf16.mxu1 %v8070_v33  ;;  %7326 = vmatprep.subr.bf16.mxu0 %v8071_v34 }
 0xa75   :  { %7305 = vmatpush3.bf16.msra.mxu1 %v8072_v35  ;;  %7327 = vmatpush3.bf16.msra.mxu0 %v8073_v36 }
 0xa76   :  { %7306 = vmatprep.subr.bf16.mxu1 %v8074_v37  ;;  %7328 = vmatprep.subr.bf16.mxu0 %v8075_v38 }
 0xa79   :  { %7307 = vmatpush3.bf16.msra.mxu1 %v8076_v39  ;;  %7329 = vmatpush3.bf16.msra.mxu0 %v8077_v18 }
 0xa7a   :  { %7308 = vmatprep.subr.bf16.mxu1 %v8078_v40  ;;  %7330 = vmatprep.subr.bf16.mxu0 %v8079_v41 }
 0xa7d   :  { %7309 = vmatpush3.bf16.msra.mxu1 %v8080_v42  ;;  %7331 = vmatpush3.bf16.msra.mxu0 %v8081_v43 }
 0xa7e   :  { %7310 = vmatprep.subr.bf16.mxu1 %v8082_v44  ;;  %7332 = vmatprep.subr.bf16.mxu0 %v8083_v45 }
 0xa81   :  { %7311 = vmatpush3.bf16.msra.mxu1 %v8084_v46  ;;  %7333 = vmatpush3.bf16.msra.mxu0 %v8085_v47 }
 0xa82   :  { %7312 = vmatprep.subr.bf16.mxu1 %v8086_v48  ;;  %7334 = vmatprep.subr.bf16.mxu0 %v8087_v49 }
 0xa85   :  { %7313 = vmatpush3.bf16.msra.mxu1 %v8088_v50  ;;  %7335 = vmatpush3.bf16.msra.mxu0 %v8089_v51 }
 0xa86   :  { %7664 = vmatprep.subr.bf16.mxu0 %v8932_v4 }
 0xb3b   :  { %v1324_v63 = vpop.f32.mrb[28].mxu1  ;;  %v1367_v0 = vpop.f32.mrb[16].mxu0 }
 0xb3c   :  { %v9295_v1 = vadd.f32 %v1324_v63, %v1113_v58  ;;  %v9297_v2 = vadd.f32 %v1367_v0, %v1121_v60  ;;  %v1326_v5 = vpop.f32.mrb[29].mxu1  ;;  %v1369_v6 = vpop.f32.mrb[17].mxu0 }
 0xb3d   :  { %v9299_v7 = vadd.f32 %v1326_v5, %v1117_v61  ;;  %v9301_v8 = vadd.f32 %v1369_v6, %v1125_v62  ;;  %v1328_v10 = vpop.f32.mrb[30].mxu1  ;;  %v1371_v11 = vpop.f32.mrb[18].mxu0 }
 0xb3e   :  { %v6867_v12 = vmul.f32 -1.702, %v9295_v1  ;;  %v6869_v13 = vmul.f32 -1.702, %v9297_v2  ;;  %v1329_v15 = vadd.f32 %v1328_v10, %v1113_v58  ;;  %v1372_v16 = vadd.f32 %v1371_v11, %v1121_v60  ;;  %v1330_v17 = vpop.f32.mrb[31].mxu1  ;;  %v1373_v3 = vpop.f32.mrb[19].mxu0 }
 0xb3f   :  { %v6868_v9 = vmul.f32 -1.702, %v9299_v7  ;;  %v6870_v20 = vmul.f32 -1.702, %v9301_v8  ;;  %v1331_v21 = vadd.f32 %v1330_v17, %v1117_v61  ;;  %v1374_v22 = vadd.f32 %v1373_v3, %v1125_v62 }
 0xb40   :  { %v1392_v23 = vmul.f32 1.442695, %v6867_v12  ;;  %v1396_v24 = vmul.f32 1.442695, %v6869_v13  ;;  %v6871_v25 = vmul.f32 -1.702, %v1329_v15 }
 0xb41   :  { %v1394_v26 = vmul.f32 1.442695, %v6868_v9  ;;  %v1398_v27 = vmul.f32 1.442695, %v6870_v20  ;;  %v6873_v28 = vmul.f32 -1.702, %v1372_v16 }
 0xb42   :  { %8474 = vpow2.f32 %v1392_v23  ;;  %v1400_v29 = vmul.f32 1.442695, %v6871_v25  ;;  %v6872_v30 = vmul.f32 -1.702, %v1331_v21  ;;  %v6874_v31 = vmul.f32 -1.702, %v1374_v22 }
 0xb43   :  { %8476 = vpow2.f32 %v1396_v24  ;;  %v1404_v33 = vmul.f32 1.442695, %v6873_v28 }
 0xb44   :  { %8478 = vpow2.f32 %v1394_v26  ;;  %v1402_v34 = vmul.f32 1.442695, %v6872_v30  ;;  %v1406_v35 = vmul.f32 1.442695, %v6874_v31 }
 0xb45   :  { %8480 = vpow2.f32 %v1398_v27 }
 0xb46   :  { %8482 = vpow2.f32 %v1400_v29 }
 0xb47   :  { %8484 = vpow2.f32 %v1404_v33 }
 0xb48   :  { %8486 = vpow2.f32 %v1402_v34 }
 0xb49   :  { %8488 = vpow2.f32 %v1406_v35 }
 0xb4c   :  { %v8475_v36 = vpop.eup %8474 }
 0xb4d   :  { %v8477_v37 = vpop.eup %8476  ;;  %v1408_v38 = vadd.f32 1.0, %v8475_v36 }
 0xb4e   :  { %v8479_v39 = vpop.eup %8478  ;;  %v1410_v18 = vadd.f32 1.0, %v8477_v37  ;;  %v8090_v37 = vld [vmem:[#allocation8 + $0xc0] ss:$12 sps:$4 sm:$0xff]  }
 0xb4f   :  { %v8481_v40 = vpop.eup %8480  ;;  %8490 = vrcp.f32 %v1408_v38  ;;  %v1409_v41 = vadd.f32 1.0, %v8479_v39  ;;  %v8092_v38 = vld [vmem:[#allocation8 + $0xc4] ss:$12 sps:$4 sm:$0xff]   ;;  %v8093_v39 = vld [vmem:[#allocation8 + $0xc8] ss:$12 sps:$4 sm:$0xff]  }
 0xb50   :  { %v8483_v42 = vpop.eup %8482  ;;  %8492 = vrcp.f32 %v1410_v18  ;;  %v1411_v43 = vadd.f32 1.0, %v8481_v40  ;;  %v8096_v18 = vld [vmem:[#allocation8 + $0xdc] ss:$12 sps:$4 sm:$0xff]   ;;  %2005 = vmatprep.subr.bf16.mxu1 %v8092_v38  ;;  %v8097_v40 = vld [vmem:[#allocation8 + $0xe0] ss:$12 sps:$4 sm:$0xff]  }
 0xb51   :  { %v8485_v44 = vpop.eup %8484  ;;  %8494 = vrcp.f32 %v1409_v41  ;;  %v1412_v45 = vadd.f32 1.0, %v8483_v42  ;;  %v8094_v41 = vld [vmem:[#allocation8 + $0xd8] ss:$12 sps:$4 sm:$0xff]  }
 0xb52   :  { %v8487_v46 = vpop.eup %8486  ;;  %8496 = vrcp.f32 %v1411_v43  ;;  %v1414_v47 = vadd.f32 1.0, %v8485_v44 }
 0xb53   :  { %v8489_v48 = vpop.eup %8488  ;;  %8498 = vrcp.f32 %v1412_v45  ;;  %v1413_v49 = vadd.f32 1.0, %v8487_v46 }
 0xb54   :  { %8500 = vrcp.f32 %v1414_v47  ;;  %v1415_v50 = vadd.f32 1.0, %v8489_v48  ;;  %v8100_v48 = vld [vmem:[#allocation8 + $0xf4] ss:$12 sps:$4 sm:$0xff]  }
 0xb55   :  { %8502 = vrcp.f32 %v1413_v49  ;;  %v8098_v49 = vld [vmem:[#allocation8 + $0xf0] ss:$12 sps:$4 sm:$0xff]  }
 0xb56   :  { %8504 = vrcp.f32 %v1415_v50  ;;  %v8101_v50 = vld [vmem:[#allocation8 + $0xf8] ss:$12 sps:$4 sm:$0xff]  }
 0xb59   :  { %v8491_v51 = vpop.eup %8490 }
 0xb5a   :  { %v8493_v52 = vpop.eup %8492  ;;  %v1432_v63 = vmul.f32 %v8491_v51, %v9295_v1  ;;  %v8104_v51 = vld [vmem:[#allocation8 + $0x10c] ss:$12 sps:$4 sm:$0xff]  }
 0xb5b   :  { %v8495_v58 = vpop.eup %8494  ;;  %v1434_v6 = vmul.f32 %v8493_v52, %v9297_v2  ;;  %v8102_v52 = vld [vmem:[#allocation8 + $0x108] ss:$12 sps:$4 sm:$0xff]  }
 0xb5c   :  { %v8497_v60 = vpop.eup %8496  ;;  %v1433_v12 = vmul.f32 %v8495_v58, %v9299_v7  ;;  %v6875_v7 = vld [vmem:[%s9815_s12] ss:$0 sm:$0xff]  ;;  %v8105_v58 = vld [vmem:[#allocation8 + $0x110] ss:$12 sps:$4 sm:$0xff]  }
 0xb5d   :  { %v8499_v61 = vpop.eup %8498  ;;  %v1435_v3 = vmul.f32 %v8497_v60, %v9301_v8  ;;  %v8108_v60 = vld [vmem:[#allocation8 + $0x124] ss:$12 sps:$4 sm:$0xff]  }
 0xb5e   :  { %v8501_v62 = vpop.eup %8500  ;;  %v1436_v0 = vmul.f32 %v8499_v61, %v1329_v15  ;;  %v8106_v61 = vld [vmem:[#allocation8 + $0x120] ss:$12 sps:$4 sm:$0xff]  }
 0xb5f   :  { %v8503_v5 = vpop.eup %8502  ;;  %v1438_v10 = vmul.f32 %v8501_v62, %v1372_v16  ;;  %v8109_v62 = vld [vmem:[#allocation8 + $0x128] ss:$12 sps:$4 sm:$0xff]  }
 0xb60   :  { %v8505_v11 = vpop.eup %8504  ;;  %v1504_v13 = vpack.c.bf16 %v1436_v0, %v1432_v63  ;;  %v1437_v17 = vmul.f32 %v8503_v5, %v1331_v21  ;;  %v8112_v63 = vld [vmem:[#allocation8 + $0x13c] ss:$12 sps:$4 sm:$0xff]   ;;  %v8110_v0 = vld [vmem:[#allocation8 + $0x138] ss:$12 sps:$4 sm:$0xff]   ;;  %v8113_v5 = vld [vmem:[#allocation8 + $0x140] ss:$12 sps:$4 sm:$0xff]  }
 0xb61   :  { %v1506_v9 = vpack.c.bf16 %v1438_v10, %v1434_v6  ;;  %v1439_v20 = vmul.f32 %v8505_v11, %v1374_v22  ;;  %v8116_v6 = vld [vmem:[#allocation8 + $0x154] ss:$12 sps:$4 sm:$0xff]   ;;  %v8114_v10 = vld [vmem:[#allocation8 + $0x150] ss:$12 sps:$4 sm:$0xff]   ;;  %v8117_v11 = vld [vmem:[#allocation8 + $0x158] ss:$12 sps:$4 sm:$0xff]  }
 0xb62   :  { %v1505_v23 = vpack.c.bf16 %v1437_v17, %v1433_v12  ;;  %v8120_v12 = vld [vmem:[#allocation8 + $0x16c] ss:$12 sps:$4 sm:$0xff]   ;;  %v8121_v17 = vld [vmem:[#allocation8 + $0x170] ss:$12 sps:$4 sm:$0xff]  }
 0xb63   :  { %v1507_v24 = vpack.c.bf16 %v1439_v20, %v1435_v3 }
 0xb64   :  { %1737 = vmatprep.mubr.bf16.mxu1 %v1505_v23 }
 0xb65   :  { %1778 = vmatprep.mubr.bf16.mxu0 %v1507_v24  ;;  %1738 = vmatmul.mubr.bf16.vlgmr.msra.gmra.mrb[32].mxu1 %v1504_v13  ;;  %v8118_v13 = vld [vmem:[#allocation8 + $0x168] ss:$12 sps:$4 sm:$0xff]  }
 0xb66   :  { %1779 = vmatmul.mubr.bf16.vlgmr.msra.gmra.mrb[20].mxu0 %v1506_v9  ;;  %2037 = vmatprep.mubr.bf16.mxu1 %v8933_v32 }
 0xb67   :  { %7680 = vmatprep.mubr.msk.bf16.mxu0 %vm8934_vm0, %v8932_v4  ;;  %7665 = vmatpush3.bf16.msra.mxu0 %v8093_v39 }
 0xb68   :  { %2006 = vmatpush1.bf16.msra.mxu1 %v8090_v37  ;;  %7666 = vmatprep.subr.bf16.mxu0 %v8932_v4 }
 0xb69   :  { %2007 = vmatprep.subr.bf16.mxu1 %v8096_v18 }
 0xb6b   :  { %7667 = vmatpush3.bf16.msra.mxu0 %v8097_v40 }
 0xb6c   :  { %2008 = vmatpush1.bf16.msra.mxu1 %v8094_v41  ;;  %7668 = vmatprep.subr.bf16.mxu0 %v8932_v4 }
 0xb6d   :  { %2009 = vmatprep.subr.bf16.mxu1 %v8100_v48 }
 0xb6f   :  { %7669 = vmatpush3.bf16.msra.mxu0 %v8101_v50 }
 0xb70   :  { %2010 = vmatpush1.bf16.msra.mxu1 %v8098_v49  ;;  %7670 = vmatprep.subr.bf16.mxu0 %v8932_v4 }
 0xb71   :  { %2011 = vmatprep.subr.bf16.mxu1 %v8104_v51 }
 0xb73   :  { %7671 = vmatpush3.bf16.msra.mxu0 %v8105_v58 }
 0xb74   :  { %2012 = vmatpush1.bf16.msra.mxu1 %v8102_v52  ;;  %7672 = vmatprep.subr.bf16.mxu0 %v8932_v4 }
 0xb75   :  { %2013 = vmatprep.subr.bf16.mxu1 %v8108_v60 }
 0xb77   :  { %7673 = vmatpush3.bf16.msra.mxu0 %v8109_v62 }
 0xb78   :  { %2014 = vmatpush1.bf16.msra.mxu1 %v8106_v61  ;;  %7674 = vmatprep.subr.bf16.mxu0 %v8932_v4 }
 0xb79   :  { %2015 = vmatprep.subr.bf16.mxu1 %v8112_v63 }
 0xb7b   :  { %7675 = vmatpush3.bf16.msra.mxu0 %v8113_v5 }
 0xb7c   :  { %2016 = vmatpush1.bf16.msra.mxu1 %v8110_v0  ;;  %7676 = vmatprep.subr.bf16.mxu0 %v8932_v4 }
 0xb7d   :  { %2017 = vmatprep.subr.bf16.mxu1 %v8116_v6 }
 0xb7f   :  { %7677 = vmatpush3.bf16.msra.mxu0 %v8117_v11 }
 0xb80   :  { %2018 = vmatpush1.bf16.msra.mxu1 %v8114_v10  ;;  %7678 = vmatprep.subr.bf16.mxu0 %v8932_v4 }
 0xb81   :  { %2019 = vmatprep.subr.bf16.mxu1 %v8120_v12 }
 0xb83   :  { %7679 = vmatpush3.bf16.msra.mxu0 %v8121_v17 }
 0xb84   :  { %2020 = vmatpush1.bf16.msra.mxu1 %v8118_v13  ;;  %7708 = vmatprep.subr.bf16.mxu0 %v8932_v4 }
 0xb85   :  { %7684 = vmatprep.subr.bf16.mxu1 %v8932_v4 }
 0xc38   :  { %v7314_v1 = vpop.f32.mrb[32].mxu1 }
 0xc39   :  { %v7336_v2 = vpop.f32.mrb[20].mxu0  ;;  %v7315_v8 = vpop.f32.mrb[33].mxu1 }
 0xc3a   :  { %v7316_v15 = vadd.f32 %v7315_v8, %v7314_v1  ;;  %v7337_v16 = vpop.f32.mrb[21].mxu0  ;;  %v7317_v21 = vpop.f32.mrb[34].mxu1 }
 0xc3b   :  { %v7338_v22 = vadd.f32 %v7337_v16, %v7336_v2  ;;  %v7339_v25 = vpop.f32.mrb[22].mxu0  ;;  %v7318_v26 = vpop.f32.mrb[35].mxu1 }
 0xc3c   :  { %v1740_v27 = vadd.f32 %v7316_v15, %v6875_v7  ;;  %v7319_v28 = vadd.f32 %v7318_v26, %v7317_v21  ;;  %v7340_v29 = vpop.f32.mrb[23].mxu0 }
 0xc3d   :  { %v7341_v30 = vadd.f32 %v7340_v29, %v7339_v25  ;;  %v6910_v29 = vld [vmem:[%s9807_s4 + $0x1] ss:$4 sm:$0x7] }
 0xc3e   :  { %v1781_v31 = vadd.f32 %v7338_v22, %v1740_v27  ;;  %v1743_v33 = vadd.f32 %v7319_v28, %v6875_v7  ;;  %v6908_v7 = vld [vmem:[#allocation5 + $0x1] ss:$0 sm:$0xff]  ;;  %v6909_v22 = vld [vmem:[#allocation7 + $0x1] ss:$0 sm:$0xff] }
 0xc40   :  { %v1784_v34 = vadd.f32 %v7341_v30, %v1743_v33  ;;  %v9318_v35 = vadd.f32 %v1781_v31, %v9266_v14  ;;  %v1869_v30 = vrot.slane %v6910_v29, %v9175_v55 }
 0xc42   :  { %1791 = vadd.xlane.f32.xlu1 %v9318_v35  ;;  %v9322_v36 = vadd.f32 %v1784_v34, %v9268_v19  ;;  %v1873_v34 = vrot.slane %v6910_v29, %v9181_v57 }
 0xc44   :  { %1793 = vadd.xlane.f32.xlu0 %v9322_v36 }
 0xccf   :  { %v1792_v14 = vpop.xlane.xlu1 %1791 }
 0xcd0   :  { %v1795_v19 = vmul.f32 0.0078125, %v1792_v14 }
 0xcd1   :  { %v1794_v42 = vpop.xlane.xlu0 %1793 }
 0xcd2   :  { %v1797_v43 = vsub.f32 %v9318_v35, %v1795_v19  ;;  %v1796_v44 = vmul.f32 0.0078125, %v1794_v42  ;;  %v1865_v42 = vrot.slane %v6910_v29, %v9185_v59 }
 0xcd4   :  { %v1798_v45 = vsub.f32 %v9322_v36, %v1796_v44  ;;  %v1799_v46 = vmul.f32 %v1797_v43, %v1797_v43 }
 0xcd6   :  { %1801 = vadd.xlane.f32.xlu1 %v1799_v46  ;;  %v1800_v47 = vmul.f32 %v1798_v45, %v1798_v45 }
 0xcd8   :  { %1803 = vadd.xlane.f32.xlu0 %v1800_v47 }
 0xd63   :  { %v1802_v3 = vpop.xlane.xlu1 %1801 }
 0xd64   :  { %v1805_v9 = vmul.f32 0.0078125, %v1802_v3 }
 0xd65   :  { %v1804_v20 = vpop.xlane.xlu0 %1803 }
 0xd66   :  { %v1807_v23 = vadd.f32 1e-05, %v1805_v9  ;;  %v1806_v24 = vmul.f32 0.0078125, %v1804_v20 }
 0xd68   :  { %8506 = vrsqrt.f32 %v1807_v23  ;;  %v1808_v1 = vadd.f32 1e-05, %v1806_v24 }
 0xd6a   :  { %8508 = vrsqrt.f32 %v1808_v1 }
 0xd72   :  { %v8507_v2 = vpop.eup %8506 }
 0xd73   :  { %v1811_v8 = vmul.f32 %v8507_v2, %v1797_v43 }
 0xd74   :  { %v8509_v15 = vpop.eup %8508 }
 0xd75   :  { %v1812_v16 = vmul.f32 %v8509_v15, %v1798_v45  ;;  %v1817_v21 = vmul.f32 %v6908_v7, %v1811_v8 }
 0xd77   :  { %v1818_v25 = vmul.f32 %v6908_v7, %v1812_v16  ;;  %v1823_v26 = vadd.f32 %v6909_v22, %v1817_v21 }
 0xd79   :  { %v1824_v27 = vadd.f32 %v6909_v22, %v1818_v25 }
 0xd7b   :  { %v1858_v28 = vpack.c.bf16 %v1824_v27, %v1823_v26 }
 0xd7d   :  { %2038 = vmatmul.mubr.bf16.vlgmr.msra.gmra.mrb[36].mxu1 %v1858_v28  ;;  %7681 = vmatmul.mubr.bf16.vlgmr.msra.gmra.mrb[24].mxu0 %v1858_v28 }
 0xd7e   :  { %7686 = vmatprep.mubr.msk.bf16.mxu1 %vm8934_vm0, %v8932_v4  ;;  %7710 = vmatprep.mubr.msk.bf16.mxu0 %vm8934_vm0, %v8932_v4 }
 0xe50   :  { %v2039_v31 = vpop.f32.mrb[36].mxu1  ;;  %v2082_v33 = vpop.f32.mrb[24].mxu0 }
 0xe51   :  { %v2041_v37 = vpop.f32.mrb[37].mxu1  ;;  %v7682_v38 = vpop.f32.mrb[25].mxu0  ;;  %v2040_v46 = vadd.f32 %v2039_v31, %v1865_v42  ;;  %v2083_v49 = vadd.f32 %v2082_v33, %v1873_v34 }
 0xe52   :  { %v2042_v39 = vadd.f32 %v2041_v37, %v1869_v30  ;;  %v2043_v18 = vpop.f32.mrb[38].mxu1  ;;  %v2085_v40 = vpop.f32.mrb[26].mxu0 }
 0xe53   :  { %v9345_v41 = vadd.f32 %v2085_v40, %v1873_v34  ;;  %v2045_v14 = vpop.f32.mrb[39].mxu1  ;;  %v7683_v19 = vpop.f32.mrb[27].mxu0  ;;  %v2089_v48 = vpack.c.bf16 %v2040_v46, %v2040_v46  ;;  %v2044_v51 = vadd.f32 %v2043_v18, %v1865_v42  ;;  %v9355_v52 = vpack.c.bf16 %v2083_v49, %v2083_v49 }
 0xe54   :  { %v2091_v43 = vpack.c.bf16 %v2042_v39, %v2042_v39  ;;  %v2046_v45 = vadd.f32 %v2045_v14, %v1869_v30 }
 0xe55   :  { %v2090_v58 = vpack.c.bf16 %v2044_v51, %v2044_v51  ;;  %v2215_v60 = vsel %vm600_vm2, %v9355_v52, 0  ;;  %v2094_v26 = vpack.c.bf16 %v9345_v41, %v9345_v41 }
 0xe56   :  { %v2099_v44 = vsel %vm479_vm1, %v2091_v43, 0  ;;  %v2092_v47 = vpack.c.bf16 %v2046_v45, %v2046_v45 }
 0xe57   :  { %7685 = vmatpush3.bf16.xpose.msra.mxu1 %v2099_v44  ;;  %v2261_v30 = vsel %vm600_vm2, %v2094_v26, 0 }
 0xe58   :  { %7690 = vmatprep.subr.bf16.mxu1 %v8932_v4  ;;  %v2145_v50 = vsel %vm479_vm1, %v2092_v47, 0 }
 0xe5e   :  { %7687 = vmatmul.mubr.msk.bf16.vlgmr.msra.gmra.mrb[40].mxu1 %vm479_vm1, %v2089_v48 }
 0xe5f   :  { %7691 = vmatpush3.bf16.xpose.msra.mxu1 %v2145_v50  ;;  %7692 = vmatprep.mubr.msk.bf16.mxu1 %vm8934_vm0, %v8932_v4 }
 0xe60   :  { %7696 = vmatprep.subr.bf16.mxu1 %v8932_v4 }
 0xe66   :  { %7693 = vmatmul.mubr.msk.bf16.vlgmr.msra.gmra.mrb[44].mxu1 %vm479_vm1, %v2090_v58 }
 0xe67   :  { %7697 = vmatpush3.bf16.msra.mxu1 %v2215_v60  ;;  %7698 = vmatprep.mubr.msk.bf16.mxu1 %vm8934_vm0, %v8932_v4 }
 0xe68   :  { %7702 = vmatprep.subr.bf16.mxu1 %v8932_v4 }
 0xf31   :  { %v2135_v61 = vpop.f32.mrb[40].mxu1 }
 0xf32   :  { %v7688_v62 = vpop.f32.mrb[41].mxu1  ;;  %v2187_v63 = vsel %vm572_vm3, %v2135_v61, -inf }
 0xf33   :  { %2188 = vmax.xlane.f32.xlu1 %v2187_v63  ;;  %v2138_v0 = vpop.f32.mrb[42].mxu1 }
 0xf34   :  { %v7689_v5 = vpop.f32.mrb[43].mxu1 }
 0xf39   :  { %v2181_v6 = vpop.f32.mrb[44].mxu1 }
 0xf3a   :  { %v7694_v10 = vpop.f32.mrb[45].mxu1  ;;  %v2190_v11 = vsel %vm572_vm3, %v2181_v6, -inf }
 0xf3b   :  { %2191 = vmax.xlane.f32.xlu0 %v2190_v11  ;;  %v2184_v12 = vpop.f32.mrb[46].mxu1 }
 0xf3c   :  { %v7695_v13 = vpop.f32.mrb[47].mxu1 }
 0xfc0   :  { %v2189_v17 = vpop.xlane.xlu1 %2188 }
 0xfc1   :  { %v2193_v3 = vsub.f32 %v2135_v61, %v2189_v17 }
 0xfc3   :  { %v2195_v9 = vmul.f32 1.442695, %v2193_v3 }
 0xfc5   :  { %8510 = vpow2.f32 %v2195_v9 }
 0xfc8   :  { %v2192_v20 = vpop.xlane.xlu0 %2191 }
 0xfc9   :  { %v2194_v23 = vsub.f32 %v2181_v6, %v2192_v20 }
 0xfcb   :  { %v2197_v24 = vmul.f32 1.442695, %v2194_v23 }
 0xfcd   :  { %8512 = vpow2.f32 %v2197_v24 }
 0xfcf   :  { %v8511_v1 = vpop.eup %8510 }
 0xfd0   :  { %v2199_v2 = vsel %vm572_vm3, %v8511_v1, 0.0 }
 0xfd1   :  { %2200 = vadd.xlane.f32.xlu1 %v2199_v2 }
 0xfd7   :  { %v8513_v7 = vpop.eup %8512 }
 0xfd8   :  { %v2202_v8 = vsel %vm572_vm3, %v8513_v7, 0.0 }
 0xfd9   :  { %2203 = vadd.xlane.f32.xlu0 %v2202_v8 }
 0xfe2   :  { %2307 = vrot.lane.b32.xlu1 %v2091_v43, %s8925_s2 }
 0xfe6   :  { %2304 = vrot.lane.b32.xlu1 %v2089_v48, %s8925_s2 }
 0xfea   :  { %2356 = vrot.lane.b32.xlu1 %v2090_v58, %s8925_s2 }
 0xfef   :  { %2359 = vrot.lane.b32.xlu0 %v2092_v47, %s8925_s2 }
0x105e   :  { %v2201_v15 = vpop.xlane.xlu1 %2200 }
0x105f   :  { %8514 = vrcp.f32 %v2201_v15 }
0x1062   :  { %v2308_v16 = vpop.permute.xlu1 %2307 }
0x1063   :  { %v2313_v21 = vsel %vm479_vm1, %v2308_v16, 0 }
0x1064   :  { %7709 = vmatpush3.bf16.xpose.msra.mxu0 %v2313_v21  ;;  %v8122_v21 = vld [vmem:[#allocation10 + $0x40] sm:$0xff]  }
0x1065   :  { %7720 = vmatprep.subr.bf16.mxu0 %v8932_v4 }
0x1066   :  { %v2204_v22 = vpop.xlane.xlu0 %2203  ;;  %v2305_v28 = vpop.permute.xlu1 %2304 }
0x1067   :  { %8516 = vrcp.f32 %v2204_v22  ;;  %v8123_v22 = vld [vmem:[#allocation10 + $0x48] sm:$0xff]  }
0x1069   :  { %v8515_v25 = vpop.eup %8514 }
0x106a   :  { %v2207_v27 = vmul.f32 %v8515_v25, %v8511_v1  ;;  %v2360_v34 = vpop.permute.xlu0 %2359  ;;  %v2357_v39 = vpop.permute.xlu1 %2356  ;;  %v8124_v25 = vld [vmem:[#allocation10 + $0x50] sm:$0xff]  }
0x106b   :  { %7711 = vmatmul.mubr.msk.bf16.vlgmr.msra.gmra.mrb[28].mxu0 %vm479_vm1, %v2305_v28  ;;  %v2365_v38 = vsel %vm479_vm1, %v2360_v34, 0  ;;  %v8127_v28 = vld [vmem:[#allocation10 + $0x68] sm:$0xff]  }
0x106c   :  { %v2209_v29 = vpack.c.bf16 %v2207_v27, %v2207_v27  ;;  %7722 = vmatprep.mubr.msk.bf16.mxu0 %vm8934_vm0, %v8932_v4  ;;  %v8126_v27 = vld [vmem:[#allocation10 + $0x60] sm:$0xff]  }
0x106e   :  { %7699 = vmatmul.mubr.msk.bf16.vlgmr.msra.gmra.mrb[48].mxu1 %vm572_vm3, %v2209_v29  ;;  %v8128_v29 = vld [vmem:[#allocation10 + $0x70] sm:$0xff]  }
0x106f   :  { %7703 = vmatpush3.bf16.msra.mxu1 %v2261_v30  ;;  %7704 = vmatprep.mubr.msk.bf16.mxu1 %vm8934_vm0, %v8932_v4 }
0x1070   :  { %7714 = vmatprep.subr.bf16.mxu1 %v8932_v4 }
0x1071   :  { %v8517_v31 = vpop.eup %8516 }
0x1072   :  { %v2208_v33 = vmul.f32 %v8517_v31, %v8513_v7 }
0x1074   :  { %v2210_v37 = vpack.c.bf16 %v2208_v33, %v2208_v33 }
0x1076   :  { %7705 = vmatmul.mubr.msk.bf16.vlgmr.msra.gmra.mrb[52].mxu1 %vm572_vm3, %v2210_v37  ;;  %v8129_v37 = vld [vmem:[#allocation10 + $0x78] sm:$0xff]  }
0x1077   :  { %7716 = vmatprep.mubr.msk.bf16.mxu1 %vm8934_vm0, %v8932_v4 }
0x1078   :  { %7715 = vmatpush3.bf16.xpose.msra.mxu1 %v2365_v38 }
0x1079   :  { %7726 = vmatprep.subr.bf16.mxu1 %v8932_v4 }
0x107f   :  { %7717 = vmatmul.mubr.msk.bf16.vlgmr.msra.gmra.mrb[56].mxu1 %vm479_vm1, %v2357_v39 }
0x1080   :  { %7728 = vmatprep.mubr.msk.bf16.mxu1 %vm8934_vm0, %v8932_v4 }
0x113e   :  { %v2349_v18 = vpop.f32.mrb[28].mxu0 }
0x113f   :  { %v7712_v40 = vpop.f32.mrb[29].mxu0  ;;  %v2407_v41 = vsel %vm572_vm3, %v2349_v18, -inf }
0x1140   :  { %2408 = vmax.xlane.f32.xlu1 %v2407_v41  ;;  %v2352_v14 = vpop.f32.mrb[30].mxu0 }
0x1141   :  { %v9392_v19 = vpop.f32.mrb[48].mxu1  ;;  %v7713_v42 = vpop.f32.mrb[31].mxu0 }
0x1142   :  { %v7700_v43 = vpop.f32.mrb[49].mxu1 }
0x1143   :  { %v2254_v44 = vpop.f32.mrb[50].mxu1 }
0x1144   :  { %v7701_v45 = vpop.f32.mrb[51].mxu1 }
0x1149   :  { %v9394_v46 = vpop.f32.mrb[52].mxu1 }
0x114a   :  { %v7706_v47 = vpop.f32.mrb[53].mxu1 }
0x114b   :  { %v2300_v48 = vpop.f32.mrb[54].mxu1 }
0x114c   :  { %v7707_v49 = vpop.f32.mrb[55].mxu1  ;;  %v6943_v48 = vld [vmem:[#allocation11 + $0x1] ss:$0 sm:$0xff] }
0x1151   :  { %2432 = vrot.lane.b32.xlu1 %v9355_v52, %s8925_s2 }
0x1152   :  { %v2401_v50 = vpop.f32.mrb[56].mxu1 }
0x1153   :  { %v7718_v51 = vpop.f32.mrb[57].mxu1  ;;  %v2410_v58 = vsel %vm572_vm3, %v2401_v50, -inf }
0x1154   :  { %2411 = vmax.xlane.f32.xlu0 %v2410_v58  ;;  %v2404_v60 = vpop.f32.mrb[58].mxu1 }
0x1155   :  { %v7719_v61 = vpop.f32.mrb[59].mxu1 }
0x11cd   :  { %v2409_v62 = vpop.xlane.xlu1 %2408 }
0x11ce   :  { %v2413_v63 = vsub.f32 %v2349_v18, %v2409_v62 }
0x11d0   :  { %v2415_v0 = vmul.f32 1.442695, %v2413_v63 }
0x11d1   :  { %v2433_v5 = vpop.permute.xlu1 %2432 }
0x11d2   :  { %8518 = vpow2.f32 %v2415_v0  ;;  %v2438_v6 = vsel %vm600_vm2, %v2433_v5, 0  ;;  %v8133_v0 = vld [vmem:[#allocation16 + $0x108] ss:$16 sps:$4 sm:$0xff]   ;;  %v8135_v5 = vld [vmem:[#allocation16 + $0x10c] ss:$16 sps:$4 sm:$0xff]  }
0x11d3   :  { %7721 = vmatpush3.bf16.msra.mxu0 %v2438_v6  ;;  %v8138_v6 = vld [vmem:[#allocation16 + $0x124] ss:$16 sps:$4 sm:$0xff]  }
0x11d4   :  { %7732 = vmatprep.subr.bf16.mxu0 %v8932_v4 }
0x11dc   :  { %v8519_v10 = vpop.eup %8518 }
0x11dd   :  { %v2419_v52 = vsel %vm572_vm3, %v8519_v10, 0.0 }
0x11de   :  { %2420 = vadd.xlane.f32.xlu0 %v2419_v52  ;;  %v8139_v52 = vld [vmem:[#allocation16 + $0x128] ss:$16 sps:$4 sm:$0xff]  }
0x11e1   :  { %v2412_v11 = vpop.xlane.xlu0 %2411 }
0x11e2   :  { %v2414_v12 = vsub.f32 %v2401_v50, %v2412_v11 }
0x11e4   :  { %v2417_v13 = vmul.f32 1.442695, %v2414_v12 }
0x11e6   :  { %8520 = vpow2.f32 %v2417_v13 }
0x11f0   :  { %v8521_v17 = vpop.eup %8520 }
0x11f1   :  { %v2422_v3 = vsel %vm572_vm3, %v8521_v17, 0.0 }
0x11f2   :  { %2423 = vadd.xlane.f32.xlu0 %v2422_v3 }
0x1208   :  { %2481 = vrot.lane.b32.xlu0 %v2094_v26, %s8925_s2  ;;  %v8125_v26 = vld [vmem:[#allocation10 + $0x58] sm:$0xff]  }
0x126b   :  { %v2421_v9 = vpop.xlane.xlu0 %2420 }
0x126c   :  { %8522 = vrcp.f32 %v2421_v9 }
0x1276   :  { %v8523_v20 = vpop.eup %8522 }
0x1277   :  { %v2427_v23 = vmul.f32 %v8523_v20, %v8519_v10  ;;  %v8141_v10 = vld [vmem:[#allocation16 + $0x12c] ss:$16 sps:$4 sm:$0xff]  }
0x1279   :  { %v2429_v24 = vpack.c.bf16 %v2427_v23, %v2427_v23  ;;  %v8144_v23 = vld [vmem:[#allocation16 + $0x144] ss:$16 sps:$4 sm:$0xff]  }
0x127b   :  { %7723 = vmatmul.mubr.msk.bf16.vlgmr.msra.gmra.mrb[32].mxu0 %vm572_vm3, %v2429_v24  ;;  %v8147_v24 = vld [vmem:[#allocation16 + $0x14c] ss:$16 sps:$4 sm:$0xff]  }
0x127c   :  { %7748 = vmatprep.mubr.msk.bf16.mxu0 %vm8934_vm0, %v8932_v4  ;;  %7733 = vmatpush3.bf16.msra.mxu0 %v8122_v21  ;;  %v8156_v21 = vld [vmem:[#allocation16 + $0x184] ss:$16 sps:$4 sm:$0xff]  }
0x127d   :  { %7734 = vmatprep.subr.bf16.mxu0 %v8932_v4 }
0x127f   :  { %v2424_v1 = vpop.xlane.xlu0 %2423 }
0x1280   :  { %8524 = vrcp.f32 %v2424_v1  ;;  %7735 = vmatpush3.bf16.msra.mxu0 %v8123_v22  ;;  %v8142_v1 = vld [vmem:[#allocation16 + $0x140] ss:$16 sps:$4 sm:$0xff]   ;;  %v8159_v22 = vld [vmem:[#allocation16 + $0x18c] ss:$16 sps:$4 sm:$0xff]  }
0x1281   :  { %7736 = vmatprep.subr.bf16.mxu0 %v8932_v4 }
0x1283   :  { %v2482_v2 = vpop.permute.xlu0 %2481 }
0x1284   :  { %v2487_v7 = vsel %vm600_vm2, %v2482_v2, 0  ;;  %7737 = vmatpush3.bf16.msra.mxu0 %v8124_v25  ;;  %v8145_v2 = vld [vmem:[#allocation16 + $0x148] ss:$16 sps:$4 sm:$0xff]   ;;  %v8154_v25 = vld [vmem:[#allocation16 + $0x180] ss:$16 sps:$4 sm:$0xff]  }
0x1285   :  { %7727 = vmatpush3.bf16.msra.mxu1 %v2487_v7  ;;  %7738 = vmatprep.subr.bf16.mxu0 %v8932_v4  ;;  %v8150_v7 = vld [vmem:[#allocation16 + $0x164] ss:$16 sps:$4 sm:$0xff]  }
0x1288   :  { %7739 = vmatpush3.bf16.msra.mxu0 %v8125_v26  ;;  %v8157_v26 = vld [vmem:[#allocation16 + $0x188] ss:$16 sps:$4 sm:$0xff]  }
0x1289   :  { %7740 = vmatprep.subr.bf16.mxu0 %v8932_v4 }
0x128a   :  { %v8525_v8 = vpop.eup %8524 }
0x128b   :  { %v2428_v15 = vmul.f32 %v8525_v8, %v8521_v17  ;;  %v8153_v8 = vld [vmem:[#allocation16 + $0x16c] ss:$16 sps:$4 sm:$0xff]  }
0x128c   :  { %7741 = vmatpush3.bf16.msra.mxu0 %v8126_v27  ;;  %v8162_v27 = vld [vmem:[#allocation16 + $0x1a4] ss:$16 sps:$4 sm:$0xff]  }
0x128d   :  { %v2430_v16 = vpack.c.bf16 %v2428_v15, %v2428_v15  ;;  %7742 = vmatprep.subr.bf16.mxu0 %v8932_v4  ;;  %v8148_v15 = vld [vmem:[#allocation16 + $0x160] ss:$16 sps:$4 sm:$0xff]  }
0x128f   :  { %7729 = vmatmul.mubr.msk.bf16.vlgmr.msra.gmra.mrb[60].mxu1 %vm572_vm3, %v2430_v16  ;;  %v8151_v16 = vld [vmem:[#allocation16 + $0x168] ss:$16 sps:$4 sm:$0xff]  }
0x1290   :  { %2938 = vmatprep.mubr.bf16.mxu1 %v8933_v32  ;;  %7743 = vmatpush3.bf16.msra.mxu0 %v8127_v28  ;;  %v8165_v28 = vld [vmem:[#allocation16 + $0x1ac] ss:$16 sps:$4 sm:$0xff]  }
0x1291   :  { %7744 = vmatprep.subr.bf16.mxu0 %v8932_v4 }
0x1294   :  { %7745 = vmatpush3.bf16.msra.mxu0 %v8128_v29  ;;  %v8160_v29 = vld [vmem:[#allocation16 + $0x1a0] ss:$16 sps:$4 sm:$0xff]  }
0x1295   :  { %7746 = vmatprep.subr.bf16.mxu0 %v8932_v4 }
0x1298   :  { %7747 = vmatpush3.bf16.msra.mxu0 %v8129_v37  ;;  %v8169_v37 = vld [vmem:[#allocation16 + $0x1c8] ss:$16 sps:$4 sm:$0xff]  }
0x1299   :  { %2949 = vmatprep.subr.bf16.mxu0 %v8135_v5  ;;  %v8178_v5 = vld [vmem:[#allocation17 + $0x140] sm:$0xff]  }
0x134e   :  { %v2474_v30 = vpop.f32.mrb[32].mxu0 }
0x134f   :  { %v7724_v31 = vpop.f32.mrb[33].mxu0 }
0x1350   :  { %v2477_v33 = vpop.f32.mrb[34].mxu0  ;;  %v8168_v31 = vld [vmem:[#allocation16 + $0x1c4] ss:$16 sps:$4 sm:$0xff]  }
0x1351   :  { %v7725_v34 = vpop.f32.mrb[35].mxu0  ;;  %v8171_v33 = vld [vmem:[#allocation16 + $0x1cc] ss:$16 sps:$4 sm:$0xff]  }
0x1352   :  { %v8166_v34 = vld [vmem:[#allocation16 + $0x1c0] ss:$16 sps:$4 sm:$0xff]  }
0x1362   :  { %v2523_v38 = vpop.f32.mrb[60].mxu1 }
0x1363   :  { %v7960_v39 = vpack.i.bf16 %v2523_v38, %v2474_v30  ;;  %v7730_v18 = vpop.f32.mrb[61].mxu1  ;;  %v8163_v30 = vld [vmem:[#allocation16 + $0x1a8] ss:$16 sps:$4 sm:$0xff]   ;;  %v8174_v38 = vld [vmem:[#allocation16 + $0x1e4] ss:$16 sps:$4 sm:$0xff]  }
0x1364   :  { %v2526_v40 = vpop.f32.mrb[62].mxu1  ;;  %v8175_v18 = vld [vmem:[#allocation16 + $0x1e8] ss:$16 sps:$4 sm:$0xff]  }
0x1365   :  { %7961 = vrot.lane.b32.xlu1 %v7960_v39, %s8925_s2  ;;  %v7731_v41 = vpop.f32.mrb[63].mxu1  ;;  %v8172_v39 = vld [vmem:[#allocation16 + $0x1e0] ss:$16 sps:$4 sm:$0xff]   ;;  %v8177_v40 = vld [vmem:[#allocation16 + $0x1ec] ss:$16 sps:$4 sm:$0xff]  }
0x13d7   :  { %v7962_v14 = vpop.permute.xlu1 %7961 }
0x13d8   :  { %v7964_v42 = vunpack.i.h.bf16 %v7962_v14  ;;  %v7963_v43 = vunpack.i.l.bf16 %v7962_v14 }
0x13da   :  { %v2538_v44 = vsel %vm479_vm1, %v9394_v46, %v7964_v42  ;;  %v2537_v45 = vsel %vm479_vm1, %v9392_v19, %v7963_v43  ;;  %v8130_v19 = vld [vmem:[#allocation16 + $0x100] ss:$16 sps:$4 sm:$0xff]   ;;  %v8132_v46 = vld [vmem:[#allocation16 + $0x104] ss:$16 sps:$4 sm:$0xff]  }
0x13db   :  { %v2556_v47 = vpack.c.bf16 %v2538_v44, %v2537_v45  ;;  %2906 = vmatprep.subr.bf16.mxu1 %v8132_v46 }
0x13dc   :  { %2907 = vmatpush1.bf16.msra.mxu1 %v8130_v19 }
0x13dd   :  { %7749 = vmatmul.mubr.bf16.vlgmr.msra.gmra.mrb[36].mxu0 %v2556_v47  ;;  %2908 = vmatprep.subr.bf16.mxu1 %v8138_v6  ;;  %v8179_v6 = vld [vmem:[#allocation17 + $0x1c0] sm:$0xff]  }
0x13de   :  { %2981 = vmatprep.mubr.bf16.mxu0 %v8933_v32  ;;  %2950 = vmatpush1.bf16.msra.mxu0 %v8133_v0 }
0x13df   :  { %2951 = vmatprep.subr.bf16.mxu0 %v8141_v10  ;;  %v8180_v10 = vld [vmem:[#allocation17 + $0x100] sm:$0xff]  }
0x13e2   :  { %2952 = vmatpush1.bf16.msra.mxu0 %v8139_v52  ;;  %v8182_v52 = vld [vmem:[#allocation17 + $0x148] sm:$0xff]  }
0x13e3   :  { %2953 = vmatprep.subr.bf16.mxu0 %v8147_v24  ;;  %v8192_v24 = vld [vmem:[#allocation17 + $0x118] sm:$0xff]  }
0x13e6   :  { %2954 = vmatpush1.bf16.msra.mxu0 %v8145_v2  ;;  %v8194_v2 = vld [vmem:[#allocation17 + $0x160] sm:$0xff]  }
0x13e7   :  { %2955 = vmatprep.subr.bf16.mxu0 %v8153_v8  ;;  %v8196_v8 = vld [vmem:[#allocation17 + $0x120] sm:$0xff]  }
0x13ea   :  { %2956 = vmatpush1.bf16.msra.mxu0 %v8151_v16  ;;  %v8198_v16 = vld [vmem:[#allocation17 + $0x168] sm:$0xff]  }
0x13eb   :  { %2957 = vmatprep.subr.bf16.mxu0 %v8159_v22  ;;  %v8200_v22 = vld [vmem:[#allocation17 + $0x128] sm:$0xff]  }
0x13ee   :  { %2958 = vmatpush1.bf16.msra.mxu0 %v8157_v26  ;;  %v8202_v26 = vld [vmem:[#allocation17 + $0x170] sm:$0xff]  }
0x13ef   :  { %2959 = vmatprep.subr.bf16.mxu0 %v8165_v28  ;;  %v8204_v28 = vld [vmem:[#allocation17 + $0x130] sm:$0xff]  }
0x13f2   :  { %2960 = vmatpush1.bf16.msra.mxu0 %v8163_v30  ;;  %v8206_v30 = vld [vmem:[#allocation17 + $0x178] sm:$0xff]  }
0x13f3   :  { %2961 = vmatprep.subr.bf16.mxu0 %v8171_v33  ;;  %v8208_v33 = vld [vmem:[#allocation17 + $0x138] sm:$0xff]  }
0x13f6   :  { %2962 = vmatpush1.bf16.msra.mxu0 %v8169_v37  ;;  %v6954_v37 = vld [vmem:[%s9813_s10 + $0x1] ss:$4 sm:$0xf] }
0x13f7   :  { %2963 = vmatprep.subr.bf16.mxu0 %v8177_v40  ;;  %v2741_v40 = vrot.slane %v6954_v37, %v9289_v56 }
0x13fa   :  { %2964 = vmatpush1.bf16.msra.mxu0 %v8175_v18  ;;  %v2733_v18 = vrot.slane %v6954_v37, %v9175_v55 }
0x13fb   :  { %7398 = vmatprep.subr.bf16.mxu0 %v8179_v6 }
0x14b0   :  { %v2644_v49 = vpop.f32.mrb[36].mxu0 }
0x14b1   :  { %v2645_v50 = vadd.f32 %v6943_v48, %v2644_v49  ;;  %v7750_v51 = vpop.f32.mrb[37].mxu0 }
0x14b2   :  { %v2647_v58 = vpop.f32.mrb[38].mxu0 }
0x14b3   :  { %v9424_v60 = vadd.f32 %v2645_v50, %v9318_v35  ;;  %v2648_v61 = vadd.f32 %v6943_v48, %v2647_v58  ;;  %v7751_v62 = vpop.f32.mrb[39].mxu0  ;;  %v8136_v35 = vld [vmem:[#allocation16 + $0x120] ss:$16 sps:$4 sm:$0xff]   ;;  %v6952_v48 = vld [vmem:[#allocation13 + $0x1] ss:$0 sm:$0xff] }
0x14b4   :  { %2909 = vmatpush1.bf16.msra.mxu1 %v8136_v35  ;;  %v8181_v35 = vld [vmem:[#allocation17 + $0x180] sm:$0xff]  }
0x14b5   :  { %v9427_v63 = vadd.f32 %v2648_v61, %v9322_v36  ;;  %2655 = vadd.xlane.f32.xlu1 %v9424_v60  ;;  %2910 = vmatprep.subr.bf16.mxu1 %v8144_v23  ;;  %v6953_v61 = vld [vmem:[#allocation14 + $0x1] ss:$0 sm:$0xff] }
0x14b6   :  { %v8191_v23 = vld [vmem:[#allocation17 + $0x1d8] sm:$0xff]  }
0x14b7   :  { %2657 = vadd.xlane.f32.xlu0 %v9427_v63 }
0x14b8   :  { %2911 = vmatpush1.bf16.msra.mxu1 %v8142_v1  ;;  %v8193_v1 = vld [vmem:[#allocation17 + $0x198] sm:$0xff]  }
0x14b9   :  { %2912 = vmatprep.subr.bf16.mxu1 %v8150_v7  ;;  %v8195_v7 = vld [vmem:[#allocation17 + $0x1e0] sm:$0xff]  }
0x14bc   :  { %2913 = vmatpush1.bf16.msra.mxu1 %v8148_v15  ;;  %v8197_v15 = vld [vmem:[#allocation17 + $0x1a0] sm:$0xff]  }
0x14bd   :  { %2914 = vmatprep.subr.bf16.mxu1 %v8156_v21  ;;  %v8199_v21 = vld [vmem:[#allocation17 + $0x1e8] sm:$0xff]  }
0x14c0   :  { %2915 = vmatpush1.bf16.msra.mxu1 %v8154_v25  ;;  %v8201_v25 = vld [vmem:[#allocation17 + $0x1a8] sm:$0xff]  }
0x14c1   :  { %2916 = vmatprep.subr.bf16.mxu1 %v8162_v27  ;;  %v8203_v27 = vld [vmem:[#allocation17 + $0x1f0] sm:$0xff]  }
0x14c4   :  { %2917 = vmatpush1.bf16.msra.mxu1 %v8160_v29  ;;  %v8205_v29 = vld [vmem:[#allocation17 + $0x1b0] sm:$0xff]  }
0x14c5   :  { %2918 = vmatprep.subr.bf16.mxu1 %v8168_v31  ;;  %v8207_v31 = vld [vmem:[#allocation17 + $0x1f8] sm:$0xff]  }
0x14c8   :  { %2919 = vmatpush1.bf16.msra.mxu1 %v8166_v34  ;;  %v8209_v34 = vld [vmem:[#allocation17 + $0x1b8] sm:$0xff]  }
0x14c9   :  { %2920 = vmatprep.subr.bf16.mxu1 %v8174_v38  ;;  %v2729_v38 = vrot.slane %v6954_v37, %v9185_v59 }
0x14cc   :  { %2921 = vmatpush1.bf16.msra.mxu1 %v8172_v39  ;;  %v2737_v39 = vrot.slane %v6954_v37, %v9181_v57 }
0x14cd   :  { %7376 = vmatprep.subr.bf16.mxu1 %v8178_v5 }
0x1542   :  { %v2656_v36 = vpop.xlane.xlu1 %2655 }
0x1543   :  { %v2659_v11 = vmul.f32 0.0078125, %v2656_v36  ;;  %v8183_v36 = vld [vmem:[#allocation17 + $0x1c8] sm:$0xff]  }
0x1544   :  { %v2658_v12 = vpop.xlane.xlu0 %2657 }
0x1545   :  { %v9432_v13 = vsub.f32 %v9424_v60, %v2659_v11  ;;  %v2660_v17 = vmul.f32 0.0078125, %v2658_v12  ;;  %v8184_v11 = vld [vmem:[#allocation17 + $0x108] sm:$0xff]  }
0x1546   :  { %v8185_v12 = vld [vmem:[#allocation17 + $0x188] sm:$0xff]  }
0x1547   :  { %v9435_v3 = vsub.f32 %v9427_v63, %v2660_v17  ;;  %v2663_v9 = vmul.f32 %v9432_v13, %v9432_v13  ;;  %v8187_v17 = vld [vmem:[#allocation17 + $0x1d0] sm:$0xff]  }
0x1549   :  { %2665 = vadd.xlane.f32.xlu0 %v2663_v9  ;;  %v2664_v20 = vmul.f32 %v9435_v3, %v9435_v3  ;;  %v8189_v9 = vld [vmem:[#allocation17 + $0x190] sm:$0xff]  }
0x154b   :  { %2667 = vadd.xlane.f32.xlu1 %v2664_v20  ;;  %v8190_v20 = vld [vmem:[#allocation17 + $0x158] sm:$0xff]  }
0x15d6   :  { %v2666_v41 = vpop.xlane.xlu0 %2665 }
0x15d7   :  { %v2669_v14 = vmul.f32 0.0078125, %v2666_v41 }
0x15d8   :  { %v2668_v42 = vpop.xlane.xlu1 %2667 }
0x15d9   :  { %v2671_v43 = vadd.f32 1e-05, %v2669_v14  ;;  %v2670_v44 = vmul.f32 0.0078125, %v2668_v42 }
0x15db   :  { %8526 = vrsqrt.f32 %v2671_v43  ;;  %v2672_v45 = vadd.f32 1e-05, %v2670_v44 }
0x15dd   :  { %8528 = vrsqrt.f32 %v2672_v45 }
0x15e5   :  { %v8527_v47 = vpop.eup %8526 }
0x15e6   :  { %v2675_v49 = vmul.f32 %v8527_v47, %v9432_v13  ;;  %v8186_v13 = vld [vmem:[#allocation17 + $0x150] sm:$0xff]  }
0x15e7   :  { %v8529_v50 = vpop.eup %8528 }
0x15e8   :  { %v2676_v51 = vmul.f32 %v8529_v50, %v9435_v3  ;;  %v2681_v58 = vmul.f32 %v6952_v48, %v2675_v49  ;;  %v8188_v3 = vld [vmem:[#allocation17 + $0x110] sm:$0xff]  }
0x15ea   :  { %v2682_v62 = vmul.f32 %v6952_v48, %v2676_v51  ;;  %v2687_v19 = vadd.f32 %v6953_v61, %v2681_v58 }
0x15ec   :  { %v2688_v46 = vadd.f32 %v6953_v61, %v2682_v62 }
0x15ee   :  { %v2722_v0 = vpack.c.bf16 %v2688_v46, %v2687_v19 }
0x15f0   :  { %2939 = vmatmul.mubr.bf16.vlgmr.msra.gmra.mrb[64].mxu1 %v2722_v0  ;;  %2982 = vmatmul.mubr.bf16.vlgmr.msra.gmra.mrb[40].mxu0 %v2722_v0 }
0x15f1   :  { %7377 = vmatpush3.bf16.msra.mxu1 %v8180_v10  ;;  %7399 = vmatpush3.bf16.msra.mxu0 %v8181_v35 }
0x15f2   :  { %7378 = vmatprep.subr.bf16.mxu1 %v8182_v52  ;;  %7400 = vmatprep.subr.bf16.mxu0 %v8183_v36 }
0x15f5   :  { %7379 = vmatpush3.bf16.msra.mxu1 %v8184_v11  ;;  %7401 = vmatpush3.bf16.msra.mxu0 %v8185_v12 }
0x15f6   :  { %7380 = vmatprep.subr.bf16.mxu1 %v8186_v13  ;;  %7402 = vmatprep.subr.bf16.mxu0 %v8187_v17 }
0x15f9   :  { %7381 = vmatpush3.bf16.msra.mxu1 %v8188_v3  ;;  %7403 = vmatpush3.bf16.msra.mxu0 %v8189_v9 }
0x15fa   :  { %7382 = vmatprep.subr.bf16.mxu1 %v8190_v20  ;;  %7404 = vmatprep.subr.bf16.mxu0 %v8191_v23 }
0x15fd   :  { %7383 = vmatpush3.bf16.msra.mxu1 %v8192_v24  ;;  %7405 = vmatpush3.bf16.msra.mxu0 %v8193_v1 }
0x15fe   :  { %7384 = vmatprep.subr.bf16.mxu1 %v8194_v2  ;;  %7406 = vmatprep.subr.bf16.mxu0 %v8195_v7 }
0x1601   :  { %7385 = vmatpush3.bf16.msra.mxu1 %v8196_v8  ;;  %7407 = vmatpush3.bf16.msra.mxu0 %v8197_v15 }
0x1602   :  { %7386 = vmatprep.subr.bf16.mxu1 %v8198_v16  ;;  %7408 = vmatprep.subr.bf16.mxu0 %v8199_v21 }
0x1605   :  { %7387 = vmatpush3.bf16.msra.mxu1 %v8200_v22  ;;  %7409 = vmatpush3.bf16.msra.mxu0 %v8201_v25 }
0x1606   :  { %7388 = vmatprep.subr.bf16.mxu1 %v8202_v26  ;;  %7410 = vmatprep.subr.bf16.mxu0 %v8203_v27 }
0x1609   :  { %7389 = vmatpush3.bf16.msra.mxu1 %v8204_v28  ;;  %7411 = vmatpush3.bf16.msra.mxu0 %v8205_v29 }
0x160a   :  { %7390 = vmatprep.subr.bf16.mxu1 %v8206_v30  ;;  %7412 = vmatprep.subr.bf16.mxu0 %v8207_v31 }
0x160d   :  { %7391 = vmatpush3.bf16.msra.mxu1 %v8208_v33  ;;  %7413 = vmatpush3.bf16.msra.mxu0 %v8209_v34 }
0x160e   :  { %7752 = vmatprep.subr.bf16.mxu0 %v8932_v4 }
0x16c3   :  { %v2940_v41 = vpop.f32.mrb[64].mxu1  ;;  %v2983_v14 = vpop.f32.mrb[40].mxu0 }
0x16c4   :  { %v9451_v42 = vadd.f32 %v2940_v41, %v2729_v38  ;;  %v9453_v43 = vadd.f32 %v2983_v14, %v2737_v39  ;;  %v2942_v44 = vpop.f32.mrb[65].mxu1  ;;  %v2985_v45 = vpop.f32.mrb[41].mxu0 }
0x16c5   :  { %v9455_v47 = vadd.f32 %v2942_v44, %v2733_v18  ;;  %v9457_v48 = vadd.f32 %v2985_v45, %v2741_v40  ;;  %v2944_v49 = vpop.f32.mrb[66].mxu1  ;;  %v2987_v50 = vpop.f32.mrb[42].mxu0 }
0x16c6   :  { %v6987_v51 = vmul.f32 -1.702, %v9451_v42  ;;  %v6989_v58 = vmul.f32 -1.702, %v9453_v43  ;;  %v2945_v61 = vadd.f32 %v2944_v49, %v2729_v38  ;;  %v2988_v62 = vadd.f32 %v2987_v50, %v2737_v39  ;;  %v2946_v19 = vpop.f32.mrb[67].mxu1  ;;  %v2989_v46 = vpop.f32.mrb[43].mxu0 }
0x16c7   :  { %v6988_v0 = vmul.f32 -1.702, %v9455_v47  ;;  %v6990_v5 = vmul.f32 -1.702, %v9457_v48  ;;  %v2947_v6 = vadd.f32 %v2946_v19, %v2733_v18  ;;  %v2990_v10 = vadd.f32 %v2989_v46, %v2741_v40 }
0x16c8   :  { %v3008_v35 = vmul.f32 1.442695, %v6987_v51  ;;  %v3012_v52 = vmul.f32 1.442695, %v6989_v58  ;;  %v6991_v36 = vmul.f32 -1.702, %v2945_v61 }
0x16c9   :  { %v3010_v11 = vmul.f32 1.442695, %v6988_v0  ;;  %v3014_v12 = vmul.f32 1.442695, %v6990_v5  ;;  %v6993_v13 = vmul.f32 -1.702, %v2988_v62 }
0x16ca   :  { %8530 = vpow2.f32 %v3008_v35  ;;  %v3016_v17 = vmul.f32 1.442695, %v6991_v36  ;;  %v6992_v3 = vmul.f32 -1.702, %v2947_v6  ;;  %v6994_v9 = vmul.f32 -1.702, %v2990_v10 }
0x16cb   :  { %8532 = vpow2.f32 %v3012_v52  ;;  %v3020_v20 = vmul.f32 1.442695, %v6993_v13 }
0x16cc   :  { %8534 = vpow2.f32 %v3010_v11  ;;  %v3018_v23 = vmul.f32 1.442695, %v6992_v3  ;;  %v3022_v24 = vmul.f32 1.442695, %v6994_v9 }
0x16cd   :  { %8536 = vpow2.f32 %v3014_v12 }
0x16ce   :  { %8538 = vpow2.f32 %v3016_v17 }
0x16cf   :  { %8540 = vpow2.f32 %v3020_v20 }
0x16d0   :  { %8542 = vpow2.f32 %v3018_v23 }
0x16d1   :  { %8544 = vpow2.f32 %v3022_v24 }
0x16d4   :  { %v8531_v1 = vpop.eup %8530 }
0x16d5   :  { %v8533_v2 = vpop.eup %8532  ;;  %v3024_v7 = vadd.f32 1.0, %v8531_v1 }
0x16d6   :  { %v8535_v8 = vpop.eup %8534  ;;  %v3026_v15 = vadd.f32 1.0, %v8533_v2  ;;  %v8210_v2 = vld [vmem:[#allocation8 + $0x180] ss:$12 sps:$4 sm:$0xff]  }
0x16d7   :  { %v8537_v16 = vpop.eup %8536  ;;  %8546 = vrcp.f32 %v3024_v7  ;;  %v3025_v21 = vadd.f32 1.0, %v8535_v8  ;;  %v8212_v7 = vld [vmem:[#allocation8 + $0x184] ss:$12 sps:$4 sm:$0xff]   ;;  %v8213_v8 = vld [vmem:[#allocation8 + $0x188] ss:$12 sps:$4 sm:$0xff]  }
0x16d8   :  { %v8539_v22 = vpop.eup %8538  ;;  %8548 = vrcp.f32 %v3026_v15  ;;  %v3027_v25 = vadd.f32 1.0, %v8537_v16  ;;  %v8216_v15 = vld [vmem:[#allocation8 + $0x19c] ss:$12 sps:$4 sm:$0xff]   ;;  %3622 = vmatprep.subr.bf16.mxu1 %v8212_v7  ;;  %v8217_v16 = vld [vmem:[#allocation8 + $0x1a0] ss:$12 sps:$4 sm:$0xff]  }
0x16d9   :  { %v8541_v26 = vpop.eup %8540  ;;  %8550 = vrcp.f32 %v3025_v21  ;;  %v3028_v27 = vadd.f32 1.0, %v8539_v22  ;;  %v8214_v21 = vld [vmem:[#allocation8 + $0x198] ss:$12 sps:$4 sm:$0xff]  }
0x16da   :  { %v8543_v28 = vpop.eup %8542  ;;  %8552 = vrcp.f32 %v3027_v25  ;;  %v3030_v29 = vadd.f32 1.0, %v8541_v26 }
0x16db   :  { %v8545_v30 = vpop.eup %8544  ;;  %8554 = vrcp.f32 %v3028_v27  ;;  %v3029_v31 = vadd.f32 1.0, %v8543_v28 }
0x16dc   :  { %8556 = vrcp.f32 %v3030_v29  ;;  %v3031_v33 = vadd.f32 1.0, %v8545_v30  ;;  %v8220_v30 = vld [vmem:[#allocation8 + $0x1b4] ss:$12 sps:$4 sm:$0xff]  }
0x16dd   :  { %8558 = vrcp.f32 %v3029_v31  ;;  %v8218_v31 = vld [vmem:[#allocation8 + $0x1b0] ss:$12 sps:$4 sm:$0xff]  }
0x16de   :  { %8560 = vrcp.f32 %v3031_v33  ;;  %v8221_v33 = vld [vmem:[#allocation8 + $0x1b8] ss:$12 sps:$4 sm:$0xff]  }
0x16e1   :  { %v8547_v34 = vpop.eup %8546 }
0x16e2   :  { %v8549_v37 = vpop.eup %8548  ;;  %v3048_v41 = vmul.f32 %v8547_v34, %v9451_v42  ;;  %v8224_v34 = vld [vmem:[#allocation8 + $0x1cc] ss:$12 sps:$4 sm:$0xff]  }
0x16e3   :  { %v8551_v38 = vpop.eup %8550  ;;  %v3050_v45 = vmul.f32 %v8549_v37, %v9453_v43  ;;  %v8222_v37 = vld [vmem:[#allocation8 + $0x1c8] ss:$12 sps:$4 sm:$0xff]  }
0x16e4   :  { %v8553_v39 = vpop.eup %8552  ;;  %v3049_v51 = vmul.f32 %v8551_v38, %v9455_v47  ;;  %v6995_v47 = vld [vmem:[%s9815_s12 + $0x1] ss:$0 sm:$0xff]  ;;  %v8225_v38 = vld [vmem:[#allocation8 + $0x1d0] ss:$12 sps:$4 sm:$0xff]  }
0x16e5   :  { %v8555_v18 = vpop.eup %8554  ;;  %v3051_v46 = vmul.f32 %v8553_v39, %v9457_v48  ;;  %v8228_v39 = vld [vmem:[#allocation8 + $0x1e4] ss:$12 sps:$4 sm:$0xff]  }
0x16e6   :  { %v8557_v40 = vpop.eup %8556  ;;  %v3052_v14 = vmul.f32 %v8555_v18, %v2945_v61  ;;  %v8226_v18 = vld [vmem:[#allocation8 + $0x1e0] ss:$12 sps:$4 sm:$0xff]  }
0x16e7   :  { %v8559_v44 = vpop.eup %8558  ;;  %v3054_v49 = vmul.f32 %v8557_v40, %v2988_v62  ;;  %v8229_v40 = vld [vmem:[#allocation8 + $0x1e8] ss:$12 sps:$4 sm:$0xff]  }
0x16e8   :  { %v8561_v50 = vpop.eup %8560  ;;  %v3121_v58 = vpack.c.bf16 %v3052_v14, %v3048_v41  ;;  %v3053_v19 = vmul.f32 %v8559_v44, %v2947_v6  ;;  %v8232_v41 = vld [vmem:[#allocation8 + $0x1fc] ss:$12 sps:$4 sm:$0xff]   ;;  %v8230_v14 = vld [vmem:[#allocation8 + $0x1f8] ss:$12 sps:$4 sm:$0xff]   ;;  %v8233_v44 = vld [vmem:[#allocation8 + $0x200] ss:$12 sps:$4 sm:$0xff]  }
0x16e9   :  { %v3123_v0 = vpack.c.bf16 %v3054_v49, %v3050_v45  ;;  %v3055_v5 = vmul.f32 %v8561_v50, %v2990_v10  ;;  %v8236_v45 = vld [vmem:[#allocation8 + $0x214] ss:$12 sps:$4 sm:$0xff]   ;;  %v8234_v49 = vld [vmem:[#allocation8 + $0x210] ss:$12 sps:$4 sm:$0xff]   ;;  %v8237_v50 = vld [vmem:[#allocation8 + $0x218] ss:$12 sps:$4 sm:$0xff]  }
0x16ea   :  { %v3122_v35 = vpack.c.bf16 %v3053_v19, %v3049_v51  ;;  %v8240_v51 = vld [vmem:[#allocation8 + $0x22c] ss:$12 sps:$4 sm:$0xff]   ;;  %v8241_v19 = vld [vmem:[#allocation8 + $0x230] ss:$12 sps:$4 sm:$0xff]  }
0x16eb   :  { %v3124_v52 = vpack.c.bf16 %v3055_v5, %v3051_v46 }
0x16ec   :  { %3354 = vmatprep.mubr.bf16.mxu1 %v3122_v35 }
0x16ed   :  { %3395 = vmatprep.mubr.bf16.mxu0 %v3124_v52  ;;  %3355 = vmatmul.mubr.bf16.vlgmr.msra.gmra.mrb[68].mxu1 %v3121_v58  ;;  %v8238_v58 = vld [vmem:[#allocation8 + $0x228] ss:$12 sps:$4 sm:$0xff]  }
0x16ee   :  { %3396 = vmatmul.mubr.bf16.vlgmr.msra.gmra.mrb[44].mxu0 %v3123_v0  ;;  %3654 = vmatprep.mubr.bf16.mxu1 %v8933_v32 }
0x16ef   :  { %7768 = vmatprep.mubr.msk.bf16.mxu0 %vm8934_vm0, %v8932_v4  ;;  %7753 = vmatpush3.bf16.msra.mxu0 %v8213_v8 }
0x16f0   :  { %3623 = vmatpush1.bf16.msra.mxu1 %v8210_v2  ;;  %7754 = vmatprep.subr.bf16.mxu0 %v8932_v4 }
0x16f1   :  { %3624 = vmatprep.subr.bf16.mxu1 %v8216_v15 }
0x16f3   :  { %7755 = vmatpush3.bf16.msra.mxu0 %v8217_v16 }
0x16f4   :  { %3625 = vmatpush1.bf16.msra.mxu1 %v8214_v21  ;;  %7756 = vmatprep.subr.bf16.mxu0 %v8932_v4 }
0x16f5   :  { %3626 = vmatprep.subr.bf16.mxu1 %v8220_v30 }
0x16f7   :  { %7757 = vmatpush3.bf16.msra.mxu0 %v8221_v33 }
0x16f8   :  { %3627 = vmatpush1.bf16.msra.mxu1 %v8218_v31  ;;  %7758 = vmatprep.subr.bf16.mxu0 %v8932_v4 }
0x16f9   :  { %3628 = vmatprep.subr.bf16.mxu1 %v8224_v34 }
0x16fb   :  { %7759 = vmatpush3.bf16.msra.mxu0 %v8225_v38 }
0x16fc   :  { %3629 = vmatpush1.bf16.msra.mxu1 %v8222_v37  ;;  %7760 = vmatprep.subr.bf16.mxu0 %v8932_v4 }
0x16fd   :  { %3630 = vmatprep.subr.bf16.mxu1 %v8228_v39 }
0x16ff   :  { %7761 = vmatpush3.bf16.msra.mxu0 %v8229_v40 }
0x1700   :  { %3631 = vmatpush1.bf16.msra.mxu1 %v8226_v18  ;;  %7762 = vmatprep.subr.bf16.mxu0 %v8932_v4 }
0x1701   :  { %3632 = vmatprep.subr.bf16.mxu1 %v8232_v41 }
0x1703   :  { %7763 = vmatpush3.bf16.msra.mxu0 %v8233_v44 }
0x1704   :  { %3633 = vmatpush1.bf16.msra.mxu1 %v8230_v14  ;;  %7764 = vmatprep.subr.bf16.mxu0 %v8932_v4 }
0x1705   :  { %3634 = vmatprep.subr.bf16.mxu1 %v8236_v45 }
0x1707   :  { %7765 = vmatpush3.bf16.msra.mxu0 %v8237_v50 }
0x1708   :  { %3635 = vmatpush1.bf16.msra.mxu1 %v8234_v49  ;;  %7766 = vmatprep.subr.bf16.mxu0 %v8932_v4 }
0x1709   :  { %3636 = vmatprep.subr.bf16.mxu1 %v8240_v51 }
0x170b   :  { %7767 = vmatpush3.bf16.msra.mxu0 %v8241_v19 }
0x170c   :  { %3637 = vmatpush1.bf16.msra.mxu1 %v8238_v58  ;;  %7796 = vmatprep.subr.bf16.mxu0 %v8932_v4 }
0x170d   :  { %7772 = vmatprep.subr.bf16.mxu1 %v8932_v4 }
0x17c0   :  { %v7392_v42 = vpop.f32.mrb[68].mxu1 }
0x17c1   :  { %v7414_v43 = vpop.f32.mrb[44].mxu0  ;;  %v7393_v48 = vpop.f32.mrb[69].mxu1 }
0x17c2   :  { %v7394_v61 = vadd.f32 %v7393_v48, %v7392_v42  ;;  %v7415_v62 = vpop.f32.mrb[45].mxu0  ;;  %v7395_v6 = vpop.f32.mrb[70].mxu1 }
0x17c3   :  { %v7416_v10 = vadd.f32 %v7415_v62, %v7414_v43  ;;  %v7417_v36 = vpop.f32.mrb[46].mxu0  ;;  %v7396_v11 = vpop.f32.mrb[71].mxu1 }
0x17c4   :  { %v3357_v12 = vadd.f32 %v7394_v61, %v6995_v47  ;;  %v7397_v13 = vadd.f32 %v7396_v11, %v7395_v6  ;;  %v7418_v17 = vpop.f32.mrb[47].mxu0 }
0x17c5   :  { %v7419_v3 = vadd.f32 %v7418_v17, %v7417_v36  ;;  %v7030_v17 = vld [vmem:[%s9807_s4 + $0x2] ss:$4 sm:$0x7] }
0x17c6   :  { %v3398_v9 = vadd.f32 %v7416_v10, %v3357_v12  ;;  %v3360_v20 = vadd.f32 %v7397_v13, %v6995_v47  ;;  %v7028_v47 = vld [vmem:[#allocation5 + $0x2] ss:$0 sm:$0xff]  ;;  %v7029_v10 = vld [vmem:[#allocation7 + $0x2] ss:$0 sm:$0xff] }
0x17c8   :  { %v3401_v23 = vadd.f32 %v7419_v3, %v3360_v20  ;;  %v9474_v24 = vadd.f32 %v3398_v9, %v9424_v60  ;;  %v3486_v3 = vrot.slane %v7030_v17, %v9175_v55 }
0x17ca   :  { %3408 = vadd.xlane.f32.xlu0 %v9474_v24  ;;  %v9478_v1 = vadd.f32 %v3401_v23, %v9427_v63  ;;  %v3490_v23 = vrot.slane %v7030_v17, %v9181_v57 }
0x17cc   :  { %3410 = vadd.xlane.f32.xlu1 %v9478_v1 }
0x1857   :  { %v3409_v60 = vpop.xlane.xlu0 %3408 }
0x1858   :  { %v3412_v63 = vmul.f32 0.0078125, %v3409_v60 }
0x1859   :  { %v3411_v22 = vpop.xlane.xlu1 %3410 }
0x185a   :  { %v3414_v25 = vsub.f32 %v9474_v24, %v3412_v63  ;;  %v3413_v26 = vmul.f32 0.0078125, %v3411_v22  ;;  %v3482_v22 = vrot.slane %v7030_v17, %v9185_v59 }
0x185c   :  { %v3415_v27 = vsub.f32 %v9478_v1, %v3413_v26  ;;  %v3416_v28 = vmul.f32 %v3414_v25, %v3414_v25 }
0x185e   :  { %3418 = vadd.xlane.f32.xlu0 %v3416_v28  ;;  %v3417_v29 = vmul.f32 %v3415_v27, %v3415_v27 }
0x1860   :  { %3420 = vadd.xlane.f32.xlu1 %v3417_v29 }
0x18eb   :  { %v3419_v46 = vpop.xlane.xlu0 %3418 }
0x18ec   :  { %v3422_v0 = vmul.f32 0.0078125, %v3419_v46 }
0x18ed   :  { %v3421_v5 = vpop.xlane.xlu1 %3420 }
0x18ee   :  { %v3424_v35 = vadd.f32 1e-05, %v3422_v0  ;;  %v3423_v52 = vmul.f32 0.0078125, %v3421_v5 }
0x18f0   :  { %8562 = vrsqrt.f32 %v3424_v35  ;;  %v3425_v42 = vadd.f32 1e-05, %v3423_v52 }
0x18f2   :  { %8564 = vrsqrt.f32 %v3425_v42 }
0x18fa   :  { %v8563_v43 = vpop.eup %8562 }
0x18fb   :  { %v3428_v48 = vmul.f32 %v8563_v43, %v3414_v25 }
0x18fc   :  { %v8565_v61 = vpop.eup %8564 }
0x18fd   :  { %v3429_v62 = vmul.f32 %v8565_v61, %v3415_v27  ;;  %v3434_v6 = vmul.f32 %v7028_v47, %v3428_v48 }
0x18ff   :  { %v3435_v36 = vmul.f32 %v7028_v47, %v3429_v62  ;;  %v3440_v11 = vadd.f32 %v7029_v10, %v3434_v6 }
0x1901   :  { %v3441_v12 = vadd.f32 %v7029_v10, %v3435_v36 }
0x1903   :  { %v3475_v13 = vpack.c.bf16 %v3441_v12, %v3440_v11 }
0x1905   :  { %3655 = vmatmul.mubr.bf16.vlgmr.msra.gmra.mrb[72].mxu1 %v3475_v13  ;;  %7769 = vmatmul.mubr.bf16.vlgmr.msra.gmra.mrb[48].mxu0 %v3475_v13 }
0x1906   :  { %7774 = vmatprep.mubr.msk.bf16.mxu1 %vm8934_vm0, %v8932_v4  ;;  %7798 = vmatprep.mubr.msk.bf16.mxu0 %vm8934_vm0, %v8932_v4 }
0x19d8   :  { %v3656_v9 = vpop.f32.mrb[72].mxu1  ;;  %v3699_v20 = vpop.f32.mrb[48].mxu0 }
0x19d9   :  { %v3658_v2 = vpop.f32.mrb[73].mxu1  ;;  %v7770_v7 = vpop.f32.mrb[49].mxu0  ;;  %v3657_v28 = vadd.f32 %v3656_v9, %v3482_v22  ;;  %v3700_v31 = vadd.f32 %v3699_v20, %v3490_v23 }
0x19da   :  { %v3659_v8 = vadd.f32 %v3658_v2, %v3486_v3  ;;  %v3660_v15 = vpop.f32.mrb[74].mxu1  ;;  %v3702_v16 = vpop.f32.mrb[50].mxu0 }
0x19db   :  { %v9501_v21 = vadd.f32 %v3702_v16, %v3490_v23  ;;  %v3662_v60 = vpop.f32.mrb[75].mxu1  ;;  %v7771_v63 = vpop.f32.mrb[51].mxu0  ;;  %v3706_v30 = vpack.c.bf16 %v3657_v28, %v3657_v28  ;;  %v3661_v34 = vadd.f32 %v3660_v15, %v3482_v22  ;;  %v9511_v37 = vpack.c.bf16 %v3700_v31, %v3700_v31 }
0x19dc   :  { %v3708_v25 = vpack.c.bf16 %v3659_v8, %v3659_v8  ;;  %v3663_v27 = vadd.f32 %v3662_v60, %v3486_v3 }
0x19dd   :  { %v3707_v38 = vpack.c.bf16 %v3661_v34, %v3661_v34  ;;  %v3832_v39 = vsel %vm600_vm2, %v9511_v37, 0  ;;  %v3711_v12 = vpack.c.bf16 %v9501_v21, %v9501_v21 }
0x19de   :  { %v3716_v26 = vsel %vm479_vm1, %v3708_v25, 0  ;;  %v3709_v29 = vpack.c.bf16 %v3663_v27, %v3663_v27 }
0x19df   :  { %7773 = vmatpush3.bf16.xpose.msra.mxu1 %v3716_v26  ;;  %v3878_v9 = vsel %vm600_vm2, %v3711_v12, 0 }
0x19e0   :  { %7778 = vmatprep.subr.bf16.mxu1 %v8932_v4  ;;  %v3762_v33 = vsel %vm479_vm1, %v3709_v29, 0 }
0x19e6   :  { %7775 = vmatmul.mubr.msk.bf16.vlgmr.msra.gmra.mrb[76].mxu1 %vm479_vm1, %v3706_v30 }
0x19e7   :  { %7779 = vmatpush3.bf16.xpose.msra.mxu1 %v3762_v33  ;;  %7780 = vmatprep.mubr.msk.bf16.mxu1 %vm8934_vm0, %v8932_v4 }
0x19e8   :  { %7784 = vmatprep.subr.bf16.mxu1 %v8932_v4 }
0x19ee   :  { %7781 = vmatmul.mubr.msk.bf16.vlgmr.msra.gmra.mrb[80].mxu1 %vm479_vm1, %v3707_v38 }
0x19ef   :  { %7785 = vmatpush3.bf16.msra.mxu1 %v3832_v39  ;;  %7786 = vmatprep.mubr.msk.bf16.mxu1 %vm8934_vm0, %v8932_v4 }
0x19f0   :  { %7790 = vmatprep.subr.bf16.mxu1 %v8932_v4 }
0x1ab9   :  { %v3752_v18 = vpop.f32.mrb[76].mxu1 }
0x1aba   :  { %v7776_v40 = vpop.f32.mrb[77].mxu1  ;;  %v3804_v41 = vsel %vm572_vm3, %v3752_v18, -inf }
0x1abb   :  { %3805 = vmax.xlane.f32.xlu0 %v3804_v41  ;;  %v3755_v14 = vpop.f32.mrb[78].mxu1 }
0x1abc   :  { %v7777_v44 = vpop.f32.mrb[79].mxu1 }
0x1ac1   :  { %v3798_v45 = vpop.f32.mrb[80].mxu1 }
0x1ac2   :  { %v7782_v49 = vpop.f32.mrb[81].mxu1  ;;  %v3807_v50 = vsel %vm572_vm3, %v3798_v45, -inf }
0x1ac3   :  { %3808 = vmax.xlane.f32.xlu1 %v3807_v50  ;;  %v3801_v51 = vpop.f32.mrb[82].mxu1 }
0x1ac4   :  { %v7783_v58 = vpop.f32.mrb[83].mxu1 }
0x1ad4   :  { %3976 = vrot.lane.b32.xlu1 %v3709_v29, %s8925_s2 }
0x1b48   :  { %v3806_v19 = vpop.xlane.xlu0 %3805 }
0x1b49   :  { %v3810_v46 = vsub.f32 %v3752_v18, %v3806_v19 }
0x1b4b   :  { %v3812_v0 = vmul.f32 1.442695, %v3810_v46 }
0x1b4d   :  { %8566 = vpow2.f32 %v3812_v0 }
0x1b50   :  { %v3809_v5 = vpop.xlane.xlu1 %3808 }
0x1b51   :  { %v3811_v35 = vsub.f32 %v3798_v45, %v3809_v5 }
0x1b53   :  { %v3814_v52 = vmul.f32 1.442695, %v3811_v35 }
0x1b54   :  { %v3977_v62 = vpop.permute.xlu1 %3976 }
0x1b55   :  { %8568 = vpow2.f32 %v3814_v52  ;;  %v3982_v7 = vsel %vm479_vm1, %v3977_v62, 0 }
0x1b57   :  { %v8567_v42 = vpop.eup %8566 }
0x1b58   :  { %v3816_v43 = vsel %vm572_vm3, %v8567_v42, 0.0 }
0x1b59   :  { %3817 = vadd.xlane.f32.xlu0 %v3816_v43 }
0x1b5f   :  { %v8569_v47 = vpop.eup %8568 }
0x1b60   :  { %v3819_v48 = vsel %vm572_vm3, %v8569_v47, 0.0 }
0x1b61   :  { %3820 = vadd.xlane.f32.xlu1 %v3819_v48 }
0x1b6f   :  { %3924 = vrot.lane.b32.xlu0 %v3708_v25, %s8925_s2 }
0x1b72   :  { %3921 = vrot.lane.b32.xlu1 %v3706_v30, %s8925_s2 }
0x1b76   :  { %3973 = vrot.lane.b32.xlu1 %v3707_v38, %s8925_s2 }
0x1be6   :  { %v3818_v61 = vpop.xlane.xlu0 %3817 }
0x1be7   :  { %8570 = vrcp.f32 %v3818_v61 }
0x1bea   :  { %v3925_v6 = vpop.permute.xlu0 %3924 }
0x1beb   :  { %v3930_v10 = vsel %vm479_vm1, %v3925_v6, 0  ;;  %v8242_v6 = vld [vmem:[#allocation10 + $0x80] sm:$0xff]  }
0x1bec   :  { %7797 = vmatpush3.bf16.xpose.msra.mxu0 %v3930_v10  ;;  %v8243_v10 = vld [vmem:[#allocation10 + $0x88] sm:$0xff]  }
0x1bed   :  { %7808 = vmatprep.subr.bf16.mxu0 %v8932_v4 }
0x1bee   :  { %v3821_v36 = vpop.xlane.xlu1 %3820 }
0x1bef   :  { %8572 = vrcp.f32 %v3821_v36  ;;  %v8244_v36 = vld [vmem:[#allocation10 + $0x90] sm:$0xff]  }
0x1bf1   :  { %v8571_v11 = vpop.eup %8570 }
0x1bf2   :  { %v3824_v13 = vmul.f32 %v8571_v11, %v8567_v42  ;;  %v3922_v17 = vpop.permute.xlu1 %3921  ;;  %v8245_v11 = vld [vmem:[#allocation10 + $0x98] sm:$0xff]  }
0x1bf3   :  { %7799 = vmatmul.mubr.msk.bf16.vlgmr.msra.gmra.mrb[52].mxu0 %vm479_vm1, %v3922_v17  ;;  %v8248_v17 = vld [vmem:[#allocation10 + $0xb0] sm:$0xff]  }
0x1bf4   :  { %v3826_v3 = vpack.c.bf16 %v3824_v13, %v3824_v13  ;;  %7810 = vmatprep.mubr.msk.bf16.mxu0 %vm8934_vm0, %v8932_v4  ;;  %v8247_v13 = vld [vmem:[#allocation10 + $0xa8] sm:$0xff]  }
0x1bf6   :  { %7787 = vmatmul.mubr.msk.bf16.vlgmr.msra.gmra.mrb[84].mxu1 %vm572_vm3, %v3826_v3  ;;  %v3974_v8 = vpop.permute.xlu1 %3973  ;;  %v8249_v3 = vld [vmem:[#allocation10 + $0xb8] sm:$0xff]  }
0x1bf7   :  { %7791 = vmatpush3.bf16.msra.mxu1 %v3878_v9  ;;  %7792 = vmatprep.mubr.msk.bf16.mxu1 %vm8934_vm0, %v8932_v4 }
0x1bf8   :  { %7802 = vmatprep.subr.bf16.mxu1 %v8932_v4 }
0x1bf9   :  { %v8573_v20 = vpop.eup %8572 }
0x1bfa   :  { %v3825_v23 = vmul.f32 %v8573_v20, %v8569_v47 }
0x1bfc   :  { %v3827_v2 = vpack.c.bf16 %v3825_v23, %v3825_v23 }
0x1bfe   :  { %7793 = vmatmul.mubr.msk.bf16.vlgmr.msra.gmra.mrb[88].mxu1 %vm572_vm3, %v3827_v2 }
0x1bff   :  { %7804 = vmatprep.mubr.msk.bf16.mxu1 %vm8934_vm0, %v8932_v4 }
0x1c00   :  { %7803 = vmatpush3.bf16.xpose.msra.mxu1 %v3982_v7 }
0x1c01   :  { %7814 = vmatprep.subr.bf16.mxu1 %v8932_v4 }
0x1c07   :  { %7805 = vmatmul.mubr.msk.bf16.vlgmr.msra.gmra.mrb[92].mxu1 %vm479_vm1, %v3974_v8 }
0x1c08   :  { %7816 = vmatprep.mubr.msk.bf16.mxu1 %vm8934_vm0, %v8932_v4 }
0x1cc6   :  { %v3966_v15 = vpop.f32.mrb[52].mxu0 }
0x1cc7   :  { %v7800_v16 = vpop.f32.mrb[53].mxu0  ;;  %v4024_v21 = vsel %vm572_vm3, %v3966_v15, -inf }
0x1cc8   :  { %4025 = vmax.xlane.f32.xlu0 %v4024_v21  ;;  %v3969_v60 = vpop.f32.mrb[54].mxu0 }
0x1cc9   :  { %v9548_v63 = vpop.f32.mrb[84].mxu1  ;;  %v7801_v22 = vpop.f32.mrb[55].mxu0 }
0x1cca   :  { %v7788_v25 = vpop.f32.mrb[85].mxu1 }
0x1ccb   :  { %v3871_v26 = vpop.f32.mrb[86].mxu1 }
0x1ccc   :  { %v7789_v27 = vpop.f32.mrb[87].mxu1 }
0x1cd1   :  { %v9550_v28 = vpop.f32.mrb[88].mxu1 }
0x1cd2   :  { %v7794_v29 = vpop.f32.mrb[89].mxu1 }
0x1cd3   :  { %v3917_v30 = vpop.f32.mrb[90].mxu1 }
0x1cd4   :  { %v7795_v31 = vpop.f32.mrb[91].mxu1  ;;  %v7063_v30 = vld [vmem:[#allocation11 + $0x2] ss:$0 sm:$0xff] }
0x1cda   :  { %v4018_v33 = vpop.f32.mrb[92].mxu1 }
0x1cdb   :  { %v7806_v34 = vpop.f32.mrb[93].mxu1  ;;  %v4027_v38 = vsel %vm572_vm3, %v4018_v33, -inf }
0x1cdc   :  { %4028 = vmax.xlane.f32.xlu1 %v4027_v38  ;;  %v4021_v39 = vpop.f32.mrb[94].mxu1 }
0x1cdd   :  { %v7807_v18 = vpop.f32.mrb[95].mxu1 }
0x1ced   :  { %4098 = vrot.lane.b32.xlu1 %v3711_v12, %s8925_s2  ;;  %v8246_v12 = vld [vmem:[#allocation10 + $0xa0] sm:$0xff]  }
0x1d55   :  { %v4026_v40 = vpop.xlane.xlu0 %4025 }
0x1d56   :  { %v4030_v41 = vsub.f32 %v3966_v15, %v4026_v40 }
0x1d58   :  { %v4032_v14 = vmul.f32 1.442695, %v4030_v41 }
0x1d5a   :  { %8574 = vpow2.f32 %v4032_v14  ;;  %v8253_v14 = vld [vmem:[#allocation16 + $0x208] ss:$16 sps:$4 sm:$0xff]  }
0x1d64   :  { %v8575_v44 = vpop.eup %8574 }
0x1d65   :  { %v4036_v45 = vsel %vm572_vm3, %v8575_v44, 0.0 }
0x1d66   :  { %4037 = vadd.xlane.f32.xlu0 %v4036_v45  ;;  %v8258_v45 = vld [vmem:[#allocation16 + $0x224] ss:$16 sps:$4 sm:$0xff]  }
0x1d69   :  { %v4029_v49 = vpop.xlane.xlu1 %4028 }
0x1d6a   :  { %v4031_v50 = vsub.f32 %v4018_v33, %v4029_v49  ;;  %v8261_v49 = vld [vmem:[#allocation16 + $0x22c] ss:$16 sps:$4 sm:$0xff]  }
0x1d6c   :  { %v4034_v51 = vmul.f32 1.442695, %v4031_v50  ;;  %v8259_v50 = vld [vmem:[#allocation16 + $0x228] ss:$16 sps:$4 sm:$0xff]  }
0x1d6d   :  { %v4099_v58 = vpop.permute.xlu1 %4098 }
0x1d6e   :  { %8576 = vpow2.f32 %v4034_v51  ;;  %v4104_v19 = vsel %vm600_vm2, %v4099_v58, 0 }
0x1d6f   :  { %7815 = vmatpush3.bf16.msra.mxu1 %v4104_v19 }
0x1d78   :  { %v8577_v46 = vpop.eup %8576 }
0x1d79   :  { %v4039_v0 = vsel %vm572_vm3, %v8577_v46, 0.0 }
0x1d7a   :  { %4040 = vadd.xlane.f32.xlu0 %v4039_v0 }
0x1d90   :  { %4049 = vrot.lane.b32.xlu0 %v9511_v37, %s8925_s2 }
0x1df3   :  { %v4038_v5 = vpop.xlane.xlu0 %4037 }
0x1df4   :  { %8578 = vrcp.f32 %v4038_v5 }
0x1dfe   :  { %v8579_v35 = vpop.eup %8578 }
0x1dff   :  { %v4044_v42 = vmul.f32 %v8579_v35, %v8575_v44  ;;  %v8255_v44 = vld [vmem:[#allocation16 + $0x20c] ss:$16 sps:$4 sm:$0xff]  }
0x1e01   :  { %v4046_v48 = vpack.c.bf16 %v4044_v42, %v4044_v42  ;;  %v8267_v42 = vld [vmem:[#allocation16 + $0x24c] ss:$16 sps:$4 sm:$0xff]  }
0x1e07   :  { %v4041_v52 = vpop.xlane.xlu0 %4040 }
0x1e08   :  { %8580 = vrcp.f32 %v4041_v52  ;;  %v8264_v52 = vld [vmem:[#allocation16 + $0x244] ss:$16 sps:$4 sm:$0xff]  }
0x1e0b   :  { %v4050_v43 = vpop.permute.xlu0 %4049 }
0x1e0c   :  { %v4055_v47 = vsel %vm600_vm2, %v4050_v43, 0  ;;  %v8262_v43 = vld [vmem:[#allocation16 + $0x240] ss:$16 sps:$4 sm:$0xff]  }
0x1e0d   :  { %7809 = vmatpush3.bf16.msra.mxu0 %v4055_v47  ;;  %v8265_v47 = vld [vmem:[#allocation16 + $0x248] ss:$16 sps:$4 sm:$0xff]  }
0x1e0e   :  { %7820 = vmatprep.subr.bf16.mxu0 %v8932_v4 }
0x1e10   :  { %7811 = vmatmul.mubr.msk.bf16.vlgmr.msra.gmra.mrb[56].mxu0 %vm572_vm3, %v4046_v48  ;;  %v8270_v48 = vld [vmem:[#allocation16 + $0x264] ss:$16 sps:$4 sm:$0xff]  }
0x1e11   :  { %7836 = vmatprep.mubr.msk.bf16.mxu0 %vm8934_vm0, %v8932_v4  ;;  %7821 = vmatpush3.bf16.msra.mxu0 %v8242_v6  ;;  %v8276_v6 = vld [vmem:[#allocation16 + $0x284] ss:$16 sps:$4 sm:$0xff]  }
0x1e12   :  { %v8581_v61 = vpop.eup %8580  ;;  %7822 = vmatprep.subr.bf16.mxu0 %v8932_v4 }
0x1e13   :  { %v4045_v37 = vmul.f32 %v8581_v61, %v8577_v46  ;;  %v8273_v61 = vld [vmem:[#allocation16 + $0x26c] ss:$16 sps:$4 sm:$0xff]  }
0x1e15   :  { %v4047_v62 = vpack.c.bf16 %v4045_v37, %v4045_v37  ;;  %7823 = vmatpush3.bf16.msra.mxu0 %v8243_v10  ;;  %v8268_v37 = vld [vmem:[#allocation16 + $0x260] ss:$16 sps:$4 sm:$0xff]   ;;  %v8279_v10 = vld [vmem:[#allocation16 + $0x28c] ss:$16 sps:$4 sm:$0xff]  }
0x1e16   :  { %7824 = vmatprep.subr.bf16.mxu0 %v8932_v4 }
0x1e17   :  { %7817 = vmatmul.mubr.msk.bf16.vlgmr.msra.gmra.mrb[96].mxu1 %vm572_vm3, %v4047_v62  ;;  %v8271_v62 = vld [vmem:[#allocation16 + $0x268] ss:$16 sps:$4 sm:$0xff]  }
0x1e18   :  { %4555 = vmatprep.mubr.bf16.mxu1 %v8933_v32 }
0x1e19   :  { %7825 = vmatpush3.bf16.msra.mxu0 %v8244_v36  ;;  %v8274_v36 = vld [vmem:[#allocation16 + $0x280] ss:$16 sps:$4 sm:$0xff]  }
0x1e1a   :  { %7826 = vmatprep.subr.bf16.mxu0 %v8932_v4 }
0x1e1d   :  { %7827 = vmatpush3.bf16.msra.mxu0 %v8245_v11  ;;  %v8277_v11 = vld [vmem:[#allocation16 + $0x288] ss:$16 sps:$4 sm:$0xff]  }
0x1e1e   :  { %7828 = vmatprep.subr.bf16.mxu0 %v8932_v4 }
0x1e21   :  { %7829 = vmatpush3.bf16.msra.mxu0 %v8246_v12  ;;  %v8282_v12 = vld [vmem:[#allocation16 + $0x2a4] ss:$16 sps:$4 sm:$0xff]  }
0x1e22   :  { %7830 = vmatprep.subr.bf16.mxu0 %v8932_v4 }
0x1e25   :  { %7831 = vmatpush3.bf16.msra.mxu0 %v8247_v13  ;;  %v8285_v13 = vld [vmem:[#allocation16 + $0x2ac] ss:$16 sps:$4 sm:$0xff]  }
0x1e26   :  { %7832 = vmatprep.subr.bf16.mxu0 %v8932_v4 }
0x1e29   :  { %7833 = vmatpush3.bf16.msra.mxu0 %v8248_v17  ;;  %v8280_v17 = vld [vmem:[#allocation16 + $0x2a0] ss:$16 sps:$4 sm:$0xff]  }
0x1e2a   :  { %7834 = vmatprep.subr.bf16.mxu0 %v8932_v4 }
0x1e2d   :  { %7835 = vmatpush3.bf16.msra.mxu0 %v8249_v3  ;;  %v8283_v3 = vld [vmem:[#allocation16 + $0x2a8] ss:$16 sps:$4 sm:$0xff]  }
0x1e2e   :  { %4566 = vmatprep.subr.bf16.mxu0 %v8255_v44  ;;  %v8298_v44 = vld [vmem:[#allocation17 + $0x240] sm:$0xff]  }
0x1ee3   :  { %v4091_v9 = vpop.f32.mrb[56].mxu0 }
0x1ee4   :  { %v7812_v20 = vpop.f32.mrb[57].mxu0 }
0x1ee5   :  { %v4094_v23 = vpop.f32.mrb[58].mxu0  ;;  %v8291_v20 = vld [vmem:[#allocation16 + $0x2cc] ss:$16 sps:$4 sm:$0xff]  }
0x1ee6   :  { %v7813_v2 = vpop.f32.mrb[59].mxu0  ;;  %v8286_v23 = vld [vmem:[#allocation16 + $0x2c0] ss:$16 sps:$4 sm:$0xff]  }
0x1ee7   :  { %v8289_v2 = vld [vmem:[#allocation16 + $0x2c8] ss:$16 sps:$4 sm:$0xff]  }
0x1eea   :  { %v4140_v7 = vpop.f32.mrb[96].mxu1 }
0x1eeb   :  { %v7965_v8 = vpack.i.bf16 %v4140_v7, %v4091_v9  ;;  %v7818_v15 = vpop.f32.mrb[97].mxu1  ;;  %v8288_v9 = vld [vmem:[#allocation16 + $0x2c4] ss:$16 sps:$4 sm:$0xff]  }
0x1eec   :  { %v4143_v16 = vpop.f32.mrb[98].mxu1  ;;  %v8294_v7 = vld [vmem:[#allocation16 + $0x2e4] ss:$16 sps:$4 sm:$0xff]   ;;  %v8295_v15 = vld [vmem:[#allocation16 + $0x2e8] ss:$16 sps:$4 sm:$0xff]  }
0x1eed   :  { %7966 = vrot.lane.b32.xlu1 %v7965_v8, %s8925_s2  ;;  %v7819_v21 = vpop.f32.mrb[99].mxu1  ;;  %v8292_v8 = vld [vmem:[#allocation16 + $0x2e0] ss:$16 sps:$4 sm:$0xff]   ;;  %v8297_v16 = vld [vmem:[#allocation16 + $0x2ec] ss:$16 sps:$4 sm:$0xff]  }
0x1f5f   :  { %v7967_v60 = vpop.permute.xlu1 %7966 }
0x1f60   :  { %v7969_v22 = vunpack.i.h.bf16 %v7967_v60  ;;  %v7968_v25 = vunpack.i.l.bf16 %v7967_v60 }
0x1f62   :  { %v4155_v26 = vsel %vm479_vm1, %v9550_v28, %v7969_v22  ;;  %v4154_v27 = vsel %vm479_vm1, %v9548_v63, %v7968_v25  ;;  %v8250_v63 = vld [vmem:[#allocation16 + $0x200] ss:$16 sps:$4 sm:$0xff]   ;;  %v8252_v28 = vld [vmem:[#allocation16 + $0x204] ss:$16 sps:$4 sm:$0xff]  }
0x1f63   :  { %v4173_v29 = vpack.c.bf16 %v4155_v26, %v4154_v27  ;;  %4523 = vmatprep.subr.bf16.mxu1 %v8252_v28 }
0x1f64   :  { %4524 = vmatpush1.bf16.msra.mxu1 %v8250_v63 }
0x1f65   :  { %7837 = vmatmul.mubr.bf16.vlgmr.msra.gmra.mrb[60].mxu0 %v4173_v29  ;;  %4525 = vmatprep.subr.bf16.mxu1 %v8258_v45  ;;  %v8299_v45 = vld [vmem:[#allocation17 + $0x2c0] sm:$0xff]  }
0x1f66   :  { %4598 = vmatprep.mubr.bf16.mxu0 %v8933_v32  ;;  %4567 = vmatpush1.bf16.msra.mxu0 %v8253_v14 }
0x1f67   :  { %4568 = vmatprep.subr.bf16.mxu0 %v8261_v49  ;;  %v8300_v49 = vld [vmem:[#allocation17 + $0x200] sm:$0xff]  }
0x1f6a   :  { %4569 = vmatpush1.bf16.msra.mxu0 %v8259_v50  ;;  %v8302_v50 = vld [vmem:[#allocation17 + $0x248] sm:$0xff]  }
0x1f6b   :  { %4570 = vmatprep.subr.bf16.mxu0 %v8267_v42  ;;  %v8312_v42 = vld [vmem:[#allocation17 + $0x218] sm:$0xff]  }
0x1f6e   :  { %4571 = vmatpush1.bf16.msra.mxu0 %v8265_v47  ;;  %v8314_v47 = vld [vmem:[#allocation17 + $0x260] sm:$0xff]  }
0x1f6f   :  { %4572 = vmatprep.subr.bf16.mxu0 %v8273_v61  ;;  %v8316_v61 = vld [vmem:[#allocation17 + $0x220] sm:$0xff]  }
0x1f72   :  { %4573 = vmatpush1.bf16.msra.mxu0 %v8271_v62  ;;  %v8318_v62 = vld [vmem:[#allocation17 + $0x268] sm:$0xff]  }
0x1f73   :  { %4574 = vmatprep.subr.bf16.mxu0 %v8279_v10  ;;  %v8320_v10 = vld [vmem:[#allocation17 + $0x228] sm:$0xff]  }
0x1f76   :  { %4575 = vmatpush1.bf16.msra.mxu0 %v8277_v11  ;;  %v8322_v11 = vld [vmem:[#allocation17 + $0x270] sm:$0xff]  }
0x1f77   :  { %4576 = vmatprep.subr.bf16.mxu0 %v8285_v13  ;;  %v8324_v13 = vld [vmem:[#allocation17 + $0x230] sm:$0xff]  }
0x1f7a   :  { %4577 = vmatpush1.bf16.msra.mxu0 %v8283_v3  ;;  %v8326_v3 = vld [vmem:[#allocation17 + $0x278] sm:$0xff]  }
0x1f7b   :  { %4578 = vmatprep.subr.bf16.mxu0 %v8291_v20  ;;  %v8328_v20 = vld [vmem:[#allocation17 + $0x238] sm:$0xff]  }
0x1f7e   :  { %4579 = vmatpush1.bf16.msra.mxu0 %v8289_v2  ;;  %v7074_v2 = vld [vmem:[%s9813_s10 + $0x2] ss:$4 sm:$0xf] }
0x1f7f   :  { %4580 = vmatprep.subr.bf16.mxu0 %v8297_v16  ;;  %v4358_v16 = vrot.slane %v7074_v2, %v9289_v56 }
0x1f82   :  { %4581 = vmatpush1.bf16.msra.mxu0 %v8295_v15  ;;  %v4350_v15 = vrot.slane %v7074_v2, %v9175_v55 }
0x1f83   :  { %7476 = vmatprep.subr.bf16.mxu0 %v8299_v45 }
0x2038   :  { %v4261_v31 = vpop.f32.mrb[60].mxu0 }
0x2039   :  { %v4262_v33 = vadd.f32 %v7063_v30, %v4261_v31  ;;  %v7838_v34 = vpop.f32.mrb[61].mxu0  ;;  %v7072_v31 = vld [vmem:[#allocation13 + $0x2] ss:$0 sm:$0xff] }
0x203a   :  { %v4264_v38 = vpop.f32.mrb[62].mxu0 }
0x203b   :  { %v9580_v39 = vadd.f32 %v4262_v33, %v9474_v24  ;;  %v4265_v18 = vadd.f32 %v7063_v30, %v4264_v38  ;;  %v7839_v40 = vpop.f32.mrb[63].mxu0  ;;  %v8256_v24 = vld [vmem:[#allocation16 + $0x220] ss:$16 sps:$4 sm:$0xff]  }
0x203c   :  { %4526 = vmatpush1.bf16.msra.mxu1 %v8256_v24  ;;  %v8301_v24 = vld [vmem:[#allocation17 + $0x280] sm:$0xff]  }
0x203d   :  { %v9583_v41 = vadd.f32 %v4265_v18, %v9478_v1  ;;  %4272 = vadd.xlane.f32.xlu1 %v9580_v39  ;;  %4527 = vmatprep.subr.bf16.mxu1 %v8264_v52  ;;  %v7073_v18 = vld [vmem:[#allocation14 + $0x2] ss:$0 sm:$0xff] }
0x203e   :  { %v8311_v52 = vld [vmem:[#allocation17 + $0x2d8] sm:$0xff]  }
0x203f   :  { %4274 = vadd.xlane.f32.xlu0 %v9583_v41 }
0x2040   :  { %4528 = vmatpush1.bf16.msra.mxu1 %v8262_v43  ;;  %v8313_v43 = vld [vmem:[#allocation17 + $0x298] sm:$0xff]  }
0x2041   :  { %4529 = vmatprep.subr.bf16.mxu1 %v8270_v48  ;;  %v8315_v48 = vld [vmem:[#allocation17 + $0x2e0] sm:$0xff]  }
0x2044   :  { %4530 = vmatpush1.bf16.msra.mxu1 %v8268_v37  ;;  %v8317_v37 = vld [vmem:[#allocation17 + $0x2a0] sm:$0xff]  }
0x2045   :  { %4531 = vmatprep.subr.bf16.mxu1 %v8276_v6  ;;  %v8319_v6 = vld [vmem:[#allocation17 + $0x2e8] sm:$0xff]  }
0x2048   :  { %4532 = vmatpush1.bf16.msra.mxu1 %v8274_v36  ;;  %v8321_v36 = vld [vmem:[#allocation17 + $0x2a8] sm:$0xff]  }
0x2049   :  { %4533 = vmatprep.subr.bf16.mxu1 %v8282_v12  ;;  %v8323_v12 = vld [vmem:[#allocation17 + $0x2f0] sm:$0xff]  }
0x204c   :  { %4534 = vmatpush1.bf16.msra.mxu1 %v8280_v17  ;;  %v8325_v17 = vld [vmem:[#allocation17 + $0x2b0] sm:$0xff]  }
0x204d   :  { %4535 = vmatprep.subr.bf16.mxu1 %v8288_v9  ;;  %v8327_v9 = vld [vmem:[#allocation17 + $0x2f8] sm:$0xff]  }
0x2050   :  { %4536 = vmatpush1.bf16.msra.mxu1 %v8286_v23  ;;  %v8329_v23 = vld [vmem:[#allocation17 + $0x2b8] sm:$0xff]  }
0x2051   :  { %4537 = vmatprep.subr.bf16.mxu1 %v8294_v7  ;;  %v4346_v7 = vrot.slane %v7074_v2, %v9185_v59 }
0x2054   :  { %4538 = vmatpush1.bf16.msra.mxu1 %v8292_v8  ;;  %v4354_v8 = vrot.slane %v7074_v2, %v9181_v57 }
0x2055   :  { %7454 = vmatprep.subr.bf16.mxu1 %v8298_v44 }
0x20ca   :  { %v4273_v1 = vpop.xlane.xlu1 %4272 }
0x20cb   :  { %v4276_v51 = vmul.f32 0.0078125, %v4273_v1  ;;  %v8303_v1 = vld [vmem:[#allocation17 + $0x2c8] sm:$0xff]  }
0x20cc   :  { %v4275_v58 = vpop.xlane.xlu0 %4274 }
0x20cd   :  { %v9588_v19 = vsub.f32 %v9580_v39, %v4276_v51  ;;  %v4277_v46 = vmul.f32 0.0078125, %v4275_v58  ;;  %v8304_v51 = vld [vmem:[#allocation17 + $0x208] sm:$0xff]  }
0x20ce   :  { %v8305_v58 = vld [vmem:[#allocation17 + $0x288] sm:$0xff]  }
0x20cf   :  { %v9591_v0 = vsub.f32 %v9583_v41, %v4277_v46  ;;  %v4280_v5 = vmul.f32 %v9588_v19, %v9588_v19  ;;  %v8307_v46 = vld [vmem:[#allocation17 + $0x2d0] sm:$0xff]  }
0x20d1   :  { %4282 = vadd.xlane.f32.xlu0 %v4280_v5  ;;  %v4281_v35 = vmul.f32 %v9591_v0, %v9591_v0  ;;  %v8309_v5 = vld [vmem:[#allocation17 + $0x290] sm:$0xff]  }
0x20d5   :  { %4284 = vadd.xlane.f32.xlu0 %v4281_v35  ;;  %v8310_v35 = vld [vmem:[#allocation17 + $0x258] sm:$0xff]  }
0x215e   :  { %v4283_v21 = vpop.xlane.xlu0 %4282 }
0x215f   :  { %v4286_v60 = vmul.f32 0.0078125, %v4283_v21 }
0x2161   :  { %v4288_v22 = vadd.f32 1e-05, %v4286_v60 }
0x2162   :  { %v4285_v25 = vpop.xlane.xlu0 %4284 }
0x2163   :  { %8582 = vrsqrt.f32 %v4288_v22  ;;  %v4287_v26 = vmul.f32 0.0078125, %v4285_v25 }
0x2165   :  { %v4289_v27 = vadd.f32 1e-05, %v4287_v26 }
0x2167   :  { %8584 = vrsqrt.f32 %v4289_v27 }
0x216d   :  { %v8583_v29 = vpop.eup %8582 }
0x216e   :  { %v4292_v30 = vmul.f32 %v8583_v29, %v9588_v19  ;;  %v8306_v19 = vld [vmem:[#allocation17 + $0x250] sm:$0xff]  }
0x2170   :  { %v4298_v38 = vmul.f32 %v7072_v31, %v4292_v30 }
0x2171   :  { %v8585_v33 = vpop.eup %8584 }
0x2172   :  { %v4293_v34 = vmul.f32 %v8585_v33, %v9591_v0  ;;  %v4304_v63 = vadd.f32 %v7073_v18, %v4298_v38  ;;  %v8308_v0 = vld [vmem:[#allocation17 + $0x210] sm:$0xff]  }
0x2174   :  { %v4299_v40 = vmul.f32 %v7072_v31, %v4293_v34 }
0x2176   :  { %v4305_v28 = vadd.f32 %v7073_v18, %v4299_v40 }
0x2178   :  { %v4339_v14 = vpack.c.bf16 %v4305_v28, %v4304_v63 }
0x217a   :  { %4556 = vmatmul.mubr.bf16.vlgmr.msra.gmra.mrb[100].mxu1 %v4339_v14  ;;  %4599 = vmatmul.mubr.bf16.vlgmr.msra.gmra.mrb[64].mxu0 %v4339_v14 }
0x217b   :  { %7455 = vmatpush3.bf16.msra.mxu1 %v8300_v49  ;;  %7477 = vmatpush3.bf16.msra.mxu0 %v8301_v24 }
0x217c   :  { %7456 = vmatprep.subr.bf16.mxu1 %v8302_v50  ;;  %7478 = vmatprep.subr.bf16.mxu0 %v8303_v1 }
0x217f   :  { %7457 = vmatpush3.bf16.msra.mxu1 %v8304_v51  ;;  %7479 = vmatpush3.bf16.msra.mxu0 %v8305_v58 }
0x2180   :  { %7458 = vmatprep.subr.bf16.mxu1 %v8306_v19  ;;  %7480 = vmatprep.subr.bf16.mxu0 %v8307_v46 }
0x2183   :  { %7459 = vmatpush3.bf16.msra.mxu1 %v8308_v0  ;;  %7481 = vmatpush3.bf16.msra.mxu0 %v8309_v5 }
0x2184   :  { %7460 = vmatprep.subr.bf16.mxu1 %v8310_v35  ;;  %7482 = vmatprep.subr.bf16.mxu0 %v8311_v52 }
0x2187   :  { %7461 = vmatpush3.bf16.msra.mxu1 %v8312_v42  ;;  %7483 = vmatpush3.bf16.msra.mxu0 %v8313_v43 }
0x2188   :  { %7462 = vmatprep.subr.bf16.mxu1 %v8314_v47  ;;  %7484 = vmatprep.subr.bf16.mxu0 %v8315_v48 }
0x218b   :  { %7463 = vmatpush3.bf16.msra.mxu1 %v8316_v61  ;;  %7485 = vmatpush3.bf16.msra.mxu0 %v8317_v37 }
0x218c   :  { %7464 = vmatprep.subr.bf16.mxu1 %v8318_v62  ;;  %7486 = vmatprep.subr.bf16.mxu0 %v8319_v6 }
0x218f   :  { %7465 = vmatpush3.bf16.msra.mxu1 %v8320_v10  ;;  %7487 = vmatpush3.bf16.msra.mxu0 %v8321_v36 }
0x2190   :  { %7466 = vmatprep.subr.bf16.mxu1 %v8322_v11  ;;  %7488 = vmatprep.subr.bf16.mxu0 %v8323_v12 }
0x2193   :  { %7467 = vmatpush3.bf16.msra.mxu1 %v8324_v13  ;;  %7489 = vmatpush3.bf16.msra.mxu0 %v8325_v17 }
0x2194   :  { %7468 = vmatprep.subr.bf16.mxu1 %v8326_v3  ;;  %7490 = vmatprep.subr.bf16.mxu0 %v8327_v9 }
0x2197   :  { %7469 = vmatpush3.bf16.msra.mxu1 %v8328_v20  ;;  %7491 = vmatpush3.bf16.msra.mxu0 %v8329_v23 }
0x2198   :  { %7840 = vmatprep.subr.bf16.mxu0 %v8932_v4 }
0x224d   :  { %v4557_v21 = vpop.f32.mrb[100].mxu1  ;;  %v4600_v60 = vpop.f32.mrb[64].mxu0 }
0x224e   :  { %v9607_v22 = vadd.f32 %v4557_v21, %v4346_v7  ;;  %v9609_v25 = vadd.f32 %v4600_v60, %v4354_v8  ;;  %v4559_v26 = vpop.f32.mrb[101].mxu1  ;;  %v4602_v27 = vpop.f32.mrb[65].mxu0 }
0x224f   :  { %v9611_v29 = vadd.f32 %v4559_v26, %v4350_v15  ;;  %v9613_v30 = vadd.f32 %v4602_v27, %v4358_v16  ;;  %v4561_v31 = vpop.f32.mrb[102].mxu1  ;;  %v4604_v33 = vpop.f32.mrb[66].mxu0 }
0x2250   :  { %v7107_v34 = vmul.f32 -1.702, %v9607_v22  ;;  %v7109_v38 = vmul.f32 -1.702, %v9609_v25  ;;  %v4562_v18 = vadd.f32 %v4561_v31, %v4346_v7  ;;  %v4605_v40 = vadd.f32 %v4604_v33, %v4354_v8  ;;  %v4563_v63 = vpop.f32.mrb[103].mxu1  ;;  %v4606_v28 = vpop.f32.mrb[67].mxu0 }
0x2251   :  { %v7108_v14 = vmul.f32 -1.702, %v9611_v29  ;;  %v7110_v44 = vmul.f32 -1.702, %v9613_v30  ;;  %v4564_v45 = vadd.f32 %v4563_v63, %v4350_v15  ;;  %v4607_v49 = vadd.f32 %v4606_v28, %v4358_v16 }
0x2252   :  { %v4625_v24 = vmul.f32 1.442695, %v7107_v34  ;;  %v4629_v50 = vmul.f32 1.442695, %v7109_v38  ;;  %v7111_v1 = vmul.f32 -1.702, %v4562_v18 }
0x2253   :  { %v4627_v51 = vmul.f32 1.442695, %v7108_v14  ;;  %v4631_v58 = vmul.f32 1.442695, %v7110_v44  ;;  %v7113_v19 = vmul.f32 -1.702, %v4605_v40 }
0x2254   :  { %8586 = vpow2.f32 %v4625_v24  ;;  %v4633_v46 = vmul.f32 1.442695, %v7111_v1  ;;  %v7112_v0 = vmul.f32 -1.702, %v4564_v45  ;;  %v7114_v5 = vmul.f32 -1.702, %v4607_v49 }
0x2255   :  { %8588 = vpow2.f32 %v4629_v50  ;;  %v4637_v35 = vmul.f32 1.442695, %v7113_v19 }
0x2256   :  { %8590 = vpow2.f32 %v4627_v51  ;;  %v4635_v52 = vmul.f32 1.442695, %v7112_v0  ;;  %v4639_v42 = vmul.f32 1.442695, %v7114_v5 }
0x2257   :  { %8592 = vpow2.f32 %v4631_v58 }
0x2258   :  { %8594 = vpow2.f32 %v4633_v46 }
0x2259   :  { %8596 = vpow2.f32 %v4637_v35 }
0x225a   :  { %8598 = vpow2.f32 %v4635_v52 }
0x225b   :  { %8600 = vpow2.f32 %v4639_v42 }
0x225e   :  { %v8587_v43 = vpop.eup %8586 }
0x225f   :  { %v8589_v47 = vpop.eup %8588  ;;  %v4641_v48 = vadd.f32 1.0, %v8587_v43 }
0x2260   :  { %v8591_v61 = vpop.eup %8590  ;;  %v4643_v37 = vadd.f32 1.0, %v8589_v47  ;;  %v8330_v47 = vld [vmem:[#allocation8 + $0x240] ss:$12 sps:$4 sm:$0xff]  }
0x2261   :  { %v8593_v62 = vpop.eup %8592  ;;  %8602 = vrcp.f32 %v4641_v48  ;;  %v4642_v6 = vadd.f32 1.0, %v8591_v61  ;;  %v8332_v48 = vld [vmem:[#allocation8 + $0x244] ss:$12 sps:$4 sm:$0xff]   ;;  %v8333_v61 = vld [vmem:[#allocation8 + $0x248] ss:$12 sps:$4 sm:$0xff]  }
0x2262   :  { %v8595_v10 = vpop.eup %8594  ;;  %8604 = vrcp.f32 %v4643_v37  ;;  %v4644_v36 = vadd.f32 1.0, %v8593_v62  ;;  %v8336_v37 = vld [vmem:[#allocation8 + $0x25c] ss:$12 sps:$4 sm:$0xff]   ;;  %5239 = vmatprep.subr.bf16.mxu1 %v8332_v48  ;;  %v8337_v62 = vld [vmem:[#allocation8 + $0x260] ss:$12 sps:$4 sm:$0xff]  }
0x2263   :  { %v8597_v11 = vpop.eup %8596  ;;  %8606 = vrcp.f32 %v4642_v6  ;;  %v4645_v12 = vadd.f32 1.0, %v8595_v10  ;;  %v8334_v6 = vld [vmem:[#allocation8 + $0x258] ss:$12 sps:$4 sm:$0xff]  }
0x2264   :  { %v8599_v13 = vpop.eup %8598  ;;  %8608 = vrcp.f32 %v4644_v36  ;;  %v4647_v17 = vadd.f32 1.0, %v8597_v11 }
0x2265   :  { %v8601_v3 = vpop.eup %8600  ;;  %8610 = vrcp.f32 %v4645_v12  ;;  %v4646_v9 = vadd.f32 1.0, %v8599_v13 }
0x2266   :  { %8612 = vrcp.f32 %v4647_v17  ;;  %v4648_v20 = vadd.f32 1.0, %v8601_v3  ;;  %v8340_v3 = vld [vmem:[#allocation8 + $0x274] ss:$12 sps:$4 sm:$0xff]  }
0x2267   :  { %8614 = vrcp.f32 %v4646_v9  ;;  %v8338_v9 = vld [vmem:[#allocation8 + $0x270] ss:$12 sps:$4 sm:$0xff]  }
0x2268   :  { %8616 = vrcp.f32 %v4648_v20  ;;  %v8341_v20 = vld [vmem:[#allocation8 + $0x278] ss:$12 sps:$4 sm:$0xff]  }
0x226b   :  { %v8603_v23 = vpop.eup %8602 }
0x226c   :  { %v8605_v2 = vpop.eup %8604  ;;  %v4665_v21 = vmul.f32 %v8603_v23, %v9607_v22  ;;  %v8344_v23 = vld [vmem:[#allocation8 + $0x28c] ss:$12 sps:$4 sm:$0xff]  }
0x226d   :  { %v8607_v7 = vpop.eup %8606  ;;  %v4667_v27 = vmul.f32 %v8605_v2, %v9609_v25  ;;  %v8342_v2 = vld [vmem:[#allocation8 + $0x288] ss:$12 sps:$4 sm:$0xff]  }
0x226e   :  { %v8609_v8 = vpop.eup %8608  ;;  %v4666_v34 = vmul.f32 %v8607_v7, %v9611_v29  ;;  %v7115_v29 = vld [vmem:[%s9815_s12 + $0x2] ss:$0 sm:$0xff]  ;;  %v8345_v7 = vld [vmem:[#allocation8 + $0x290] ss:$12 sps:$4 sm:$0xff]  }
0x226f   :  { %v8611_v15 = vpop.eup %8610  ;;  %v4668_v28 = vmul.f32 %v8609_v8, %v9613_v30  ;;  %v8348_v8 = vld [vmem:[#allocation8 + $0x2a4] ss:$12 sps:$4 sm:$0xff]  }
0x2270   :  { %v8613_v16 = vpop.eup %8612  ;;  %v4669_v60 = vmul.f32 %v8611_v15, %v4562_v18  ;;  %v8346_v15 = vld [vmem:[#allocation8 + $0x2a0] ss:$12 sps:$4 sm:$0xff]  }
0x2271   :  { %v8615_v26 = vpop.eup %8614  ;;  %v4671_v31 = vmul.f32 %v8613_v16, %v4605_v40  ;;  %v8349_v16 = vld [vmem:[#allocation8 + $0x2a8] ss:$12 sps:$4 sm:$0xff]  }
0x2272   :  { %v8617_v33 = vpop.eup %8616  ;;  %v4738_v38 = vpack.c.bf16 %v4669_v60, %v4665_v21  ;;  %v4670_v63 = vmul.f32 %v8615_v26, %v4564_v45  ;;  %v8352_v21 = vld [vmem:[#allocation8 + $0x2bc] ss:$12 sps:$4 sm:$0xff]   ;;  %v8350_v60 = vld [vmem:[#allocation8 + $0x2b8] ss:$12 sps:$4 sm:$0xff]   ;;  %v8353_v26 = vld [vmem:[#allocation8 + $0x2c0] ss:$12 sps:$4 sm:$0xff]  }
0x2273   :  { %v4740_v14 = vpack.c.bf16 %v4671_v31, %v4667_v27  ;;  %v4672_v44 = vmul.f32 %v8617_v33, %v4607_v49  ;;  %v8356_v27 = vld [vmem:[#allocation8 + $0x2d4] ss:$12 sps:$4 sm:$0xff]   ;;  %v8354_v31 = vld [vmem:[#allocation8 + $0x2d0] ss:$12 sps:$4 sm:$0xff]   ;;  %v8357_v33 = vld [vmem:[#allocation8 + $0x2d8] ss:$12 sps:$4 sm:$0xff]  }
0x2274   :  { %v4739_v24 = vpack.c.bf16 %v4670_v63, %v4666_v34  ;;  %v8360_v34 = vld [vmem:[#allocation8 + $0x2ec] ss:$12 sps:$4 sm:$0xff]   ;;  %v8361_v63 = vld [vmem:[#allocation8 + $0x2f0] ss:$12 sps:$4 sm:$0xff]  }
0x2275   :  { %v4741_v50 = vpack.c.bf16 %v4672_v44, %v4668_v28 }
0x2276   :  { %4971 = vmatprep.mubr.bf16.mxu1 %v4739_v24 }
0x2277   :  { %5012 = vmatprep.mubr.bf16.mxu0 %v4741_v50  ;;  %4972 = vmatmul.mubr.bf16.vlgmr.msra.gmra.mrb[104].mxu1 %v4738_v38  ;;  %v8358_v38 = vld [vmem:[#allocation8 + $0x2e8] ss:$12 sps:$4 sm:$0xff]  }
0x2278   :  { %5013 = vmatmul.mubr.bf16.vlgmr.msra.gmra.mrb[68].mxu0 %v4740_v14  ;;  %5271 = vmatprep.mubr.bf16.mxu1 %v8933_v32 }
0x2279   :  { %7856 = vmatprep.mubr.msk.bf16.mxu0 %vm8934_vm0, %v8932_v4  ;;  %7841 = vmatpush3.bf16.msra.mxu0 %v8333_v61 }
0x227a   :  { %5240 = vmatpush1.bf16.msra.mxu1 %v8330_v47  ;;  %7842 = vmatprep.subr.bf16.mxu0 %v8932_v4 }
0x227b   :  { %5241 = vmatprep.subr.bf16.mxu1 %v8336_v37 }
0x227d   :  { %7843 = vmatpush3.bf16.msra.mxu0 %v8337_v62 }
0x227e   :  { %5242 = vmatpush1.bf16.msra.mxu1 %v8334_v6  ;;  %7844 = vmatprep.subr.bf16.mxu0 %v8932_v4 }
0x227f   :  { %5243 = vmatprep.subr.bf16.mxu1 %v8340_v3 }
0x2281   :  { %7845 = vmatpush3.bf16.msra.mxu0 %v8341_v20 }
0x2282   :  { %5244 = vmatpush1.bf16.msra.mxu1 %v8338_v9  ;;  %7846 = vmatprep.subr.bf16.mxu0 %v8932_v4 }
0x2283   :  { %5245 = vmatprep.subr.bf16.mxu1 %v8344_v23 }
0x2285   :  { %7847 = vmatpush3.bf16.msra.mxu0 %v8345_v7 }
0x2286   :  { %5246 = vmatpush1.bf16.msra.mxu1 %v8342_v2  ;;  %7848 = vmatprep.subr.bf16.mxu0 %v8932_v4 }
0x2287   :  { %5247 = vmatprep.subr.bf16.mxu1 %v8348_v8 }
0x2289   :  { %7849 = vmatpush3.bf16.msra.mxu0 %v8349_v16 }
0x228a   :  { %5248 = vmatpush1.bf16.msra.mxu1 %v8346_v15  ;;  %7850 = vmatprep.subr.bf16.mxu0 %v8932_v4 }
0x228b   :  { %5249 = vmatprep.subr.bf16.mxu1 %v8352_v21 }
0x228d   :  { %7851 = vmatpush3.bf16.msra.mxu0 %v8353_v26 }
0x228e   :  { %5250 = vmatpush1.bf16.msra.mxu1 %v8350_v60  ;;  %7852 = vmatprep.subr.bf16.mxu0 %v8932_v4 }
0x228f   :  { %5251 = vmatprep.subr.bf16.mxu1 %v8356_v27 }
0x2291   :  { %7853 = vmatpush3.bf16.msra.mxu0 %v8357_v33 }
0x2292   :  { %5252 = vmatpush1.bf16.msra.mxu1 %v8354_v31  ;;  %7854 = vmatprep.subr.bf16.mxu0 %v8932_v4 }
0x2293   :  { %5253 = vmatprep.subr.bf16.mxu1 %v8360_v34 }
0x2295   :  { %7855 = vmatpush3.bf16.msra.mxu0 %v8361_v63 }
0x2296   :  { %5254 = vmatpush1.bf16.msra.mxu1 %v8358_v38  ;;  %7884 = vmatprep.subr.bf16.mxu0 %v8932_v4 }
0x2297   :  { %7860 = vmatprep.subr.bf16.mxu1 %v8932_v4 }
0x234a   :  { %v7470_v22 = vpop.f32.mrb[104].mxu1 }
0x234b   :  { %v7492_v25 = vpop.f32.mrb[68].mxu0  ;;  %v7471_v30 = vpop.f32.mrb[105].mxu1 }
0x234c   :  { %v7472_v18 = vadd.f32 %v7471_v30, %v7470_v22  ;;  %v7493_v40 = vpop.f32.mrb[69].mxu0  ;;  %v7473_v45 = vpop.f32.mrb[106].mxu1 }
0x234d   :  { %v7494_v49 = vadd.f32 %v7493_v40, %v7492_v25  ;;  %v7495_v1 = vpop.f32.mrb[70].mxu0  ;;  %v7474_v51 = vpop.f32.mrb[107].mxu1 }
0x234e   :  { %v4974_v58 = vadd.f32 %v7472_v18, %v7115_v29  ;;  %v7475_v19 = vadd.f32 %v7474_v51, %v7473_v45  ;;  %v7496_v46 = vpop.f32.mrb[71].mxu0 }
0x234f   :  { %v7497_v0 = vadd.f32 %v7496_v46, %v7495_v1  ;;  %v7150_v46 = vld [vmem:[%s9807_s4 + $0x3] ss:$4 sm:$0x7] }
0x2350   :  { %v5015_v5 = vadd.f32 %v7494_v49, %v4974_v58  ;;  %v4977_v35 = vadd.f32 %v7475_v19, %v7115_v29  ;;  %v7148_v29 = vld [vmem:[#allocation5 + $0x3] ss:$0 sm:$0xff]  ;;  %v7149_v49 = vld [vmem:[#allocation7 + $0x3] ss:$0 sm:$0xff] }
0x2352   :  { %v5018_v52 = vadd.f32 %v7497_v0, %v4977_v35  ;;  %v9630_v42 = vadd.f32 %v5015_v5, %v9580_v39  ;;  %v5103_v0 = vrot.slane %v7150_v46, %v9175_v55 }
0x2354   :  { %5025 = vadd.xlane.f32.xlu1 %v9630_v42  ;;  %v9634_v43 = vadd.f32 %v5018_v52, %v9583_v41  ;;  %v5107_v52 = vrot.slane %v7150_v46, %v9181_v57 }
0x2356   :  { %5027 = vadd.xlane.f32.xlu0 %v9634_v43 }
0x23e1   :  { %v5026_v39 = vpop.xlane.xlu1 %5025 }
0x23e2   :  { %v5029_v41 = vmul.f32 0.0078125, %v5026_v39 }
0x23e3   :  { %v5028_v10 = vpop.xlane.xlu0 %5027 }
0x23e4   :  { %v5031_v36 = vsub.f32 %v9630_v42, %v5029_v41  ;;  %v5030_v11 = vmul.f32 0.0078125, %v5028_v10  ;;  %v5099_v10 = vrot.slane %v7150_v46, %v9185_v59 }
0x23e6   :  { %v5032_v12 = vsub.f32 %v9634_v43, %v5030_v11  ;;  %v5033_v13 = vmul.f32 %v5031_v36, %v5031_v36 }
0x23e8   :  { %5035 = vadd.xlane.f32.xlu1 %v5033_v13  ;;  %v5034_v17 = vmul.f32 %v5032_v12, %v5032_v12 }
0x23ea   :  { %5037 = vadd.xlane.f32.xlu0 %v5034_v17 }
0x2475   :  { %v5036_v28 = vpop.xlane.xlu1 %5035 }
0x2476   :  { %v5039_v14 = vmul.f32 0.0078125, %v5036_v28 }
0x2477   :  { %v5038_v44 = vpop.xlane.xlu0 %5037 }
0x2478   :  { %v5041_v24 = vadd.f32 1e-05, %v5039_v14  ;;  %v5040_v50 = vmul.f32 0.0078125, %v5038_v44 }
0x247a   :  { %8618 = vrsqrt.f32 %v5041_v24  ;;  %v5042_v22 = vadd.f32 1e-05, %v5040_v50 }
0x247c   :  { %8620 = vrsqrt.f32 %v5042_v22 }
0x2484   :  { %v8619_v25 = vpop.eup %8618 }
0x2485   :  { %v5045_v30 = vmul.f32 %v8619_v25, %v5031_v36 }
0x2486   :  { %v8621_v18 = vpop.eup %8620 }
0x2487   :  { %v5046_v40 = vmul.f32 %v8621_v18, %v5032_v12  ;;  %v5051_v45 = vmul.f32 %v7148_v29, %v5045_v30 }
0x2489   :  { %v5052_v1 = vmul.f32 %v7148_v29, %v5046_v40  ;;  %v5057_v51 = vadd.f32 %v7149_v49, %v5051_v45 }
0x248b   :  { %v5058_v58 = vadd.f32 %v7149_v49, %v5052_v1 }
0x248d   :  { %v5092_v19 = vpack.c.bf16 %v5058_v58, %v5057_v51 }
0x248f   :  { %5272 = vmatmul.mubr.bf16.vlgmr.msra.gmra.mrb[108].mxu1 %v5092_v19  ;;  %7857 = vmatmul.mubr.bf16.vlgmr.msra.gmra.mrb[72].mxu0 %v5092_v19 }
0x2490   :  { %7862 = vmatprep.mubr.msk.bf16.mxu1 %vm8934_vm0, %v8932_v4  ;;  %7886 = vmatprep.mubr.msk.bf16.mxu0 %vm8934_vm0, %v8932_v4 }
0x2562   :  { %v5273_v5 = vpop.f32.mrb[108].mxu1  ;;  %v5316_v35 = vpop.f32.mrb[72].mxu0 }
0x2563   :  { %v5275_v47 = vpop.f32.mrb[109].mxu1  ;;  %v7858_v48 = vpop.f32.mrb[73].mxu0  ;;  %v5274_v13 = vadd.f32 %v5273_v5, %v5099_v10  ;;  %v5317_v9 = vadd.f32 %v5316_v35, %v5107_v52 }
0x2564   :  { %v5276_v61 = vadd.f32 %v5275_v47, %v5103_v0  ;;  %v5277_v37 = vpop.f32.mrb[110].mxu1  ;;  %v5319_v62 = vpop.f32.mrb[74].mxu0 }
0x2565   :  { %v9657_v6 = vadd.f32 %v5319_v62, %v5107_v52  ;;  %v5279_v39 = vpop.f32.mrb[111].mxu1  ;;  %v7859_v41 = vpop.f32.mrb[75].mxu0  ;;  %v5323_v3 = vpack.c.bf16 %v5274_v13, %v5274_v13  ;;  %v5278_v23 = vadd.f32 %v5277_v37, %v5099_v10  ;;  %v9667_v2 = vpack.c.bf16 %v5317_v9, %v5317_v9 }
0x2566   :  { %v5325_v36 = vpack.c.bf16 %v5276_v61, %v5276_v61  ;;  %v5280_v12 = vadd.f32 %v5279_v39, %v5103_v0 }
0x2567   :  { %v5324_v7 = vpack.c.bf16 %v5278_v23, %v5278_v23  ;;  %v5450_v8 = vsel %vm600_vm2, %v9667_v2, 0  ;;  %v5328_v51 = vpack.c.bf16 %v9657_v6, %v9657_v6 }
0x2568   :  { %v5333_v11 = vsel %vm479_vm1, %v5325_v36, 0  ;;  %v5326_v17 = vpack.c.bf16 %v5280_v12, %v5280_v12 }
0x2569   :  { %7861 = vmatpush3.bf16.xpose.msra.mxu1 %v5333_v11  ;;  %v5496_v0 = vsel %vm600_vm2, %v5328_v51, 0 }
0x256a   :  { %7866 = vmatprep.subr.bf16.mxu1 %v8932_v4  ;;  %v5379_v20 = vsel %vm479_vm1, %v5326_v17, 0 }
0x2570   :  { %7863 = vmatmul.mubr.msk.bf16.vlgmr.msra.gmra.mrb[112].mxu1 %vm479_vm1, %v5323_v3 }
0x2571   :  { %7867 = vmatpush3.bf16.xpose.msra.mxu1 %v5379_v20  ;;  %7868 = vmatprep.mubr.msk.bf16.mxu1 %vm8934_vm0, %v8932_v4 }
0x2572   :  { %7872 = vmatprep.subr.bf16.mxu1 %v8932_v4 }
0x2578   :  { %7869 = vmatmul.mubr.msk.bf16.vlgmr.msra.gmra.mrb[116].mxu1 %vm479_vm1, %v5324_v7 }
0x2579   :  { %7873 = vmatpush3.bf16.msra.mxu1 %v5450_v8  ;;  %7874 = vmatprep.mubr.msk.bf16.mxu1 %vm8934_vm0, %v8932_v4 }
0x257a   :  { %7878 = vmatprep.subr.bf16.mxu1 %v8932_v4 }
0x2643   :  { %v5369_v15 = vpop.f32.mrb[112].mxu1 }
0x2644   :  { %v7864_v16 = vpop.f32.mrb[113].mxu1  ;;  %v5422_v21 = vsel %vm5421_vm4, %v5369_v15, -inf }
0x2645   :  { %5423 = vmax.xlane.f32.xlu1 %v5422_v21  ;;  %v5372_v60 = vpop.f32.mrb[114].mxu1 }
0x2646   :  { %v7865_v26 = vpop.f32.mrb[115].mxu1 }
0x264b   :  { %v5415_v27 = vpop.f32.mrb[116].mxu1 }
0x264c   :  { %v7870_v31 = vpop.f32.mrb[117].mxu1  ;;  %v5425_v33 = vsel %vm5421_vm4, %v5415_v27, -inf }
0x264d   :  { %5426 = vmax.xlane.f32.xlu0 %v5425_v33  ;;  %v5418_v34 = vpop.f32.mrb[118].mxu1 }
0x264e   :  { %v7871_v38 = vpop.f32.mrb[119].mxu1 }
0x26d2   :  { %v5424_v63 = vpop.xlane.xlu1 %5423 }
0x26d3   :  { %v5428_v28 = vsub.f32 %v5369_v15, %v5424_v63 }
0x26d5   :  { %v5430_v14 = vmul.f32 1.442695, %v5428_v28 }
0x26d7   :  { %8622 = vpow2.f32 %v5430_v14 }
0x26da   :  { %v5427_v44 = vpop.xlane.xlu0 %5426 }
0x26db   :  { %v5429_v24 = vsub.f32 %v5415_v27, %v5427_v44 }
0x26dd   :  { %v5432_v50 = vmul.f32 1.442695, %v5429_v24 }
0x26df   :  { %8624 = vpow2.f32 %v5432_v50 }
0x26e1   :  { %v8623_v22 = vpop.eup %8622 }
0x26e2   :  { %v5434_v25 = vsel %vm5421_vm4, %v8623_v22, 0.0 }
0x26e3   :  { %5435 = vadd.xlane.f32.xlu1 %v5434_v25 }
0x26e9   :  { %v8625_v29 = vpop.eup %8624 }
0x26ea   :  { %v5437_v30 = vsel %vm5421_vm4, %v8625_v29, 0.0 }
0x26eb   :  { %5438 = vadd.xlane.f32.xlu0 %v5437_v30 }
0x26f4   :  { %5542 = vrot.lane.b32.xlu1 %v5325_v36, %s8925_s2 }
0x26f8   :  { %5539 = vrot.lane.b32.xlu1 %v5323_v3, %s8925_s2 }
0x26fc   :  { %5591 = vrot.lane.b32.xlu1 %v5324_v7, %s8925_s2 }
0x2701   :  { %5594 = vrot.lane.b32.xlu0 %v5326_v17, %s8925_s2 }
0x2770   :  { %v5436_v18 = vpop.xlane.xlu1 %5435 }
0x2771   :  { %8626 = vrcp.f32 %v5436_v18 }
0x2774   :  { %v5543_v40 = vpop.permute.xlu1 %5542 }
0x2775   :  { %v5548_v45 = vsel %vm479_vm1, %v5543_v40, 0 }
0x2776   :  { %7885 = vmatpush3.bf16.xpose.msra.mxu0 %v5548_v45  ;;  %v8362_v45 = vld [vmem:[#allocation10 + $0xc0] sm:$0xff]  }
0x2777   :  { %7896 = vmatprep.subr.bf16.mxu0 %v8932_v4 }
0x2778   :  { %v5439_v49 = vpop.xlane.xlu0 %5438  ;;  %v5540_v19 = vpop.permute.xlu1 %5539 }
0x2779   :  { %8628 = vrcp.f32 %v5439_v49  ;;  %v8363_v49 = vld [vmem:[#allocation10 + $0xc8] sm:$0xff]  }
0x277b   :  { %v8627_v1 = vpop.eup %8626 }
0x277c   :  { %v5442_v58 = vmul.f32 %v8627_v1, %v8623_v22  ;;  %v5595_v52 = vpop.permute.xlu0 %5594  ;;  %v5592_v61 = vpop.permute.xlu1 %5591  ;;  %v8364_v1 = vld [vmem:[#allocation10 + $0xd0] sm:$0xff]  }
0x277d   :  { %7887 = vmatmul.mubr.msk.bf16.vlgmr.msra.gmra.mrb[76].mxu0 %vm479_vm1, %v5540_v19  ;;  %v5600_v48 = vsel %vm479_vm1, %v5595_v52, 0  ;;  %v8367_v19 = vld [vmem:[#allocation10 + $0xe8] sm:$0xff]  }
0x277e   :  { %v5444_v46 = vpack.c.bf16 %v5442_v58, %v5442_v58  ;;  %7898 = vmatprep.mubr.msk.bf16.mxu0 %vm8934_vm0, %v8932_v4  ;;  %v8366_v58 = vld [vmem:[#allocation10 + $0xe0] sm:$0xff]  }
0x2780   :  { %7875 = vmatmul.mubr.msk.bf16.vlgmr.msra.gmra.mrb[120].mxu1 %vm572_vm3, %v5444_v46 }
0x2781   :  { %7879 = vmatpush3.bf16.msra.mxu1 %v5496_v0  ;;  %7880 = vmatprep.mubr.msk.bf16.mxu1 %vm8934_vm0, %v8932_v4 }
0x2782   :  { %7890 = vmatprep.subr.bf16.mxu1 %v8932_v4 }
0x2783   :  { %v8629_v5 = vpop.eup %8628 }
0x2784   :  { %v5443_v35 = vmul.f32 %v8629_v5, %v8625_v29 }
0x2786   :  { %v5445_v47 = vpack.c.bf16 %v5443_v35, %v5443_v35  ;;  %v8368_v35 = vld [vmem:[#allocation10 + $0xf0] sm:$0xff]  }
0x2788   :  { %7881 = vmatmul.mubr.msk.bf16.vlgmr.msra.gmra.mrb[124].mxu1 %vm572_vm3, %v5445_v47  ;;  %v8369_v47 = vld [vmem:[#allocation10 + $0xf8] sm:$0xff]  }
0x2789   :  { %7892 = vmatprep.mubr.msk.bf16.mxu1 %vm8934_vm0, %v8932_v4 }
0x278a   :  { %7891 = vmatpush3.bf16.xpose.msra.mxu1 %v5600_v48 }
0x278b   :  { %7902 = vmatprep.subr.bf16.mxu1 %v8932_v4 }
0x2791   :  { %7893 = vmatmul.mubr.msk.bf16.vlgmr.msra.gmra.mrb[128].mxu1 %vm479_vm1, %v5592_v61 }
0x2792   :  { %7904 = vmatprep.mubr.msk.bf16.mxu1 %vm8934_vm0, %v8932_v4 }
0x2850   :  { %v5584_v37 = vpop.f32.mrb[76].mxu0 }
0x2851   :  { %v7888_v62 = vpop.f32.mrb[77].mxu0  ;;  %v5642_v6 = vsel %vm5421_vm4, %v5584_v37, -inf }
0x2852   :  { %5643 = vmax.xlane.f32.xlu1 %v5642_v6  ;;  %v5587_v39 = vpop.f32.mrb[78].mxu0 }
0x2853   :  { %v9704_v41 = vpop.f32.mrb[120].mxu1  ;;  %v7889_v10 = vpop.f32.mrb[79].mxu0 }
0x2854   :  { %v7876_v36 = vpop.f32.mrb[121].mxu1 }
0x2855   :  { %v5489_v11 = vpop.f32.mrb[122].mxu1 }
0x2856   :  { %v7877_v12 = vpop.f32.mrb[123].mxu1 }
0x285b   :  { %v9706_v13 = vpop.f32.mrb[124].mxu1 }
0x285c   :  { %v7882_v17 = vpop.f32.mrb[125].mxu1 }
0x285d   :  { %v5535_v3 = vpop.f32.mrb[126].mxu1  ;;  %v7183_v17 = vld [vmem:[#allocation11 + $0x3] ss:$0 sm:$0xff] }
0x285e   :  { %v7883_v9 = vpop.f32.mrb[127].mxu1 }
0x2863   :  { %5667 = vrot.lane.b32.xlu1 %v9667_v2, %s8925_s2 }
0x2864   :  { %v5636_v20 = vpop.f32.mrb[128].mxu1 }
0x2865   :  { %v7894_v23 = vpop.f32.mrb[129].mxu1  ;;  %v5645_v7 = vsel %vm5421_vm4, %v5636_v20, -inf }
0x2866   :  { %5646 = vmax.xlane.f32.xlu0 %v5645_v7  ;;  %v5639_v8 = vpop.f32.mrb[130].mxu1 }
0x2867   :  { %v7895_v15 = vpop.f32.mrb[131].mxu1 }
0x28df   :  { %v5644_v16 = vpop.xlane.xlu1 %5643 }
0x28e0   :  { %v5648_v21 = vsub.f32 %v5584_v37, %v5644_v16  ;;  %v8370_v16 = vld [vmem:[#allocation16 + $0x300] ss:$16 sps:$4 sm:$0xff]  }
0x28e2   :  { %v5650_v60 = vmul.f32 1.442695, %v5648_v21  ;;  %v8372_v21 = vld [vmem:[#allocation16 + $0x304] ss:$16 sps:$4 sm:$0xff]  }
0x28e3   :  { %v5668_v26 = vpop.permute.xlu1 %5667 }
0x28e4   :  { %8630 = vpow2.f32 %v5650_v60  ;;  %v5673_v27 = vsel %vm600_vm2, %v5668_v26, 0  ;;  %v8375_v60 = vld [vmem:[#allocation16 + $0x30c] ss:$16 sps:$4 sm:$0xff]   ;;  %v8378_v26 = vld [vmem:[#allocation16 + $0x324] ss:$16 sps:$4 sm:$0xff]  }
0x28e5   :  { %7897 = vmatpush3.bf16.msra.mxu0 %v5673_v27  ;;  %v8381_v27 = vld [vmem:[#allocation16 + $0x32c] ss:$16 sps:$4 sm:$0xff]  }
0x28e6   :  { %7908 = vmatprep.subr.bf16.mxu0 %v8932_v4 }
0x28ee   :  { %v8631_v31 = vpop.eup %8630 }
0x28ef   :  { %v5654_v2 = vsel %vm5421_vm4, %v8631_v31, 0.0 }
0x28f0   :  { %5655 = vadd.xlane.f32.xlu0 %v5654_v2 }
0x28f3   :  { %v5647_v33 = vpop.xlane.xlu0 %5646 }
0x28f4   :  { %v5649_v34 = vsub.f32 %v5636_v20, %v5647_v33  ;;  %v8936_v33 = vmov 1985246804  }
0x28f6   :  { %v5652_v38 = vmul.f32 1.442695, %v5649_v34  ;;  %v5912_v34 = vunpack.c.l.s4 %v8936_v33 }
0x28f8   :  { %8632 = vpow2.f32 %v5652_v38 }
0x2902   :  { %v8633_v63 = vpop.eup %8632 }
0x2903   :  { %v5657_v28 = vsel %vm5421_vm4, %v8633_v63, 0.0 }
0x2904   :  { %5658 = vadd.xlane.f32.xlu0 %v5657_v28 }
0x291a   :  { %5716 = vrot.lane.b32.xlu0 %v5328_v51, %s8925_s2  ;;  %v8365_v51 = vld [vmem:[#allocation10 + $0xd8] sm:$0xff]  }
0x297d   :  { %v5656_v14 = vpop.xlane.xlu0 %5655 }
0x297e   :  { %8634 = vrcp.f32 %v5656_v14 }
0x2988   :  { %v8635_v44 = vpop.eup %8634 }
0x2989   :  { %v5662_v24 = vmul.f32 %v8635_v44, %v8631_v31  ;;  %v8376_v31 = vld [vmem:[#allocation16 + $0x320] ss:$16 sps:$4 sm:$0xff]  }
0x298b   :  { %v5664_v50 = vpack.c.bf16 %v5662_v24, %v5662_v24 }
0x298d   :  { %7899 = vmatmul.mubr.msk.bf16.vlgmr.msra.gmra.mrb[80].mxu0 %vm572_vm3, %v5664_v50 }
0x298e   :  { %7924 = vmatprep.mubr.msk.bf16.mxu0 %vm8934_vm0, %v8932_v4  ;;  %7909 = vmatpush3.bf16.msra.mxu0 %v8362_v45  ;;  %v8384_v45 = vld [vmem:[#allocation16 + $0x344] ss:$16 sps:$4 sm:$0xff]  }
0x298f   :  { %7910 = vmatprep.subr.bf16.mxu0 %v8932_v4 }
0x2991   :  { %v5659_v22 = vpop.xlane.xlu0 %5658 }
0x2992   :  { %8636 = vrcp.f32 %v5659_v22  ;;  %7911 = vmatpush3.bf16.msra.mxu0 %v8363_v49  ;;  %v8387_v49 = vld [vmem:[#allocation16 + $0x34c] ss:$16 sps:$4 sm:$0xff]  }
0x2993   :  { %7912 = vmatprep.subr.bf16.mxu0 %v8932_v4 }
0x2995   :  { %v5717_v25 = vpop.permute.xlu0 %5716 }
0x2996   :  { %v5722_v29 = vsel %vm600_vm2, %v5717_v25, 0  ;;  %7913 = vmatpush3.bf16.msra.mxu0 %v8364_v1  ;;  %v8382_v1 = vld [vmem:[#allocation16 + $0x340] ss:$16 sps:$4 sm:$0xff]  }
0x2997   :  { %7903 = vmatpush3.bf16.msra.mxu1 %v5722_v29  ;;  %7914 = vmatprep.subr.bf16.mxu0 %v8932_v4 }
0x2998   :  { %6191 = vmatprep.subr.bf16.mxu1 %v8372_v21 }
0x299a   :  { %7915 = vmatpush3.bf16.msra.mxu0 %v8365_v51  ;;  %v8385_v51 = vld [vmem:[#allocation16 + $0x348] ss:$16 sps:$4 sm:$0xff]  }
0x299b   :  { %7916 = vmatprep.subr.bf16.mxu0 %v8932_v4 }
0x299c   :  { %v8637_v30 = vpop.eup %8636 }
0x299d   :  { %v5663_v18 = vmul.f32 %v8637_v30, %v8633_v63  ;;  %v5913_v63 = vunpack.c.0.s8 %v5912_v34 }
0x299e   :  { %7917 = vmatpush3.bf16.msra.mxu0 %v8366_v58  ;;  %v8390_v58 = vld [vmem:[#allocation16 + $0x364] ss:$16 sps:$4 sm:$0xff]  }
0x299f   :  { %v5665_v40 = vpack.c.bf16 %v5663_v18, %v5663_v18  ;;  %7918 = vmatprep.subr.bf16.mxu0 %v8932_v4  ;;  %v9748_v14 = vsub.s32 %v5913_v63, %v9172_v54  ;;  %v8419_v63 = vld [vmem:[#allocation17 + $0x3c0] sm:$0xff]  }
0x29a1   :  { %7905 = vmatmul.mubr.msk.bf16.vlgmr.msra.gmra.mrb[132].mxu1 %vm572_vm3, %v5665_v40 }
0x29a2   :  { %6223 = vmatprep.mubr.bf16.mxu1 %v8933_v32  ;;  %7919 = vmatpush3.bf16.msra.mxu0 %v8367_v19  ;;  %v8393_v19 = vld [vmem:[#allocation16 + $0x36c] ss:$16 sps:$4 sm:$0xff]  }
0x29a3   :  { %7920 = vmatprep.subr.bf16.mxu0 %v8932_v4  ;;  %6192 = vmatpush1.bf16.msra.mxu1 %v8370_v16 }
0x29a4   :  { %6193 = vmatprep.subr.bf16.mxu1 %v8378_v26 }
0x29a6   :  { %7921 = vmatpush3.bf16.msra.mxu0 %v8368_v35  ;;  %v8399_v35 = vld [vmem:[#allocation16 + $0x38c] ss:$16 sps:$4 sm:$0xff]  }
0x29a7   :  { %7922 = vmatprep.subr.bf16.mxu0 %v8932_v4  ;;  %6194 = vmatpush1.bf16.msra.mxu1 %v8376_v31 }
0x29a8   :  { %6195 = vmatprep.subr.bf16.mxu1 %v8384_v45  ;;  %v8431_v45 = vld [vmem:[#allocation17 + $0x3d8] sm:$0xff]  }
0x29aa   :  { %7923 = vmatpush3.bf16.msra.mxu0 %v8369_v47  ;;  %v8397_v47 = vld [vmem:[#allocation16 + $0x388] ss:$16 sps:$4 sm:$0xff]  }
0x29ab   :  { %6232 = vmatprep.subr.bf16.mxu0 %v8375_v60  ;;  %6196 = vmatpush1.bf16.msra.mxu1 %v8382_v1  ;;  %v8433_v1 = vld [vmem:[#allocation17 + $0x398] sm:$0xff]  }
0x29ac   :  { %6197 = vmatprep.subr.bf16.mxu1 %v8390_v58  ;;  %v8435_v58 = vld [vmem:[#allocation17 + $0x3e0] sm:$0xff]  }
0x2a60   :  { %v5709_v46 = vpop.f32.mrb[80].mxu0 }
0x2a61   :  { %5766 = vrot.lane.b32.xlu1 %v5709_v46, %s8925_s2  ;;  %v7900_v0 = vpop.f32.mrb[81].mxu0  ;;  %v8388_v46 = vld [vmem:[#allocation16 + $0x360] ss:$16 sps:$4 sm:$0xff]  }
0x2a62   :  { %v5712_v5 = vpop.f32.mrb[82].mxu0  ;;  %v8391_v0 = vld [vmem:[#allocation16 + $0x368] ss:$16 sps:$4 sm:$0xff]   ;;  %6198 = vmatpush1.bf16.msra.mxu1 %v8388_v46  ;;  %v8437_v46 = vld [vmem:[#allocation17 + $0x3a0] sm:$0xff]  }
0x2a63   :  { %v7901_v52 = vpop.f32.mrb[83].mxu0  ;;  %v8396_v5 = vld [vmem:[#allocation16 + $0x384] ss:$16 sps:$4 sm:$0xff]  }
0x2a64   :  { %v8394_v52 = vld [vmem:[#allocation16 + $0x380] ss:$16 sps:$4 sm:$0xff]   ;;  %6199 = vmatprep.subr.bf16.mxu1 %v8396_v5  ;;  %v8439_v5 = vld [vmem:[#allocation17 + $0x3e8] sm:$0xff]  }
0x2a66   :  { %6200 = vmatpush1.bf16.msra.mxu1 %v8394_v52  ;;  %v8441_v52 = vld [vmem:[#allocation17 + $0x3a8] sm:$0xff]  }
0x2a74   :  { %v5758_v48 = vpop.f32.mrb[132].mxu1 }
0x2a75   :  { %5768 = vrot.lane.b32.xlu1 %v5758_v48, %s8925_s2  ;;  %v7906_v61 = vpop.f32.mrb[133].mxu1  ;;  %v8402_v48 = vld [vmem:[#allocation16 + $0x3a4] ss:$16 sps:$4 sm:$0xff]  }
0x2a76   :  { %v5761_v37 = vpop.f32.mrb[134].mxu1  ;;  %v8405_v61 = vld [vmem:[#allocation16 + $0x3ac] ss:$16 sps:$4 sm:$0xff]   ;;  %6201 = vmatprep.subr.bf16.mxu1 %v8402_v48  ;;  %v8443_v48 = vld [vmem:[#allocation17 + $0x3f0] sm:$0xff]  }
0x2a77   :  { %v7907_v62 = vpop.f32.mrb[135].mxu1  ;;  %v8400_v37 = vld [vmem:[#allocation16 + $0x3a0] ss:$16 sps:$4 sm:$0xff]  }
0x2a78   :  { %v8403_v62 = vld [vmem:[#allocation16 + $0x3a8] ss:$16 sps:$4 sm:$0xff]   ;;  %6202 = vmatpush1.bf16.msra.mxu1 %v8400_v37  ;;  %v8445_v37 = vld [vmem:[#allocation17 + $0x3b0] sm:$0xff]  }
0x2ad3   :  { %v5767_v6 = vpop.permute.xlu1 %5766 }
0x2ad4   :  { %v5772_v10 = vsel %vm479_vm1, %v9704_v41, %v5767_v6  ;;  %v8406_v6 = vld [vmem:[#allocation16 + $0x3c0] ss:$16 sps:$4 sm:$0xff]  }
0x2ae7   :  { %v5769_v39 = vpop.permute.xlu1 %5768 }
0x2ae8   :  { %v5773_v36 = vsel %vm479_vm1, %v9706_v13, %v5769_v39  ;;  %v8408_v39 = vld [vmem:[#allocation16 + $0x3c4] ss:$16 sps:$4 sm:$0xff]  }
0x2ae9   :  { %v5793_v11 = vcombine.low %v5772_v10, %v5773_v36  ;;  %v8409_v10 = vld [vmem:[#allocation16 + $0x3c8] ss:$16 sps:$4 sm:$0xff]   ;;  %v8411_v36 = vld [vmem:[#allocation16 + $0x3cc] ss:$16 sps:$4 sm:$0xff]   ;;  %6203 = vmatprep.subr.bf16.mxu1 %v8408_v39 }
0x2aea   :  { %6204 = vmatpush1.bf16.msra.mxu1 %v8406_v6  ;;  %v8447_v6 = vld [vmem:[#allocation17 + $0x3f8] sm:$0xff]  }
0x2aeb   :  { %v5795_v12 = vpack.c.bf16 %v5793_v11, %v5793_v11  ;;  %v8414_v11 = vld [vmem:[#allocation16 + $0x3e4] ss:$16 sps:$4 sm:$0xff]   ;;  %v8448_v39 = vld [vmem:[#allocation17 + $0x338] sm:$0xff]  }
0x2aec   :  { %6205 = vmatprep.subr.bf16.mxu1 %v8414_v11 }
0x2aed   :  { %7925 = vmatmul.mubr.bf16.vlgmr.msra.gmra.mrb[84].mxu0 %v5795_v12  ;;  %v8417_v12 = vld [vmem:[#allocation16 + $0x3ec] ss:$16 sps:$4 sm:$0xff]  }
0x2aee   :  { %6264 = vmatprep.mubr.bf16.mxu0 %v8933_v32  ;;  %v8373_v32 = vld [vmem:[#allocation16 + $0x308] ss:$16 sps:$4 sm:$0xff]  }
0x2aef   :  { %6233 = vmatpush1.bf16.msra.mxu0 %v8373_v32 }
0x2af0   :  { %6234 = vmatprep.subr.bf16.mxu0 %v8381_v27 }
0x2bc0   :  { %v5883_v3 = vpop.f32.mrb[84].mxu0 }
0x2bc1   :  { %v5884_v9 = vadd.f32 %v7183_v17, %v5883_v3  ;;  %v7926_v20 = vpop.f32.mrb[85].mxu0  ;;  %v8412_v17 = vld [vmem:[#allocation16 + $0x3e0] ss:$16 sps:$4 sm:$0xff]   ;;  %v8415_v3 = vld [vmem:[#allocation16 + $0x3e8] ss:$16 sps:$4 sm:$0xff]  }
0x2bc2   :  { %v5886_v23 = vpop.f32.mrb[86].mxu0  ;;  %6206 = vmatpush1.bf16.msra.mxu1 %v8412_v17 }
0x2bc3   :  { %v5890_v7 = vcombine.high %v5884_v9, %v5884_v9  ;;  %v7927_v8 = vpop.f32.mrb[87].mxu0  ;;  %v9737_v15 = vadd.f32 %v5884_v9, %v9630_v42  ;;  %v8379_v42 = vld [vmem:[#allocation16 + $0x328] ss:$16 sps:$4 sm:$0xff]  }
0x2bc4   :  { %6235 = vmatpush1.bf16.msra.mxu0 %v8379_v42 }
0x2bc5   :  { %v9740_v41 = vadd.f32 %v5890_v7, %v9634_v43  ;;  %v8935_v43 = vmov 839922192   ;;  %6236 = vmatprep.subr.bf16.mxu0 %v8387_v49  ;;  %v7192_v7 = vld [vmem:[#allocation13 + $0x3] ss:$0 sm:$0xff] }
0x2bc6   :  { %v5905_v2 = vunpack.c.l.s4 %v8935_v43  ;;  %v5957_v32 = vcombine.high %v7192_v7, %v7192_v7  ;;  %v8432_v49 = vld [vmem:[#allocation17 + $0x318] sm:$0xff]  }
0x2bc7   :  { %v5898_v13 = vcombine.low %v9737_v15, %v9740_v41 }
0x2bc8   :  { %v5906_v38 = vunpack.c.0.s8 %v5905_v2  ;;  %6237 = vmatpush1.bf16.msra.mxu0 %v8385_v51  ;;  %v8434_v51 = vld [vmem:[#allocation17 + $0x360] sm:$0xff]  }
0x2bc9   :  { %5900 = vadd.xlane.f32.xlu1 %v5898_v13  ;;  %6238 = vmatprep.subr.bf16.mxu0 %v8393_v19  ;;  %v7193_v13 = vld [vmem:[#allocation14 + $0x3] ss:$0 sm:$0xff]  ;;  %v8436_v19 = vld [vmem:[#allocation17 + $0x320] sm:$0xff]  }
0x2bca   :  { %v9745_v28 = vsub.s32 %v5906_v38, %v9172_v54  ;;  %v5966_v27 = vcombine.high %v7193_v13, %v7193_v13  ;;  %v8418_v38 = vld [vmem:[#allocation17 + $0x340] sm:$0xff]  }
0x2bcb   :  { %7532 = vmatprep.subr.bf16.mxu1 %v8418_v38 }
0x2bcc   :  { %6239 = vmatpush1.bf16.msra.mxu0 %v8391_v0  ;;  %v8438_v0 = vld [vmem:[#allocation17 + $0x368] sm:$0xff]  }
0x2bcd   :  { %6240 = vmatprep.subr.bf16.mxu0 %v8399_v35  ;;  %v8440_v35 = vld [vmem:[#allocation17 + $0x328] sm:$0xff]  }
0x2bd0   :  { %6241 = vmatpush1.bf16.msra.mxu0 %v8397_v47  ;;  %v8442_v47 = vld [vmem:[#allocation17 + $0x370] sm:$0xff]  }
0x2bd1   :  { %6242 = vmatprep.subr.bf16.mxu0 %v8405_v61  ;;  %v8444_v61 = vld [vmem:[#allocation17 + $0x330] sm:$0xff]  }
0x2bd4   :  { %6243 = vmatpush1.bf16.msra.mxu0 %v8403_v62  ;;  %v8446_v62 = vld [vmem:[#allocation17 + $0x378] sm:$0xff]  }
0x2bd5   :  { %6244 = vmatprep.subr.bf16.mxu0 %v8411_v36  ;;  %v7194_v36 = vld [vmem:[%s9813_s10 + $0x3] ss:$4 sm:$0xf] }
0x2bd6   :  { %v6014_v11 = vrot.slane %v7194_v36, %v9185_v59  ;;  %v6018_v17 = vrot.slane %v7194_v36, %v9175_v55 }
0x2bd8   :  { %6245 = vmatpush1.bf16.msra.mxu0 %v8409_v10  ;;  %v8449_v10 = vld [vmem:[#allocation17 + $0x3b8] sm:$0xff]  }
0x2bd9   :  { %6246 = vmatprep.subr.bf16.mxu0 %v8417_v12  ;;  %v6022_v12 = vrot.slane %v7194_v36, %v9181_v57 }
0x2bdc   :  { %6247 = vmatpush1.bf16.msra.mxu0 %v8415_v3  ;;  %v6026_v3 = vrot.slane %v7194_v36, %v9289_v56 }
0x2bdd   :  { %7554 = vmatprep.subr.bf16.mxu0 %v8419_v63 }
0x2c56   :  { %v5901_v44 = vpop.xlane.xlu1 %5900 }
0x2c57   :  { %v5902_v24 = vmul.f32 0.0078125, %v5901_v44  ;;  %v8420_v44 = vld [vmem:[#allocation17 + $0x300] sm:$0xff]  }
0x2c59   :  { %v5910_v50 = vrot.slane %v5902_v24, %v9745_v28  ;;  %v5917_v22 = vrot.slane %v5902_v24, %v9748_v14  ;;  %v8423_v24 = vld [vmem:[#allocation17 + $0x3c8] sm:$0xff]  }
0x2c5b   :  { %v9753_v25 = vsub.f32 %v9737_v15, %v5910_v50  ;;  %v9756_v29 = vsub.f32 %v9740_v41, %v5917_v22  ;;  %v8424_v50 = vld [vmem:[#allocation17 + $0x308] sm:$0xff]  }
0x2c5c   :  { %v8425_v22 = vld [vmem:[#allocation17 + $0x388] sm:$0xff]  }
0x2c5d   :  { %v5922_v30 = vmul.f32 %v9753_v25, %v9753_v25  ;;  %v5923_v18 = vmul.f32 %v9756_v29, %v9756_v29 }
0x2c5f   :  { %v5926_v40 = vcombine.low %v5922_v30, %v5923_v18  ;;  %v8428_v30 = vld [vmem:[#allocation17 + $0x310] sm:$0xff]  }
0x2c60   :  { %v8429_v18 = vld [vmem:[#allocation17 + $0x390] sm:$0xff]  }
0x2c61   :  { %5928 = vadd.xlane.f32.xlu0 %v5926_v40  ;;  %v8430_v40 = vld [vmem:[#allocation17 + $0x358] sm:$0xff]  }
0x2cee   :  { %v5929_v9 = vpop.xlane.xlu0 %5928 }
0x2cef   :  { %v5930_v20 = vmul.f32 0.0078125, %v5929_v9 }
0x2cf1   :  { %v5931_v23 = vadd.f32 1e-05, %v5930_v20 }
0x2cf3   :  { %8638 = vrsqrt.f32 %v5931_v23 }
0x2cfd   :  { %v8639_v8 = vpop.eup %8638 }
0x2cfe   :  { %v5940_v16 = vrot.slane %v8639_v8, %v9745_v28  ;;  %v5947_v21 = vrot.slane %v8639_v8, %v9748_v14  ;;  %v8421_v28 = vld [vmem:[#allocation17 + $0x380] sm:$0xff]   ;;  %v8422_v14 = vld [vmem:[#allocation17 + $0x348] sm:$0xff]  }
0x2d00   :  { %v5950_v60 = vmul.f32 %v5940_v16, %v9753_v25  ;;  %v5951_v26 = vmul.f32 %v5947_v21, %v9756_v29  ;;  %v8426_v25 = vld [vmem:[#allocation17 + $0x350] sm:$0xff]  }
0x2d01   :  { %v8427_v29 = vld [vmem:[#allocation17 + $0x3d0] sm:$0xff]  }
0x2d02   :  { %v5959_v31 = vmul.f32 %v7192_v7, %v5950_v60  ;;  %v5960_v42 = vmul.f32 %v5957_v32, %v5951_v26 }
0x2d04   :  { %v5968_v43 = vadd.f32 %v7193_v13, %v5959_v31  ;;  %v5969_v2 = vadd.f32 %v5966_v27, %v5960_v42 }
0x2d06   :  { %v6005_v33 = vcombine.low %v5968_v43, %v5969_v2 }
0x2d08   :  { %v6007_v34 = vpack.c.bf16 %v6005_v33, %v6005_v33 }
0x2d0a   :  { %6224 = vmatmul.mubr.bf16.vlgmr.msra.gmra.mrb[136].mxu1 %v6007_v34  ;;  %6265 = vmatmul.mubr.bf16.vlgmr.msra.gmra.mrb[88].mxu0 %v6007_v34 }
0x2d0b   :  { %7533 = vmatpush3.bf16.msra.mxu1 %v8420_v44  ;;  %7555 = vmatpush3.bf16.msra.mxu0 %v8421_v28 }
0x2d0c   :  { %7534 = vmatprep.subr.bf16.mxu1 %v8422_v14  ;;  %7556 = vmatprep.subr.bf16.mxu0 %v8423_v24 }
0x2d0f   :  { %7535 = vmatpush3.bf16.msra.mxu1 %v8424_v50  ;;  %7557 = vmatpush3.bf16.msra.mxu0 %v8425_v22 }
0x2d10   :  { %7536 = vmatprep.subr.bf16.mxu1 %v8426_v25  ;;  %7558 = vmatprep.subr.bf16.mxu0 %v8427_v29 }
0x2d13   :  { %7537 = vmatpush3.bf16.msra.mxu1 %v8428_v30  ;;  %7559 = vmatpush3.bf16.msra.mxu0 %v8429_v18 }
0x2d14   :  { %7538 = vmatprep.subr.bf16.mxu1 %v8430_v40  ;;  %7560 = vmatprep.subr.bf16.mxu0 %v8431_v45 }
0x2d17   :  { %7539 = vmatpush3.bf16.msra.mxu1 %v8432_v49  ;;  %7561 = vmatpush3.bf16.msra.mxu0 %v8433_v1 }
0x2d18   :  { %7540 = vmatprep.subr.bf16.mxu1 %v8434_v51  ;;  %7562 = vmatprep.subr.bf16.mxu0 %v8435_v58 }
0x2d1b   :  { %7541 = vmatpush3.bf16.msra.mxu1 %v8436_v19  ;;  %7563 = vmatpush3.bf16.msra.mxu0 %v8437_v46  ;;  %v8937_v19 = vmov 1983009808  }
0x2d1c   :  { %7542 = vmatprep.subr.bf16.mxu1 %v8438_v0  ;;  %7564 = vmatprep.subr.bf16.mxu0 %v8439_v5  ;;  %v6656_v46 = vunpack.c.l.s4 %v8937_v19  ;;  %v8938_v5 = vmov 1934713408  }
0x2d1f   :  { %7543 = vmatpush3.bf16.msra.mxu1 %v8440_v35  ;;  %7565 = vmatpush3.bf16.msra.mxu0 %v8441_v52  ;;  %v6664_v35 = vunpack.c.l.s4 %v8938_v5 }
0x2d20   :  { %7544 = vmatprep.subr.bf16.mxu1 %v8442_v47  ;;  %7566 = vmatprep.subr.bf16.mxu0 %v8443_v48  ;;  %v7231_v47 = vld [vmem:[%s9815_s12 + $0x3] ss:$0 sm:$0xff]  ;;  %s8940_s12 = smov [#allocation19]  }
0x2d21   :  { %s6773_s28 = sshll.u32 %s8940_s12, 4  ;;  %s6774_s28 = int_to_ptr.vmem [resolvable:$true] %s6773_s28 }
0x2d22   :  { %s8878_s9 = scalar_lea.vmem %s6774_s28, 128  ;;  %p8883_p11 = scmp.lt.s32.totalorder %s6774_s28, %s6774_s28 }
0x2d23   :  { %7545 = vmatpush3.bf16.msra.mxu1 %v8444_v61  ;;  %7567 = vmatpush3.bf16.msra.mxu0 %v8445_v37  ;;  %p8879_p10 = scmp.ne.s32.totalorder %s6774_s28, %s8878_s9  ;;  %p8884_p12 = scmp.lt.s32.totalorder %s8878_s9, %s8878_s9 }
0x2d24   :  { %7546 = vmatprep.subr.bf16.mxu1 %v8446_v62  ;;  %7568 = vmatprep.subr.bf16.mxu0 %v8447_v6  ;;  %v6657_v62 = vunpack.c.0.s8 %v6656_v46 }
0x2d25   :  { %p8885_p13 = por %p8884_p12, %p8883_p11 }
0x2d27   :  { %7547 = vmatpush3.bf16.msra.mxu1 %v8448_v39  ;;  %7569 = vmatpush3.bf16.msra.mxu0 %v8449_v10  ;;  %p8886_p0 = pnand %p8885_p13, %p8879_p10 }
0x2ddd   :  { %v6225_v9 = vpop.f32.mrb[136].mxu1  ;;  %v6266_v20 = vpop.f32.mrb[88].mxu0 }
0x2dde   :  { %v6226_v23 = vadd.f32 %v6225_v9, %v6014_v11  ;;  %v6267_v7 = vadd.f32 %v6266_v20, %v6022_v12  ;;  %v6227_v8 = vpop.f32.mrb[137].mxu1  ;;  %v6268_v13 = vpop.f32.mrb[89].mxu0  ;;  %v6665_v12 = vunpack.c.0.s8 %v6664_v35  ;;  %v6660_v9 = vsub.s32 %v6657_v62, %v9172_v54 }
0x2ddf   :  { %v6228_v16 = vadd.f32 %v6227_v8, %v6018_v17  ;;  %v6269_v21 = vadd.f32 %v6268_v13, %v6026_v3  ;;  %v6229_v32 = vpop.f32.mrb[138].mxu1  ;;  %v6270_v60 = vpop.f32.mrb[90].mxu0  ;;  %v8939_v20 = vmov 1966171168  }
0x2de0   :  { %v7227_v26 = vmul.f32 -1.702, %v6226_v23  ;;  %v7229_v27 = vmul.f32 -1.702, %v6267_v7  ;;  %v6230_v31 = vpop.f32.mrb[139].mxu1  ;;  %v6271_v59 = vpop.f32.mrb[91].mxu0  ;;  %v6668_v13 = vsub.s32 %v6665_v12, %v9172_v54 }
0x2de1   :  { %v7228_v42 = vmul.f32 -1.702, %v6228_v16  ;;  %v7230_v57 = vmul.f32 -1.702, %v6269_v21 }
0x2de2   :  { %v6281_v43 = vmul.f32 1.442695, %v7227_v26  ;;  %v6285_v55 = vmul.f32 1.442695, %v7229_v27 }
0x2de3   :  { %v6283_v2 = vmul.f32 1.442695, %v7228_v42  ;;  %v6287_v56 = vmul.f32 1.442695, %v7230_v57 }
0x2de4   :  { %8640 = vpow2.f32 %v6281_v43 }
0x2de5   :  { %8642 = vpow2.f32 %v6285_v55 }
0x2de6   :  { %8644 = vpow2.f32 %v6283_v2 }
0x2de7   :  { %8646 = vpow2.f32 %v6287_v56 }
0x2dee   :  { %v8641_v33 = vpop.eup %8640 }
0x2def   :  { %v8643_v34 = vpop.eup %8642  ;;  %v6289_v38 = vadd.f32 1.0, %v8641_v33 }
0x2df0   :  { %v8645_v63 = vpop.eup %8644  ;;  %v6291_v44 = vadd.f32 1.0, %v8643_v34 }
0x2df1   :  { %v8647_v28 = vpop.eup %8646  ;;  %8648 = vrcp.f32 %v6289_v38  ;;  %v6290_v14 = vadd.f32 1.0, %v8645_v63 }
0x2df2   :  { %8650 = vrcp.f32 %v6291_v44  ;;  %v6292_v24 = vadd.f32 1.0, %v8647_v28 }
0x2df3   :  { %8652 = vrcp.f32 %v6290_v14 }
0x2df4   :  { %8654 = vrcp.f32 %v6292_v24 }
0x2dfb   :  { %v8649_v50 = vpop.eup %8648 }
0x2dfc   :  { %v8651_v22 = vpop.eup %8650  ;;  %v6301_v29 = vmul.f32 %v8649_v50, %v6226_v23  ;;  %v6715_v23 = vunpack.c.l.s4 %v8939_v20 }
0x2dfd   :  { %v8653_v25 = vpop.eup %8652  ;;  %v6303_v18 = vmul.f32 %v8651_v22, %v6267_v7 }
0x2dfe   :  { %v8655_v30 = vpop.eup %8654  ;;  %v6302_v40 = vmul.f32 %v8653_v25, %v6228_v16  ;;  %v6370_v1 = vpack.c.bf16 %v6301_v29, %v6301_v29  ;;  %v6716_v32 = vunpack.c.0.s8 %v6715_v23 }
0x2dff   :  { %v6304_v45 = vmul.f32 %v8655_v30, %v6269_v21  ;;  %v6372_v58 = vpack.c.bf16 %v6303_v18, %v6303_v18 }
0x2e00   :  { %v6371_v49 = vpack.c.bf16 %v6302_v40, %v6302_v40  ;;  %v6719_v43 = vsub.s32 %v6716_v32, %v9172_v54 }
0x2e01   :  { %v6373_v51 = vpack.c.bf16 %v6304_v45, %v6304_v45 }
0x2e02   :  { %6603 = vmatprep.mubr.bf16.mxu1 %v6371_v49 }
0x2e03   :  { %6643 = vmatprep.mubr.bf16.mxu0 %v6373_v51  ;;  %6604 = vmatmul.mubr.bf16.vlgmr.msra.gmra.mrb[140].mxu1 %v6370_v1 }
0x2e04   :  { %6644 = vmatmul.mubr.bf16.vlgmr.msra.gmra.mrb[92].mxu0 %v6372_v58 }
0x2ed6   :  { %v7548_v0 = vpop.f32.mrb[140].mxu1 }
0x2ed7   :  { %v7570_v52 = vpop.f32.mrb[92].mxu0  ;;  %v7549_v48 = vpop.f32.mrb[141].mxu1 }
0x2ed8   :  { %v7550_v61 = vadd.f32 %v7549_v48, %v7548_v0  ;;  %v7571_v37 = vpop.f32.mrb[93].mxu0  ;;  %v7551_v6 = vpop.f32.mrb[142].mxu1 }
0x2ed9   :  { %v7572_v39 = vadd.f32 %v7571_v37, %v7570_v52  ;;  %v7573_v10 = vpop.f32.mrb[94].mxu0  ;;  %v7552_v36 = vpop.f32.mrb[143].mxu1 }
0x2eda   :  { %v6606_v11 = vadd.f32 %v7550_v61, %v7231_v47  ;;  %v7574_v17 = vpop.f32.mrb[95].mxu0 }
0x2edc   :  { %v6646_v3 = vadd.f32 %v7572_v39, %v6606_v11 }
0x2ede   :  { %v6652_v7 = vcombine.high %v6646_v3, %v6646_v3  ;;  %v6654_v8 = vadd.f32 %v6646_v3, %v9737_v15 }
0x2ee0   :  { %v6661_v16 = vrot.slane %v6654_v8, %v6660_v9  ;;  %v6679_v21 = vadd.f32 %v6652_v7, %v9740_v41 }
0x2ee2   :  { %v6662_v60 = vcombine.high %v6661_v16, %v8932_v4  ;;  %v6669_v26 = vrot.slane %v6661_v16, %v6668_v13  ;;  %v6686_v27 = vrot.slane %v6679_v21, %v6660_v9 }
0x2ee4   :  { %v6676_v31 = vrot.slane %v6662_v60, %v6668_v13  ;;  %v6677_v59 = vcombine.high %v6669_v26, %v8932_v4  ;;  %v6687_v42 = vcombine.high %v6686_v27, %v8932_v4  ;;  %v6694_v57 = vrot.slane %v6686_v27, %v6668_v13 }
0x2ee6   :  { %v6678_v15 = vcombine.high %v6676_v31, %v8932_v4  ;;  %v6701_v55 = vrot.slane %v6687_v42, %v6668_v13  ;;  %v6702_v2 = vcombine.high %v6694_v57, %v8932_v4  ;;  %v6712_v56 = vcombine.low %v6669_v26, %v6677_v59 }
0x2ee8   :  { %v6703_v41 = vcombine.high %v6701_v55, %v8932_v4  ;;  %v6713_v33 = vcombine.low %v6676_v31, %v6678_v15  ;;  %v6736_v34 = vcombine.low %v6694_v57, %v6702_v2  ;;  %v6720_v38 = vrot.slane %v6712_v56, %v6719_v43 }
0x2eea   :  { %v6727_v63 = vrot.slane %v6713_v33, %v6719_v43  ;;  %v6737_v44 = vcombine.low %v6701_v55, %v6703_v41  ;;  %v6744_v14 = vrot.slane %v6736_v34, %v6719_v43 }
0x2eec   :  { %v6728_v28 = vcombine.low %v6720_v38, %v6727_v63  ;;  %v6751_v24 = vrot.slane %v6737_v44, %v6719_v43 }
0x2eee   :  { %v6735_v54 = vrot.slane %v6728_v28, %v6719_v43  ;;  %v6752_v50 = vcombine.low %v6744_v14, %v6751_v24 }
0x2ef0   :  { %v6759_v22 = vrot.slane %v6752_v50, %v6719_v43  ;;  %6766 = vst.msk [vmem:[#allocation19] sm:$0xf] %vm6764_vm5, %v6735_v54 }
0x2ef2   :  { %6767 = vst.msk [vmem:[#allocation19 + $0x4] sm:$0xf] %vm6764_vm5, %v6759_v22 }
0x2ef3   :  { %8889 = shalt.err (!%p8886_p0)
}
0x2ef4   :  { %s8890_s30 = scalar_lea.hbm %s9816_s13, 128 }
0x2ef5   :  { %p8891_p1 = scmp.ne.s32.totalorder %s9816_s13, %s8890_s30  ;;  %p8894_p2 = scmp.lt.u32.totalorder %s8890_s30, %s9816_s13 }
0x2ef7   :  { %p8896_p3 = pnand %p8894_p2, %p8891_p1 }
0x2ef9   :  { %8899 = shalt.err (!%p8896_p3)
}
0x2efa   :  { %6779 = dma.vmem_to_hbm [thread:$0]  %s6774_s28, 128, %s9816_s13, [#allocation4], %s8925_s2, %s8925_s2, %s8926_s15  }
0x2efb   :  { %8912 = dma.done.wait [#allocation4], 128  }
0x2efc   :  { %8913 = vsyncadd [#allocation4], 4294967168 }
0x2efd   :  { %6783 = vsyncpa [#allocation3], 1 }
0x2efe   :  { %6784 = vsyncpa [#allocation6], 1 }
0x2eff   :  { %6785 = vsyncpa [#allocation9], 1 }
0x2f00   :  { %6786 = vsyncpa [#allocation12], 1 }
0x2f01   :  { %6787 = vsyncpa [#allocation15], 1 }
0x2f02   :  { %6788 = vsyncpa [#allocation18], 1 }
0x2f03   :  { %6789 = vsyncpa [#allocation4], 1 }

</bundles_post_ra>
